<compile_context>
chip_gen: v6e
topology: v6e:2x2x1
jax: 0.10.0
libtpu: 0.0.40
codegen_flags: <defaults>
</compile_context>

<pallas_src>
import jax
import jax.numpy as jnp
from jax.experimental import pallas as pl
from jax.experimental.pallas import tpu as pltpu


# ---------------------------------------------------------------------------
# Architecture constants (fixed by the PyTorch DQN module)
# ---------------------------------------------------------------------------
_C_IN = 4
_K1, _S1, _OH1 = 8, 4, 20          # conv1: 4 -> 32, k=8, s=4  -> 20x20
_S2, _OH2 = 2, 9                   # conv2: 32 -> 64, k=4, s=2 ->  9x9
_K3, _OH3 = 3, 7                   # conv3: 64 -> 64, k=3, s=1 ->  7x7
_C1, _C2, _C3 = 32, 64, 64
_FC1 = 512
_PATCH1 = _C_IN * _K1 * _K1        # 256 = conv1 im2col patch length (c, kh, kw)
_PHASES = _S2 * _S2                # 4 stride-2 phases of the conv1 output grid
_F1 = _OH1 // _S2                  # 10: half-resolution frame side
_FR = _F1 * _F1                    # 100 frame rows per sample
_C1X = _PHASES * _C1               # 128: conv1 channels x phases (lane dense)
_P1X = _PHASES * _PATCH1           # 1024: conv1 patch length x phases


def _round8(n):
    return ((n + 7) // 8) * 8


def _h1_rows(tb):                  # conv2 taps read up to 11*tb rows past R
    return _round8((_FR + 11) * tb)


def _h2_rows(tb):                  # conv3 taps read up to 22*tb rows past R
    return _round8((_FR + 22) * tb)


def _h3_rows(tb):
    return _round8(_FR * tb)


def _pick_tb(batch):
    """Samples per grid step: amortize grid / fc1 weight-load overhead while
    keeping >= 2 grid steps so a v7x megacore can split the batch."""
    if batch >= 16:
        return 8
    return max(1, batch // 2)


# ---------------------------------------------------------------------------
# Fused kernel: conv1 -> conv2 -> conv3 -> fc1 -> fc2 for TB samples
# ---------------------------------------------------------------------------
def _make_kernel(tb, apad):
    R = _FR * tb                       # rows of valid activations per step
    H1, H2 = _h1_rows(tb), _h2_rows(tb)

    def kernel(p_ref, w1_ref, b1_ref, w2_ref, b2_ref, w3_ref, b3_ref,
               wfc1_ref, bfc1_ref, wfc2_ref, bfc2_ref, o_ref,
               h1_ref, h2_ref, h3_ref):
        f32, bf16 = jnp.float32, jnp.bfloat16

        # One-time zeroing of the pad rows.  Pad rows only ever feed invalid
        # (never-read) output rows, so it is harmless if a megacore shard that
        # starts at a later grid index skips this.
        @pl.when(pl.program_id(0) == 0)
        def _():
            h1_ref[R:H1, :] = jnp.zeros((H1 - R, _C1X), f32)
            h2_ref[R:H2, :] = jnp.zeros((H2 - R, _C2), f32)

        # ---- conv1: one lane-dense MXU matmul.  The block-diagonal weight
        # puts the 4 stride-2 phases of the 20x20 output into 4 channel blocks.
        a1 = jnp.dot(p_ref[0], w1_ref[...], preferred_element_type=f32)
        h1_ref[0:R, :] = jnp.maximum(a1 + b1_ref[...], 0.0)   # (R, 128) f32

        # ---- conv2 (k=4, s=2): 4 taps, each a contiguous shifted slice of h1
        # (all 4 phases along K) matmul'ed against a (128, 64) weight block.
        acc2 = jnp.zeros((R, _C2), f32)
        for qh in range(_S2):
            for qw in range(_S2):
                off = (qh * _F1 + qw) * tb
                lhs = h1_ref[off:off + R, :].astype(bf16)      # (R, 128)
                acc2 = acc2 + jnp.dot(lhs, w2_ref[qh * _S2 + qw],
                                      preferred_element_type=f32)
        h2_ref[0:R, :] = jnp.maximum(acc2 + b2_ref[...], 0.0)  # (R, 64) f32

        # ---- conv3 (k=3, s=1): 9 taps of contiguous shifted slices.
        acc3 = jnp.zeros((R, _C3), f32)
        for kh in range(_K3):
            for kw in range(_K3):
                off = (kh * _F1 + kw) * tb
                lhs = h2_ref[off:off + R, :].astype(bf16)      # (R, 64)
                acc3 = acc3 + jnp.dot(lhs, w3_ref[kh * _K3 + kw],
                                      preferred_element_type=f32)
        h3_ref[0:R, :] = jnp.maximum(acc3 + b3_ref[...], 0.0)  # (R, 64) f32

        # ---- fc1: 49 valid spatial positions; the sample-interleaved layout
        # makes each position a contiguous (TB, 64) slice, so M = TB.
        accf = jnp.zeros((tb, _FC1), f32)
        for oh in range(_OH3):
            for ow in range(_OH3):
                r = (oh * _F1 + ow) * tb
                s = (oh * _OH3 + ow) * _C3
                lhs = h3_ref[r:r + tb, :].astype(bf16)          # (TB, 64)
                accf = accf + jnp.dot(lhs, wfc1_ref[s:s + _C3, :],
                                      preferred_element_type=f32)
        f1 = jnp.maximum(accf + bfc1_ref[...], 0.0).astype(bf16)  # (TB, 512)

        # ---- fc2 (no ReLU), zero-padded to a lane-dense 128-wide output.
        out = jnp.dot(f1, wfc2_ref[...], preferred_element_type=f32) + bfc2_ref[...]
        o_ref[...] = out.reshape(1, tb, apad)

    return kernel


# ---------------------------------------------------------------------------
# Thin JAX glue: conv1 im2col patches, phases along columns, samples interleaved
# ---------------------------------------------------------------------------
def _conv1_patches(x, tb):
    """(B,4,84,84) f32 (B = G*TB) -> (G, 100*TB, 1024) bf16 patches.

    Row (within a group) = (I*10 + J)*TB + s; columns = phase*(256) + (c,kh,kw)
    where phase (rh,rw) selects conv1 output position (2I+rh, 2J+rw).
    """
    # TODO(synk): patch construction could move in-kernel via strided DMA of the
    # raw 112 KB/sample input; kept as thin XLA glue here.
    B = x.shape[0]
    G = B // tb
    xb = x.astype(jnp.bfloat16)
    span = _S1 * (_OH1 - 1) + 1                                   # 77
    cols = []
    for kh in range(_K1):
        for kw in range(_K1):
            cols.append(xb[:, :, kh:kh + span:_S1, kw:kw + span:_S1])  # (B,4,20,20)
    p = jnp.stack(cols, axis=0).reshape(_K1, _K1, B, _C_IN, _OH1, _OH1)
    p = p.transpose(2, 4, 5, 3, 0, 1).reshape(B, _OH1, _OH1, _PATCH1)   # (B,i1,j1,256)
    p = p.reshape(B, _F1, _S2, _F1, _S2, _PATCH1)                       # (B,I,rh,J,rw,k)
    p = p.transpose(0, 1, 3, 2, 4, 5).reshape(B, _FR, _P1X)             # (B,r,1024)
    p = p.reshape(G, tb, _FR, _P1X).transpose(0, 2, 1, 3)               # (G,r,s,1024)
    return p.reshape(G, _FR * tb, _P1X)


def _dqn_pallas(patches, pp, tb):
    G = patches.shape[0]
    apad = pp["wfc2"].shape[1]
    R = _FR * tb
    rep2 = lambda g: (0, 0)
    rep3 = lambda g: (0, 0, 0)
    return pl.pallas_call(
        _make_kernel(tb, apad),
        out_shape=jax.ShapeDtypeStruct((G, tb, apad), jnp.float32),
        grid=(G,),
        in_specs=[
            pl.BlockSpec((1, R, _P1X), lambda g: (g, 0, 0)),
            pl.BlockSpec((_P1X, _C1X), rep2),
            pl.BlockSpec((1, _C1X), rep2),
            pl.BlockSpec((_PHASES, _C1X, _C2), rep3),
            pl.BlockSpec((1, _C2), rep2),
            pl.BlockSpec((_K3 * _K3, _C2, _C3), rep3),
            pl.BlockSpec((1, _C3), rep2),
            pl.BlockSpec((_OH3 * _OH3 * _C3, _FC1), rep2),
            pl.BlockSpec((1, _FC1), rep2),
            pl.BlockSpec((_FC1, apad), rep2),
            pl.BlockSpec((1, apad), rep2),
        ],
        out_specs=pl.BlockSpec((1, tb, apad), lambda g: (g, 0, 0)),
        scratch_shapes=[
            pltpu.VMEM((_h1_rows(tb), _C1X), jnp.float32),
            pltpu.VMEM((_h2_rows(tb), _C2), jnp.float32),
            pltpu.VMEM((_h3_rows(tb), _C3), jnp.float32),
        ],
        compiler_params=pltpu.CompilerParams(
            dimension_semantics=("parallel",),
            vmem_limit_bytes=32 << 20,
        ),
    )(patches, pp["w1"], pp["b1"], pp["w2"], pp["b2"], pp["w3"], pp["b3"],
      pp["wfc1"], pp["bfc1"], pp["wfc2"], pp["bfc2"])


@jax.jit
def _dqn_forward_padded(prepared, x):
    B = x.shape[0]
    tb = _pick_tb(B)
    G = -(-B // tb)
    Bp = G * tb
    if Bp > B:
        x = jnp.pad(x, ((0, Bp - B), (0, 0), (0, 0), (0, 0)))
    patches = _conv1_patches(x, tb)
    return _dqn_pallas(patches, prepared, tb)      # (G, TB, 128) f32


def dqn_forward(prepared, x, num_actions):
    out = _dqn_forward_padded(prepared, x)
    G, tb, apad = out.shape
    return out.reshape(G * tb, apad)[: x.shape[0], :num_actions]


# ---------------------------------------------------------------------------
# Parameters (torch layout) and one-time re-layout for the fused kernel
# ---------------------------------------------------------------------------
def make_dqn_params(num_actions, key):
    ks = jax.random.split(key, 10)
    s = 0.05
    return {
        "conv1_w": jax.random.normal(ks[0], (32, 4, 8, 8), jnp.float32) * s,
        "conv1_b": jax.random.normal(ks[1], (32,), jnp.float32) * s,
        "conv2_w": jax.random.normal(ks[2], (64, 32, 4, 4), jnp.float32) * s,
        "conv2_b": jax.random.normal(ks[3], (64,), jnp.float32) * s,
        "conv3_w": jax.random.normal(ks[4], (64, 64, 3, 3), jnp.float32) * s,
        "conv3_b": jax.random.normal(ks[5], (64,), jnp.float32) * s,
        "fc1_w": jax.random.normal(ks[6], (512, 7 * 7 * 64), jnp.float32) * s,
        "fc1_b": jax.random.normal(ks[7], (512,), jnp.float32) * s,
        "fc2_w": jax.random.normal(ks[8], (num_actions, 512), jnp.float32) * s,
        "fc2_b": jax.random.normal(ks[9], (num_actions,), jnp.float32) * s,
    }


def prepare_params(p):
    """One-time re-layout of the torch-style weights (outside the forward jit)."""
    f32, bf16 = jnp.float32, jnp.bfloat16
    # conv1 as a block-diagonal (1024, 128) matrix: one (256, 32) block per phase.
    w1 = p["conv1_w"].reshape(_C1, _PATCH1).T                      # (256, 32)
    w1big = jnp.zeros((_P1X, _C1X), f32)
    for ph in range(_PHASES):
        w1big = w1big.at[ph * _PATCH1:(ph + 1) * _PATCH1,
                         ph * _C1:(ph + 1) * _C1].set(w1)
    b1big = jnp.tile(p["conv1_b"], _PHASES).reshape(1, _C1X)
    # conv2: one (128, 64) block per (qh, qw) tap; phases concatenated along K.
    taps = []
    for qh in range(_S2):
        for qw in range(_S2):
            per_phase = [p["conv2_w"][:, :, _S2 * qh + rh, _S2 * qw + rw].T
                         for rh in range(_S2) for rw in range(_S2)]
            taps.append(jnp.concatenate(per_phase, axis=0))        # (128, 64)
    w2cat = jnp.stack(taps, axis=0)                                # (4, 128, 64)
    # conv3: (9, 64, 64) per-tap blocks.
    w3cat = p["conv3_w"].transpose(2, 3, 1, 0).reshape(_K3 * _K3, _C2, _C3)
    # fc1 consumes (h, w, c) activation order; torch flatten is (c, h, w).
    wfc1 = (p["fc1_w"].reshape(_FC1, _C3, _OH3, _OH3)
            .transpose(2, 3, 1, 0).reshape(_OH3 * _OH3 * _C3, _FC1))  # (3136, 512)
    # fc2 transposed and zero-padded to a lane-dense 128-wide output.
    A = p["fc2_w"].shape[0]
    apad = max(128, ((A + 127) // 128) * 128)
    wfc2 = jnp.zeros((_FC1, apad), f32).at[:, :A].set(p["fc2_w"].T)
    bfc2 = jnp.zeros((1, apad), f32).at[0, :A].set(p["fc2_b"])
    return {
        "w1": w1big.astype(bf16), "b1": b1big.astype(f32),
        "w2": w2cat.astype(bf16), "b2": p["conv2_b"].reshape(1, _C2).astype(f32),
        "w3": w3cat.astype(bf16), "b3": p["conv3_b"].reshape(1, _C3).astype(f32),
        "wfc1": wfc1.astype(bf16), "bfc1": p["fc1_b"].reshape(1, _FC1).astype(f32),
        "wfc2": wfc2.astype(bf16), "bfc2": bfc2,
    }


# ---------------------------------------------------------------------------
# Pure-JAX float32 reference of the PyTorch module (for validation only)
# ---------------------------------------------------------------------------
def _dqn_reference(params, x):
    dn = ("NCHW", "OIHW", "NCHW")
    hi = jax.lax.Precision.HIGHEST
    y = jax.lax.conv_general_dilated(x, params["conv1_w"], (4, 4), "VALID",
                                     dimension_numbers=dn, precision=hi)
    y = jax.nn.relu(y + params["conv1_b"][None, :, None, None])
    y = jax.lax.conv_general_dilated(y, params["conv2_w"], (2, 2), "VALID",
                                     dimension_numbers=dn, precision=hi)
    y = jax.nn.relu(y + params["conv2_b"][None, :, None, None])
    y = jax.lax.conv_general_dilated(y, params["conv3_w"], (1, 1), "VALID",
                                     dimension_numbers=dn, precision=hi)
    y = jax.nn.relu(y + params["conv3_b"][None, :, None, None])
    y = y.reshape(y.shape[0], -1)
    y = jax.nn.relu(jnp.dot(y, params["fc1_w"].T, precision=hi) + params["fc1_b"])
    return jnp.dot(y, params["fc2_w"].T, precision=hi) + params["fc2_b"]


if __name__ == "__main__":
    num_actions = 6
    key = jax.random.PRNGKey(0)
    pkey, k1, k2 = jax.random.split(key, 3)
    params = make_dqn_params(num_actions, pkey)
    prepared = prepare_params(params)

    # Architecture fixes the spatial size (fc1 expects 7*7*64 -> 84x84 input).
    x_small = jax.random.uniform(k1, (2, 4, 84, 84), jnp.float32)
    q_small = dqn_forward(prepared, x_small, num_actions)
    jax.block_until_ready(q_small)
    assert q_small.shape == (2, num_actions) and q_small.dtype == jnp.float32

    # Larger batch exercises the multi-sample-per-grid-step (TB=8) fast path.
    x_big = jax.random.uniform(k2, (16, 4, 84, 84), jnp.float32)
    q_big = dqn_forward(prepared, x_big, num_actions)
    jax.block_until_ready(q_big)
    assert q_big.shape == (16, num_actions)

    # Validate against a pure-JAX float32 reference (bf16 tolerance).
    for xx, qq in ((x_small, q_small), (x_big, q_big)):
        q_ref = _dqn_reference(params, xx)
        rel = jnp.linalg.norm(qq - q_ref) / (jnp.linalg.norm(q_ref) + 1e-12)
        assert float(rel) < 5e-2, f"relative error too large: {float(rel)}"

    print("KERNEL_OK")
</pallas_src>

<mosaic_0001>
module attributes {stable_mosaic.version = 11 : i64} {
  func.func @kernel(%arg0: i32, %arg1: memref<1x100x1024xbf16, #tpu.memory_space<vmem>>, %arg2: memref<1024x128xbf16, #tpu.memory_space<vmem>>, %arg3: memref<1x128xf32, #tpu.memory_space<vmem>>, %arg4: memref<4x128x64xbf16, #tpu.memory_space<vmem>>, %arg5: memref<1x64xf32, #tpu.memory_space<vmem>>, %arg6: memref<9x64x64xbf16, #tpu.memory_space<vmem>>, %arg7: memref<1x64xf32, #tpu.memory_space<vmem>>, %arg8: memref<3136x512xbf16, #tpu.memory_space<vmem>>, %arg9: memref<1x512xf32, #tpu.memory_space<vmem>>, %arg10: memref<512x128xbf16, #tpu.memory_space<vmem>>, %arg11: memref<1x128xf32, #tpu.memory_space<vmem>>, %arg12: memref<1x1x128xf32, #tpu.memory_space<vmem>>, %arg13: memref<112x128xf32, #tpu.memory_space<vmem>>, %arg14: memref<128x64xf32, #tpu.memory_space<vmem>>, %arg15: memref<104x64xf32, #tpu.memory_space<vmem>>) attributes {dimension_semantics = [#tpu.dimension_semantics<parallel>], iteration_bounds = array<i64: 2>, scalar_prefetch = 0 : i64, scratch_operands = 3 : i64, tpu.core_type = #tpu.core_type<tc>, window_params = [{transform_indices = @transform_0, window_bounds = array<i64: 1, 100, 1024>}, {pipeline_mode = #tpu.pipeline_mode<synchronous>, transform_indices = @transform_1, window_bounds = array<i64: 1024, 128>}, {pipeline_mode = #tpu.pipeline_mode<synchronous>, transform_indices = @transform_2, window_bounds = array<i64: 1, 128>}, {pipeline_mode = #tpu.pipeline_mode<synchronous>, transform_indices = @transform_3, window_bounds = array<i64: 4, 128, 64>}, {pipeline_mode = #tpu.pipeline_mode<synchronous>, transform_indices = @transform_4, window_bounds = array<i64: 1, 64>}, {pipeline_mode = #tpu.pipeline_mode<synchronous>, transform_indices = @transform_5, window_bounds = array<i64: 9, 64, 64>}, {pipeline_mode = #tpu.pipeline_mode<synchronous>, transform_indices = @transform_6, window_bounds = array<i64: 1, 64>}, {pipeline_mode = #tpu.pipeline_mode<synchronous>, transform_indices = @transform_7, window_bounds = array<i64: 3136, 512>}, {pipeline_mode = #tpu.pipeline_mode<synchronous>, transform_indices = @transform_8, window_bounds = array<i64: 1, 512>}, {pipeline_mode = #tpu.pipeline_mode<synchronous>, transform_indices = @transform_9, window_bounds = array<i64: 512, 128>}, {pipeline_mode = #tpu.pipeline_mode<synchronous>, transform_indices = @transform_10, window_bounds = array<i64: 1, 128>}, {transform_indices = @transform_11, window_bounds = array<i64: 1, 1, 128>}]} {
    %c0_i32 = arith.constant 0 : i32
    %0 = arith.cmpi eq, %arg0, %c0_i32 : i32
    %1 = arith.extui %0 : i1 to i32
    %c0_i32_0 = arith.constant 0 : i32
    %2 = arith.cmpi ne, %1, %c0_i32_0 : i32
    scf.if %2 {
      %cst_260 = arith.constant 0.000000e+00 : f32
      %362 = vector.broadcast %cst_260 : f32 to vector<12x128xf32>
      %c100 = arith.constant 100 : index
      %c0_261 = arith.constant 0 : index
      %363 = vector.load %arg13[%c100, %c0_261] : memref<112x128xf32, #tpu.memory_space<vmem>>, vector<12x128xf32>
      tpu.vector_store %arg13[%c100, %c0_261], %362 {strides = array<i32>} : memref<112x128xf32, #tpu.memory_space<vmem>>, vector<12x128xf32>,
      %cst_262 = arith.constant 0.000000e+00 : f32
      %364 = vector.broadcast %cst_262 : f32 to vector<28x64xf32>
      %c100_263 = arith.constant 100 : index
      %c0_264 = arith.constant 0 : index
      %365 = vector.load %arg14[%c100_263, %c0_264] : memref<128x64xf32, #tpu.memory_space<vmem>>, vector<28x64xf32>
      tpu.vector_store %arg14[%c100_263, %c0_264], %364 {strides = array<i32>} : memref<128x64xf32, #tpu.memory_space<vmem>>, vector<28x64xf32>,
    } else {
    }
    %c0 = arith.constant 0 : index
    %c0_1 = arith.constant 0 : index
    %c0_2 = arith.constant 0 : index
    %3 = vector.load %arg1[%c0, %c0_1, %c0_2] : memref<1x100x1024xbf16, #tpu.memory_space<vmem>>, vector<1x100x1024xbf16>
    %4 = vector.shape_cast %3 : vector<1x100x1024xbf16> to vector<100x1024xbf16>
    %c0_3 = arith.constant 0 : index
    %c0_4 = arith.constant 0 : index
    %5 = vector.load %arg2[%c0_3, %c0_4] : memref<1024x128xbf16, #tpu.memory_space<vmem>>, vector<1024x128xbf16>
    %cst = arith.constant dense<0.000000e+00> : vector<100x128xf32>
    %6 = tpu.matmul %4, %5, %cst {dimension_numbers = #tpu.dot_dimension_numbers<[1], [0], [0], [1], [0, 0, 1, 1], [], []>} : vector<100x1024xbf16>, vector<1024x128xbf16>, vector<100x128xf32> -> vector<100x128xf32>
    %c0_5 = arith.constant 0 : index
    %c0_6 = arith.constant 0 : index
    %7 = vector.load %arg3[%c0_5, %c0_6] : memref<1x128xf32, #tpu.memory_space<vmem>>, vector<1x128xf32>
    %8 = vector.broadcast %7 : vector<1x128xf32> to vector<100x128xf32>
    %9 = arith.addf %6, %8 : vector<100x128xf32>
    %cst_7 = arith.constant 0.000000e+00 : f32
    %10 = vector.broadcast %cst_7 : f32 to vector<100x128xf32>
    %11 = arith.maximumf %9, %10 : vector<100x128xf32>
    %c0_8 = arith.constant 0 : index
    %c0_9 = arith.constant 0 : index
    %12 = vector.load %arg13[%c0_8, %c0_9] : memref<112x128xf32, #tpu.memory_space<vmem>>, vector<100x128xf32>
    tpu.vector_store %arg13[%c0_8, %c0_9], %11 {strides = array<i32>} : memref<112x128xf32, #tpu.memory_space<vmem>>, vector<100x128xf32>,
    %cst_10 = arith.constant 0.000000e+00 : f32
    %13 = vector.broadcast %cst_10 : f32 to vector<100x64xf32>
    %c0_11 = arith.constant 0 : index
    %c0_12 = arith.constant 0 : index
    %14 = vector.load %arg13[%c0_11, %c0_12] : memref<112x128xf32, #tpu.memory_space<vmem>>, vector<100x128xf32>
    %15 = arith.truncf %14 : vector<100x128xf32> to vector<100x128xbf16>
    %c0_13 = arith.constant 0 : index
    %c0_14 = arith.constant 0 : index
    %c0_15 = arith.constant 0 : index
    %16 = vector.load %arg4[%c0_13, %c0_14, %c0_15] : memref<4x128x64xbf16, #tpu.memory_space<vmem>>, vector<1x128x64xbf16>
    %17 = vector.shape_cast %16 : vector<1x128x64xbf16> to vector<128x64xbf16>
    %cst_16 = arith.constant dense<0.000000e+00> : vector<100x64xf32>
    %18 = tpu.matmul %15, %17, %cst_16 {dimension_numbers = #tpu.dot_dimension_numbers<[1], [0], [0], [1], [0, 0, 1, 1], [], []>} : vector<100x128xbf16>, vector<128x64xbf16>, vector<100x64xf32> -> vector<100x64xf32>
    %19 = arith.addf %13, %18 : vector<100x64xf32>
    %c1 = arith.constant 1 : index
    %c0_17 = arith.constant 0 : index
    %20 = vector.load %arg13[%c1, %c0_17] : memref<112x128xf32, #tpu.memory_space<vmem>>, vector<100x128xf32>
    %21 = arith.truncf %20 : vector<100x128xf32> to vector<100x128xbf16>
    %c1_18 = arith.constant 1 : index
    %c0_19 = arith.constant 0 : index
    %c0_20 = arith.constant 0 : index
    %22 = vector.load %arg4[%c1_18, %c0_19, %c0_20] : memref<4x128x64xbf16, #tpu.memory_space<vmem>>, vector<1x128x64xbf16>
    %23 = vector.shape_cast %22 : vector<1x128x64xbf16> to vector<128x64xbf16>
    %cst_21 = arith.constant dense<0.000000e+00> : vector<100x64xf32>
    %24 = tpu.matmul %21, %23, %cst_21 {dimension_numbers = #tpu.dot_dimension_numbers<[1], [0], [0], [1], [0, 0, 1, 1], [], []>} : vector<100x128xbf16>, vector<128x64xbf16>, vector<100x64xf32> -> vector<100x64xf32>
    %25 = arith.addf %19, %24 : vector<100x64xf32>
    %c10 = arith.constant 10 : index
    %c0_22 = arith.constant 0 : index
    %26 = vector.load %arg13[%c10, %c0_22] : memref<112x128xf32, #tpu.memory_space<vmem>>, vector<100x128xf32>
    %27 = arith.truncf %26 : vector<100x128xf32> to vector<100x128xbf16>
    %c2 = arith.constant 2 : index
    %c0_23 = arith.constant 0 : index
    %c0_24 = arith.constant 0 : index
    %28 = vector.load %arg4[%c2, %c0_23, %c0_24] : memref<4x128x64xbf16, #tpu.memory_space<vmem>>, vector<1x128x64xbf16>
    %29 = vector.shape_cast %28 : vector<1x128x64xbf16> to vector<128x64xbf16>
    %cst_25 = arith.constant dense<0.000000e+00> : vector<100x64xf32>
    %30 = tpu.matmul %27, %29, %cst_25 {dimension_numbers = #tpu.dot_dimension_numbers<[1], [0], [0], [1], [0, 0, 1, 1], [], []>} : vector<100x128xbf16>, vector<128x64xbf16>, vector<100x64xf32> -> vector<100x64xf32>
    %31 = arith.addf %25, %30 : vector<100x64xf32>
    %c11 = arith.constant 11 : index
    %c0_26 = arith.constant 0 : index
    %32 = vector.load %arg13[%c11, %c0_26] : memref<112x128xf32, #tpu.memory_space<vmem>>, vector<100x128xf32>
    %33 = arith.truncf %32 : vector<100x128xf32> to vector<100x128xbf16>
    %c3 = arith.constant 3 : index
    %c0_27 = arith.constant 0 : index
    %c0_28 = arith.constant 0 : index
    %34 = vector.load %arg4[%c3, %c0_27, %c0_28] : memref<4x128x64xbf16, #tpu.memory_space<vmem>>, vector<1x128x64xbf16>
    %35 = vector.shape_cast %34 : vector<1x128x64xbf16> to vector<128x64xbf16>
    %cst_29 = arith.constant dense<0.000000e+00> : vector<100x64xf32>
    %36 = tpu.matmul %33, %35, %cst_29 {dimension_numbers = #tpu.dot_dimension_numbers<[1], [0], [0], [1], [0, 0, 1, 1], [], []>} : vector<100x128xbf16>, vector<128x64xbf16>, vector<100x64xf32> -> vector<100x64xf32>
    %37 = arith.addf %31, %36 : vector<100x64xf32>
    %c0_30 = arith.constant 0 : index
    %c0_31 = arith.constant 0 : index
    %38 = vector.load %arg5[%c0_30, %c0_31] : memref<1x64xf32, #tpu.memory_space<vmem>>, vector<1x64xf32>
    %39 = vector.broadcast %38 : vector<1x64xf32> to vector<100x64xf32>
    %40 = arith.addf %37, %39 : vector<100x64xf32>
    %cst_32 = arith.constant 0.000000e+00 : f32
    %41 = vector.broadcast %cst_32 : f32 to vector<100x64xf32>
    %42 = arith.maximumf %40, %41 : vector<100x64xf32>
    %c0_33 = arith.constant 0 : index
    %c0_34 = arith.constant 0 : index
    %43 = vector.load %arg14[%c0_33, %c0_34] : memref<128x64xf32, #tpu.memory_space<vmem>>, vector<100x64xf32>
    tpu.vector_store %arg14[%c0_33, %c0_34], %42 {strides = array<i32>} : memref<128x64xf32, #tpu.memory_space<vmem>>, vector<100x64xf32>,
    %cst_35 = arith.constant 0.000000e+00 : f32
    %44 = vector.broadcast %cst_35 : f32 to vector<100x64xf32>
    %c0_36 = arith.constant 0 : index
    %c0_37 = arith.constant 0 : index
    %45 = vector.load %arg14[%c0_36, %c0_37] : memref<128x64xf32, #tpu.memory_space<vmem>>, vector<100x64xf32>
    %46 = arith.truncf %45 : vector<100x64xf32> to vector<100x64xbf16>
    %c0_38 = arith.constant 0 : index
    %c0_39 = arith.constant 0 : index
    %c0_40 = arith.constant 0 : index
    %47 = vector.load %arg6[%c0_38, %c0_39, %c0_40] : memref<9x64x64xbf16, #tpu.memory_space<vmem>>, vector<1x64x64xbf16>
    %48 = vector.shape_cast %47 : vector<1x64x64xbf16> to vector<64x64xbf16>
    %cst_41 = arith.constant dense<0.000000e+00> : vector<100x64xf32>
    %49 = tpu.matmul %46, %48, %cst_41 {dimension_numbers = #tpu.dot_dimension_numbers<[1], [0], [0], [1], [0, 0, 1, 1], [], []>} : vector<100x64xbf16>, vector<64x64xbf16>, vector<100x64xf32> -> vector<100x64xf32>
    %50 = arith.addf %44, %49 : vector<100x64xf32>
    %c1_42 = arith.constant 1 : index
    %c0_43 = arith.constant 0 : index
    %51 = vector.load %arg14[%c1_42, %c0_43] : memref<128x64xf32, #tpu.memory_space<vmem>>, vector<100x64xf32>
    %52 = arith.truncf %51 : vector<100x64xf32> to vector<100x64xbf16>
    %c1_44 = arith.constant 1 : index
    %c0_45 = arith.constant 0 : index
    %c0_46 = arith.constant 0 : index
    %53 = vector.load %arg6[%c1_44, %c0_45, %c0_46] : memref<9x64x64xbf16, #tpu.memory_space<vmem>>, vector<1x64x64xbf16>
    %54 = vector.shape_cast %53 : vector<1x64x64xbf16> to vector<64x64xbf16>
    %cst_47 = arith.constant dense<0.000000e+00> : vector<100x64xf32>
    %55 = tpu.matmul %52, %54, %cst_47 {dimension_numbers = #tpu.dot_dimension_numbers<[1], [0], [0], [1], [0, 0, 1, 1], [], []>} : vector<100x64xbf16>, vector<64x64xbf16>, vector<100x64xf32> -> vector<100x64xf32>
    %56 = arith.addf %50, %55 : vector<100x64xf32>
    %c2_48 = arith.constant 2 : index
    %c0_49 = arith.constant 0 : index
    %57 = vector.load %arg14[%c2_48, %c0_49] : memref<128x64xf32, #tpu.memory_space<vmem>>, vector<100x64xf32>
    %58 = arith.truncf %57 : vector<100x64xf32> to vector<100x64xbf16>
    %c2_50 = arith.constant 2 : index
    %c0_51 = arith.constant 0 : index
    %c0_52 = arith.constant 0 : index
    %59 = vector.load %arg6[%c2_50, %c0_51, %c0_52] : memref<9x64x64xbf16, #tpu.memory_space<vmem>>, vector<1x64x64xbf16>
    %60 = vector.shape_cast %59 : vector<1x64x64xbf16> to vector<64x64xbf16>
    %cst_53 = arith.constant dense<0.000000e+00> : vector<100x64xf32>
    %61 = tpu.matmul %58, %60, %cst_53 {dimension_numbers = #tpu.dot_dimension_numbers<[1], [0], [0], [1], [0, 0, 1, 1], [], []>} : vector<100x64xbf16>, vector<64x64xbf16>, vector<100x64xf32> -> vector<100x64xf32>
    %62 = arith.addf %56, %61 : vector<100x64xf32>
    %c10_54 = arith.constant 10 : index
    %c0_55 = arith.constant 0 : index
    %63 = vector.load %arg14[%c10_54, %c0_55] : memref<128x64xf32, #tpu.memory_space<vmem>>, vector<100x64xf32>
    %64 = arith.truncf %63 : vector<100x64xf32> to vector<100x64xbf16>
    %c3_56 = arith.constant 3 : index
    %c0_57 = arith.constant 0 : index
    %c0_58 = arith.constant 0 : index
    %65 = vector.load %arg6[%c3_56, %c0_57, %c0_58] : memref<9x64x64xbf16, #tpu.memory_space<vmem>>, vector<1x64x64xbf16>
    %66 = vector.shape_cast %65 : vector<1x64x64xbf16> to vector<64x64xbf16>
    %cst_59 = arith.constant dense<0.000000e+00> : vector<100x64xf32>
    %67 = tpu.matmul %64, %66, %cst_59 {dimension_numbers = #tpu.dot_dimension_numbers<[1], [0], [0], [1], [0, 0, 1, 1], [], []>} : vector<100x64xbf16>, vector<64x64xbf16>, vector<100x64xf32> -> vector<100x64xf32>
    %68 = arith.addf %62, %67 : vector<100x64xf32>
    %c11_60 = arith.constant 11 : index
    %c0_61 = arith.constant 0 : index
    %69 = vector.load %arg14[%c11_60, %c0_61] : memref<128x64xf32, #tpu.memory_space<vmem>>, vector<100x64xf32>
    %70 = arith.truncf %69 : vector<100x64xf32> to vector<100x64xbf16>
    %c4 = arith.constant 4 : index
    %c0_62 = arith.constant 0 : index
    %c0_63 = arith.constant 0 : index
    %71 = vector.load %arg6[%c4, %c0_62, %c0_63] : memref<9x64x64xbf16, #tpu.memory_space<vmem>>, vector<1x64x64xbf16>
    %72 = vector.shape_cast %71 : vector<1x64x64xbf16> to vector<64x64xbf16>
    %cst_64 = arith.constant dense<0.000000e+00> : vector<100x64xf32>
    %73 = tpu.matmul %70, %72, %cst_64 {dimension_numbers = #tpu.dot_dimension_numbers<[1], [0], [0], [1], [0, 0, 1, 1], [], []>} : vector<100x64xbf16>, vector<64x64xbf16>, vector<100x64xf32> -> vector<100x64xf32>
    %74 = arith.addf %68, %73 : vector<100x64xf32>
    %c12 = arith.constant 12 : index
    %c0_65 = arith.constant 0 : index
    %75 = vector.load %arg14[%c12, %c0_65] : memref<128x64xf32, #tpu.memory_space<vmem>>, vector<100x64xf32>
    %76 = arith.truncf %75 : vector<100x64xf32> to vector<100x64xbf16>
    %c5 = arith.constant 5 : index
    %c0_66 = arith.constant 0 : index
    %c0_67 = arith.constant 0 : index
    %77 = vector.load %arg6[%c5, %c0_66, %c0_67] : memref<9x64x64xbf16, #tpu.memory_space<vmem>>, vector<1x64x64xbf16>
    %78 = vector.shape_cast %77 : vector<1x64x64xbf16> to vector<64x64xbf16>
    %cst_68 = arith.constant dense<0.000000e+00> : vector<100x64xf32>
    %79 = tpu.matmul %76, %78, %cst_68 {dimension_numbers = #tpu.dot_dimension_numbers<[1], [0], [0], [1], [0, 0, 1, 1], [], []>} : vector<100x64xbf16>, vector<64x64xbf16>, vector<100x64xf32> -> vector<100x64xf32>
    %80 = arith.addf %74, %79 : vector<100x64xf32>
    %c20 = arith.constant 20 : index
    %c0_69 = arith.constant 0 : index
    %81 = vector.load %arg14[%c20, %c0_69] : memref<128x64xf32, #tpu.memory_space<vmem>>, vector<100x64xf32>
    %82 = arith.truncf %81 : vector<100x64xf32> to vector<100x64xbf16>
    %c6 = arith.constant 6 : index
    %c0_70 = arith.constant 0 : index
    %c0_71 = arith.constant 0 : index
    %83 = vector.load %arg6[%c6, %c0_70, %c0_71] : memref<9x64x64xbf16, #tpu.memory_space<vmem>>, vector<1x64x64xbf16>
    %84 = vector.shape_cast %83 : vector<1x64x64xbf16> to vector<64x64xbf16>
    %cst_72 = arith.constant dense<0.000000e+00> : vector<100x64xf32>
    %85 = tpu.matmul %82, %84, %cst_72 {dimension_numbers = #tpu.dot_dimension_numbers<[1], [0], [0], [1], [0, 0, 1, 1], [], []>} : vector<100x64xbf16>, vector<64x64xbf16>, vector<100x64xf32> -> vector<100x64xf32>
    %86 = arith.addf %80, %85 : vector<100x64xf32>
    %c21 = arith.constant 21 : index
    %c0_73 = arith.constant 0 : index
    %87 = vector.load %arg14[%c21, %c0_73] : memref<128x64xf32, #tpu.memory_space<vmem>>, vector<100x64xf32>
    %88 = arith.truncf %87 : vector<100x64xf32> to vector<100x64xbf16>
    %c7 = arith.constant 7 : index
    %c0_74 = arith.constant 0 : index
    %c0_75 = arith.constant 0 : index
    %89 = vector.load %arg6[%c7, %c0_74, %c0_75] : memref<9x64x64xbf16, #tpu.memory_space<vmem>>, vector<1x64x64xbf16>
    %90 = vector.shape_cast %89 : vector<1x64x64xbf16> to vector<64x64xbf16>
    %cst_76 = arith.constant dense<0.000000e+00> : vector<100x64xf32>
    %91 = tpu.matmul %88, %90, %cst_76 {dimension_numbers = #tpu.dot_dimension_numbers<[1], [0], [0], [1], [0, 0, 1, 1], [], []>} : vector<100x64xbf16>, vector<64x64xbf16>, vector<100x64xf32> -> vector<100x64xf32>
    %92 = arith.addf %86, %91 : vector<100x64xf32>
    %c22 = arith.constant 22 : index
    %c0_77 = arith.constant 0 : index
    %93 = vector.load %arg14[%c22, %c0_77] : memref<128x64xf32, #tpu.memory_space<vmem>>, vector<100x64xf32>
    %94 = arith.truncf %93 : vector<100x64xf32> to vector<100x64xbf16>
    %c8 = arith.constant 8 : index
    %c0_78 = arith.constant 0 : index
    %c0_79 = arith.constant 0 : index
    %95 = vector.load %arg6[%c8, %c0_78, %c0_79] : memref<9x64x64xbf16, #tpu.memory_space<vmem>>, vector<1x64x64xbf16>
    %96 = vector.shape_cast %95 : vector<1x64x64xbf16> to vector<64x64xbf16>
    %cst_80 = arith.constant dense<0.000000e+00> : vector<100x64xf32>
    %97 = tpu.matmul %94, %96, %cst_80 {dimension_numbers = #tpu.dot_dimension_numbers<[1], [0], [0], [1], [0, 0, 1, 1], [], []>} : vector<100x64xbf16>, vector<64x64xbf16>, vector<100x64xf32> -> vector<100x64xf32>
    %98 = arith.addf %92, %97 : vector<100x64xf32>
    %c0_81 = arith.constant 0 : index
    %c0_82 = arith.constant 0 : index
    %99 = vector.load %arg7[%c0_81, %c0_82] : memref<1x64xf32, #tpu.memory_space<vmem>>, vector<1x64xf32>
    %100 = vector.broadcast %99 : vector<1x64xf32> to vector<100x64xf32>
    %101 = arith.addf %98, %100 : vector<100x64xf32>
    %cst_83 = arith.constant 0.000000e+00 : f32
    %102 = vector.broadcast %cst_83 : f32 to vector<100x64xf32>
    %103 = arith.maximumf %101, %102 : vector<100x64xf32>
    %c0_84 = arith.constant 0 : index
    %c0_85 = arith.constant 0 : index
    %104 = vector.load %arg15[%c0_84, %c0_85] : memref<104x64xf32, #tpu.memory_space<vmem>>, vector<100x64xf32>
    tpu.vector_store %arg15[%c0_84, %c0_85], %103 {strides = array<i32>} : memref<104x64xf32, #tpu.memory_space<vmem>>, vector<100x64xf32>,
    %cst_86 = arith.constant 0.000000e+00 : f32
    %105 = vector.broadcast %cst_86 : f32 to vector<1x512xf32>
    %c0_87 = arith.constant 0 : index
    %c0_88 = arith.constant 0 : index
    %106 = vector.load %arg15[%c0_87, %c0_88] : memref<104x64xf32, #tpu.memory_space<vmem>>, vector<1x64xf32>
    %107 = arith.truncf %106 : vector<1x64xf32> to vector<1x64xbf16>
    %c0_89 = arith.constant 0 : index
    %c0_90 = arith.constant 0 : index
    %108 = vector.load %arg8[%c0_89, %c0_90] : memref<3136x512xbf16, #tpu.memory_space<vmem>>, vector<64x512xbf16>
    %cst_91 = arith.constant dense<0.000000e+00> : vector<1x512xf32>
    %109 = tpu.matmul %107, %108, %cst_91 {dimension_numbers = #tpu.dot_dimension_numbers<[1], [0], [0], [1], [0, 0, 1, 1], [], []>} : vector<1x64xbf16>, vector<64x512xbf16>, vector<1x512xf32> -> vector<1x512xf32>
    %110 = arith.addf %105, %109 : vector<1x512xf32>
    %c1_92 = arith.constant 1 : index
    %c0_93 = arith.constant 0 : index
    %111 = vector.load %arg15[%c1_92, %c0_93] : memref<104x64xf32, #tpu.memory_space<vmem>>, vector<1x64xf32>
    %112 = arith.truncf %111 : vector<1x64xf32> to vector<1x64xbf16>
    %c64 = arith.constant 64 : index
    %c0_94 = arith.constant 0 : index
    %113 = vector.load %arg8[%c64, %c0_94] : memref<3136x512xbf16, #tpu.memory_space<vmem>>, vector<64x512xbf16>
    %cst_95 = arith.constant dense<0.000000e+00> : vector<1x512xf32>
    %114 = tpu.matmul %112, %113, %cst_95 {dimension_numbers = #tpu.dot_dimension_numbers<[1], [0], [0], [1], [0, 0, 1, 1], [], []>} : vector<1x64xbf16>, vector<64x512xbf16>, vector<1x512xf32> -> vector<1x512xf32>
    %115 = arith.addf %110, %114 : vector<1x512xf32>
    %c2_96 = arith.constant 2 : index
    %c0_97 = arith.constant 0 : index
    %116 = vector.load %arg15[%c2_96, %c0_97] : memref<104x64xf32, #tpu.memory_space<vmem>>, vector<1x64xf32>
    %117 = arith.truncf %116 : vector<1x64xf32> to vector<1x64xbf16>
    %c128 = arith.constant 128 : index
    %c0_98 = arith.constant 0 : index
    %118 = vector.load %arg8[%c128, %c0_98] : memref<3136x512xbf16, #tpu.memory_space<vmem>>, vector<64x512xbf16>
    %cst_99 = arith.constant dense<0.000000e+00> : vector<1x512xf32>
    %119 = tpu.matmul %117, %118, %cst_99 {dimension_numbers = #tpu.dot_dimension_numbers<[1], [0], [0], [1], [0, 0, 1, 1], [], []>} : vector<1x64xbf16>, vector<64x512xbf16>, vector<1x512xf32> -> vector<1x512xf32>
    %120 = arith.addf %115, %119 : vector<1x512xf32>
    %c3_100 = arith.constant 3 : index
    %c0_101 = arith.constant 0 : index
    %121 = vector.load %arg15[%c3_100, %c0_101] : memref<104x64xf32, #tpu.memory_space<vmem>>, vector<1x64xf32>
    %122 = arith.truncf %121 : vector<1x64xf32> to vector<1x64xbf16>
    %c192 = arith.constant 192 : index
    %c0_102 = arith.constant 0 : index
    %123 = vector.load %arg8[%c192, %c0_102] : memref<3136x512xbf16, #tpu.memory_space<vmem>>, vector<64x512xbf16>
    %cst_103 = arith.constant dense<0.000000e+00> : vector<1x512xf32>
    %124 = tpu.matmul %122, %123, %cst_103 {dimension_numbers = #tpu.dot_dimension_numbers<[1], [0], [0], [1], [0, 0, 1, 1], [], []>} : vector<1x64xbf16>, vector<64x512xbf16>, vector<1x512xf32> -> vector<1x512xf32>
    %125 = arith.addf %120, %124 : vector<1x512xf32>
    %c4_104 = arith.constant 4 : index
    %c0_105 = arith.constant 0 : index
    %126 = vector.load %arg15[%c4_104, %c0_105] : memref<104x64xf32, #tpu.memory_space<vmem>>, vector<1x64xf32>
    %127 = arith.truncf %126 : vector<1x64xf32> to vector<1x64xbf16>
    %c256 = arith.constant 256 : index
    %c0_106 = arith.constant 0 : index
    %128 = vector.load %arg8[%c256, %c0_106] : memref<3136x512xbf16, #tpu.memory_space<vmem>>, vector<64x512xbf16>
    %cst_107 = arith.constant dense<0.000000e+00> : vector<1x512xf32>
    %129 = tpu.matmul %127, %128, %cst_107 {dimension_numbers = #tpu.dot_dimension_numbers<[1], [0], [0], [1], [0, 0, 1, 1], [], []>} : vector<1x64xbf16>, vector<64x512xbf16>, vector<1x512xf32> -> vector<1x512xf32>
    %130 = arith.addf %125, %129 : vector<1x512xf32>
    %c5_108 = arith.constant 5 : index
    %c0_109 = arith.constant 0 : index
    %131 = vector.load %arg15[%c5_108, %c0_109] : memref<104x64xf32, #tpu.memory_space<vmem>>, vector<1x64xf32>
    %132 = arith.truncf %131 : vector<1x64xf32> to vector<1x64xbf16>
    %c320 = arith.constant 320 : index
    %c0_110 = arith.constant 0 : index
    %133 = vector.load %arg8[%c320, %c0_110] : memref<3136x512xbf16, #tpu.memory_space<vmem>>, vector<64x512xbf16>
    %cst_111 = arith.constant dense<0.000000e+00> : vector<1x512xf32>
    %134 = tpu.matmul %132, %133, %cst_111 {dimension_numbers = #tpu.dot_dimension_numbers<[1], [0], [0], [1], [0, 0, 1, 1], [], []>} : vector<1x64xbf16>, vector<64x512xbf16>, vector<1x512xf32> -> vector<1x512xf32>
    %135 = arith.addf %130, %134 : vector<1x512xf32>
    %c6_112 = arith.constant 6 : index
    %c0_113 = arith.constant 0 : index
    %136 = vector.load %arg15[%c6_112, %c0_113] : memref<104x64xf32, #tpu.memory_space<vmem>>, vector<1x64xf32>
    %137 = arith.truncf %136 : vector<1x64xf32> to vector<1x64xbf16>
    %c384 = arith.constant 384 : index
    %c0_114 = arith.constant 0 : index
    %138 = vector.load %arg8[%c384, %c0_114] : memref<3136x512xbf16, #tpu.memory_space<vmem>>, vector<64x512xbf16>
    %cst_115 = arith.constant dense<0.000000e+00> : vector<1x512xf32>
    %139 = tpu.matmul %137, %138, %cst_115 {dimension_numbers = #tpu.dot_dimension_numbers<[1], [0], [0], [1], [0, 0, 1, 1], [], []>} : vector<1x64xbf16>, vector<64x512xbf16>, vector<1x512xf32> -> vector<1x512xf32>
    %140 = arith.addf %135, %139 : vector<1x512xf32>
    %c10_116 = arith.constant 10 : index
    %c0_117 = arith.constant 0 : index
    %141 = vector.load %arg15[%c10_116, %c0_117] : memref<104x64xf32, #tpu.memory_space<vmem>>, vector<1x64xf32>
    %142 = arith.truncf %141 : vector<1x64xf32> to vector<1x64xbf16>
    %c448 = arith.constant 448 : index
    %c0_118 = arith.constant 0 : index
    %143 = vector.load %arg8[%c448, %c0_118] : memref<3136x512xbf16, #tpu.memory_space<vmem>>, vector<64x512xbf16>
    %cst_119 = arith.constant dense<0.000000e+00> : vector<1x512xf32>
    %144 = tpu.matmul %142, %143, %cst_119 {dimension_numbers = #tpu.dot_dimension_numbers<[1], [0], [0], [1], [0, 0, 1, 1], [], []>} : vector<1x64xbf16>, vector<64x512xbf16>, vector<1x512xf32> -> vector<1x512xf32>
    %145 = arith.addf %140, %144 : vector<1x512xf32>
    %c11_120 = arith.constant 11 : index
    %c0_121 = arith.constant 0 : index
    %146 = vector.load %arg15[%c11_120, %c0_121] : memref<104x64xf32, #tpu.memory_space<vmem>>, vector<1x64xf32>
    %147 = arith.truncf %146 : vector<1x64xf32> to vector<1x64xbf16>
    %c512 = arith.constant 512 : index
    %c0_122 = arith.constant 0 : index
    %148 = vector.load %arg8[%c512, %c0_122] : memref<3136x512xbf16, #tpu.memory_space<vmem>>, vector<64x512xbf16>
    %cst_123 = arith.constant dense<0.000000e+00> : vector<1x512xf32>
    %149 = tpu.matmul %147, %148, %cst_123 {dimension_numbers = #tpu.dot_dimension_numbers<[1], [0], [0], [1], [0, 0, 1, 1], [], []>} : vector<1x64xbf16>, vector<64x512xbf16>, vector<1x512xf32> -> vector<1x512xf32>
    %150 = arith.addf %145, %149 : vector<1x512xf32>
    %c12_124 = arith.constant 12 : index
    %c0_125 = arith.constant 0 : index
    %151 = vector.load %arg15[%c12_124, %c0_125] : memref<104x64xf32, #tpu.memory_space<vmem>>, vector<1x64xf32>
    %152 = arith.truncf %151 : vector<1x64xf32> to vector<1x64xbf16>
    %c576 = arith.constant 576 : index
    %c0_126 = arith.constant 0 : index
    %153 = vector.load %arg8[%c576, %c0_126] : memref<3136x512xbf16, #tpu.memory_space<vmem>>, vector<64x512xbf16>
    %cst_127 = arith.constant dense<0.000000e+00> : vector<1x512xf32>
    %154 = tpu.matmul %152, %153, %cst_127 {dimension_numbers = #tpu.dot_dimension_numbers<[1], [0], [0], [1], [0, 0, 1, 1], [], []>} : vector<1x64xbf16>, vector<64x512xbf16>, vector<1x512xf32> -> vector<1x512xf32>
    %155 = arith.addf %150, %154 : vector<1x512xf32>
    %c13 = arith.constant 13 : index
    %c0_128 = arith.constant 0 : index
    %156 = vector.load %arg15[%c13, %c0_128] : memref<104x64xf32, #tpu.memory_space<vmem>>, vector<1x64xf32>
    %157 = arith.truncf %156 : vector<1x64xf32> to vector<1x64xbf16>
    %c640 = arith.constant 640 : index
    %c0_129 = arith.constant 0 : index
    %158 = vector.load %arg8[%c640, %c0_129] : memref<3136x512xbf16, #tpu.memory_space<vmem>>, vector<64x512xbf16>
    %cst_130 = arith.constant dense<0.000000e+00> : vector<1x512xf32>
    %159 = tpu.matmul %157, %158, %cst_130 {dimension_numbers = #tpu.dot_dimension_numbers<[1], [0], [0], [1], [0, 0, 1, 1], [], []>} : vector<1x64xbf16>, vector<64x512xbf16>, vector<1x512xf32> -> vector<1x512xf32>
    %160 = arith.addf %155, %159 : vector<1x512xf32>
    %c14 = arith.constant 14 : index
    %c0_131 = arith.constant 0 : index
    %161 = vector.load %arg15[%c14, %c0_131] : memref<104x64xf32, #tpu.memory_space<vmem>>, vector<1x64xf32>
    %162 = arith.truncf %161 : vector<1x64xf32> to vector<1x64xbf16>
    %c704 = arith.constant 704 : index
    %c0_132 = arith.constant 0 : index
    %163 = vector.load %arg8[%c704, %c0_132] : memref<3136x512xbf16, #tpu.memory_space<vmem>>, vector<64x512xbf16>
    %cst_133 = arith.constant dense<0.000000e+00> : vector<1x512xf32>
    %164 = tpu.matmul %162, %163, %cst_133 {dimension_numbers = #tpu.dot_dimension_numbers<[1], [0], [0], [1], [0, 0, 1, 1], [], []>} : vector<1x64xbf16>, vector<64x512xbf16>, vector<1x512xf32> -> vector<1x512xf32>
    %165 = arith.addf %160, %164 : vector<1x512xf32>
    %c15 = arith.constant 15 : index
    %c0_134 = arith.constant 0 : index
    %166 = vector.load %arg15[%c15, %c0_134] : memref<104x64xf32, #tpu.memory_space<vmem>>, vector<1x64xf32>
    %167 = arith.truncf %166 : vector<1x64xf32> to vector<1x64xbf16>
    %c768 = arith.constant 768 : index
    %c0_135 = arith.constant 0 : index
    %168 = vector.load %arg8[%c768, %c0_135] : memref<3136x512xbf16, #tpu.memory_space<vmem>>, vector<64x512xbf16>
    %cst_136 = arith.constant dense<0.000000e+00> : vector<1x512xf32>
    %169 = tpu.matmul %167, %168, %cst_136 {dimension_numbers = #tpu.dot_dimension_numbers<[1], [0], [0], [1], [0, 0, 1, 1], [], []>} : vector<1x64xbf16>, vector<64x512xbf16>, vector<1x512xf32> -> vector<1x512xf32>
    %170 = arith.addf %165, %169 : vector<1x512xf32>
    %c16 = arith.constant 16 : index
    %c0_137 = arith.constant 0 : index
    %171 = vector.load %arg15[%c16, %c0_137] : memref<104x64xf32, #tpu.memory_space<vmem>>, vector<1x64xf32>
    %172 = arith.truncf %171 : vector<1x64xf32> to vector<1x64xbf16>
    %c832 = arith.constant 832 : index
    %c0_138 = arith.constant 0 : index
    %173 = vector.load %arg8[%c832, %c0_138] : memref<3136x512xbf16, #tpu.memory_space<vmem>>, vector<64x512xbf16>
    %cst_139 = arith.constant dense<0.000000e+00> : vector<1x512xf32>
    %174 = tpu.matmul %172, %173, %cst_139 {dimension_numbers = #tpu.dot_dimension_numbers<[1], [0], [0], [1], [0, 0, 1, 1], [], []>} : vector<1x64xbf16>, vector<64x512xbf16>, vector<1x512xf32> -> vector<1x512xf32>
    %175 = arith.addf %170, %174 : vector<1x512xf32>
    %c20_140 = arith.constant 20 : index
    %c0_141 = arith.constant 0 : index
    %176 = vector.load %arg15[%c20_140, %c0_141] : memref<104x64xf32, #tpu.memory_space<vmem>>, vector<1x64xf32>
    %177 = arith.truncf %176 : vector<1x64xf32> to vector<1x64xbf16>
    %c896 = arith.constant 896 : index
    %c0_142 = arith.constant 0 : index
    %178 = vector.load %arg8[%c896, %c0_142] : memref<3136x512xbf16, #tpu.memory_space<vmem>>, vector<64x512xbf16>
    %cst_143 = arith.constant dense<0.000000e+00> : vector<1x512xf32>
    %179 = tpu.matmul %177, %178, %cst_143 {dimension_numbers = #tpu.dot_dimension_numbers<[1], [0], [0], [1], [0, 0, 1, 1], [], []>} : vector<1x64xbf16>, vector<64x512xbf16>, vector<1x512xf32> -> vector<1x512xf32>
    %180 = arith.addf %175, %179 : vector<1x512xf32>
    %c21_144 = arith.constant 21 : index
    %c0_145 = arith.constant 0 : index
    %181 = vector.load %arg15[%c21_144, %c0_145] : memref<104x64xf32, #tpu.memory_space<vmem>>, vector<1x64xf32>
    %182 = arith.truncf %181 : vector<1x64xf32> to vector<1x64xbf16>
    %c960 = arith.constant 960 : index
    %c0_146 = arith.constant 0 : index
    %183 = vector.load %arg8[%c960, %c0_146] : memref<3136x512xbf16, #tpu.memory_space<vmem>>, vector<64x512xbf16>
    %cst_147 = arith.constant dense<0.000000e+00> : vector<1x512xf32>
    %184 = tpu.matmul %182, %183, %cst_147 {dimension_numbers = #tpu.dot_dimension_numbers<[1], [0], [0], [1], [0, 0, 1, 1], [], []>} : vector<1x64xbf16>, vector<64x512xbf16>, vector<1x512xf32> -> vector<1x512xf32>
    %185 = arith.addf %180, %184 : vector<1x512xf32>
    %c22_148 = arith.constant 22 : index
    %c0_149 = arith.constant 0 : index
    %186 = vector.load %arg15[%c22_148, %c0_149] : memref<104x64xf32, #tpu.memory_space<vmem>>, vector<1x64xf32>
    %187 = arith.truncf %186 : vector<1x64xf32> to vector<1x64xbf16>
    %c1024 = arith.constant 1024 : index
    %c0_150 = arith.constant 0 : index
    %188 = vector.load %arg8[%c1024, %c0_150] : memref<3136x512xbf16, #tpu.memory_space<vmem>>, vector<64x512xbf16>
    %cst_151 = arith.constant dense<0.000000e+00> : vector<1x512xf32>
    %189 = tpu.matmul %187, %188, %cst_151 {dimension_numbers = #tpu.dot_dimension_numbers<[1], [0], [0], [1], [0, 0, 1, 1], [], []>} : vector<1x64xbf16>, vector<64x512xbf16>, vector<1x512xf32> -> vector<1x512xf32>
    %190 = arith.addf %185, %189 : vector<1x512xf32>
    %c23 = arith.constant 23 : index
    %c0_152 = arith.constant 0 : index
    %191 = vector.load %arg15[%c23, %c0_152] : memref<104x64xf32, #tpu.memory_space<vmem>>, vector<1x64xf32>
    %192 = arith.truncf %191 : vector<1x64xf32> to vector<1x64xbf16>
    %c1088 = arith.constant 1088 : index
    %c0_153 = arith.constant 0 : index
    %193 = vector.load %arg8[%c1088, %c0_153] : memref<3136x512xbf16, #tpu.memory_space<vmem>>, vector<64x512xbf16>
    %cst_154 = arith.constant dense<0.000000e+00> : vector<1x512xf32>
    %194 = tpu.matmul %192, %193, %cst_154 {dimension_numbers = #tpu.dot_dimension_numbers<[1], [0], [0], [1], [0, 0, 1, 1], [], []>} : vector<1x64xbf16>, vector<64x512xbf16>, vector<1x512xf32> -> vector<1x512xf32>
    %195 = arith.addf %190, %194 : vector<1x512xf32>
    %c24 = arith.constant 24 : index
    %c0_155 = arith.constant 0 : index
    %196 = vector.load %arg15[%c24, %c0_155] : memref<104x64xf32, #tpu.memory_space<vmem>>, vector<1x64xf32>
    %197 = arith.truncf %196 : vector<1x64xf32> to vector<1x64xbf16>
    %c1152 = arith.constant 1152 : index
    %c0_156 = arith.constant 0 : index
    %198 = vector.load %arg8[%c1152, %c0_156] : memref<3136x512xbf16, #tpu.memory_space<vmem>>, vector<64x512xbf16>
    %cst_157 = arith.constant dense<0.000000e+00> : vector<1x512xf32>
    %199 = tpu.matmul %197, %198, %cst_157 {dimension_numbers = #tpu.dot_dimension_numbers<[1], [0], [0], [1], [0, 0, 1, 1], [], []>} : vector<1x64xbf16>, vector<64x512xbf16>, vector<1x512xf32> -> vector<1x512xf32>
    %200 = arith.addf %195, %199 : vector<1x512xf32>
    %c25 = arith.constant 25 : index
    %c0_158 = arith.constant 0 : index
    %201 = vector.load %arg15[%c25, %c0_158] : memref<104x64xf32, #tpu.memory_space<vmem>>, vector<1x64xf32>
    %202 = arith.truncf %201 : vector<1x64xf32> to vector<1x64xbf16>
    %c1216 = arith.constant 1216 : index
    %c0_159 = arith.constant 0 : index
    %203 = vector.load %arg8[%c1216, %c0_159] : memref<3136x512xbf16, #tpu.memory_space<vmem>>, vector<64x512xbf16>
    %cst_160 = arith.constant dense<0.000000e+00> : vector<1x512xf32>
    %204 = tpu.matmul %202, %203, %cst_160 {dimension_numbers = #tpu.dot_dimension_numbers<[1], [0], [0], [1], [0, 0, 1, 1], [], []>} : vector<1x64xbf16>, vector<64x512xbf16>, vector<1x512xf32> -> vector<1x512xf32>
    %205 = arith.addf %200, %204 : vector<1x512xf32>
    %c26 = arith.constant 26 : index
    %c0_161 = arith.constant 0 : index
    %206 = vector.load %arg15[%c26, %c0_161] : memref<104x64xf32, #tpu.memory_space<vmem>>, vector<1x64xf32>
    %207 = arith.truncf %206 : vector<1x64xf32> to vector<1x64xbf16>
    %c1280 = arith.constant 1280 : index
    %c0_162 = arith.constant 0 : index
    %208 = vector.load %arg8[%c1280, %c0_162] : memref<3136x512xbf16, #tpu.memory_space<vmem>>, vector<64x512xbf16>
    %cst_163 = arith.constant dense<0.000000e+00> : vector<1x512xf32>
    %209 = tpu.matmul %207, %208, %cst_163 {dimension_numbers = #tpu.dot_dimension_numbers<[1], [0], [0], [1], [0, 0, 1, 1], [], []>} : vector<1x64xbf16>, vector<64x512xbf16>, vector<1x512xf32> -> vector<1x512xf32>
    %210 = arith.addf %205, %209 : vector<1x512xf32>
    %c30 = arith.constant 30 : index
    %c0_164 = arith.constant 0 : index
    %211 = vector.load %arg15[%c30, %c0_164] : memref<104x64xf32, #tpu.memory_space<vmem>>, vector<1x64xf32>
    %212 = arith.truncf %211 : vector<1x64xf32> to vector<1x64xbf16>
    %c1344 = arith.constant 1344 : index
    %c0_165 = arith.constant 0 : index
    %213 = vector.load %arg8[%c1344, %c0_165] : memref<3136x512xbf16, #tpu.memory_space<vmem>>, vector<64x512xbf16>
    %cst_166 = arith.constant dense<0.000000e+00> : vector<1x512xf32>
    %214 = tpu.matmul %212, %213, %cst_166 {dimension_numbers = #tpu.dot_dimension_numbers<[1], [0], [0], [1], [0, 0, 1, 1], [], []>} : vector<1x64xbf16>, vector<64x512xbf16>, vector<1x512xf32> -> vector<1x512xf32>
    %215 = arith.addf %210, %214 : vector<1x512xf32>
    %c31 = arith.constant 31 : index
    %c0_167 = arith.constant 0 : index
    %216 = vector.load %arg15[%c31, %c0_167] : memref<104x64xf32, #tpu.memory_space<vmem>>, vector<1x64xf32>
    %217 = arith.truncf %216 : vector<1x64xf32> to vector<1x64xbf16>
    %c1408 = arith.constant 1408 : index
    %c0_168 = arith.constant 0 : index
    %218 = vector.load %arg8[%c1408, %c0_168] : memref<3136x512xbf16, #tpu.memory_space<vmem>>, vector<64x512xbf16>
    %cst_169 = arith.constant dense<0.000000e+00> : vector<1x512xf32>
    %219 = tpu.matmul %217, %218, %cst_169 {dimension_numbers = #tpu.dot_dimension_numbers<[1], [0], [0], [1], [0, 0, 1, 1], [], []>} : vector<1x64xbf16>, vector<64x512xbf16>, vector<1x512xf32> -> vector<1x512xf32>
    %220 = arith.addf %215, %219 : vector<1x512xf32>
    %c32 = arith.constant 32 : index
    %c0_170 = arith.constant 0 : index
    %221 = vector.load %arg15[%c32, %c0_170] : memref<104x64xf32, #tpu.memory_space<vmem>>, vector<1x64xf32>
    %222 = arith.truncf %221 : vector<1x64xf32> to vector<1x64xbf16>
    %c1472 = arith.constant 1472 : index
    %c0_171 = arith.constant 0 : index
    %223 = vector.load %arg8[%c1472, %c0_171] : memref<3136x512xbf16, #tpu.memory_space<vmem>>, vector<64x512xbf16>
    %cst_172 = arith.constant dense<0.000000e+00> : vector<1x512xf32>
    %224 = tpu.matmul %222, %223, %cst_172 {dimension_numbers = #tpu.dot_dimension_numbers<[1], [0], [0], [1], [0, 0, 1, 1], [], []>} : vector<1x64xbf16>, vector<64x512xbf16>, vector<1x512xf32> -> vector<1x512xf32>
    %225 = arith.addf %220, %224 : vector<1x512xf32>
    %c33 = arith.constant 33 : index
    %c0_173 = arith.constant 0 : index
    %226 = vector.load %arg15[%c33, %c0_173] : memref<104x64xf32, #tpu.memory_space<vmem>>, vector<1x64xf32>
    %227 = arith.truncf %226 : vector<1x64xf32> to vector<1x64xbf16>
    %c1536 = arith.constant 1536 : index
    %c0_174 = arith.constant 0 : index
    %228 = vector.load %arg8[%c1536, %c0_174] : memref<3136x512xbf16, #tpu.memory_space<vmem>>, vector<64x512xbf16>
    %cst_175 = arith.constant dense<0.000000e+00> : vector<1x512xf32>
    %229 = tpu.matmul %227, %228, %cst_175 {dimension_numbers = #tpu.dot_dimension_numbers<[1], [0], [0], [1], [0, 0, 1, 1], [], []>} : vector<1x64xbf16>, vector<64x512xbf16>, vector<1x512xf32> -> vector<1x512xf32>
    %230 = arith.addf %225, %229 : vector<1x512xf32>
    %c34 = arith.constant 34 : index
    %c0_176 = arith.constant 0 : index
    %231 = vector.load %arg15[%c34, %c0_176] : memref<104x64xf32, #tpu.memory_space<vmem>>, vector<1x64xf32>
    %232 = arith.truncf %231 : vector<1x64xf32> to vector<1x64xbf16>
    %c1600 = arith.constant 1600 : index
    %c0_177 = arith.constant 0 : index
    %233 = vector.load %arg8[%c1600, %c0_177] : memref<3136x512xbf16, #tpu.memory_space<vmem>>, vector<64x512xbf16>
    %cst_178 = arith.constant dense<0.000000e+00> : vector<1x512xf32>
    %234 = tpu.matmul %232, %233, %cst_178 {dimension_numbers = #tpu.dot_dimension_numbers<[1], [0], [0], [1], [0, 0, 1, 1], [], []>} : vector<1x64xbf16>, vector<64x512xbf16>, vector<1x512xf32> -> vector<1x512xf32>
    %235 = arith.addf %230, %234 : vector<1x512xf32>
    %c35 = arith.constant 35 : index
    %c0_179 = arith.constant 0 : index
    %236 = vector.load %arg15[%c35, %c0_179] : memref<104x64xf32, #tpu.memory_space<vmem>>, vector<1x64xf32>
    %237 = arith.truncf %236 : vector<1x64xf32> to vector<1x64xbf16>
    %c1664 = arith.constant 1664 : index
    %c0_180 = arith.constant 0 : index
    %238 = vector.load %arg8[%c1664, %c0_180] : memref<3136x512xbf16, #tpu.memory_space<vmem>>, vector<64x512xbf16>
    %cst_181 = arith.constant dense<0.000000e+00> : vector<1x512xf32>
    %239 = tpu.matmul %237, %238, %cst_181 {dimension_numbers = #tpu.dot_dimension_numbers<[1], [0], [0], [1], [0, 0, 1, 1], [], []>} : vector<1x64xbf16>, vector<64x512xbf16>, vector<1x512xf32> -> vector<1x512xf32>
    %240 = arith.addf %235, %239 : vector<1x512xf32>
    %c36 = arith.constant 36 : index
    %c0_182 = arith.constant 0 : index
    %241 = vector.load %arg15[%c36, %c0_182] : memref<104x64xf32, #tpu.memory_space<vmem>>, vector<1x64xf32>
    %242 = arith.truncf %241 : vector<1x64xf32> to vector<1x64xbf16>
    %c1728 = arith.constant 1728 : index
    %c0_183 = arith.constant 0 : index
    %243 = vector.load %arg8[%c1728, %c0_183] : memref<3136x512xbf16, #tpu.memory_space<vmem>>, vector<64x512xbf16>
    %cst_184 = arith.constant dense<0.000000e+00> : vector<1x512xf32>
    %244 = tpu.matmul %242, %243, %cst_184 {dimension_numbers = #tpu.dot_dimension_numbers<[1], [0], [0], [1], [0, 0, 1, 1], [], []>} : vector<1x64xbf16>, vector<64x512xbf16>, vector<1x512xf32> -> vector<1x512xf32>
    %245 = arith.addf %240, %244 : vector<1x512xf32>
    %c40 = arith.constant 40 : index
    %c0_185 = arith.constant 0 : index
    %246 = vector.load %arg15[%c40, %c0_185] : memref<104x64xf32, #tpu.memory_space<vmem>>, vector<1x64xf32>
    %247 = arith.truncf %246 : vector<1x64xf32> to vector<1x64xbf16>
    %c1792 = arith.constant 1792 : index
    %c0_186 = arith.constant 0 : index
    %248 = vector.load %arg8[%c1792, %c0_186] : memref<3136x512xbf16, #tpu.memory_space<vmem>>, vector<64x512xbf16>
    %cst_187 = arith.constant dense<0.000000e+00> : vector<1x512xf32>
    %249 = tpu.matmul %247, %248, %cst_187 {dimension_numbers = #tpu.dot_dimension_numbers<[1], [0], [0], [1], [0, 0, 1, 1], [], []>} : vector<1x64xbf16>, vector<64x512xbf16>, vector<1x512xf32> -> vector<1x512xf32>
    %250 = arith.addf %245, %249 : vector<1x512xf32>
    %c41 = arith.constant 41 : index
    %c0_188 = arith.constant 0 : index
    %251 = vector.load %arg15[%c41, %c0_188] : memref<104x64xf32, #tpu.memory_space<vmem>>, vector<1x64xf32>
    %252 = arith.truncf %251 : vector<1x64xf32> to vector<1x64xbf16>
    %c1856 = arith.constant 1856 : index
    %c0_189 = arith.constant 0 : index
    %253 = vector.load %arg8[%c1856, %c0_189] : memref<3136x512xbf16, #tpu.memory_space<vmem>>, vector<64x512xbf16>
    %cst_190 = arith.constant dense<0.000000e+00> : vector<1x512xf32>
    %254 = tpu.matmul %252, %253, %cst_190 {dimension_numbers = #tpu.dot_dimension_numbers<[1], [0], [0], [1], [0, 0, 1, 1], [], []>} : vector<1x64xbf16>, vector<64x512xbf16>, vector<1x512xf32> -> vector<1x512xf32>
    %255 = arith.addf %250, %254 : vector<1x512xf32>
    %c42 = arith.constant 42 : index
    %c0_191 = arith.constant 0 : index
    %256 = vector.load %arg15[%c42, %c0_191] : memref<104x64xf32, #tpu.memory_space<vmem>>, vector<1x64xf32>
    %257 = arith.truncf %256 : vector<1x64xf32> to vector<1x64xbf16>
    %c1920 = arith.constant 1920 : index
    %c0_192 = arith.constant 0 : index
    %258 = vector.load %arg8[%c1920, %c0_192] : memref<3136x512xbf16, #tpu.memory_space<vmem>>, vector<64x512xbf16>
    %cst_193 = arith.constant dense<0.000000e+00> : vector<1x512xf32>
    %259 = tpu.matmul %257, %258, %cst_193 {dimension_numbers = #tpu.dot_dimension_numbers<[1], [0], [0], [1], [0, 0, 1, 1], [], []>} : vector<1x64xbf16>, vector<64x512xbf16>, vector<1x512xf32> -> vector<1x512xf32>
    %260 = arith.addf %255, %259 : vector<1x512xf32>
    %c43 = arith.constant 43 : index
    %c0_194 = arith.constant 0 : index
    %261 = vector.load %arg15[%c43, %c0_194] : memref<104x64xf32, #tpu.memory_space<vmem>>, vector<1x64xf32>
    %262 = arith.truncf %261 : vector<1x64xf32> to vector<1x64xbf16>
    %c1984 = arith.constant 1984 : index
    %c0_195 = arith.constant 0 : index
    %263 = vector.load %arg8[%c1984, %c0_195] : memref<3136x512xbf16, #tpu.memory_space<vmem>>, vector<64x512xbf16>
    %cst_196 = arith.constant dense<0.000000e+00> : vector<1x512xf32>
    %264 = tpu.matmul %262, %263, %cst_196 {dimension_numbers = #tpu.dot_dimension_numbers<[1], [0], [0], [1], [0, 0, 1, 1], [], []>} : vector<1x64xbf16>, vector<64x512xbf16>, vector<1x512xf32> -> vector<1x512xf32>
    %265 = arith.addf %260, %264 : vector<1x512xf32>
    %c44 = arith.constant 44 : index
    %c0_197 = arith.constant 0 : index
    %266 = vector.load %arg15[%c44, %c0_197] : memref<104x64xf32, #tpu.memory_space<vmem>>, vector<1x64xf32>
    %267 = arith.truncf %266 : vector<1x64xf32> to vector<1x64xbf16>
    %c2048 = arith.constant 2048 : index
    %c0_198 = arith.constant 0 : index
    %268 = vector.load %arg8[%c2048, %c0_198] : memref<3136x512xbf16, #tpu.memory_space<vmem>>, vector<64x512xbf16>
    %cst_199 = arith.constant dense<0.000000e+00> : vector<1x512xf32>
    %269 = tpu.matmul %267, %268, %cst_199 {dimension_numbers = #tpu.dot_dimension_numbers<[1], [0], [0], [1], [0, 0, 1, 1], [], []>} : vector<1x64xbf16>, vector<64x512xbf16>, vector<1x512xf32> -> vector<1x512xf32>
    %270 = arith.addf %265, %269 : vector<1x512xf32>
    %c45 = arith.constant 45 : index
    %c0_200 = arith.constant 0 : index
    %271 = vector.load %arg15[%c45, %c0_200] : memref<104x64xf32, #tpu.memory_space<vmem>>, vector<1x64xf32>
    %272 = arith.truncf %271 : vector<1x64xf32> to vector<1x64xbf16>
    %c2112 = arith.constant 2112 : index
    %c0_201 = arith.constant 0 : index
    %273 = vector.load %arg8[%c2112, %c0_201] : memref<3136x512xbf16, #tpu.memory_space<vmem>>, vector<64x512xbf16>
    %cst_202 = arith.constant dense<0.000000e+00> : vector<1x512xf32>
    %274 = tpu.matmul %272, %273, %cst_202 {dimension_numbers = #tpu.dot_dimension_numbers<[1], [0], [0], [1], [0, 0, 1, 1], [], []>} : vector<1x64xbf16>, vector<64x512xbf16>, vector<1x512xf32> -> vector<1x512xf32>
    %275 = arith.addf %270, %274 : vector<1x512xf32>
    %c46 = arith.constant 46 : index
    %c0_203 = arith.constant 0 : index
    %276 = vector.load %arg15[%c46, %c0_203] : memref<104x64xf32, #tpu.memory_space<vmem>>, vector<1x64xf32>
    %277 = arith.truncf %276 : vector<1x64xf32> to vector<1x64xbf16>
    %c2176 = arith.constant 2176 : index
    %c0_204 = arith.constant 0 : index
    %278 = vector.load %arg8[%c2176, %c0_204] : memref<3136x512xbf16, #tpu.memory_space<vmem>>, vector<64x512xbf16>
    %cst_205 = arith.constant dense<0.000000e+00> : vector<1x512xf32>
    %279 = tpu.matmul %277, %278, %cst_205 {dimension_numbers = #tpu.dot_dimension_numbers<[1], [0], [0], [1], [0, 0, 1, 1], [], []>} : vector<1x64xbf16>, vector<64x512xbf16>, vector<1x512xf32> -> vector<1x512xf32>
    %280 = arith.addf %275, %279 : vector<1x512xf32>
    %c50 = arith.constant 50 : index
    %c0_206 = arith.constant 0 : index
    %281 = vector.load %arg15[%c50, %c0_206] : memref<104x64xf32, #tpu.memory_space<vmem>>, vector<1x64xf32>
    %282 = arith.truncf %281 : vector<1x64xf32> to vector<1x64xbf16>
    %c2240 = arith.constant 2240 : index
    %c0_207 = arith.constant 0 : index
    %283 = vector.load %arg8[%c2240, %c0_207] : memref<3136x512xbf16, #tpu.memory_space<vmem>>, vector<64x512xbf16>
    %cst_208 = arith.constant dense<0.000000e+00> : vector<1x512xf32>
    %284 = tpu.matmul %282, %283, %cst_208 {dimension_numbers = #tpu.dot_dimension_numbers<[1], [0], [0], [1], [0, 0, 1, 1], [], []>} : vector<1x64xbf16>, vector<64x512xbf16>, vector<1x512xf32> -> vector<1x512xf32>
    %285 = arith.addf %280, %284 : vector<1x512xf32>
    %c51 = arith.constant 51 : index
    %c0_209 = arith.constant 0 : index
    %286 = vector.load %arg15[%c51, %c0_209] : memref<104x64xf32, #tpu.memory_space<vmem>>, vector<1x64xf32>
    %287 = arith.truncf %286 : vector<1x64xf32> to vector<1x64xbf16>
    %c2304 = arith.constant 2304 : index
    %c0_210 = arith.constant 0 : index
    %288 = vector.load %arg8[%c2304, %c0_210] : memref<3136x512xbf16, #tpu.memory_space<vmem>>, vector<64x512xbf16>
    %cst_211 = arith.constant dense<0.000000e+00> : vector<1x512xf32>
    %289 = tpu.matmul %287, %288, %cst_211 {dimension_numbers = #tpu.dot_dimension_numbers<[1], [0], [0], [1], [0, 0, 1, 1], [], []>} : vector<1x64xbf16>, vector<64x512xbf16>, vector<1x512xf32> -> vector<1x512xf32>
    %290 = arith.addf %285, %289 : vector<1x512xf32>
    %c52 = arith.constant 52 : index
    %c0_212 = arith.constant 0 : index
    %291 = vector.load %arg15[%c52, %c0_212] : memref<104x64xf32, #tpu.memory_space<vmem>>, vector<1x64xf32>
    %292 = arith.truncf %291 : vector<1x64xf32> to vector<1x64xbf16>
    %c2368 = arith.constant 2368 : index
    %c0_213 = arith.constant 0 : index
    %293 = vector.load %arg8[%c2368, %c0_213] : memref<3136x512xbf16, #tpu.memory_space<vmem>>, vector<64x512xbf16>
    %cst_214 = arith.constant dense<0.000000e+00> : vector<1x512xf32>
    %294 = tpu.matmul %292, %293, %cst_214 {dimension_numbers = #tpu.dot_dimension_numbers<[1], [0], [0], [1], [0, 0, 1, 1], [], []>} : vector<1x64xbf16>, vector<64x512xbf16>, vector<1x512xf32> -> vector<1x512xf32>
    %295 = arith.addf %290, %294 : vector<1x512xf32>
    %c53 = arith.constant 53 : index
    %c0_215 = arith.constant 0 : index
    %296 = vector.load %arg15[%c53, %c0_215] : memref<104x64xf32, #tpu.memory_space<vmem>>, vector<1x64xf32>
    %297 = arith.truncf %296 : vector<1x64xf32> to vector<1x64xbf16>
    %c2432 = arith.constant 2432 : index
    %c0_216 = arith.constant 0 : index
    %298 = vector.load %arg8[%c2432, %c0_216] : memref<3136x512xbf16, #tpu.memory_space<vmem>>, vector<64x512xbf16>
    %cst_217 = arith.constant dense<0.000000e+00> : vector<1x512xf32>
    %299 = tpu.matmul %297, %298, %cst_217 {dimension_numbers = #tpu.dot_dimension_numbers<[1], [0], [0], [1], [0, 0, 1, 1], [], []>} : vector<1x64xbf16>, vector<64x512xbf16>, vector<1x512xf32> -> vector<1x512xf32>
    %300 = arith.addf %295, %299 : vector<1x512xf32>
    %c54 = arith.constant 54 : index
    %c0_218 = arith.constant 0 : index
    %301 = vector.load %arg15[%c54, %c0_218] : memref<104x64xf32, #tpu.memory_space<vmem>>, vector<1x64xf32>
    %302 = arith.truncf %301 : vector<1x64xf32> to vector<1x64xbf16>
    %c2496 = arith.constant 2496 : index
    %c0_219 = arith.constant 0 : index
    %303 = vector.load %arg8[%c2496, %c0_219] : memref<3136x512xbf16, #tpu.memory_space<vmem>>, vector<64x512xbf16>
    %cst_220 = arith.constant dense<0.000000e+00> : vector<1x512xf32>
    %304 = tpu.matmul %302, %303, %cst_220 {dimension_numbers = #tpu.dot_dimension_numbers<[1], [0], [0], [1], [0, 0, 1, 1], [], []>} : vector<1x64xbf16>, vector<64x512xbf16>, vector<1x512xf32> -> vector<1x512xf32>
    %305 = arith.addf %300, %304 : vector<1x512xf32>
    %c55 = arith.constant 55 : index
    %c0_221 = arith.constant 0 : index
    %306 = vector.load %arg15[%c55, %c0_221] : memref<104x64xf32, #tpu.memory_space<vmem>>, vector<1x64xf32>
    %307 = arith.truncf %306 : vector<1x64xf32> to vector<1x64xbf16>
    %c2560 = arith.constant 2560 : index
    %c0_222 = arith.constant 0 : index
    %308 = vector.load %arg8[%c2560, %c0_222] : memref<3136x512xbf16, #tpu.memory_space<vmem>>, vector<64x512xbf16>
    %cst_223 = arith.constant dense<0.000000e+00> : vector<1x512xf32>
    %309 = tpu.matmul %307, %308, %cst_223 {dimension_numbers = #tpu.dot_dimension_numbers<[1], [0], [0], [1], [0, 0, 1, 1], [], []>} : vector<1x64xbf16>, vector<64x512xbf16>, vector<1x512xf32> -> vector<1x512xf32>
    %310 = arith.addf %305, %309 : vector<1x512xf32>
    %c56 = arith.constant 56 : index
    %c0_224 = arith.constant 0 : index
    %311 = vector.load %arg15[%c56, %c0_224] : memref<104x64xf32, #tpu.memory_space<vmem>>, vector<1x64xf32>
    %312 = arith.truncf %311 : vector<1x64xf32> to vector<1x64xbf16>
    %c2624 = arith.constant 2624 : index
    %c0_225 = arith.constant 0 : index
    %313 = vector.load %arg8[%c2624, %c0_225] : memref<3136x512xbf16, #tpu.memory_space<vmem>>, vector<64x512xbf16>
    %cst_226 = arith.constant dense<0.000000e+00> : vector<1x512xf32>
    %314 = tpu.matmul %312, %313, %cst_226 {dimension_numbers = #tpu.dot_dimension_numbers<[1], [0], [0], [1], [0, 0, 1, 1], [], []>} : vector<1x64xbf16>, vector<64x512xbf16>, vector<1x512xf32> -> vector<1x512xf32>
    %315 = arith.addf %310, %314 : vector<1x512xf32>
    %c60 = arith.constant 60 : index
    %c0_227 = arith.constant 0 : index
    %316 = vector.load %arg15[%c60, %c0_227] : memref<104x64xf32, #tpu.memory_space<vmem>>, vector<1x64xf32>
    %317 = arith.truncf %316 : vector<1x64xf32> to vector<1x64xbf16>
    %c2688 = arith.constant 2688 : index
    %c0_228 = arith.constant 0 : index
    %318 = vector.load %arg8[%c2688, %c0_228] : memref<3136x512xbf16, #tpu.memory_space<vmem>>, vector<64x512xbf16>
    %cst_229 = arith.constant dense<0.000000e+00> : vector<1x512xf32>
    %319 = tpu.matmul %317, %318, %cst_229 {dimension_numbers = #tpu.dot_dimension_numbers<[1], [0], [0], [1], [0, 0, 1, 1], [], []>} : vector<1x64xbf16>, vector<64x512xbf16>, vector<1x512xf32> -> vector<1x512xf32>
    %320 = arith.addf %315, %319 : vector<1x512xf32>
    %c61 = arith.constant 61 : index
    %c0_230 = arith.constant 0 : index
    %321 = vector.load %arg15[%c61, %c0_230] : memref<104x64xf32, #tpu.memory_space<vmem>>, vector<1x64xf32>
    %322 = arith.truncf %321 : vector<1x64xf32> to vector<1x64xbf16>
    %c2752 = arith.constant 2752 : index
    %c0_231 = arith.constant 0 : index
    %323 = vector.load %arg8[%c2752, %c0_231] : memref<3136x512xbf16, #tpu.memory_space<vmem>>, vector<64x512xbf16>
    %cst_232 = arith.constant dense<0.000000e+00> : vector<1x512xf32>
    %324 = tpu.matmul %322, %323, %cst_232 {dimension_numbers = #tpu.dot_dimension_numbers<[1], [0], [0], [1], [0, 0, 1, 1], [], []>} : vector<1x64xbf16>, vector<64x512xbf16>, vector<1x512xf32> -> vector<1x512xf32>
    %325 = arith.addf %320, %324 : vector<1x512xf32>
    %c62 = arith.constant 62 : index
    %c0_233 = arith.constant 0 : index
    %326 = vector.load %arg15[%c62, %c0_233] : memref<104x64xf32, #tpu.memory_space<vmem>>, vector<1x64xf32>
    %327 = arith.truncf %326 : vector<1x64xf32> to vector<1x64xbf16>
    %c2816 = arith.constant 2816 : index
    %c0_234 = arith.constant 0 : index
    %328 = vector.load %arg8[%c2816, %c0_234] : memref<3136x512xbf16, #tpu.memory_space<vmem>>, vector<64x512xbf16>
    %cst_235 = arith.constant dense<0.000000e+00> : vector<1x512xf32>
    %329 = tpu.matmul %327, %328, %cst_235 {dimension_numbers = #tpu.dot_dimension_numbers<[1], [0], [0], [1], [0, 0, 1, 1], [], []>} : vector<1x64xbf16>, vector<64x512xbf16>, vector<1x512xf32> -> vector<1x512xf32>
    %330 = arith.addf %325, %329 : vector<1x512xf32>
    %c63 = arith.constant 63 : index
    %c0_236 = arith.constant 0 : index
    %331 = vector.load %arg15[%c63, %c0_236] : memref<104x64xf32, #tpu.memory_space<vmem>>, vector<1x64xf32>
    %332 = arith.truncf %331 : vector<1x64xf32> to vector<1x64xbf16>
    %c2880 = arith.constant 2880 : index
    %c0_237 = arith.constant 0 : index
    %333 = vector.load %arg8[%c2880, %c0_237] : memref<3136x512xbf16, #tpu.memory_space<vmem>>, vector<64x512xbf16>
    %cst_238 = arith.constant dense<0.000000e+00> : vector<1x512xf32>
    %334 = tpu.matmul %332, %333, %cst_238 {dimension_numbers = #tpu.dot_dimension_numbers<[1], [0], [0], [1], [0, 0, 1, 1], [], []>} : vector<1x64xbf16>, vector<64x512xbf16>, vector<1x512xf32> -> vector<1x512xf32>
    %335 = arith.addf %330, %334 : vector<1x512xf32>
    %c64_239 = arith.constant 64 : index
    %c0_240 = arith.constant 0 : index
    %336 = vector.load %arg15[%c64_239, %c0_240] : memref<104x64xf32, #tpu.memory_space<vmem>>, vector<1x64xf32>
    %337 = arith.truncf %336 : vector<1x64xf32> to vector<1x64xbf16>
    %c2944 = arith.constant 2944 : index
    %c0_241 = arith.constant 0 : index
    %338 = vector.load %arg8[%c2944, %c0_241] : memref<3136x512xbf16, #tpu.memory_space<vmem>>, vector<64x512xbf16>
    %cst_242 = arith.constant dense<0.000000e+00> : vector<1x512xf32>
    %339 = tpu.matmul %337, %338, %cst_242 {dimension_numbers = #tpu.dot_dimension_numbers<[1], [0], [0], [1], [0, 0, 1, 1], [], []>} : vector<1x64xbf16>, vector<64x512xbf16>, vector<1x512xf32> -> vector<1x512xf32>
    %340 = arith.addf %335, %339 : vector<1x512xf32>
    %c65 = arith.constant 65 : index
    %c0_243 = arith.constant 0 : index
    %341 = vector.load %arg15[%c65, %c0_243] : memref<104x64xf32, #tpu.memory_space<vmem>>, vector<1x64xf32>
    %342 = arith.truncf %341 : vector<1x64xf32> to vector<1x64xbf16>
    %c3008 = arith.constant 3008 : index
    %c0_244 = arith.constant 0 : index
    %343 = vector.load %arg8[%c3008, %c0_244] : memref<3136x512xbf16, #tpu.memory_space<vmem>>, vector<64x512xbf16>
    %cst_245 = arith.constant dense<0.000000e+00> : vector<1x512xf32>
    %344 = tpu.matmul %342, %343, %cst_245 {dimension_numbers = #tpu.dot_dimension_numbers<[1], [0], [0], [1], [0, 0, 1, 1], [], []>} : vector<1x64xbf16>, vector<64x512xbf16>, vector<1x512xf32> -> vector<1x512xf32>
    %345 = arith.addf %340, %344 : vector<1x512xf32>
    %c66 = arith.constant 66 : index
    %c0_246 = arith.constant 0 : index
    %346 = vector.load %arg15[%c66, %c0_246] : memref<104x64xf32, #tpu.memory_space<vmem>>, vector<1x64xf32>
    %347 = arith.truncf %346 : vector<1x64xf32> to vector<1x64xbf16>
    %c3072 = arith.constant 3072 : index
    %c0_247 = arith.constant 0 : index
    %348 = vector.load %arg8[%c3072, %c0_247] : memref<3136x512xbf16, #tpu.memory_space<vmem>>, vector<64x512xbf16>
    %cst_248 = arith.constant dense<0.000000e+00> : vector<1x512xf32>
    %349 = tpu.matmul %347, %348, %cst_248 {dimension_numbers = #tpu.dot_dimension_numbers<[1], [0], [0], [1], [0, 0, 1, 1], [], []>} : vector<1x64xbf16>, vector<64x512xbf16>, vector<1x512xf32> -> vector<1x512xf32>
    %350 = arith.addf %345, %349 : vector<1x512xf32>
    %c0_249 = arith.constant 0 : index
    %c0_250 = arith.constant 0 : index
    %351 = vector.load %arg9[%c0_249, %c0_250] : memref<1x512xf32, #tpu.memory_space<vmem>>, vector<1x512xf32>
    %352 = arith.addf %350, %351 : vector<1x512xf32>
    %cst_251 = arith.constant 0.000000e+00 : f32
    %353 = vector.broadcast %cst_251 : f32 to vector<1x512xf32>
    %354 = arith.maximumf %352, %353 : vector<1x512xf32>
    %355 = arith.truncf %354 : vector<1x512xf32> to vector<1x512xbf16>
    %c0_252 = arith.constant 0 : index
    %c0_253 = arith.constant 0 : index
    %356 = vector.load %arg10[%c0_252, %c0_253] : memref<512x128xbf16, #tpu.memory_space<vmem>>, vector<512x128xbf16>
    %cst_254 = arith.constant dense<0.000000e+00> : vector<1x128xf32>
    %357 = tpu.matmul %355, %356, %cst_254 {dimension_numbers = #tpu.dot_dimension_numbers<[1], [0], [0], [1], [0, 0, 1, 1], [], []>} : vector<1x512xbf16>, vector<512x128xbf16>, vector<1x128xf32> -> vector<1x128xf32>
    %c0_255 = arith.constant 0 : index
    %c0_256 = arith.constant 0 : index
    %358 = vector.load %arg11[%c0_255, %c0_256] : memref<1x128xf32, #tpu.memory_space<vmem>>, vector<1x128xf32>
    %359 = arith.addf %357, %358 : vector<1x128xf32>
    %360 = vector.shape_cast %359 : vector<1x128xf32> to vector<1x1x128xf32>
    %c0_257 = arith.constant 0 : index
    %c0_258 = arith.constant 0 : index
    %c0_259 = arith.constant 0 : index
    %361 = vector.load %arg12[%c0_257, %c0_258, %c0_259] : memref<1x1x128xf32, #tpu.memory_space<vmem>>, vector<1x1x128xf32>
    tpu.vector_store %arg12[%c0_257, %c0_258, %c0_259], %360 {strides = array<i32>} : memref<1x1x128xf32, #tpu.memory_space<vmem>>, vector<1x1x128xf32>,
    return
  }
  func.func @transform_0(%arg0: i32) -> (i32, i32, i32) {
    %c0_i32 = arith.constant 0 : i32
    %c0_i32_0 = arith.constant 0 : i32
    %c0_i32_1 = arith.constant 0 : i32
    return %arg0, %c0_i32, %c0_i32_0 : i32, i32, i32
  }
  func.func @transform_1(%arg0: i32) -> (i32, i32) {
    %c0_i32 = arith.constant 0 : i32
    %c0_i32_0 = arith.constant 0 : i32
    %c0_i32_1 = arith.constant 0 : i32
    return %c0_i32, %c0_i32_0 : i32, i32
  }
  func.func @transform_2(%arg0: i32) -> (i32, i32) {
    %c0_i32 = arith.constant 0 : i32
    %c0_i32_0 = arith.constant 0 : i32
    %c0_i32_1 = arith.constant 0 : i32
    return %c0_i32, %c0_i32_0 : i32, i32
  }
  func.func @transform_3(%arg0: i32) -> (i32, i32, i32) {
    %c0_i32 = arith.constant 0 : i32
    %c0_i32_0 = arith.constant 0 : i32
    %c0_i32_1 = arith.constant 0 : i32
    %c0_i32_2 = arith.constant 0 : i32
    return %c0_i32, %c0_i32_0, %c0_i32_1 : i32, i32, i32
  }
  func.func @transform_4(%arg0: i32) -> (i32, i32) {
    %c0_i32 = arith.constant 0 : i32
    %c0_i32_0 = arith.constant 0 : i32
    %c0_i32_1 = arith.constant 0 : i32
    return %c0_i32, %c0_i32_0 : i32, i32
  }
  func.func @transform_5(%arg0: i32) -> (i32, i32, i32) {
    %c0_i32 = arith.constant 0 : i32
    %c0_i32_0 = arith.constant 0 : i32
    %c0_i32_1 = arith.constant 0 : i32
    %c0_i32_2 = arith.constant 0 : i32
    return %c0_i32, %c0_i32_0, %c0_i32_1 : i32, i32, i32
  }
  func.func @transform_6(%arg0: i32) -> (i32, i32) {
    %c0_i32 = arith.constant 0 : i32
    %c0_i32_0 = arith.constant 0 : i32
    %c0_i32_1 = arith.constant 0 : i32
    return %c0_i32, %c0_i32_0 : i32, i32
  }
  func.func @transform_7(%arg0: i32) -> (i32, i32) {
    %c0_i32 = arith.constant 0 : i32
    %c0_i32_0 = arith.constant 0 : i32
    %c0_i32_1 = arith.constant 0 : i32
    return %c0_i32, %c0_i32_0 : i32, i32
  }
  func.func @transform_8(%arg0: i32) -> (i32, i32) {
    %c0_i32 = arith.constant 0 : i32
    %c0_i32_0 = arith.constant 0 : i32
    %c0_i32_1 = arith.constant 0 : i32
    return %c0_i32, %c0_i32_0 : i32, i32
  }
  func.func @transform_9(%arg0: i32) -> (i32, i32) {
    %c0_i32 = arith.constant 0 : i32
    %c0_i32_0 = arith.constant 0 : i32
    %c0_i32_1 = arith.constant 0 : i32
    return %c0_i32, %c0_i32_0 : i32, i32
  }
  func.func @transform_10(%arg0: i32) -> (i32, i32) {
    %c0_i32 = arith.constant 0 : i32
    %c0_i32_0 = arith.constant 0 : i32
    %c0_i32_1 = arith.constant 0 : i32
    return %c0_i32, %c0_i32_0 : i32, i32
  }
  func.func @transform_11(%arg0: i32) -> (i32, i32, i32) {
    %c0_i32 = arith.constant 0 : i32
    %c0_i32_0 = arith.constant 0 : i32
    %c0_i32_1 = arith.constant 0 : i32
    return %arg0, %c0_i32, %c0_i32_0 : i32, i32, i32
  }
}

</mosaic_0001>

<bundles_post_ra>
// kernel: _dqn_forward_padded.1
= control target key start
LH: loop header
LB: loop body
LE: loop exit
PB: predicated region body
PF: predicated region fallthrough
CT: control target
= control target key end

     0   :  { %s21469_s0 = inlined_call_operand.vmem [shape: bf16[2,100,1024], index: 0, kind: input, shape index: {}]   ;;  %s21470_s1 = inlined_call_operand.vmem [shape: bf16[1024,128], index: 1, kind: input, shape index: {}]   ;;  %s21471_s2 = inlined_call_operand.vmem [shape: f32[1,128], index: 2, kind: input, shape index: {}]   ;;  %s21472_s3 = inlined_call_operand.vmem [shape: bf16[4,128,64], index: 3, kind: input, shape index: {}]   ;;  %s21473_s4 = inlined_call_operand.vmem [shape: f32[1,64], index: 4, kind: input, shape index: {}]   ;;  %s21474_s5 = inlined_call_operand.vmem [shape: bf16[9,64,64], index: 5, kind: input, shape index: {}]   ;;  %s21475_s6 = inlined_call_operand.vmem [shape: f32[1,64], index: 6, kind: input, shape index: {}]   ;;  %s21476_s7 = inlined_call_operand.vmem [shape: bf16[3136,512], index: 7, kind: input, shape index: {}]   ;;  %s21477_s8 = inlined_call_operand.vmem [shape: f32[1,512], index: 8, kind: input, shape index: {}]   ;;  %s21478_s9 = inlined_call_operand.vmem [shape: bf16[512,128], index: 9, kind: input, shape index: {}]   ;;  %s21479_s10 = inlined_call_operand.vmem [shape: f32[1,128], index: 10, kind: input, shape index: {}]   ;;  %s21480_s11 = inlined_call_operand.hbm [shape: f32[2,1,128], index: 11, kind: output, shape index: {}]  }
   0x1   :  { %21484 = sst [smem:[#allocation14_spill]] %s21469_s0 }
   0x2   :  { %16 = vsyncpa [#allocation6], 0 }
   0x3   :  { %18 = vsyncpa [#allocation6 + $0x1], 0  ;;  %s17311_s17 = smov 0   ;;  %s17313_s18 = smov 0  }
   0x4   :  { %s17315_s19 = smov 0   ;;  %s17317_s20 = smov 0  }
   0x5 LB: > { %s17332_s21 = sadd.s32 4294967295, %s17244_s20   ;;  %s13568_s22 = sadd.s32 4294967294, %s17244_s20   ;;  %s17244_s20 = sphi %s17317_s20, %s21505_s20   ;;  %s17240_s19 = sphi %s17315_s19, %s21504_s19   ;;  %s17236_s18 = sphi %s17313_s18, %s21503_s18   ;;  %s17232_s17 = sphi %s17311_s17, %s21502_s17  }
   0x6   : > { %s17336_s23 = sadd.s32 1, %s17244_s20   ;;  %s267_s24 = sadd.s32 1, %s17240_s19 }
   0x7   : > { %s264_s25 = ssub.s32 %s17244_s20, %s17336_s23  ;;  %p277_p0 = scmp.ne.s32.totalorder %s17240_s19, %s17236_s18 }
   0x8   : > { %p265_p1 = scmp.eq.s32.totalorder %s264_s25, 0  ;;  %p278_p2 = scmp.eq.s32.totalorder %s17332_s21, 1 }
   0x9   : > { %p283_p3 = scmp.ne.s32.totalorder %s17236_s18, %s17232_s17  ;;  %p284_p4 = scmp.eq.s32.totalorder %s13568_s22, 1 }
   0xa   : > { %s17347_s26 = scalar_select %p265_p1, %s17240_s19, %s267_s24  }
   0xb   : > { %p17349_p5 = por %p278_p2, %p277_p0  ;;  %p17353_p6 = por %p284_p4, %p283_p3 }
   0xc   : > { %21485 = sst [smem:[#allocation8_spill]] %s17347_s26  ;;  %p13571_p7 = scmp.ge.s32.totalorder %s17244_s20, 1 }
   0xd   : > { %p340_p8 = scmp.lt.s32.totalorder %s17244_s20, 3 }
   0xf   : > { %p341_p9 = pnand %p13571_p7, %p340_p8 }
  0x11   : > { %344 = sbr.rel (%p341_p9) target bundleno = 2271 (0x8df), region = 64 }
  0x16   : > { %s21481_s29 = sand.u32 1, %s17236_s18   ;;  %p379_p10 = scmp.lt.s32.totalorder %s17332_s21, 1 }
  0x17   : > { %s21488_s0 = sld [smem:[#allocation14_spill]]  ;;  %s17369_s16 = scalar_lea.vmem [#allocation5], %s21481_s29 }
  0x18   : > { %s380_s30 = scalar_select %p379_p10, %s17332_s21, 1 }
  0x19   : > { %p13573_p11 = scmp.ne.s32.totalorder %s17332_s21, 0 }
  0x1a   : > { %s15792_s12 = smul.u32 416, %s380_s30 }
  0x1b   : > { %388 = sbr.rel (%p13573_p11) target bundleno = 36 (0x24), region = 68 }
  0x1d   : > { %s17365_s15 = scalar_lea.vmem %s21488_s0, %s15792_s12 }
  0x20   : > { %vm391_vm0 = vcmask 523264   ;;  %v17246_v0 = vmov 0.0  }
  0x21   : > { %389 = vst [vmem:[#allocation2 + $0x64] sm:$0xff] %v17246_v0  ;;  %390 = vst [vmem:[#allocation2 + $0x6c] sm:$0xf] %v17246_v0 }
  0x22   : > { %392 = vst.msk [vmem:[#allocation3 + $0x64] sm:$0xff] %vm391_vm0, %v17246_v0  ;;  %393 = vst.msk [vmem:[#allocation3 + $0x6c] sm:$0xff] %vm391_vm0, %v17246_v0 }
  0x23   : > { %394 = vst.msk [vmem:[#allocation3 + $0x74] sm:$0xff] %vm391_vm0, %v17246_v0 }
  0x24 PF: > { %v15836_v1 = vld [vmem:[%s21470_s1 + $0x78] sm:$0xff]   ;;  %v15840_v5 = vld [vmem:[%s21470_s1 + $0x70] sm:$0xff]   ;;  %v15844_v9 = vld [vmem:[%s21470_s1 + $0x68] sm:$0xff]   ;;  %vm17248_vm1 = vmmov 0   ;;  %vm2364_vm2 = vcmask 523264   ;;  %vm2377_vm3 = vcmask 519168  }
  0x25   : > { %v15837_v2 = vld [vmem:[%s21470_s1 + $0xf8] sm:$0xff]   ;;  %14857 = vmatprep.subr.bf16.mxu0 %v15836_v1  ;;  %v15841_v6 = vld [vmem:[%s21470_s1 + $0xf0] sm:$0xff]   ;;  %v15845_v10 = vld [vmem:[%s21470_s1 + $0xe8] sm:$0xff]   ;;  %s14854_s12 = sshll.u32 %s17332_s21, 4  ;;  %s13513_s13 = sshll.u32 %s17369_s16, 4  ;;  %s13514_s13 = int_to_ptr.vmem [resolvable:$true] %s13513_s13 }
  0x26   : > { %v15838_v3 = vld [vmem:[%s21470_s1 + $0x38] sm:$0xff]   ;;  %14915 = vmatprep.subr.bf16.mxu1 %v15837_v2  ;;  %v15842_v7 = vld [vmem:[%s21470_s1 + $0x30] sm:$0xff]   ;;  %v15846_v11 = vld [vmem:[%s21470_s1 + $0x28] sm:$0xff]   ;;  %s21431_s0 = scalar_lea.hbm %s21480_s11, %s14854_s12  ;;  %s21500_s26 = sand.u32 1, %s17236_s18  }
  0x27   : > { %v15839_v4 = vld [vmem:[%s21470_s1 + $0xb8] sm:$0xff]   ;;  %14858 = vmatpush3.bf16.msra.mxu0 %v15838_v3  ;;  %v15843_v8 = vld [vmem:[%s21470_s1 + $0xb0] sm:$0xff]   ;;  %v15847_v12 = vld [vmem:[%s21470_s1 + $0xa8] sm:$0xff]   ;;  %s13501_s22 = scalar_lea.sflag [#allocation6], %s21500_s26  ;;  %s17250_s21 = smov [#allocation5]  }
  0x28   : > { %14916 = vmatpush3.bf16.msra.mxu1 %v15839_v4  ;;  %14859 = vmatprep.subr.bf16.mxu0 %v15840_v5  ;;  %v15848_v13 = vld [vmem:[%s21470_s1 + $0x60] sm:$0xff]   ;;  %v15852_v17 = vld [vmem:[%s21470_s1 + $0x58] sm:$0xff]   ;;  %v15856_v21 = vld [vmem:[%s21470_s1 + $0x50] sm:$0xff]   ;;  %s17188_s24 = sshll.u32 %s17250_s21, 4  ;;  %s17189_s24 = int_to_ptr.vmem [resolvable:$false] %s17188_s24 }
  0x29   : > { %14917 = vmatprep.subr.bf16.mxu1 %v15841_v6  ;;  %v15849_v14 = vld [vmem:[%s21470_s1 + $0xe0] sm:$0xff]   ;;  %v15853_v18 = vld [vmem:[%s21470_s1 + $0xd8] sm:$0xff]   ;;  %v15857_v22 = vld [vmem:[%s21470_s1 + $0xd0] sm:$0xff]   ;;  %s17190_s25 = scalar_lea.vmem %s17189_s24, 32  ;;  %p17191_p1 = scmp.lt.s32.totalorder %s13514_s13, %s17189_s24 }
  0x2a   : > { %v15850_v15 = vld [vmem:[%s21470_s1 + $0x20] sm:$0xff]   ;;  %v15854_v19 = vld [vmem:[%s21470_s1 + $0x18] sm:$0xff]   ;;  %v15858_v23 = vld [vmem:[%s21470_s1 + $0x10] sm:$0xff]  }
  0x2b   : > { %14860 = vmatpush3.bf16.msra.mxu0 %v15842_v7  ;;  %v15851_v16 = vld [vmem:[%s21470_s1 + $0xa0] sm:$0xff]   ;;  %v15855_v20 = vld [vmem:[%s21470_s1 + $0x98] sm:$0xff]   ;;  %v15859_v24 = vld [vmem:[%s21470_s1 + $0x90] sm:$0xff]  }
  0x2c   : > { %14918 = vmatpush3.bf16.msra.mxu1 %v15843_v8  ;;  %14861 = vmatprep.subr.bf16.mxu0 %v15844_v9  ;;  %v15860_v25 = vld [vmem:[%s21470_s1 + $0x48] sm:$0xff]   ;;  %v15864_v29 = vld [vmem:[%s21470_s1 + $0x40] sm:$0xff]   ;;  %v15868_v41 = vld [vmem:[%s21470_s1 + $0x178] sm:$0xff]  }
  0x2d   : > { %14919 = vmatprep.subr.bf16.mxu1 %v15845_v10  ;;  %v15861_v26 = vld [vmem:[%s21470_s1 + $0xc8] sm:$0xff]   ;;  %v15865_v30 = vld [vmem:[%s21470_s1 + $0xc0] sm:$0xff]   ;;  %v15869_v42 = vld [vmem:[%s21470_s1 + $0x138] sm:$0xff]  }
  0x2e   : > { %v15862_v27 = vld [vmem:[%s21470_s1 + $0x8] sm:$0xff]   ;;  %v15866_v31 = vld [vmem:[%s21470_s1] sm:$0xff]   ;;  %v15870_v43 = vld [vmem:[%s21470_s1 + $0x1f8] sm:$0xff]  }
  0x2f   : > { %14862 = vmatpush3.bf16.msra.mxu0 %v15846_v11  ;;  %v15863_v28 = vld [vmem:[%s21470_s1 + $0x88] sm:$0xff]   ;;  %v15867_v32 = vld [vmem:[%s21470_s1 + $0x80] sm:$0xff]   ;;  %v15871_v44 = vld [vmem:[%s21470_s1 + $0x1b8] sm:$0xff]  }
  0x30   : > { %14920 = vmatpush3.bf16.msra.mxu1 %v15847_v12  ;;  %14863 = vmatprep.subr.bf16.mxu0 %v15848_v13  ;;  %v397_v33 = vld [vmem:[%s17365_s15] sm:$0xff]  ;;  %v398_v35 = vld [vmem:[%s17365_s15 + $0x8] sm:$0xff]  ;;  %v15872_v51 = vld [vmem:[%s21470_s1 + $0x170] sm:$0xff]  }
  0x31   : > { %14921 = vmatprep.subr.bf16.mxu1 %v15849_v14  ;;  %v401_v34 = vld [vmem:[%s17365_s15 + $0x20] sm:$0xff]  ;;  %v402_v38 = vld [vmem:[%s17365_s15 + $0x28] sm:$0xff]  ;;  %v15873_v53 = vld [vmem:[%s21470_s1 + $0x130] sm:$0xff]  }
  0x32   : > { %v13575_v36 = vcombine.low %v397_v33, %v401_v34  ;;  %v13576_v37 = vcombine.high %v397_v33, %v401_v34  ;;  %v13577_v39 = vcombine.low %v398_v35, %v402_v38  ;;  %v13578_v40 = vcombine.high %v398_v35, %v402_v38  ;;  %v405_v45 = vld [vmem:[%s17365_s15 + $0x40] sm:$0xff]  ;;  %v406_v48 = vld [vmem:[%s17365_s15 + $0x48] sm:$0xff]  ;;  %v15874_v55 = vld [vmem:[%s21470_s1 + $0x1f0] sm:$0xff]  }
  0x33   : > { %14864 = vmatpush3.bf16.msra.mxu0 %v15850_v15  ;;  %v409_v46 = vld [vmem:[%s17365_s15 + $0x60] sm:$0xff]  ;;  %v410_v49 = vld [vmem:[%s17365_s15 + $0x68] sm:$0xff]  ;;  %v15875_v56 = vld [vmem:[%s21470_s1 + $0x1b0] sm:$0xff]  }
  0x34   : > { %14922 = vmatpush3.bf16.msra.mxu1 %v15851_v16  ;;  %14865 = vmatprep.subr.bf16.mxu0 %v15852_v17  ;;  %v13584_v47 = vcombine.high %v405_v45, %v409_v46  ;;  %v13586_v50 = vcombine.high %v406_v48, %v410_v49  ;;  %v13583_v52 = vcombine.low %v405_v45, %v409_v46  ;;  %v15876_v57 = vld [vmem:[%s21470_s1 + $0x168] sm:$0xff]   ;;  %v413_v58 = vld [vmem:[%s17365_s15 + $0x80] sm:$0xff]  ;;  %v15884_v15 = vld [vmem:[%s21470_s1 + $0x158] sm:$0xff]  }
  0x35   : > { %14923 = vmatprep.subr.bf16.mxu1 %v15853_v18  ;;  %1268 = vmatprep.mubr.bf16.mxu0 %v13576_v37  ;;  %v13585_v54 = vcombine.low %v406_v48, %v410_v49  ;;  %v417_v59 = vld [vmem:[%s17365_s15 + $0xa0] sm:$0xff]  ;;  %v414_v60 = vld [vmem:[%s17365_s15 + $0x88] sm:$0xff]  ;;  %v15885_v16 = vld [vmem:[%s21470_s1 + $0x118] sm:$0xff]  }
  0x36   : > { %1356 = vmatprep.mubr.bf16.mxu1 %v13578_v40  ;;  %v418_v61 = vld [vmem:[%s17365_s15 + $0xa8] sm:$0xff]  ;;  %v13592_v62 = vcombine.high %v413_v58, %v417_v59  ;;  %v13591_v3 = vcombine.low %v413_v58, %v417_v59  ;;  %v15880_v4 = vld [vmem:[%s21470_s1 + $0x160] sm:$0xff]   ;;  %v15886_v18 = vld [vmem:[%s21470_s1 + $0x1d8] sm:$0xff]  }
  0x37   : > { %14866 = vmatpush3.bf16.msra.mxu0 %v15854_v19  ;;  %v13594_v63 = vcombine.high %v414_v60, %v418_v61  ;;  %v15877_v0 = vld [vmem:[%s21470_s1 + $0x128] sm:$0xff]   ;;  %v13593_v5 = vcombine.low %v414_v60, %v418_v61  ;;  %v15881_v6 = vld [vmem:[%s21470_s1 + $0x120] sm:$0xff]   ;;  %v407_v61 = vld [vmem:[%s17365_s15 + $0x50] sm:$0xff] }
  0x38   : > { %14924 = vmatpush3.bf16.msra.mxu1 %v15855_v20  ;;  %14867 = vmatprep.subr.bf16.mxu0 %v15856_v21  ;;  %v15878_v1 = vld [vmem:[%s21470_s1 + $0x1e8] sm:$0xff]   ;;  %v421_v7 = vld [vmem:[%s17365_s15 + $0xc0] sm:$0xff] }
  0x39   : > { %14925 = vmatprep.subr.bf16.mxu1 %v15857_v22  ;;  %v15879_v2 = vld [vmem:[%s21470_s1 + $0x1a8] sm:$0xff]   ;;  %v425_v8 = vld [vmem:[%s17365_s15 + $0xe0] sm:$0xff] }
  0x3a   : > { %v422_v9 = vld [vmem:[%s17365_s15 + $0xc8] sm:$0xff]  ;;  %v13600_v10 = vcombine.high %v421_v7, %v425_v8  ;;  %v15882_v13 = vld [vmem:[%s21470_s1 + $0x1e0] sm:$0xff]   ;;  %v13599_v17 = vcombine.low %v421_v7, %v425_v8  ;;  %v416_v7 = vld [vmem:[%s17365_s15 + $0x98] sm:$0xff] }
  0x3b   : > { %14868 = vmatpush3.bf16.msra.mxu0 %v15858_v23  ;;  %v426_v11 = vld [vmem:[%s17365_s15 + $0xe8] sm:$0xff]  ;;  %v15883_v14 = vld [vmem:[%s21470_s1 + $0x1a0] sm:$0xff]   ;;  %v420_v8 = vld [vmem:[%s17365_s15 + $0xb8] sm:$0xff] }
  0x3c   : > { %14926 = vmatpush3.bf16.msra.mxu1 %v15859_v24  ;;  %14869 = vmatprep.subr.bf16.mxu0 %v15860_v25  ;;  %v13602_v12 = vcombine.high %v422_v9, %v426_v11  ;;  %v429_v19 = vld [vmem:[%s17365_s15 + $0x100] sm:$0xff]  ;;  %v13601_v21 = vcombine.low %v422_v9, %v426_v11  ;;  %v430_v23 = vld [vmem:[%s17365_s15 + $0x108] sm:$0xff] }
  0x3d   : > { %14927 = vmatprep.subr.bf16.mxu1 %v15861_v26  ;;  %v433_v20 = vld [vmem:[%s17365_s15 + $0x120] sm:$0xff]  ;;  %v434_v24 = vld [vmem:[%s17365_s15 + $0x128] sm:$0xff]  ;;  %v15887_v26 = vld [vmem:[%s21470_s1 + $0x198] sm:$0xff]  }
  0x3e   : > { %v13608_v22 = vcombine.high %v429_v19, %v433_v20  ;;  %v13610_v25 = vcombine.high %v430_v23, %v434_v24  ;;  %v438_v33 = vld [vmem:[%s17365_s15 + $0x148] sm:$0xff]  ;;  %v13607_v35 = vcombine.low %v429_v19, %v433_v20  ;;  %v13609_v37 = vcombine.low %v430_v23, %v434_v24  ;;  %v15900_v45 = vld [vmem:[%s21470_s1 + $0x140] sm:$0xff]   ;;  %v432_v23 = vld [vmem:[%s17365_s15 + $0x118] sm:$0xff] }
  0x3f   : > { %14870 = vmatpush3.bf16.msra.mxu0 %v15862_v27  ;;  %v15888_v27 = vld [vmem:[%s21470_s1 + $0x150] sm:$0xff]   ;;  %v442_v34 = vld [vmem:[%s17365_s15 + $0x168] sm:$0xff]  ;;  %v15901_v46 = vld [vmem:[%s21470_s1 + $0x100] sm:$0xff]  }
  0x40   : > { %14928 = vmatpush3.bf16.msra.mxu1 %v15863_v28  ;;  %14871 = vmatprep.subr.bf16.mxu0 %v15864_v29  ;;  %v15889_v28 = vld [vmem:[%s21470_s1 + $0x110] sm:$0xff]   ;;  %v13618_v40 = vcombine.high %v438_v33, %v442_v34  ;;  %v15903_v49 = vld [vmem:[%s21470_s1 + $0x180] sm:$0xff]   ;;  %v436_v24 = vld [vmem:[%s17365_s15 + $0x138] sm:$0xff] }
  0x41   : > { %14929 = vmatprep.subr.bf16.mxu1 %v15865_v30  ;;  %v15890_v29 = vld [vmem:[%s21470_s1 + $0x1d0] sm:$0xff]  }
  0x42   : > { %v15891_v30 = vld [vmem:[%s21470_s1 + $0x190] sm:$0xff]  }
  0x43   : > { %14872 = vmatpush3.bf16.msra.mxu0 %v15866_v31  ;;  %v437_v31 = vld [vmem:[%s17365_s15 + $0x140] sm:$0xff] }
  0x44   : > { %14930 = vmatpush3.bf16.msra.mxu1 %v15867_v32  ;;  %14973 = vmatprep.subr.bf16.mxu0 %v15868_v41  ;;  %v441_v32 = vld [vmem:[%s17365_s15 + $0x160] sm:$0xff]  ;;  %v15894_v41 = vld [vmem:[%s21470_s1 + $0x1c8] sm:$0xff]  }
  0x45   : > { %15031 = vmatprep.subr.bf16.mxu1 %v15870_v43  ;;  %v13616_v38 = vcombine.high %v437_v31, %v441_v32  ;;  %v445_v43 = vld [vmem:[%s17365_s15 + $0x180] sm:$0x33]  ;;  %v13615_v48 = vcombine.low %v437_v31, %v441_v32  ;;  %v440_v31 = vld [vmem:[%s17365_s15 + $0x158] sm:$0xff] }
  0x46   : > { %1269 = vmatmul.mubr.bf16.vlgmr.msra.gmra.mxu0 %v13575_v36  ;;  %v15892_v36 = vld [vmem:[%s21470_s1 + $0x148] sm:$0xff]   ;;  %v444_v32 = vld [vmem:[%s17365_s15 + $0x178] sm:$0xff] }
  0x47   : > { %1357 = vmatmul.mubr.bf16.vlgmr.msra.gmra.mxu1 %v13577_v39  ;;  %14974 = vmatpush3.bf16.msra.mxu0 %v15869_v42  ;;  %v15893_v39 = vld [vmem:[%s21470_s1 + $0x108] sm:$0xff]  }
  0x48   : > { %15032 = vmatpush3.bf16.msra.mxu1 %v15871_v44  ;;  %1276 = vmatprep.mubr.bf16.mxu0 %v13584_v47  ;;  %v15895_v42 = vld [vmem:[%s21470_s1 + $0x188] sm:$0xff]   ;;  %v15902_v47 = vld [vmem:[%s21470_s1 + $0x1c0] sm:$0xff]  }
  0x49   : > { %1364 = vmatprep.mubr.bf16.mxu1 %v13586_v50  ;;  %14975 = vmatprep.subr.bf16.mxu0 %v15872_v51  ;;  %v446_v44 = vld [vmem:[%s17365_s15 + $0x188] sm:$0x33]  ;;  %v13617_v50 = vcombine.low %v438_v33, %v442_v34  ;;  %v13624_v51 = vcombine.high %v445_v43, %v445_v43  ;;  %v13613_v34 = vcombine.low %v432_v23, %v436_v24 }
  0x4a   : > { %15033 = vmatprep.subr.bf16.mxu1 %v15874_v55  ;;  %v400_v55 = vld [vmem:[%s17365_s15 + $0x18] sm:$0xff]  ;;  %v13625_v58 = vcombine.low %v446_v44, %v446_v44 }
  0x4b   : > { %14976 = vmatpush3.bf16.msra.mxu0 %v15873_v53  ;;  %v399_v53 = vld [vmem:[%s17365_s15 + $0x10] sm:$0xff] }
  0x4c   : > { %15034 = vmatpush3.bf16.msra.mxu1 %v15875_v56  ;;  %14977 = vmatprep.subr.bf16.mxu0 %v15876_v57  ;;  %v404_v56 = vld [vmem:[%s17365_s15 + $0x38] sm:$0xff]  ;;  %v13623_v57 = vcombine.low %v445_v43, %v445_v43  ;;  %v21482_v43 = vmov 0.0  }
  0x4d   : > { %15035 = vmatprep.subr.bf16.mxu1 %v15878_v1  ;;  %v13582_v60 = vcombine.high %v400_v55, %v404_v56 }
  0x4e   : > { %1277 = vmatmul.mubr.bf16.gmra.mxu0 %v13583_v52  ;;  %v13626_v52 = vcombine.high %v446_v44, %v446_v44  ;;  %v15908_v44 = vld [vmem:[%s21472_s3 + $0x78] sm:$0xff]  }
  0x4f   : > { %1365 = vmatmul.mubr.bf16.gmra.mxu1 %v13585_v54  ;;  %1284 = vmatprep.mubr.bf16.mxu0 %v13592_v62  ;;  %v403_v54 = vld [vmem:[%s17365_s15 + $0x30] sm:$0xff] }
  0x50   : > { %1372 = vmatprep.mubr.bf16.mxu1 %v13594_v63  ;;  %14978 = vmatpush3.bf16.msra.mxu0 %v15877_v0  ;;  %v13580_v59 = vcombine.high %v399_v53, %v403_v54  ;;  %v411_v62 = vld [vmem:[%s17365_s15 + $0x70] sm:$0xff]  ;;  %v408_v63 = vld [vmem:[%s17365_s15 + $0x58] sm:$0xff]  ;;  %v13579_v1 = vcombine.low %v399_v53, %v403_v54  ;;  %v15914_v53 = vld [vmem:[%s21472_s3 + $0x60] sm:$0xff]  }
  0x51   : > { %15036 = vmatpush3.bf16.msra.mxu1 %v15879_v2  ;;  %14979 = vmatprep.subr.bf16.mxu0 %v15880_v4  ;;  %v412_v0 = vld [vmem:[%s17365_s15 + $0x78] sm:$0xff]  ;;  %v13581_v2 = vcombine.low %v400_v55, %v404_v56  ;;  %v13587_v9 = vcombine.low %v407_v61, %v411_v62  ;;  %v15919_v55 = vld [vmem:[%s21472_s3 + $0x10] sm:$0xff]   ;;  %v15921_v56 = vld [vmem:[%s21472_s3 + $0x8] sm:$0xff]  }
  0x52   : > { %15037 = vmatprep.subr.bf16.mxu1 %v15882_v13  ;;  %v13590_v4 = vcombine.high %v408_v63, %v412_v0  ;;  %v423_v13 = vld [vmem:[%s17365_s15 + $0xd0] sm:$0xff]  ;;  %v15917_v54 = vld [vmem:[%s21472_s3 + $0x18] sm:$0xff]  }
  0x54   : > { %14980 = vmatpush3.bf16.msra.mxu0 %v15881_v6  ;;  %v419_v6 = vld [vmem:[%s17365_s15 + $0xb0] sm:$0xff] }
  0x55   : > { %15038 = vmatpush3.bf16.msra.mxu1 %v15883_v14  ;;  %14981 = vmatprep.subr.bf16.mxu0 %v15884_v15  ;;  %v427_v14 = vld [vmem:[%s17365_s15 + $0xf0] sm:$0xff]  ;;  %v424_v15 = vld [vmem:[%s17365_s15 + $0xd8] sm:$0xff] }
  0x56   : > { %1285 = vmatmul.mubr.bf16.gmra.mxu0 %v13591_v3  ;;  %15039 = vmatprep.subr.bf16.mxu1 %v15886_v18  ;;  %v13588_v3 = vcombine.high %v407_v61, %v411_v62  ;;  %v13597_v18 = vcombine.low %v416_v7, %v420_v8  ;;  %v13604_v19 = vcombine.high %v423_v13, %v427_v14  ;;  %v15923_v61 = vld [vmem:[%s21472_s3 + $0x40] sm:$0xff]  }
  0x57   : > { %1373 = vmatmul.mubr.bf16.gmra.mxu1 %v13593_v5  ;;  %1292 = vmatprep.mubr.bf16.mxu0 %v13600_v10  ;;  %v415_v5 = vld [vmem:[%s17365_s15 + $0x90] sm:$0xff]  ;;  %v13589_v10 = vcombine.low %v408_v63, %v412_v0 }
  0x58   : > { %1380 = vmatprep.mubr.bf16.mxu1 %v13602_v12  ;;  %14982 = vmatpush3.bf16.msra.mxu0 %v15885_v16  ;;  %v13596_v11 = vcombine.high %v415_v5, %v419_v6  ;;  %v13598_v12 = vcombine.high %v416_v7, %v420_v8  ;;  %v428_v16 = vld [vmem:[%s17365_s15 + $0xf8] sm:$0xff] }
  0x59   : > { %15040 = vmatpush3.bf16.msra.mxu1 %v15887_v26  ;;  %14983 = vmatprep.subr.bf16.mxu0 %v15888_v27  ;;  %v13606_v20 = vcombine.high %v424_v15, %v428_v16  ;;  %v13605_v26 = vcombine.low %v424_v15, %v428_v16 }
  0x5a   : > { %15041 = vmatprep.subr.bf16.mxu1 %v15890_v29  ;;  %v439_v29 = vld [vmem:[%s17365_s15 + $0x150] sm:$0xff] }
  0x5c   : > { %14984 = vmatpush3.bf16.msra.mxu0 %v15889_v28  ;;  %v13614_v28 = vcombine.high %v432_v23, %v436_v24 }
  0x5d   : > { %15042 = vmatpush3.bf16.msra.mxu1 %v15891_v30  ;;  %14985 = vmatprep.subr.bf16.mxu0 %v15892_v36  ;;  %v443_v30 = vld [vmem:[%s17365_s15 + $0x170] sm:$0xff]  ;;  %v13622_v36 = vcombine.high %v440_v31, %v444_v32 }
  0x5e   : > { %1293 = vmatmul.mubr.bf16.gmra.mxu0 %v13599_v17  ;;  %15043 = vmatprep.subr.bf16.mxu1 %v15894_v41  ;;  %v13595_v17 = vcombine.low %v415_v5, %v419_v6 }
  0x5f   : > { %1381 = vmatmul.mubr.bf16.gmra.mxu1 %v13601_v21  ;;  %1300 = vmatprep.mubr.bf16.mxu0 %v13608_v22  ;;  %v431_v21 = vld [vmem:[%s17365_s15 + $0x110] sm:$0xff] }
  0x60   : > { %1388 = vmatprep.mubr.bf16.mxu1 %v13610_v25  ;;  %14986 = vmatpush3.bf16.msra.mxu0 %v15893_v39  ;;  %v435_v22 = vld [vmem:[%s17365_s15 + $0x130] sm:$0xff]  ;;  %v13603_v25 = vcombine.low %v423_v13, %v427_v14  ;;  %v13619_v39 = vcombine.low %v439_v29, %v443_v30 }
  0x61   : > { %15044 = vmatpush3.bf16.msra.mxu1 %v15895_v42  ;;  %14987 = vmatprep.subr.bf16.mxu0 %v15900_v45  ;;  %v13612_v27 = vcombine.high %v431_v21, %v435_v22  ;;  %v13611_v33 = vcombine.low %v431_v21, %v435_v22  ;;  %v15909_v45 = vld [vmem:[%s21472_s3 + $0x38] sm:$0xff]  }
  0x62   : > { %15045 = vmatprep.subr.bf16.mxu1 %v15902_v47 }
  0x64   : > { %14988 = vmatpush3.bf16.msra.mxu0 %v15901_v46 }
  0x65   : > { %15046 = vmatpush3.bf16.msra.mxu1 %v15903_v49  ;;  %15292 = vmatprep.subr.bf16.mxu0 %v21482_v43  ;;  %v15911_v49 = vld [vmem:[%s21472_s3 + $0x30] sm:$0xff]  }
  0x66   : > { %1301 = vmatmul.mubr.bf16.gmra.mxu0 %v13607_v35  ;;  %v13620_v35 = vcombine.high %v439_v29, %v443_v30  ;;  %15336 = vmatprep.subr.bf16.mxu1 %v21482_v43 }
  0x67   : > { %1389 = vmatmul.mubr.bf16.gmra.mxu1 %v13609_v37  ;;  %1308 = vmatprep.mubr.bf16.mxu0 %v13616_v38  ;;  %v447_v37 = vld [vmem:[%s17365_s15 + $0x190] sm:$0x33]  ;;  %v448_v38 = vld [vmem:[%s17365_s15 + $0x198] sm:$0x33]  ;;  %s17184_s15 = scalar_lea.vmem %s13514_s13, 16 }
  0x68   : > { %1396 = vmatprep.mubr.bf16.mxu1 %v13618_v40  ;;  %v13621_v40 = vcombine.low %v440_v31, %v444_v32  ;;  %v13628_v41 = vcombine.high %v447_v37, %v447_v37  ;;  %v13630_v42 = vcombine.high %v448_v38, %v448_v38  ;;  %v13627_v46 = vcombine.low %v447_v37, %v447_v37  ;;  %p17185_p12 = scmp.ne.s32.totalorder %s13514_s13, %s17184_s15  ;;  %p17192_p2 = scmp.lt.s32.totalorder %s17190_s25, %s17184_s15 }
  0x69   : > { %v13629_v47 = vcombine.low %v448_v38, %v448_v38 }
  0x6a   : > { %p17186_p13 = pnand %p17185_p12, %p17349_p5  ;;  %p17193_p3 = por %p17192_p2, %p17191_p1 }
  0x6c   : > { %p17187_p0 = pneg %p17186_p13 }
  0x6e   : > { %1309 = vmatmul.mubr.bf16.gmra.mxu0 %v13615_v48  ;;  %v15910_v48 = vld [vmem:[%s21472_s3 + $0x70] sm:$0xff]   ;;  %p17194_p4 = pnand %p17193_p3, %p17187_p0 }
  0x6f   : > { %1397 = vmatmul.mubr.bf16.gmra.mxu1 %v13617_v50  ;;  %1316 = vmatprep.mubr.bf16.mxu0 %v13624_v51  ;;  %v15912_v50 = vld [vmem:[%s21472_s3 + $0x68] sm:$0xff]  }
  0x70   : > { %1404 = vmatprep.mubr.bf16.mxu1 %v13626_v52  ;;  %v15913_v51 = vld [vmem:[%s21472_s3 + $0x28] sm:$0xff]   ;;  %v15915_v52 = vld [vmem:[%s21472_s3 + $0x20] sm:$0xff]  }
  0x76   : > { %1317 = vmatmul.mubr.bf16.gmra.mxu0 %v13623_v57  ;;  %v15916_v57 = vld [vmem:[%s21472_s3 + $0x58] sm:$0xff]  }
  0x77   : > { %1405 = vmatmul.mubr.bf16.gmra.mxu1 %v13625_v58  ;;  %1444 = vmatprep.mubr.bf16.mxu0 %v13580_v59  ;;  %v15922_v58 = vld [vmem:[%s21472_s3] sm:$0xff]   ;;  %v15918_v59 = vld [vmem:[%s21472_s3 + $0x50] sm:$0xff]  }
  0x78   : > { %1532 = vmatprep.mubr.bf16.mxu1 %v13582_v60  ;;  %v15920_v60 = vld [vmem:[%s21472_s3 + $0x48] sm:$0xff]  }
  0x7e   : > { %1445 = vmatmul.mubr.bf16.vlgmr.msra.gmra.mxu0 %v13579_v1 }
  0x7f   : > { %1533 = vmatmul.mubr.bf16.vlgmr.msra.gmra.mxu1 %v13581_v2  ;;  %1452 = vmatprep.mubr.bf16.mxu0 %v13588_v3 }
  0x80   : > { %1540 = vmatprep.mubr.bf16.mxu1 %v13590_v4  ;;  %15293 = vmatpush3.bf16.msra.mxu0 %v15908_v44 }
  0x81   : > { %15337 = vmatpush3.bf16.msra.mxu1 %v15909_v45  ;;  %15294 = vmatprep.subr.bf16.mxu0 %v21482_v43 }
  0x82   : > { %15338 = vmatprep.subr.bf16.mxu1 %v21482_v43 }
  0x84   : > { %15295 = vmatpush3.bf16.msra.mxu0 %v15910_v48 }
  0x85   : > { %15296 = vmatprep.subr.bf16.mxu0 %v21482_v43  ;;  %15339 = vmatpush3.bf16.msra.mxu1 %v15911_v49  ;;  %v17769_v49 = vld [vmem:[%s21471_s2] ss:$0 sm:$0xff] }
  0x86   : > { %1453 = vmatmul.mubr.bf16.gmra.mxu0 %v13587_v9  ;;  %15340 = vmatprep.subr.bf16.mxu1 %v21482_v43 }
  0x87   : > { %1541 = vmatmul.mubr.bf16.gmra.mxu1 %v13589_v10  ;;  %1460 = vmatprep.mubr.bf16.mxu0 %v13596_v11 }
  0x88   : > { %1548 = vmatprep.mubr.bf16.mxu1 %v13598_v12  ;;  %15297 = vmatpush3.bf16.msra.mxu0 %v15912_v50 }
  0x89   : > { %15298 = vmatprep.subr.bf16.mxu0 %v21482_v43  ;;  %15341 = vmatpush3.bf16.msra.mxu1 %v15913_v51 }
  0x8a   : > { %15342 = vmatprep.subr.bf16.mxu1 %v21482_v43 }
  0x8c   : > { %15299 = vmatpush3.bf16.msra.mxu0 %v15914_v53 }
  0x8d   : > { %15343 = vmatpush3.bf16.msra.mxu1 %v15915_v52  ;;  %15300 = vmatprep.subr.bf16.mxu0 %v21482_v43 }
  0x8e   : > { %1461 = vmatmul.mubr.bf16.gmra.mxu0 %v13595_v17  ;;  %15344 = vmatprep.subr.bf16.mxu1 %v21482_v43 }
  0x8f   : > { %1549 = vmatmul.mubr.bf16.gmra.mxu1 %v13597_v18  ;;  %1468 = vmatprep.mubr.bf16.mxu0 %v13604_v19 }
  0x90   : > { %1556 = vmatprep.mubr.bf16.mxu1 %v13606_v20  ;;  %15301 = vmatpush3.bf16.msra.mxu0 %v15916_v57 }
  0x91   : > { %15345 = vmatpush3.bf16.msra.mxu1 %v15917_v54  ;;  %15302 = vmatprep.subr.bf16.mxu0 %v21482_v43 }
  0x92   : > { %15346 = vmatprep.subr.bf16.mxu1 %v21482_v43 }
  0x94   : > { %15303 = vmatpush3.bf16.msra.mxu0 %v15918_v59 }
  0x95   : > { %15347 = vmatpush3.bf16.msra.mxu1 %v15919_v55  ;;  %15304 = vmatprep.subr.bf16.mxu0 %v21482_v43 }
  0x96   : > { %1469 = vmatmul.mubr.bf16.gmra.mxu0 %v13603_v25  ;;  %15348 = vmatprep.subr.bf16.mxu1 %v21482_v43 }
  0x97   : > { %1557 = vmatmul.mubr.bf16.gmra.mxu1 %v13605_v26  ;;  %1476 = vmatprep.mubr.bf16.mxu0 %v13612_v27 }
  0x98   : > { %1564 = vmatprep.mubr.bf16.mxu1 %v13614_v28  ;;  %15305 = vmatpush3.bf16.msra.mxu0 %v15920_v60 }
  0x99   : > { %15349 = vmatpush3.bf16.msra.mxu1 %v15921_v56  ;;  %15306 = vmatprep.subr.bf16.mxu0 %v21482_v43 }
  0x9a   : > { %15350 = vmatprep.subr.bf16.mxu1 %v21482_v43 }
  0x9c   : > { %15307 = vmatpush3.bf16.msra.mxu0 %v15923_v61 }
  0x9d   : > { %15351 = vmatpush3.bf16.msra.mxu1 %v15922_v58  ;;  %15380 = vmatprep.subr.bf16.mxu0 %v21482_v43 }
  0x9e   : > { %1477 = vmatmul.mubr.bf16.gmra.mxu0 %v13611_v33  ;;  %15424 = vmatprep.subr.bf16.mxu1 %v21482_v43 }
  0x9f   : > { %1565 = vmatmul.mubr.bf16.gmra.mxu1 %v13613_v34  ;;  %1484 = vmatprep.mubr.bf16.mxu0 %v13620_v35 }
  0xa0   : > { %1572 = vmatprep.mubr.bf16.mxu1 %v13622_v36 }
  0xa6   : > { %1485 = vmatmul.mubr.bf16.gmra.mxu0 %v13619_v39 }
  0xa7   : > { %1573 = vmatmul.mubr.bf16.gmra.mxu1 %v13621_v40  ;;  %1492 = vmatprep.mubr.bf16.mxu0 %v13628_v41 }
  0xa8   : > { %1580 = vmatprep.mubr.bf16.mxu1 %v13630_v42 }
  0xae   : > { %1493 = vmatmul.mubr.bf16.gmra.mxu0 %v13627_v46 }
  0xaf   : > { %1581 = vmatmul.mubr.bf16.gmra.mxu1 %v13629_v47  ;;  %15308 = vmatprep.mubr.msk.bf16.mxu0 %vm17248_vm1, %v21482_v43 }
  0xb0   : > { %15352 = vmatprep.mubr.msk.bf16.mxu1 %vm17248_vm1, %v21482_v43 }
 0x106   : > { %v14873_v62 = vpop.f32.mrf.mxu0 }
 0x107   : > { %v14931_v63 = vpop.f32.mrf.mxu1 }
 0x108   : > { %v14874_v0 = vpop.f32.mrf.mxu0 }
 0x109   : > { %v14932_v1 = vpop.f32.mrf.mxu1  ;;  %v14875_v51 = vadd.f32 %v14874_v0, %v14873_v62 }
 0x10a   : > { %v14876_v2 = vpop.f32.mrf.mxu0  ;;  %v14933_v60 = vadd.f32 %v14932_v1, %v14931_v63 }
 0x10b   : > { %v17686_v3 = vpop.f32.mrf.mxu1  ;;  %v1271_v56 = vadd.f32 %v14875_v51, %v17769_v49 }
 0x10c   : > { %v14877_v4 = vpop.f32.mrf.mxu0 }
 0x10d   : > { %v17688_v5 = vpop.f32.mrf.mxu1  ;;  %v14878_v57 = vadd.f32 %v14877_v4, %v14876_v2 }
 0x10e   : > { %v14879_v6 = vpop.f32.mrf.mxu0  ;;  %v14936_v0 = vadd.f32 %v17688_v5, %v17686_v3 }
 0x10f   : > { %v17690_v7 = vpop.f32.mrf.mxu1 }
 0x110   : > { %v14880_v8 = vpop.f32.mrf.mxu0 }
 0x111   : > { %v17692_v9 = vpop.f32.mrf.mxu1 }
 0x112   : > { %v14882_v10 = vpop.f32.mrf.mxu0 }
 0x113   : > { %v17694_v11 = vpop.f32.mrf.mxu1 }
 0x114   : > { %v14883_v12 = vpop.f32.mrf.mxu0 }
 0x115   : > { %v17696_v13 = vpop.f32.mrf.mxu1  ;;  %v14884_v51 = vadd.f32 %v14883_v12, %v14882_v10 }
 0x116   : > { %v17698_v14 = vpop.f32.mrf.mxu0 }
 0x117   : > { %v17700_v15 = vpop.f32.mrf.mxu1  ;;  %v1282_v3 = vadd.f32 %v14884_v51, %v17769_v49 }
 0x118   : > { %v17702_v16 = vpop.f32.mrf.mxu0 }
 0x119   : > { %v17704_v17 = vpop.f32.mrf.mxu1  ;;  %v14887_v10 = vadd.f32 %v17702_v16, %v17698_v14 }
 0x11a   : > { %v17706_v18 = vpop.f32.mrf.mxu0 }
 0x11b   : > { %v17708_v19 = vpop.f32.mrf.mxu1 }
 0x11c   : > { %v17710_v20 = vpop.f32.mrf.mxu0 }
 0x11d   : > { %v17712_v21 = vpop.f32.mrf.mxu1  ;;  %v14890_v14 = vadd.f32 %v17710_v20, %v17706_v18 }
 0x11e   : > { %v17714_v22 = vpop.f32.mrf.mxu0 }
 0x11f   : > { %v17716_v23 = vpop.f32.mrf.mxu1  ;;  %v1290_v20 = vadd.f32 %v14890_v14, %v17769_v49 }
 0x120   : > { %v17718_v24 = vpop.f32.mrf.mxu0 }
 0x121   : > { %v17720_v25 = vpop.f32.mrf.mxu1 }
 0x122   : > { %v17722_v26 = vpop.f32.mrf.mxu0 }
 0x123   : > { %v17724_v27 = vpop.f32.mrf.mxu1 }
 0x124   : > { %v17726_v28 = vpop.f32.mrf.mxu0 }
 0x125   : > { %v17728_v29 = vpop.f32.mrf.mxu1 }
 0x126   : > { %v17730_v30 = vpop.f32.mrf.mxu0 }
 0x127   : > { %v17732_v31 = vpop.f32.mrf.mxu1 }
 0x128   : > { %v17734_v32 = vpop.f32.mrf.mxu0 }
 0x129   : > { %v17736_v33 = vpop.f32.mrf.mxu1 }
 0x12a   : > { %v17738_v34 = vpop.f32.mrf.mxu0 }
 0x12b   : > { %v17740_v35 = vpop.f32.mrf.mxu1 }
 0x12c   : > { %v17742_v36 = vpop.f32.mrf.mxu0 }
 0x12d   : > { %v17744_v37 = vpop.f32.mrf.mxu1 }
 0x12e   : > { %v17746_v38 = vpop.f32.mrf.mxu0 }
 0x12f   : > { %v17748_v39 = vpop.f32.mrf.mxu1 }
 0x130   : > { %v17750_v40 = vpop.f32.mrf.mxu0 }
 0x131   : > { %v17752_v41 = vpop.f32.mrf.mxu1 }
 0x132   : > { %v17754_v42 = vpop.f32.mrf.mxu0 }
 0x133   : > { %v17756_v44 = vpop.f32.mrf.mxu1 }
 0x134   : > { %21489 = vst [vmem:[#allocation9_spill] sm:$0xff] %v17756_v44  ;;  %v17758_v45 = vpop.f32.mrf.mxu0  ;;  %v14881_v44 = vadd.f32 %v14880_v8, %v14879_v6 }
 0x135   : > { %v17760_v46 = vpop.f32.mrf.mxu1 }
 0x136   : > { %21490 = vst [vmem:[#allocation10_spill] sm:$0xff] %v17760_v46  ;;  %v17762_v47 = vpop.f32.mrf.mxu0  ;;  %v1274_v46 = vadd.f32 %v14878_v57, %v17769_v49  ;;  %v1279_v63 = vadd.f32 %v14881_v44, %v17769_v49 }
 0x137   : > { %21491 = vst [vmem:[#allocation11_spill] sm:$0xff] %v17762_v47  ;;  %v17764_v48 = vpop.f32.mrf.mxu1 }
 0x138   : > { %21492 = vst [vmem:[#allocation12_spill] sm:$0xff] %v17764_v48  ;;  %v17771_v50 = vpop.f32.mrf.mxu0  ;;  %v1359_v48 = vadd.f32 %v14933_v60, %v1271_v56  ;;  %v1362_v4 = vadd.f32 %v14936_v0, %v1274_v46 }
 0x139   : > { %21493 = vst [vmem:[#allocation13_spill] sm:$0xff] %v17771_v50  ;;  %v17773_v52 = vpop.f32.mrf.mxu1 }
 0x13a   : > { %v14912_v53 = vpop.f32.mrf.mxu0 }
 0x13b   : > { %v14970_v54 = vpop.f32.mrf.mxu1 }
 0x13c   : > { %v14913_v55 = vpop.f32.mrf.mxu0 }
 0x13d   : > { %v14971_v58 = vpop.f32.mrf.mxu1 }
 0x13e   : > { %v14989_v59 = vpop.f32.mrf.mxu0 }
 0x13f   : > { %v15047_v61 = vpop.f32.mrf.mxu1 }
 0x140   : > { %v14990_v43 = vpop.f32.mrf.mxu0 }
 0x141   : > { %v14991_v47 = vadd.f32 %v14990_v43, %v14989_v59  ;;  %v15048_v50 = vpop.f32.mrf.mxu1  ;;  %v14939_v43 = vadd.f32 %v17692_v9, %v17690_v7  ;;  %v15925_v7 = vld [vmem:[%s21472_s3 + $0xf8] sm:$0xff]  }
 0x142   : > { %v14992_v62 = vpop.f32.mrf.mxu0  ;;  %v15049_v54 = vadd.f32 %v15048_v50, %v15047_v61 }
 0x143   : > { %v1447_v53 = vadd.f32 %v14991_v47, %v1359_v48  ;;  %v15050_v55 = vpop.f32.mrf.mxu1  ;;  %v1367_v47 = vadd.f32 %v14939_v43, %v1279_v63  ;;  %v14942_v48 = vadd.f32 %v17696_v13, %v17694_v11  ;;  %v14945_v63 = vadd.f32 %v17704_v17, %v17700_v15 }
 0x144   : > { %v14993_v2 = vpop.f32.mrf.mxu0  ;;  %v21494_v43 = vmov 0.0   ;;  %v14948_v17 = vadd.f32 %v17712_v21, %v17708_v19 }
 0x145   : > { %v1535_v1 = vadd.f32 %v15049_v54, %v1447_v53  ;;  %v14994_v58 = vadd.f32 %v14993_v2, %v14992_v62  ;;  %v15051_v56 = vpop.f32.mrf.mxu1  ;;  %v1370_v53 = vadd.f32 %v14942_v48, %v1282_v3  ;;  %v1287_v54 = vadd.f32 %v14887_v10, %v17769_v49 }
 0x146   : > { %v14995_v60 = vpop.f32.mrf.mxu0  ;;  %v15052_v57 = vadd.f32 %v15051_v56, %v15050_v55 }
 0x147   : > { %v1588_v6 = vmax.f32 %v1535_v1, 0.0  ;;  %v1450_v8 = vadd.f32 %v14994_v58, %v1362_v4  ;;  %v15053_v59 = vpop.f32.mrf.mxu1  ;;  %v15927_v4 = vld [vmem:[%s21472_s3 + $0xf0] sm:$0xff]  }
 0x148   : > { %v14996_v5 = vpop.f32.mrf.mxu0 }
 0x149   : > { %1601 = vst [vmem:[#allocation2] sm:$0xff] %v1588_v6  ;;  %v1538_v12 = vadd.f32 %v15052_v57, %v1450_v8  ;;  %v14997_v44 = vadd.f32 %v14996_v5, %v14995_v60  ;;  %v15054_v46 = vpop.f32.mrf.mxu1  ;;  %v14893_v8 = vadd.f32 %v17718_v24, %v17714_v22  ;;  %v15929_v22 = vld [vmem:[%s21472_s3 + $0xe8] sm:$0xff]  }
 0x14a   : > { %v14998_v50 = vpop.f32.mrf.mxu0  ;;  %v15055_v62 = vadd.f32 %v15054_v46, %v15053_v59  ;;  %v14896_v46 = vadd.f32 %v17726_v28, %v17722_v26  ;;  %v15924_v26 = vld [vmem:[%s21472_s3 + $0xb8] sm:$0xff]   ;;  %v14951_v28 = vadd.f32 %v17720_v25, %v17716_v23  ;;  %v15931_v23 = vld [vmem:[%s21472_s3 + $0xe0] sm:$0xff]  }
 0x14b   : > { %v1589_v9 = vmax.f32 %v1538_v12, 0.0  ;;  %v1455_v61 = vadd.f32 %v14997_v44, %v1367_v47  ;;  %v15056_v0 = vpop.f32.mrf.mxu1  ;;  %v1378_v44 = vadd.f32 %v14948_v17, %v1290_v20  ;;  %v1295_v24 = vadd.f32 %v14893_v8, %v17769_v49  ;;  %v15928_v17 = vld [vmem:[%s21472_s3 + $0xa8] sm:$0xff]  }
 0x14c   : > { %v14999_v16 = vpop.f32.mrf.mxu0  ;;  %v1298_v14 = vadd.f32 %v14896_v46, %v17769_v49  ;;  %v14905_v46 = vadd.f32 %v17750_v40, %v17746_v38  ;;  %v14960_v38 = vadd.f32 %v17744_v37, %v17740_v35  ;;  %v15930_v35 = vld [vmem:[%s21472_s3 + $0xa0] sm:$0xff]   ;;  %v15937_v37 = vld [vmem:[%s21472_s3 + $0xc8] sm:$0xff]  }
 0x14d   : > { %1602 = vst [vmem:[#allocation2 + $0x8] sm:$0xff] %v1589_v9  ;;  %v1543_v55 = vadd.f32 %v15055_v62, %v1455_v61  ;;  %v15000_v51 = vadd.f32 %v14999_v16, %v14998_v50  ;;  %v15057_v11 = vpop.f32.mrf.mxu1  ;;  %v1627_v13 = vpack.c.bf16 %v1589_v9, %v1588_v6  ;;  %v1375_v6 = vadd.f32 %v14945_v63, %v1287_v54 }
 0x14e   : > { %v15001_v2 = vpop.f32.mrf.mxu0  ;;  %v15058_v56 = vadd.f32 %v15057_v11, %v15056_v0  ;;  %v14899_v16 = vadd.f32 %v17734_v32, %v17730_v30  ;;  %v1383_v25 = vadd.f32 %v14951_v28, %v1295_v24  ;;  %v14954_v30 = vadd.f32 %v17728_v29, %v17724_v27  ;;  %v15926_v27 = vld [vmem:[%s21472_s3 + $0xb0] sm:$0xff]   ;;  %v15933_v29 = vld [vmem:[%s21472_s3 + $0xd8] sm:$0xff]  }
 0x14f   : > { %v1590_v1 = vmax.f32 %v1543_v55, 0.0  ;;  %v1458_v58 = vadd.f32 %v15000_v51, %v1370_v53  ;;  %v15059_v18 = vpop.f32.mrf.mxu1  ;;  %15353 = vmatmul.mubr.bf16.vlgmr.msra.gmra.mxu1 %v1627_v13 }
 0x150   : > { %v15002_v60 = vpop.f32.mrf.mxu0  ;;  %15356 = vmatprep.mubr.msk.bf16.mxu1 %vm17248_vm1, %v21494_v43  ;;  %15425 = vmatpush3.bf16.msra.mxu1 %v15925_v7  ;;  %v1303_v20 = vadd.f32 %v14899_v16, %v17769_v49 }
 0x151   : > { %1603 = vst [vmem:[#allocation2 + $0x10] sm:$0xff] %v1590_v1  ;;  %v1546_v57 = vadd.f32 %v15058_v56, %v1458_v58  ;;  %v15003_v59 = vadd.f32 %v15002_v60, %v15001_v2  ;;  %v15060_v15 = vpop.f32.mrf.mxu1  ;;  %15426 = vmatprep.subr.bf16.mxu1 %v21494_v43  ;;  %v14902_v60 = vadd.f32 %v17742_v36, %v17738_v34 }
 0x152   : > { %v15004_v3 = vpop.f32.mrf.mxu0  ;;  %v15061_v10 = vadd.f32 %v15060_v15, %v15059_v18  ;;  %v1386_v18 = vadd.f32 %v14954_v30, %v1298_v14  ;;  %v14957_v36 = vadd.f32 %v17736_v33, %v17732_v31  ;;  %v21495_v30 = vld [vmem:[#allocation11_spill] sm:$0xff] }
 0x153   : > { %v1591_v5 = vmax.f32 %v1546_v57, 0.0  ;;  %v1463_v47 = vadd.f32 %v15003_v59, %v1375_v6  ;;  %v15062_v12 = vpop.f32.mrf.mxu1 }
 0x154   : > { %v15005_v48 = vpop.f32.mrf.mxu0  ;;  %15427 = vmatpush3.bf16.msra.mxu1 %v15927_v4  ;;  %v1650_v55 = vld [vmem:[#allocation2 + $0x1] sm:$0xff] }
 0x155   : > { %1604 = vst [vmem:[#allocation2 + $0x18] sm:$0xff] %v1591_v5  ;;  %v1551_v50 = vadd.f32 %v15061_v10, %v1463_v47  ;;  %v15006_v19 = vadd.f32 %v15005_v48, %v15004_v3  ;;  %v15063_v21 = vpop.f32.mrf.mxu1  ;;  %v1628_v7 = vpack.c.bf16 %v1591_v5, %v1590_v1  ;;  %15428 = vmatprep.subr.bf16.mxu1 %v21494_v43 }
 0x156   : > { %v15007_v9 = vpop.f32.mrf.mxu0  ;;  %v15064_v0 = vadd.f32 %v15063_v21, %v15062_v12  ;;  %v1391_v12 = vadd.f32 %v14957_v36, %v1303_v20 }
 0x157   : > { %v1592_v61 = vmax.f32 %v1551_v50, 0.0  ;;  %v1466_v62 = vadd.f32 %v15006_v19, %v1378_v44  ;;  %v15065_v53 = vpop.f32.mrf.mxu1  ;;  %15357 = vmatmul.mubr.bf16.gmra.mxu1 %v1628_v7  ;;  %v1306_v44 = vadd.f32 %v14902_v60, %v17769_v49 }
 0x158   : > { %v15008_v54 = vpop.f32.mrf.mxu0  ;;  %v1651_v51 = vld [vmem:[#allocation2 + $0x9] sm:$0xff]  ;;  %15360 = vmatprep.mubr.msk.bf16.mxu1 %vm17248_vm1, %v21494_v43  ;;  %15429 = vmatpush3.bf16.msra.mxu1 %v15929_v22 }
 0x159   : > { %1605 = vst [vmem:[#allocation2 + $0x20] sm:$0xff] %v1592_v61  ;;  %v1554_v11 = vadd.f32 %v15064_v0, %v1466_v62  ;;  %v15009_v13 = vadd.f32 %v15008_v54, %v15007_v9  ;;  %v15066_v2 = vpop.f32.mrf.mxu1  ;;  %v1663_v4 = vpack.c.bf16 %v1651_v51, %v1650_v55  ;;  %15430 = vmatprep.subr.bf16.mxu1 %v21494_v43  ;;  %v15935_v22 = vld [vmem:[%s21472_s3 + $0xd0] sm:$0xff]   ;;  %v15932_v51 = vld [vmem:[%s21472_s3 + $0x98] sm:$0xff]  }
 0x15a   : > { %v15010_v32 = vpop.f32.mrf.mxu0  ;;  %v15067_v58 = vadd.f32 %v15066_v2, %v15065_v53  ;;  %v1311_v62 = vadd.f32 %v14905_v46, %v17769_v49  ;;  %v14908_v0 = vadd.f32 %v17758_v45, %v17754_v42  ;;  %v14963_v42 = vadd.f32 %v17752_v41, %v17748_v39 }
 0x15b   : > { %v1593_v63 = vmax.f32 %v1554_v11, 0.0  ;;  %v1471_v1 = vadd.f32 %v15009_v13, %v1383_v25  ;;  %v15068_v56 = vpop.f32.mrf.mxu1  ;;  %15309 = vmatmul.mubr.bf16.vlgmr.msra.gmra.mxu0 %v1663_v4 }
 0x15c   : > { %v15011_v6 = vpop.f32.mrf.mxu0  ;;  %15381 = vmatpush3.bf16.msra.mxu0 %v15924_v26  ;;  %15312 = vmatprep.mubr.msk.bf16.mxu0 %vm17248_vm1, %v21494_v43  ;;  %v1652_v31 = vld [vmem:[#allocation2 + $0x11] sm:$0xff]  ;;  %v1399_v2 = vadd.f32 %v14963_v42, %v1311_v62  ;;  %v1314_v4 = vadd.f32 %v14908_v0, %v17769_v49 }
 0x15d   : > { %1606 = vst [vmem:[#allocation2 + $0x28] sm:$0xff] %v1593_v63  ;;  %v1559_v8 = vadd.f32 %v15067_v58, %v1471_v1  ;;  %v15012_v57 = vadd.f32 %v15011_v6, %v15010_v32  ;;  %v15069_v59 = vpop.f32.mrf.mxu1  ;;  %15382 = vmatprep.subr.bf16.mxu0 %v21494_v43  ;;  %v1629_v34 = vpack.c.bf16 %v1593_v63, %v1592_v61  ;;  %v21496_v32 = vld [vmem:[#allocation13_spill] sm:$0xff] }
 0x15e   : > { %15431 = vmatpush3.bf16.msra.mxu1 %v15931_v23  ;;  %v15013_v15 = vpop.f32.mrf.mxu0  ;;  %v15070_v47 = vadd.f32 %v15069_v59, %v15068_v56  ;;  %v1394_v61 = vadd.f32 %v14960_v38, %v1306_v44  ;;  %v14911_v63 = vadd.f32 %v21496_v32, %v21495_v30  ;;  %v15938_v58 = vld [vmem:[%s21472_s3 + $0xc0] sm:$0xff]   ;;  %v15936_v38 = vld [vmem:[%s21472_s3 + $0x88] sm:$0xff]   ;;  %v2146_v30 = vld [vmem:[#allocation2 + $0x13] sm:$0xff] }
 0x15f   : > { %15432 = vmatprep.subr.bf16.mxu1 %v21494_v43  ;;  %v1594_v3 = vmax.f32 %v1559_v8, 0.0  ;;  %v1474_v5 = vadd.f32 %v15012_v57, %v1386_v18  ;;  %v15071_v10 = vpop.f32.mrf.mxu1  ;;  %15361 = vmatmul.mubr.bf16.gmra.mxu1 %v1629_v34  ;;  %v21497_v6 = vld [vmem:[#allocation9_spill] sm:$0xff]  ;;  %v2145_v32 = vld [vmem:[#allocation2 + $0xb] sm:$0xff] }
 0x160   : > { %v15014_v48 = vpop.f32.mrf.mxu0  ;;  %v1653_v33 = vld [vmem:[#allocation2 + $0x19] sm:$0xff]  ;;  %15383 = vmatpush3.bf16.msra.mxu0 %v15926_v27  ;;  %15364 = vmatprep.mubr.msk.bf16.mxu1 %vm17248_vm1, %v21494_v43  ;;  %v21498_v27 = vld [vmem:[#allocation10_spill] sm:$0xff] }
 0x161   : > { %1607 = vst [vmem:[#allocation2 + $0x30] sm:$0xff] %v1594_v3  ;;  %v1562_v24 = vadd.f32 %v15070_v47, %v1474_v5  ;;  %v15015_v50 = vadd.f32 %v15014_v48, %v15013_v15  ;;  %v15072_v19 = vpop.f32.mrf.mxu1  ;;  %v1664_v21 = vpack.c.bf16 %v1653_v33, %v1652_v31  ;;  %15384 = vmatprep.subr.bf16.mxu0 %v21494_v43  ;;  %v15934_v5 = vld [vmem:[%s21472_s3 + $0x90] sm:$0xff]  }
 0x162   : > { %15433 = vmatpush3.bf16.msra.mxu1 %v15933_v29  ;;  %v15016_v40 = vpop.f32.mrf.mxu0  ;;  %v15073_v26 = vadd.f32 %v15072_v19, %v15071_v10  ;;  %v14966_v29 = vadd.f32 %v21498_v27, %v21497_v6  ;;  %v1961_v27 = vld [vmem:[#allocation2 + $0x1a] sm:$0xff] }
 0x163   : > { %15434 = vmatprep.subr.bf16.mxu1 %v21494_v43  ;;  %v1595_v7 = vmax.f32 %v1562_v24, 0.0  ;;  %v1479_v9 = vadd.f32 %v15015_v50, %v1391_v12  ;;  %v15074_v28 = vpop.f32.mrf.mxu1  ;;  %15313 = vmatmul.mubr.bf16.gmra.mxu0 %v1664_v21 }
 0x164   : > { %v15017_v53 = vpop.f32.mrf.mxu0  ;;  %15316 = vmatprep.mubr.msk.bf16.mxu0 %vm17248_vm1, %v21494_v43  ;;  %15385 = vmatpush3.bf16.msra.mxu0 %v15928_v17  ;;  %v1654_v39 = vld [vmem:[#allocation2 + $0x21] sm:$0xff]  ;;  %v1402_v15 = vadd.f32 %v14966_v29, %v1314_v4  ;;  %v1319_v17 = vadd.f32 %v14911_v63, %v17769_v49  ;;  %v21499_v49 = vld [vmem:[#allocation12_spill] sm:$0xff] }
 0x165   : > { %1608 = vst [vmem:[#allocation2 + $0x38] sm:$0xff] %v1595_v7  ;;  %v1567_v14 = vadd.f32 %v15073_v26, %v1479_v9  ;;  %v15018_v16 = vadd.f32 %v15017_v53, %v15016_v40  ;;  %v15075_v54 = vpop.f32.mrf.mxu1  ;;  %v1630_v55 = vpack.c.bf16 %v1595_v7, %v1594_v3  ;;  %15386 = vmatprep.subr.bf16.mxu0 %v21494_v43 }
 0x166   : > { %15435 = vmatpush3.bf16.msra.mxu1 %v15935_v22  ;;  %v15019_v45 = vpop.f32.mrf.mxu0  ;;  %v15076_v11 = vadd.f32 %v15075_v54, %v15074_v28  ;;  %v14969_v48 = vadd.f32 %v17773_v52, %v21499_v49 }
 0x167   : > { %15436 = vmatprep.subr.bf16.mxu1 %v21494_v43  ;;  %v1596_v23 = vmax.f32 %v1567_v14, 0.0  ;;  %v1482_v25 = vadd.f32 %v15018_v16, %v1394_v61  ;;  %v15077_v13 = vpop.f32.mrf.mxu1  ;;  %15365 = vmatmul.mubr.bf16.gmra.mxu1 %v1630_v55 }
 0x168   : > { %v15020_v1 = vpop.f32.mrf.mxu0  ;;  %v1655_v41 = vld [vmem:[#allocation2 + $0x29] sm:$0xff]  ;;  %15387 = vmatpush3.bf16.msra.mxu0 %v15930_v35  ;;  %15368 = vmatprep.mubr.msk.bf16.mxu1 %vm17248_vm1, %v21494_v43  ;;  %v1407_v40 = vadd.f32 %v14969_v48, %v1319_v17 }
 0x169   : > { %1609 = vst [vmem:[#allocation2 + $0x40] sm:$0xff] %v1596_v23  ;;  %v1570_v56 = vadd.f32 %v15076_v11, %v1482_v25  ;;  %v15021_v18 = vadd.f32 %v15020_v1, %v15019_v45  ;;  %v15078_v20 = vpop.f32.mrf.mxu1  ;;  %v1665_v60 = vpack.c.bf16 %v1655_v41, %v1654_v39  ;;  %15388 = vmatprep.subr.bf16.mxu0 %v21494_v43  ;;  %v1960_v39 = vld [vmem:[#allocation2 + $0x12] sm:$0xff]  ;;  %v2148_v41 = vld [vmem:[#allocation2 + $0x23] sm:$0xff] }
 0x16a   : > { %15437 = vmatpush3.bf16.msra.mxu1 %v15937_v37  ;;  %v15022_v8 = vpop.f32.mrf.mxu0  ;;  %v15079_v34 = vadd.f32 %v15078_v20, %v15077_v13  ;;  %v15939_v37 = vld [vmem:[%s21472_s3 + $0x80] sm:$0xff]   ;;  %v2158_v1 = vpack.c.bf16 %v2146_v30, %v2145_v32  ;;  %v2149_v29 = vld [vmem:[#allocation2 + $0x2b] sm:$0xff] }
 0x16b   : > { %15438 = vmatprep.subr.bf16.mxu1 %v21494_v43  ;;  %v1597_v57 = vmax.f32 %v1570_v56, 0.0  ;;  %v1487_v59 = vadd.f32 %v15021_v18, %v1399_v2  ;;  %v15080_v36 = vpop.f32.mrf.mxu1  ;;  %15317 = vmatmul.mubr.bf16.gmra.mxu0 %v1665_v60  ;;  %v2147_v56 = vld [vmem:[#allocation2 + $0x1b] sm:$0xff] }
 0x16c   : > { %v15023_v3 = vpop.f32.mrf.mxu0  ;;  %15320 = vmatprep.mubr.msk.bf16.mxu0 %vm17248_vm1, %v21494_v43  ;;  %15389 = vmatpush3.bf16.msra.mxu0 %v15932_v51  ;;  %v1656_v19 = vld [vmem:[#allocation2 + $0x31] sm:$0xff]  ;;  %v2159_v20 = vpack.c.bf16 %v2148_v41, %v2147_v56  ;;  %v1962_v60 = vld [vmem:[#allocation2 + $0x22] sm:$0xff] }
 0x16d   : > { %1610 = vst [vmem:[#allocation2 + $0x48] sm:$0xff] %v1597_v57  ;;  %v1575_v47 = vadd.f32 %v15079_v34, %v1487_v59  ;;  %v15024_v10 = vadd.f32 %v15023_v3, %v15022_v8  ;;  %v15081_v12 = vpop.f32.mrf.mxu1  ;;  %v1631_v44 = vpack.c.bf16 %v1597_v57, %v1596_v23  ;;  %15390 = vmatprep.subr.bf16.mxu0 %v21494_v43  ;;  %v2150_v6 = vld [vmem:[#allocation2 + $0x33] sm:$0xff] }
 0x16e   : > { %15439 = vmatpush3.bf16.msra.mxu1 %v15938_v58  ;;  %v15025_v46 = vpop.f32.mrf.mxu0  ;;  %v15082_v22 = vadd.f32 %v15081_v12, %v15080_v36  ;;  %v1959_v58 = vld [vmem:[#allocation2 + $0xa] sm:$0xff]  ;;  %v1973_v8 = vpack.c.bf16 %v1962_v60, %v1961_v27  ;;  %v2160_v57 = vpack.c.bf16 %v2150_v6, %v2149_v29  ;;  %v1964_v59 = vld [vmem:[#allocation2 + $0x32] sm:$0xff] }
 0x16f   : > { %15504 = vmatprep.subr.bf16.mxu1 %v21494_v43  ;;  %v1598_v31 = vmax.f32 %v1575_v47, 0.0  ;;  %v1490_v33 = vadd.f32 %v15024_v10, %v1402_v15  ;;  %v15083_v24 = vpop.f32.mrf.mxu1  ;;  %15369 = vmatmul.mubr.bf16.gmra.mxu1 %v1631_v44  ;;  %v1972_v18 = vpack.c.bf16 %v1960_v39, %v1959_v58  ;;  %v1963_v36 = vld [vmem:[#allocation2 + $0x2a] sm:$0xff] }
 0x170   : > { %v15026_v50 = vpop.f32.mrf.mxu0  ;;  %v1657_v21 = vld [vmem:[#allocation2 + $0x39] sm:$0xff]  ;;  %15372 = vmatprep.mubr.msk.bf16.mxu1 %vm17248_vm1, %v21494_v43  ;;  %15391 = vmatpush3.bf16.msra.mxu0 %v15934_v5  ;;  %v1974_v17 = vpack.c.bf16 %v1964_v59, %v1963_v36 }
 0x171   : > { %1611 = vst [vmem:[#allocation2 + $0x50] sm:$0xff] %v1598_v31  ;;  %v1578_v7 = vadd.f32 %v15082_v22, %v1490_v33  ;;  %v15027_v52 = vadd.f32 %v15026_v50, %v15025_v46  ;;  %v15084_v9 = vpop.f32.mrf.mxu1  ;;  %v1666_v26 = vpack.c.bf16 %v1657_v21, %v1656_v19  ;;  %15392 = vmatprep.subr.bf16.mxu0 %v21494_v43  ;;  %v2151_v15 = vld [vmem:[#allocation2 + $0x3b] sm:$0xff]  ;;  %v2157_v50 = vld [vmem:[#allocation2 + $0x6b] sm:$0xf] }
 0x172   : > { %v15028_v28 = vpop.f32.mrf.mxu0  ;;  %v15085_v0 = vadd.f32 %v15084_v9, %v15083_v24  ;;  %v1965_v10 = vld [vmem:[#allocation2 + $0x3a] sm:$0xff] }
 0x173   : > { %v1599_v61 = vmax.f32 %v1578_v7, 0.0  ;;  %v1495_v62 = vadd.f32 %v15027_v52, %v1407_v40  ;;  %v15086_v53 = vpop.f32.mrf.mxu1  ;;  %15321 = vmatmul.mubr.bf16.gmra.mxu0 %v1666_v26  ;;  %v15940_v40 = vld [vmem:[%s21474_s5 + $0x38] sm:$0xff]   ;;  %v1971_v52 = vld [vmem:[#allocation2 + $0x6a] sm:$0xf]  ;;  %v15941_v26 = vld [vmem:[%s21474_s5 + $0x30] sm:$0xff]  }
 0x174   : > { %v15029_v35 = vpop.f32.mrf.mxu0  ;;  %15324 = vmatprep.mubr.msk.bf16.mxu0 %vm17248_vm1, %v21494_v43  ;;  %15393 = vmatpush3.bf16.msra.mxu0 %v15936_v38  ;;  %v1658_v42 = vld [vmem:[#allocation2 + $0x41] sm:$0xff]  ;;  %v2164_v38 = vpack.c.bf16 %v2157_v50, %v2157_v50  ;;  %v1978_v9 = vpack.c.bf16 %v1971_v52, %v1971_v52  ;;  %v15943_v28 = vld [vmem:[%s21474_s5 + $0x18] sm:$0xff]  }
 0x175   : > { %1612 = vst [vmem:[#allocation2 + $0x58] sm:$0xff] %v1599_v61  ;;  %v1583_v14 = vadd.f32 %v15085_v0, %v1495_v62  ;;  %v15087_v16 = vpop.f32.mrf.mxu1  ;;  %v1632_v54 = vpack.c.bf16 %v1599_v61, %v1598_v31  ;;  %15394 = vmatprep.subr.bf16.mxu0 %v21494_v43  ;;  %v2152_v34 = vld [vmem:[#allocation2 + $0x43] sm:$0xff]  ;;  %v15944_v62 = vld [vmem:[%s21474_s5 + $0x10] sm:$0xff]  }
 0x176   : > { %v2161_v3 = vpack.c.bf16 %v2152_v34, %v2151_v15  ;;  %v1966_v5 = vld [vmem:[#allocation2 + $0x42] sm:$0xff] }
 0x177   : > { %v1600_v55 = vmax.f32 %v1583_v14, 0.0  ;;  %15373 = vmatmul.mubr.bf16.gmra.mxu1 %v1632_v54  ;;  %v1975_v44 = vpack.c.bf16 %v1966_v5, %v1965_v10  ;;  %v15942_v61 = vld [vmem:[%s21474_s5 + $0x28] sm:$0xff]   ;;  %v15947_v53 = vld [vmem:[%s21474_s5] sm:$0xff]  }
 0x178   : > { %v1659_v45 = vld [vmem:[#allocation2 + $0x49] sm:$0xff]  ;;  %15376 = vmatprep.mubr.msk.bf16.mxu1 %vm17248_vm1, %v21494_v43  ;;  %15395 = vmatpush3.bf16.msra.mxu0 %v15939_v37  ;;  %v15945_v35 = vld [vmem:[%s21474_s5 + $0x20] sm:$0xff]  }
 0x179   : > { %1613 = vst [vmem:[#allocation2 + $0x60] sm:$0xf] %v1600_v55  ;;  %v1667_v51 = vpack.c.bf16 %v1659_v45, %v1658_v42  ;;  %15468 = vmatprep.subr.bf16.mxu0 %v21494_v43  ;;  %v2153_v12 = vld [vmem:[#allocation2 + $0x4b] sm:$0xff] }
 0x17a   : > { %v1967_v33 = vld [vmem:[#allocation2 + $0x4a] sm:$0xff] }
 0x17b   : > { %15325 = vmatmul.mubr.bf16.gmra.mxu0 %v1667_v51  ;;  %v15946_v0 = vld [vmem:[%s21474_s5 + $0x8] sm:$0xff]  }
 0x17c   : > { %15328 = vmatprep.mubr.msk.bf16.mxu0 %vm17248_vm1, %v21494_v43  ;;  %v1660_v23 = vld [vmem:[#allocation2 + $0x51] sm:$0xff] }
 0x17d   : > { %v2154_v47 = vld [vmem:[#allocation2 + $0x53] sm:$0xff] }
 0x17e   : > { %v2162_v46 = vpack.c.bf16 %v2154_v47, %v2153_v12  ;;  %v1968_v49 = vld [vmem:[#allocation2 + $0x52] sm:$0xff] }
 0x17f   : > { %v1976_v22 = vpack.c.bf16 %v1968_v49, %v1967_v33 }
 0x180   : > { %v1661_v25 = vld [vmem:[#allocation2 + $0x59] sm:$0xff]  ;;  %v1662_v4 = vld [vmem:[#allocation2 + $0x61] sm:$0xf] }
 0x181   : > { %v1626_v11 = vld [vmem:[#allocation2 + $0x60] sm:$0xf]  ;;  %v1668_v13 = vpack.c.bf16 %v1661_v25, %v1660_v23  ;;  %v1669_v63 = vpack.c.bf16 %v1662_v4, %v1662_v4 }
 0x182   : > { %v1633_v2 = vpack.c.bf16 %v1626_v11, %v1626_v11  ;;  %v2155_v48 = vld [vmem:[#allocation2 + $0x5b] sm:$0xff]  ;;  %v2156_v31 = vld [vmem:[#allocation2 + $0x63] sm:$0xff] }
 0x183   : > { %15329 = vmatmul.mubr.bf16.gmra.mxu0 %v1668_v13  ;;  %v2163_v24 = vpack.c.bf16 %v2156_v31, %v2155_v48  ;;  %v1969_v19 = vld [vmem:[#allocation2 + $0x5a] sm:$0xff]  ;;  %v1970_v21 = vld [vmem:[#allocation2 + $0x62] sm:$0xff] }
 0x184   : > { %15377 = vmatmul.mubr.bf16.gmra.mxu1 %v1633_v2  ;;  %15332 = vmatprep.mubr.msk.bf16.mxu0 %vm17248_vm1, %v21494_v43  ;;  %v1977_v7 = vpack.c.bf16 %v1970_v21, %v1969_v19 }
 0x185   : > { %15440 = vmatprep.mubr.msk.bf16.mxu1 %vm17248_vm1, %v21494_v43 }
 0x18b   : > { %15333 = vmatmul.mubr.bf16.gmra.mxu0 %v1669_v63 }
 0x18c   : > { %15441 = vmatmul.mubr.bf16.vlgmr.msra.gmra.mxu1 %v2158_v1  ;;  %15396 = vmatprep.mubr.msk.bf16.mxu0 %vm17248_vm1, %v21494_v43 }
 0x18d   : > { %15444 = vmatprep.mubr.msk.bf16.mxu1 %vm17248_vm1, %v21494_v43  ;;  %15505 = vmatpush3.bf16.msra.mxu1 %v15943_v28 }
 0x18e   : > { %15506 = vmatprep.subr.bf16.mxu1 %v21494_v43 }
 0x191   : > { %15507 = vmatpush3.bf16.msra.mxu1 %v15944_v62 }
 0x192   : > { %15508 = vmatprep.subr.bf16.mxu1 %v21494_v43 }
 0x193   : > { %15397 = vmatmul.mubr.bf16.vlgmr.msra.gmra.mxu0 %v1972_v18 }
 0x194   : > { %15445 = vmatmul.mubr.bf16.gmra.mxu1 %v2159_v20  ;;  %15400 = vmatprep.mubr.msk.bf16.mxu0 %vm17248_vm1, %v21494_v43 }
 0x195   : > { %15448 = vmatprep.mubr.msk.bf16.mxu1 %vm17248_vm1, %v21494_v43  ;;  %15469 = vmatpush3.bf16.msra.mxu0 %v15940_v40 }
 0x196   : > { %15470 = vmatprep.subr.bf16.mxu0 %v21494_v43  ;;  %15509 = vmatpush3.bf16.msra.mxu1 %v15946_v0 }
 0x197   : > { %15510 = vmatprep.subr.bf16.mxu1 %v21494_v43 }
 0x199   : > { %15471 = vmatpush3.bf16.msra.mxu0 %v15941_v26 }
 0x19a   : > { %15472 = vmatprep.subr.bf16.mxu0 %v21494_v43  ;;  %15511 = vmatpush3.bf16.msra.mxu1 %v15947_v53 }
 0x19b   : > { %15401 = vmatmul.mubr.bf16.gmra.mxu0 %v1973_v8  ;;  %15576 = vmatprep.subr.bf16.mxu1 %v21494_v43 }
 0x19c   : > { %15449 = vmatmul.mubr.bf16.gmra.mxu1 %v2160_v57  ;;  %15404 = vmatprep.mubr.msk.bf16.mxu0 %vm17248_vm1, %v21494_v43 }
 0x19d   : > { %15452 = vmatprep.mubr.msk.bf16.mxu1 %vm17248_vm1, %v21494_v43  ;;  %15473 = vmatpush3.bf16.msra.mxu0 %v15942_v61 }
 0x19e   : > { %15474 = vmatprep.subr.bf16.mxu0 %v21494_v43 }
 0x1a1   : > { %15475 = vmatpush3.bf16.msra.mxu0 %v15945_v35 }
 0x1a2   : > { %15540 = vmatprep.subr.bf16.mxu0 %v21494_v43 }
 0x1a3   : > { %15405 = vmatmul.mubr.bf16.gmra.mxu0 %v1974_v17 }
 0x1a4   : > { %15453 = vmatmul.mubr.bf16.gmra.mxu1 %v2161_v3  ;;  %15408 = vmatprep.mubr.msk.bf16.mxu0 %vm17248_vm1, %v21494_v43 }
 0x1a5   : > { %15456 = vmatprep.mubr.msk.bf16.mxu1 %vm17248_vm1, %v21494_v43 }
 0x1ab   : > { %15409 = vmatmul.mubr.bf16.gmra.mxu0 %v1975_v44 }
 0x1ac   : > { %15457 = vmatmul.mubr.bf16.gmra.mxu1 %v2162_v46  ;;  %15412 = vmatprep.mubr.msk.bf16.mxu0 %vm17248_vm1, %v21494_v43 }
 0x1ad   : > { %15460 = vmatprep.mubr.msk.bf16.mxu1 %vm17248_vm1, %v21494_v43 }
 0x1b3   : > { %15413 = vmatmul.mubr.bf16.gmra.mxu0 %v1976_v22 }
 0x1b4   : > { %15461 = vmatmul.mubr.bf16.gmra.mxu1 %v2163_v24  ;;  %15416 = vmatprep.mubr.msk.bf16.mxu0 %vm17248_vm1, %v21494_v43 }
 0x1b5   : > { %15464 = vmatprep.mubr.msk.bf16.mxu1 %vm17248_vm1, %v21494_v43 }
 0x1bb   : > { %15417 = vmatmul.mubr.bf16.gmra.mxu0 %v1977_v7 }
 0x1bc   : > { %15465 = vmatmul.mubr.bf16.gmra.mxu1 %v2164_v38  ;;  %15420 = vmatprep.mubr.msk.bf16.mxu0 %vm17248_vm1, %v21494_v43 }
 0x1bd   : > { %15512 = vmatprep.mubr.msk.bf16.mxu1 %vm17248_vm1, %v21494_v43 }
 0x1c3   : > { %15421 = vmatmul.mubr.bf16.gmra.mxu0 %v1978_v9 }
 0x1c4   : > { %15476 = vmatprep.mubr.msk.bf16.mxu0 %vm17248_vm1, %v21494_v43 }
 0x20f   : > { %v1905_v37 = vpop.f32.mrf.mxu1 }
 0x211   : > { %v15354_v14 = vpop.f32.mrf.mxu1 }
 0x213   : > { %v17982_v16 = vpop.f32.mrf.mxu1 }
 0x215   : > { %v15355_v54 = vpop.f32.mrf.mxu1 }
 0x216   : > { %v18029_v54 = vld [vmem:[%s21473_s4] ss:$0 sm:$0xff] }
 0x217   : > { %v17984_v55 = vpop.f32.mrf.mxu1 }
 0x219   : > { %v15358_v42 = vpop.f32.mrf.mxu1 }
 0x21b   : > { %v1769_v45 = vpop.f32.mrf.mxu0  ;;  %v17986_v51 = vpop.f32.mrf.mxu1 }
 0x21c   : > { %v1906_v0 = vadd.f32 %v1905_v37, %v1769_v45 }
 0x21d   : > { %v15310_v23 = vpop.f32.mrf.mxu0  ;;  %v15359_v25 = vpop.f32.mrf.mxu1 }
 0x21f   : > { %v1772_v11 = vpop.f32.mrf.mxu0  ;;  %v17988_v13 = vpop.f32.mrf.mxu1 }
 0x220   : > { %v1909_v25 = vadd.f32 %v17982_v16, %v1772_v11 }
 0x221   : > { %v15311_v2 = vpop.f32.mrf.mxu0  ;;  %v15362_v4 = vpop.f32.mrf.mxu1 }
 0x223   : > { %v1777_v30 = vpop.f32.mrf.mxu0  ;;  %v17990_v32 = vpop.f32.mrf.mxu1 }
 0x225   : > { %v15314_v63 = vpop.f32.mrf.mxu0  ;;  %v15363_v1 = vpop.f32.mrf.mxu1 }
 0x227   : > { %v17992_v39 = vpop.f32.mrf.mxu0  ;;  %v17994_v41 = vpop.f32.mrf.mxu1 }
 0x229   : > { %v15315_v58 = vpop.f32.mrf.mxu0  ;;  %v15366_v56 = vpop.f32.mrf.mxu1 }
 0x22a   : > { %v1914_v56 = vadd.f32 %v17984_v55, %v1777_v30 }
 0x22b   : > { %v17996_v18 = vpop.f32.mrf.mxu0  ;;  %v17998_v20 = vpop.f32.mrf.mxu1 }
 0x22d   : > { %v15318_v60 = vpop.f32.mrf.mxu0  ;;  %v15367_v6 = vpop.f32.mrf.mxu1 }
 0x22f   : > { %v18000_v27 = vpop.f32.mrf.mxu0  ;;  %v18002_v29 = vpop.f32.mrf.mxu1 }
 0x231   : > { %v15319_v8 = vpop.f32.mrf.mxu0  ;;  %v15370_v57 = vpop.f32.mrf.mxu1 }
 0x233   : > { %v18004_v59 = vpop.f32.mrf.mxu0  ;;  %v18006_v34 = vpop.f32.mrf.mxu1 }
 0x235   : > { %v15322_v36 = vpop.f32.mrf.mxu0  ;;  %v15371_v15 = vpop.f32.mrf.mxu1 }
 0x237   : > { %v18008_v17 = vpop.f32.mrf.mxu0  ;;  %v18010_v3 = vpop.f32.mrf.mxu1 }
 0x239   : > { %v15323_v5 = vpop.f32.mrf.mxu0  ;;  %v15374_v47 = vpop.f32.mrf.mxu1 }
 0x23a   : > { %v1917_v5 = vadd.f32 %v17986_v51, %v17992_v39 }
 0x23b   : > { %v18012_v10 = vpop.f32.mrf.mxu0  ;;  %v18014_v12 = vpop.f32.mrf.mxu1 }
 0x23d   : > { %v15326_v44 = vpop.f32.mrf.mxu0  ;;  %v15375_v46 = vpop.f32.mrf.mxu1 }
 0x23f   : > { %v18016_v49 = vpop.f32.mrf.mxu0 }
 0x241   : > { %v15327_v48 = vpop.f32.mrf.mxu0 }
 0x243   : > { %v18018_v31 = vpop.f32.mrf.mxu0 }
 0x244   : > { %v18020_v33 = vpop.f32.mrf.mxu1 }
 0x245   : > { %v15330_v22 = vpop.f32.mrf.mxu0 }
 0x246   : > { %v15378_v24 = vpop.f32.mrf.mxu1 }
 0x247   : > { %v18022_v50 = vpop.f32.mrf.mxu0 }
 0x248   : > { %v1956_v19 = vpop.f32.mrf.mxu1 }
 0x249   : > { %v15331_v21 = vpop.f32.mrf.mxu0  ;;  %v1922_v19 = vadd.f32 %v17988_v13, %v17996_v18  ;;  %v15951_v18 = vld [vmem:[%s21474_s5 + $0x78] sm:$0xff]  }
 0x24a   : > { %v15379_v38 = vpop.f32.mrf.mxu1 }
 0x24b   : > { %v18024_v40 = vpop.f32.mrf.mxu0 }
 0x24c   : > { %v2264_v7 = vpop.f32.mrf.mxu1 }
 0x24d   : > { %v15334_v52 = vpop.f32.mrf.mxu0 }
 0x24e   : > { %v15442_v9 = vpop.f32.mrf.mxu1 }
 0x24f   : > { %v1820_v26 = vpop.f32.mrf.mxu0 }
 0x250   : > { %v2267_v28 = vpop.f32.mrf.mxu1 }
 0x251   : > { %v15335_v61 = vpop.f32.mrf.mxu0 }
 0x252   : > { %v15443_v62 = vpop.f32.mrf.mxu1 }
 0x253   : > { %v2078_v53 = vpop.f32.mrf.mxu0 }
 0x254   : > { %v2272_v35 = vpop.f32.mrf.mxu1  ;;  %v2132_v14 = vadd.f32 %v2078_v53, %v1906_v0 }
 0x255   : > { %v15398_v42 = vpop.f32.mrf.mxu0 }
 0x256   : > { %v15446_v23 = vpop.f32.mrf.mxu1  ;;  %v2318_v2 = vadd.f32 %v2264_v7, %v2132_v14 }
 0x257   : > { %v2081_v4 = vpop.f32.mrf.mxu0 }
 0x258   : > { %v2275_v63 = vpop.f32.mrf.mxu1  ;;  %v2338_v1 = vadd.f32 %v18029_v54, %v2318_v2  ;;  %v2133_v58 = vadd.f32 %v2081_v4, %v1909_v25 }
 0x259   : > { %v15399_v37 = vpop.f32.mrf.mxu0 }
 0x25a   : > { %v15447_v45 = vpop.f32.mrf.mxu1  ;;  %v2351_v60 = vmax.f32 %v2338_v1, 0.0  ;;  %v2319_v6 = vadd.f32 %v2267_v28, %v2133_v58  ;;  %v1925_v28 = vadd.f32 %v17990_v32, %v18000_v27  ;;  %v1930_v32 = vadd.f32 %v17994_v41, %v18004_v59 }
 0x25b   : > { %v2086_v8 = vpop.f32.mrf.mxu0  ;;  %v15948_v45 = vld [vmem:[%s21474_s5 + $0x58] sm:$0xff]  }
 0x25c   : > { %v2280_v57 = vpop.f32.mrf.mxu1  ;;  %2365 = vst.msk [vmem:[#allocation3] sm:$0xff] %vm2364_vm2, %v2351_v60  ;;  %v2339_v36 = vadd.f32 %v18029_v54, %v2319_v6  ;;  %v2134_v16 = vadd.f32 %v2086_v8, %v1914_v56  ;;  %v15952_v60 = vld [vmem:[%s21474_s5 + $0x70] sm:$0xff]  }
 0x25d   : > { %v15402_v11 = vpop.f32.mrf.mxu0 }
 0x25e   : > { %v15450_v15 = vpop.f32.mrf.mxu1  ;;  %v2352_v47 = vmax.f32 %v2339_v36, 0.0  ;;  %v2320_v44 = vadd.f32 %v2272_v35, %v2134_v16 }
 0x25f   : > { %v2089_v46 = vpop.f32.mrf.mxu0 }
 0x260   : > { %v2283_v48 = vpop.f32.mrf.mxu1  ;;  %2366 = vst.msk [vmem:[#allocation3 + $0x8] sm:$0xff] %vm2364_vm2, %v2352_v47  ;;  %v2340_v55 = vadd.f32 %v18029_v54, %v2320_v44  ;;  %v2135_v30 = vadd.f32 %v2089_v46, %v1917_v5  ;;  %v15949_v44 = vld [vmem:[%s21474_s5 + $0x50] sm:$0xff]  }
 0x261   : > { %v15403_v22 = vpop.f32.mrf.mxu0 }
 0x262   : > { %v15451_v24 = vpop.f32.mrf.mxu1  ;;  %v2353_v21 = vmax.f32 %v2340_v55, 0.0  ;;  %v2321_v38 = vadd.f32 %v2275_v63, %v2135_v30  ;;  %v1938_v22 = vadd.f32 %v18002_v29, %v18012_v10 }
 0x263   : > { %v2094_v7 = vpop.f32.mrf.mxu0  ;;  %v2379_v53 = vld [vmem:[#allocation3] sm:$0xff] }
 0x264   : > { %v2288_v52 = vpop.f32.mrf.mxu1  ;;  %2367 = vst.msk [vmem:[#allocation3 + $0x10] sm:$0xff] %vm2364_vm2, %v2353_v21  ;;  %v2341_v51 = vadd.f32 %v18029_v54, %v2321_v38  ;;  %v2136_v39 = vadd.f32 %v2094_v7, %v1922_v19 }
 0x265   : > { %v15406_v9 = vpop.f32.mrf.mxu0 }
 0x266   : > { %v15454_v26 = vpop.f32.mrf.mxu1  ;;  %v2354_v61 = vmax.f32 %v2341_v51, 0.0  ;;  %v2322_v62 = vadd.f32 %v2280_v57, %v2136_v39  ;;  %v1933_v57 = vadd.f32 %v17998_v20, %v18008_v17  ;;  %v15950_v51 = vld [vmem:[%s21474_s5 + $0x48] sm:$0xff]   ;;  %v15955_v9 = vld [vmem:[%s21474_s5 + $0x60] sm:$0xff]  }
 0x267   : > { %v2097_v0 = vpop.f32.mrf.mxu0  ;;  %v2380_v35 = vld [vmem:[#allocation3 + $0x8] sm:$0xff] }
 0x268   : > { %v2291_v13 = vpop.f32.mrf.mxu1  ;;  %2368 = vst.msk [vmem:[#allocation3 + $0x18] sm:$0xff] %vm2364_vm2, %v2354_v61  ;;  %v2342_v14 = vadd.f32 %v18029_v54, %v2322_v62  ;;  %v2137_v42 = vadd.f32 %v2097_v0, %v1925_v28  ;;  %v2392_v23 = vpack.c.bf16 %v2380_v35, %v2379_v53  ;;  %v2407_v1 = vld [vmem:[#allocation3 + $0x1] sm:$0xff]  ;;  %v1941_v61 = vadd.f32 %v18006_v34, %v18016_v49 }
 0x269   : > { %v15407_v25 = vpop.f32.mrf.mxu0 }
 0x26a   : > { %v15455_v2 = vpop.f32.mrf.mxu1  ;;  %v2355_v27 = vmax.f32 %v2342_v14, 0.0  ;;  %v2323_v4 = vadd.f32 %v2283_v48, %v2137_v42  ;;  %15513 = vmatmul.mubr.msk.bf16.vlgmr.msra.gmra.mxu1 %vm2364_vm2, %v2392_v23  ;;  %v15954_v48 = vld [vmem:[%s21474_s5 + $0x68] sm:$0xff]   ;;  %v15953_v14 = vld [vmem:[%s21474_s5 + $0x40] sm:$0xff]  }
 0x26b   : > { %v2102_v63 = vpop.f32.mrf.mxu0  ;;  %v2408_v58 = vld [vmem:[#allocation3 + $0x9] sm:$0xff]  ;;  %15516 = vmatprep.mubr.msk.bf16.mxu1 %vm17248_vm1, %v21494_v43  ;;  %15577 = vmatpush3.bf16.msra.mxu1 %v15951_v18  ;;  %v1946_v2 = vadd.f32 %v18010_v3, %v18018_v31 }
 0x26c   : > { %v2296_v37 = vpop.f32.mrf.mxu1  ;;  %2369 = vst.msk [vmem:[#allocation3 + $0x20] sm:$0xff] %vm2364_vm2, %v2355_v27  ;;  %v2343_v41 = vadd.f32 %v18029_v54, %v2323_v4  ;;  %v2138_v59 = vadd.f32 %v2102_v63, %v1930_v32  ;;  %v2420_v56 = vpack.c.bf16 %v2408_v58, %v2407_v1  ;;  %15578 = vmatprep.subr.bf16.mxu1 %v21494_v43  ;;  %v2381_v15 = vld [vmem:[#allocation3 + $0x10] sm:$0xff] }
 0x26d   : > { %v15410_v6 = vpop.f32.mrf.mxu0 }
 0x26e   : > { %v15458_v8 = vpop.f32.mrf.mxu1  ;;  %v2356_v36 = vmax.f32 %v2343_v41, 0.0  ;;  %v2324_v16 = vadd.f32 %v2288_v52, %v2138_v59  ;;  %15477 = vmatmul.mubr.msk.bf16.vlgmr.msra.gmra.mxu0 %vm2364_vm2, %v2420_v56  ;;  %v1949_v59 = vadd.f32 %v18014_v12, %v18022_v50  ;;  %v1954_v12 = vadd.f32 %v18020_v33, %v18024_v40 }
 0x26f   : > { %v2105_v11 = vpop.f32.mrf.mxu0  ;;  %15541 = vmatpush3.bf16.msra.mxu0 %v15948_v45  ;;  %v2382_v5 = vld [vmem:[#allocation3 + $0x18] sm:$0xff]  ;;  %15480 = vmatprep.mubr.msk.bf16.mxu0 %vm17248_vm1, %v21494_v43 }
 0x270   : > { %v2299_v47 = vpop.f32.mrf.mxu1  ;;  %2370 = vst.msk [vmem:[#allocation3 + $0x28] sm:$0xff] %vm2364_vm2, %v2356_v36  ;;  %v2344_v20 = vadd.f32 %v18029_v54, %v2324_v16  ;;  %v2139_v17 = vadd.f32 %v2105_v11, %v1933_v57  ;;  %v2393_v46 = vpack.c.bf16 %v2382_v5, %v2381_v15  ;;  %15542 = vmatprep.subr.bf16.mxu0 %v21494_v43  ;;  %v2409_v38 = vld [vmem:[#allocation3 + $0x11] sm:$0xff] }
 0x271   : > { %15579 = vmatpush3.bf16.msra.mxu1 %v15952_v60  ;;  %v15411_v55 = vpop.f32.mrf.mxu0 }
 0x272   : > { %v15459_v30 = vpop.f32.mrf.mxu1  ;;  %15580 = vmatprep.subr.bf16.mxu1 %v21494_v43  ;;  %v2357_v24 = vmax.f32 %v2344_v20, 0.0  ;;  %v2325_v19 = vadd.f32 %v2291_v13, %v2139_v17  ;;  %15517 = vmatmul.mubr.msk.bf16.gmra.mxu1 %vm2364_vm2, %v2393_v46 }
 0x273   : > { %v2110_v21 = vpop.f32.mrf.mxu0  ;;  %v2410_v7 = vld [vmem:[#allocation3 + $0x19] sm:$0xff]  ;;  %15520 = vmatprep.mubr.msk.bf16.mxu1 %vm17248_vm1, %v21494_v43  ;;  %15543 = vmatpush3.bf16.msra.mxu0 %v15949_v44 }
 0x274   : > { %v2304_v52 = vpop.f32.mrf.mxu1  ;;  %2371 = vst.msk [vmem:[#allocation3 + $0x30] sm:$0xff] %vm2364_vm2, %v2357_v24  ;;  %v2345_v29 = vadd.f32 %v18029_v54, %v2325_v19  ;;  %v2140_v10 = vadd.f32 %v2110_v21, %v1938_v22  ;;  %v2421_v39 = vpack.c.bf16 %v2410_v7, %v2409_v38  ;;  %15544 = vmatprep.subr.bf16.mxu0 %v21494_v43  ;;  %v2383_v35 = vld [vmem:[#allocation3 + $0x20] sm:$0xff] }
 0x275   : > { %15581 = vmatpush3.bf16.msra.mxu1 %v15954_v48  ;;  %v15414_v26 = vpop.f32.mrf.mxu0 }
 0x276   : > { %v15462_v28 = vpop.f32.mrf.mxu1  ;;  %15582 = vmatprep.subr.bf16.mxu1 %v21494_v43  ;;  %v2358_v62 = vmax.f32 %v2345_v29, 0.0  ;;  %v2326_v0 = vadd.f32 %v2296_v37, %v2140_v10  ;;  %15481 = vmatmul.mubr.msk.bf16.gmra.mxu0 %vm2364_vm2, %v2421_v39 }
 0x277   : > { %v2113_v53 = vpop.f32.mrf.mxu0  ;;  %v2384_v13 = vld [vmem:[#allocation3 + $0x28] sm:$0xff]  ;;  %15484 = vmatprep.mubr.msk.bf16.mxu0 %vm17248_vm1, %v21494_v43  ;;  %15545 = vmatpush3.bf16.msra.mxu0 %v15950_v51 }
 0x278   : > { %v2307_v18 = vpop.f32.mrf.mxu1  ;;  %2372 = vst.msk [vmem:[#allocation3 + $0x38] sm:$0xff] %vm2364_vm2, %v2358_v62  ;;  %v2346_v34 = vadd.f32 %v18029_v54, %v2326_v0  ;;  %v2141_v49 = vadd.f32 %v2113_v53, %v1941_v61  ;;  %v2394_v42 = vpack.c.bf16 %v2384_v13, %v2383_v35  ;;  %15546 = vmatprep.subr.bf16.mxu0 %v21494_v43  ;;  %v2411_v63 = vld [vmem:[#allocation3 + $0x21] sm:$0xff] }
 0x279   : > { %15583 = vmatpush3.bf16.msra.mxu1 %v15955_v9  ;;  %v15415_v23 = vpop.f32.mrf.mxu0 }
 0x27a   : > { %v15463_v25 = vpop.f32.mrf.mxu1  ;;  %15648 = vmatprep.subr.bf16.mxu1 %v21494_v43  ;;  %v2359_v32 = vmax.f32 %v2346_v34, 0.0  ;;  %v2327_v27 = vadd.f32 %v2299_v47, %v2141_v49  ;;  %15521 = vmatmul.mubr.msk.bf16.gmra.mxu1 %vm2364_vm2, %v2394_v42  ;;  %v15959_v34 = vld [vmem:[%s21474_s5 + $0xb8] sm:$0xff]  }
 0x27b   : > { %v2118_v4 = vpop.f32.mrf.mxu0  ;;  %v2412_v1 = vld [vmem:[#allocation3 + $0x29] sm:$0xff]  ;;  %15524 = vmatprep.mubr.msk.bf16.mxu1 %vm17248_vm1, %v21494_v43  ;;  %15547 = vmatpush3.bf16.msra.mxu0 %v15953_v14 }
 0x27c   : > { %v2312_v58 = vpop.f32.mrf.mxu1  ;;  %2373 = vst.msk [vmem:[#allocation3 + $0x40] sm:$0xff] %vm2364_vm2, %v2359_v32  ;;  %v2347_v37 = vadd.f32 %v18029_v54, %v2327_v27  ;;  %v2142_v45 = vadd.f32 %v2118_v4, %v1946_v2  ;;  %v2422_v41 = vpack.c.bf16 %v2412_v1, %v2411_v63  ;;  %15612 = vmatprep.subr.bf16.mxu0 %v21494_v43  ;;  %v2385_v8 = vld [vmem:[#allocation3 + $0x30] sm:$0xff]  ;;  %v2702_v42 = vld [vmem:[#allocation3 + $0x2] sm:$0xff]  ;;  %v2879_v27 = vld [vmem:[#allocation3 + $0x1a] sm:$0xff] }
 0x27d   : > { %v15418_v3 = vpop.f32.mrf.mxu0  ;;  %v2877_v14 = vld [vmem:[#allocation3 + $0xa] sm:$0xff]  ;;  %v15960_v2 = vld [vmem:[%s21474_s5 + $0xb0] sm:$0xff]   ;;  %v15962_v1 = vld [vmem:[%s21474_s5 + $0xa8] sm:$0xff]  }
 0x27e   : > { %v15466_v31 = vpop.f32.mrf.mxu1  ;;  %v2360_v56 = vmax.f32 %v2347_v37, 0.0  ;;  %v2328_v60 = vadd.f32 %v2304_v52, %v2142_v45  ;;  %15485 = vmatmul.mubr.msk.bf16.gmra.mxu0 %vm2364_vm2, %v2422_v41  ;;  %v15956_v23 = vld [vmem:[%s21474_s5 + $0x98] sm:$0xff]   ;;  %v2715_v25 = vpack.c.bf16 %v2877_v14, %v2702_v42  ;;  %v15957_v4 = vld [vmem:[%s21474_s5 + $0x90] sm:$0xff]   ;;  %v15963_v45 = vld [vmem:[%s21474_s5 + $0xa0] sm:$0xff]  }
 0x27f   : > { %v2121_v6 = vpop.f32.mrf.mxu0  ;;  %v2386_v57 = vld [vmem:[#allocation3 + $0x38] sm:$0xff]  ;;  %15488 = vmatprep.mubr.msk.bf16.mxu0 %vm17248_vm1, %v21494_v43  ;;  %v2880_v32 = vld [vmem:[#allocation3 + $0x22] sm:$0xff]  ;;  %v2881_v3 = vld [vmem:[#allocation3 + $0x2a] sm:$0xff] }
 0x280   : > { %v2315_v36 = vpop.f32.mrf.mxu1  ;;  %2374 = vst.msk [vmem:[#allocation3 + $0x48] sm:$0xff] %vm2364_vm2, %v2360_v56  ;;  %v2348_v16 = vadd.f32 %v18029_v54, %v2328_v60  ;;  %v2143_v11 = vadd.f32 %v2121_v6, %v1949_v59  ;;  %v2395_v15 = vpack.c.bf16 %v2386_v57, %v2385_v8  ;;  %v2413_v17 = vld [vmem:[#allocation3 + $0x31] sm:$0xff]  ;;  %v2891_v63 = vpack.c.bf16 %v2880_v32, %v2879_v27 }
 0x281   : > { %v15419_v5 = vpop.f32.mrf.mxu0  ;;  %v2882_v41 = vld [vmem:[#allocation3 + $0x32] sm:$0xff]  ;;  %v2717_v56 = vpack.c.bf16 %v2881_v3, %v2880_v32 }
 0x282   : > { %v15467_v47 = vpop.f32.mrf.mxu1  ;;  %v2361_v50 = vmax.f32 %v2348_v16, 0.0  ;;  %v2329_v44 = vadd.f32 %v2307_v18, %v2143_v11  ;;  %15525 = vmatmul.mubr.msk.bf16.gmra.mxu1 %vm2364_vm2, %v2395_v15  ;;  %v2878_v18 = vld [vmem:[#allocation3 + $0x12] sm:$0xff]  ;;  %v2892_v59 = vpack.c.bf16 %v2882_v41, %v2881_v3  ;;  %v3239_v3 = vld [vmem:[#allocation3 + $0x6c] sm:$0xf] }
 0x283   : > { %v2126_v20 = vpop.f32.mrf.mxu0  ;;  %v2414_v46 = vld [vmem:[#allocation3 + $0x39] sm:$0xff]  ;;  %15528 = vmatprep.mubr.msk.bf16.mxu1 %vm17248_vm1, %v21494_v43  ;;  %v2890_v49 = vpack.c.bf16 %v2878_v18, %v2877_v14  ;;  %v2716_v37 = vpack.c.bf16 %v2879_v27, %v2878_v18  ;;  %v15961_v31 = vld [vmem:[%s21474_s5 + $0x80] sm:$0xff]  }
 0x284   : > { %2375 = vst.msk [vmem:[#allocation3 + $0x50] sm:$0xff] %vm2364_vm2, %v2361_v50  ;;  %v2349_v48 = vadd.f32 %v18029_v54, %v2329_v44  ;;  %v2144_v55 = vadd.f32 %v2126_v20, %v1954_v12  ;;  %v2423_v30 = vpack.c.bf16 %v2414_v46, %v2413_v17  ;;  %v2387_v40 = vld [vmem:[#allocation3 + $0x40] sm:$0xff]  ;;  %v2889_v50 = vld [vmem:[#allocation3 + $0x6a] sm:$0xf] }
 0x285   : > { %v15422_v22 = vpop.f32.mrf.mxu0  ;;  %v2883_v6 = vld [vmem:[#allocation3 + $0x3a] sm:$0xff]  ;;  %v2896_v20 = vpack.c.bf16 %v2889_v50, %v2889_v50 }
 0x286   : > { %v2362_v24 = vmax.f32 %v2349_v48, 0.0  ;;  %v2330_v19 = vadd.f32 %v2312_v58, %v2144_v55  ;;  %15489 = vmatmul.mubr.msk.bf16.gmra.mxu0 %vm2364_vm2, %v2423_v30  ;;  %v15958_v58 = vld [vmem:[%s21474_s5 + $0x88] sm:$0xff]   ;;  %v2718_v57 = vpack.c.bf16 %v2883_v6, %v2882_v41  ;;  %v3227_v55 = vld [vmem:[#allocation3 + $0xc] sm:$0xff] }
 0x287   : > { %v2129_v33 = vpop.f32.mrf.mxu0  ;;  %v2388_v21 = vld [vmem:[#allocation3 + $0x48] sm:$0xff]  ;;  %15492 = vmatprep.mubr.msk.bf16.mxu0 %vm17248_vm1, %v21494_v43  ;;  %v18223_v48 = vld [vmem:[#allocation3 + $0x14] sm:$0xff]  ;;  %v18290_v14 = vld [vmem:[#allocation3 + $0x3c] sm:$0xff] }
 0x288   : > { %2376 = vst.msk [vmem:[#allocation3 + $0x58] sm:$0xff] %vm2364_vm2, %v2362_v24  ;;  %v2350_v38 = vadd.f32 %v18029_v54, %v2330_v19  ;;  %v2396_v7 = vpack.c.bf16 %v2388_v21, %v2387_v40  ;;  %v2415_v29 = vld [vmem:[#allocation3 + $0x41] sm:$0xff]  ;;  %v3240_v22 = vpack.c.bf16 %v18223_v48, %v3227_v55  ;;  %v3053_v24 = vld [vmem:[#allocation3 + $0x13] sm:$0xff]  ;;  %v3052_v19 = vld [vmem:[#allocation3 + $0xb] sm:$0xff] }
 0x289   : > { %v15423_v52 = vpop.f32.mrf.mxu0  ;;  %v2884_v60 = vld [vmem:[#allocation3 + $0x42] sm:$0xff]  ;;  %v3065_v40 = vpack.c.bf16 %v3053_v24, %v3052_v19 }
 0x28a   : > { %v2363_v51 = vmax.f32 %v2350_v38, 0.0  ;;  %15529 = vmatmul.mubr.msk.bf16.gmra.mxu1 %vm2364_vm2, %v2396_v7  ;;  %v2893_v8 = vpack.c.bf16 %v2884_v60, %v2883_v6  ;;  %v15967_v30 = vld [vmem:[%s21474_s5 + $0xf8] sm:$0xff]   ;;  %v15968_v21 = vld [vmem:[%s21474_s5 + $0xf0] sm:$0xff]  }
 0x28b   : > { %v2416_v10 = vld [vmem:[#allocation3 + $0x49] sm:$0xff]  ;;  %15532 = vmatprep.mubr.msk.bf16.mxu1 %vm17248_vm1, %v21494_v43  ;;  %v18245_v7 = vld [vmem:[#allocation3 + $0x1c] sm:$0xff] }
 0x28c   : > { %2378 = vst.msk [vmem:[#allocation3 + $0x60] sm:$0xf] %vm2377_vm3, %v2363_v51  ;;  %v2424_v39 = vpack.c.bf16 %v2416_v10, %v2415_v29  ;;  %v2389_v9 = vld [vmem:[#allocation3 + $0x50] sm:$0xff]  ;;  %v15964_v33 = vld [vmem:[%s21474_s5 + $0xd8] sm:$0xff]   ;;  %v15965_v52 = vld [vmem:[%s21474_s5 + $0xd0] sm:$0xff]  }
 0x28d   : > { %v2885_v16 = vld [vmem:[#allocation3 + $0x4a] sm:$0xff]  ;;  %v15970_v29 = vld [vmem:[%s21474_s5 + $0xe8] sm:$0xff]  }
 0x28e   : > { %15493 = vmatmul.mubr.msk.bf16.gmra.mxu0 %vm2364_vm2, %v2424_v39  ;;  %v2719_v15 = vpack.c.bf16 %v2885_v16, %v2884_v60  ;;  %v18242_v38 = vld [vmem:[#allocation3 + $0x24] sm:$0xff]  ;;  %v3054_v39 = vld [vmem:[#allocation3 + $0x1b] sm:$0xff]  ;;  %v3584_v55 = vld [vmem:[#allocation3 + $0x4d] sm:$0xff] }
 0x28f   : > { %v2390_v26 = vld [vmem:[#allocation3 + $0x58] sm:$0xff]  ;;  %15496 = vmatprep.mubr.msk.bf16.mxu0 %vm17248_vm1, %v21494_v43  ;;  %v3241_v51 = vpack.c.bf16 %v18242_v38, %v18245_v7  ;;  %v3055_v10 = vld [vmem:[#allocation3 + $0x23] sm:$0xff] }
 0x290   : > { %v2397_v54 = vpack.c.bf16 %v2390_v26, %v2389_v9  ;;  %v2417_v28 = vld [vmem:[#allocation3 + $0x51] sm:$0xff]  ;;  %v3066_v26 = vpack.c.bf16 %v3055_v10, %v3054_v39  ;;  %v18287_v18 = vld [vmem:[#allocation3 + $0x44] sm:$0xff]  ;;  %v3058_v42 = vld [vmem:[#allocation3 + $0x3b] sm:$0xff] }
 0x291   : > { %v2886_v36 = vld [vmem:[#allocation3 + $0x52] sm:$0xff]  ;;  %v3578_v6 = vld [vmem:[#allocation3 + $0x1d] sm:$0xff] }
 0x292   : > { %15533 = vmatmul.mubr.msk.bf16.gmra.mxu1 %vm2364_vm2, %v2397_v54  ;;  %v2894_v11 = vpack.c.bf16 %v2886_v36, %v2885_v16  ;;  %v15966_v9 = vld [vmem:[%s21474_s5 + $0xc8] sm:$0xff]   ;;  %v15971_v54 = vld [vmem:[%s21474_s5 + $0xe0] sm:$0xff]   ;;  %v3415_v16 = vpack.c.bf16 %v18245_v7, %v18223_v48 }
 0x293   : > { %v2418_v61 = vld [vmem:[#allocation3 + $0x59] sm:$0xff]  ;;  %15536 = vmatprep.mubr.msk.bf16.mxu1 %vm17248_vm1, %v21494_v43  ;;  %v2419_v35 = vld [vmem:[#allocation3 + $0x61] sm:$0xf] }
 0x294   : > { %v2425_v62 = vpack.c.bf16 %v2418_v61, %v2417_v28  ;;  %v2391_v0 = vld [vmem:[#allocation3 + $0x60] sm:$0xf]  ;;  %v2426_v13 = vpack.c.bf16 %v2419_v35, %v2419_v35  ;;  %v18269_v28 = vld [vmem:[#allocation3 + $0x34] sm:$0xff]  ;;  %v18273_v61 = vld [vmem:[#allocation3 + $0x2c] sm:$0xff] }
 0x295   : > { %v2398_v53 = vpack.c.bf16 %v2391_v0, %v2391_v0  ;;  %v2887_v5 = vld [vmem:[#allocation3 + $0x5a] sm:$0xff]  ;;  %v2888_v47 = vld [vmem:[#allocation3 + $0x62] sm:$0xff]  ;;  %v3242_v0 = vpack.c.bf16 %v18269_v28, %v18273_v61  ;;  %v3056_v35 = vld [vmem:[#allocation3 + $0x2b] sm:$0xff]  ;;  %v3416_v50 = vpack.c.bf16 %v18273_v61, %v18242_v38  ;;  %v3417_v48 = vpack.c.bf16 %v18290_v14, %v18269_v28 }
 0x296   : > { %15497 = vmatmul.mubr.msk.bf16.gmra.mxu0 %vm2364_vm2, %v2425_v62  ;;  %v2895_v12 = vpack.c.bf16 %v2888_v47, %v2887_v5  ;;  %v2720_v44 = vpack.c.bf16 %v2887_v5, %v2886_v36  ;;  %v2714_v17 = vld [vmem:[#allocation3 + $0x62] sm:$0xf]  ;;  %v15969_v62 = vld [vmem:[%s21474_s5 + $0xc0] sm:$0xff]   ;;  %v15972_v36 = vld [vmem:[%s21474_s5 + $0x118] sm:$0xff]  }
 0x297   : > { %15500 = vmatprep.mubr.msk.bf16.mxu0 %vm17248_vm1, %v21494_v43  ;;  %v2721_v46 = vpack.c.bf16 %v2714_v17, %v2714_v17  ;;  %v3061_v27 = vld [vmem:[#allocation3 + $0x53] sm:$0xff]  ;;  %v3063_v41 = vld [vmem:[#allocation3 + $0x63] sm:$0xff] }
 0x298   : > { %v15973_v5 = vld [vmem:[%s21474_s5 + $0x110] sm:$0xff]   ;;  %v15975_v17 = vld [vmem:[%s21474_s5 + $0x100] sm:$0xff]  }
 0x299   : > { %v3588_v28 = vld [vmem:[#allocation3 + $0x6d] sm:$0xff] }
 0x29a   : > { %15537 = vmatmul.mubr.msk.bf16.gmra.mxu1 %vm2364_vm2, %v2398_v53  ;;  %v3057_v53 = vld [vmem:[#allocation3 + $0x33] sm:$0xff] }
 0x29b   : > { %15584 = vmatprep.mubr.msk.bf16.mxu1 %vm17248_vm1, %v21494_v43 }
 0x29e   : > { %15501 = vmatmul.mubr.msk.bf16.gmra.mxu0 %vm2364_vm2, %v2426_v13  ;;  %v3067_v13 = vpack.c.bf16 %v3057_v53, %v3056_v35 }
 0x29f   : > { %15548 = vmatprep.mubr.msk.bf16.mxu0 %vm17248_vm1, %v21494_v43 }
 0x2a2   : > { %15585 = vmatmul.mubr.msk.bf16.vlgmr.msra.gmra.mxu1 %vm2364_vm2, %v2890_v49  ;;  %v3059_v49 = vld [vmem:[#allocation3 + $0x43] sm:$0xff] }
 0x2a3   : > { %15588 = vmatprep.mubr.msk.bf16.mxu1 %vm17248_vm1, %v21494_v43  ;;  %15649 = vmatpush3.bf16.msra.mxu1 %v15959_v34  ;;  %v3243_v34 = vpack.c.bf16 %v18287_v18, %v18290_v14  ;;  %v3413_v14 = vld [vmem:[#allocation3 + $0x6c] sm:$0xff] }
 0x2a4   : > { %15650 = vmatprep.subr.bf16.mxu1 %v21494_v43 }
 0x2a6   : > { %15549 = vmatmul.mubr.msk.bf16.vlgmr.msra.gmra.mxu0 %vm2364_vm2, %v2715_v25  ;;  %v18299_v25 = vld [vmem:[#allocation3 + $0x54] sm:$0xff] }
 0x2a7   : > { %15613 = vmatpush3.bf16.msra.mxu0 %v15956_v23  ;;  %15552 = vmatprep.mubr.msk.bf16.mxu0 %vm17248_vm1, %v21494_v43  ;;  %v3068_v23 = vpack.c.bf16 %v3059_v49, %v3058_v42 }
 0x2a8   : > { %15614 = vmatprep.subr.bf16.mxu0 %v21494_v43  ;;  %15651 = vmatpush3.bf16.msra.mxu1 %v15960_v2  ;;  %v18302_v2 = vld [vmem:[#allocation3 + $0x4c] sm:$0xff] }
 0x2a9   : > { %15652 = vmatprep.subr.bf16.mxu1 %v21494_v43  ;;  %v3244_v32 = vpack.c.bf16 %v18299_v25, %v18302_v2 }
 0x2aa   : > { %15589 = vmatmul.mubr.msk.bf16.gmra.mxu1 %vm2364_vm2, %v2891_v63 }
 0x2ab   : > { %15592 = vmatprep.mubr.msk.bf16.mxu1 %vm17248_vm1, %v21494_v43  ;;  %15615 = vmatpush3.bf16.msra.mxu0 %v15957_v4  ;;  %v3060_v4 = vld [vmem:[#allocation3 + $0x4b] sm:$0xff] }
 0x2ac   : > { %15616 = vmatprep.subr.bf16.mxu0 %v21494_v43  ;;  %15653 = vmatpush3.bf16.msra.mxu1 %v15962_v1  ;;  %v3069_v63 = vpack.c.bf16 %v3061_v27, %v3060_v4  ;;  %v18311_v1 = vld [vmem:[#allocation3 + $0x5c] sm:$0xff] }
 0x2ad   : > { %15654 = vmatprep.subr.bf16.mxu1 %v21494_v43 }
 0x2ae   : > { %15553 = vmatmul.mubr.msk.bf16.gmra.mxu0 %vm2364_vm2, %v2716_v37 }
 0x2af   : > { %15556 = vmatprep.mubr.msk.bf16.mxu0 %vm17248_vm1, %v21494_v43  ;;  %15617 = vmatpush3.bf16.msra.mxu0 %v15958_v58  ;;  %v18313_v58 = vld [vmem:[#allocation3 + $0x64] sm:$0xff] }
 0x2b0   : > { %15618 = vmatprep.subr.bf16.mxu0 %v21494_v43  ;;  %15655 = vmatpush3.bf16.msra.mxu1 %v15963_v45  ;;  %v3245_v37 = vpack.c.bf16 %v18313_v58, %v18311_v1  ;;  %v3062_v45 = vld [vmem:[#allocation3 + $0x5b] sm:$0xff] }
 0x2b1   : > { %15720 = vmatprep.subr.bf16.mxu1 %v21494_v43 }
 0x2b2   : > { %15593 = vmatmul.mubr.msk.bf16.gmra.mxu1 %vm2364_vm2, %v2892_v59  ;;  %v3246_v59 = vpack.c.bf16 %v3239_v3, %v3239_v3 }
 0x2b3   : > { %15596 = vmatprep.mubr.msk.bf16.mxu1 %vm17248_vm1, %v21494_v43  ;;  %15619 = vmatpush3.bf16.msra.mxu0 %v15961_v31  ;;  %v3070_v31 = vpack.c.bf16 %v3063_v41, %v3062_v45 }
 0x2b4   : > { %15684 = vmatprep.subr.bf16.mxu0 %v21494_v43 }
 0x2b6   : > { %15557 = vmatmul.mubr.msk.bf16.gmra.mxu0 %vm2364_vm2, %v2717_v56  ;;  %v3064_v56 = vld [vmem:[#allocation3 + $0x6b] sm:$0xf] }
 0x2b7   : > { %15560 = vmatprep.mubr.msk.bf16.mxu0 %vm17248_vm1, %v21494_v43  ;;  %v3071_v60 = vpack.c.bf16 %v3064_v56, %v3064_v56 }
 0x2ba   : > { %15597 = vmatmul.mubr.msk.bf16.gmra.mxu1 %vm2364_vm2, %v2893_v8  ;;  %v3577_v8 = vld [vmem:[#allocation3 + $0x15] sm:$0xff] }
 0x2bb   : > { %15600 = vmatprep.mubr.msk.bf16.mxu1 %vm17248_vm1, %v21494_v43 }
 0x2be   : > { %15561 = vmatmul.mubr.msk.bf16.gmra.mxu0 %vm2364_vm2, %v2718_v57  ;;  %v3590_v57 = vpack.c.bf16 %v3578_v6, %v3577_v8 }
 0x2bf   : > { %15564 = vmatprep.mubr.msk.bf16.mxu0 %vm17248_vm1, %v21494_v43 }
 0x2c2   : > { %15601 = vmatmul.mubr.msk.bf16.gmra.mxu1 %vm2364_vm2, %v2894_v11  ;;  %v3580_v11 = vld [vmem:[#allocation3 + $0x2d] sm:$0xff] }
 0x2c3   : > { %15604 = vmatprep.mubr.msk.bf16.mxu1 %vm17248_vm1, %v21494_v43 }
 0x2c6   : > { %15565 = vmatmul.mubr.msk.bf16.gmra.mxu0 %vm2364_vm2, %v2719_v15  ;;  %v3579_v15 = vld [vmem:[#allocation3 + $0x25] sm:$0xff] }
 0x2c7   : > { %15568 = vmatprep.mubr.msk.bf16.mxu0 %vm17248_vm1, %v21494_v43  ;;  %v3591_v47 = vpack.c.bf16 %v3580_v11, %v3579_v15 }
 0x2ca   : > { %15605 = vmatmul.mubr.msk.bf16.gmra.mxu1 %vm2364_vm2, %v2895_v12  ;;  %v15974_v12 = vld [vmem:[%s21474_s5 + $0x108] sm:$0xff]  }
 0x2cb   : > { %15608 = vmatprep.mubr.msk.bf16.mxu1 %vm17248_vm1, %v21494_v43 }
 0x2ce   : > { %15569 = vmatmul.mubr.msk.bf16.gmra.mxu0 %vm2364_vm2, %v2720_v44  ;;  %v3582_v44 = vld [vmem:[#allocation3 + $0x3d] sm:$0xff] }
 0x2cf   : > { %15572 = vmatprep.mubr.msk.bf16.mxu0 %vm17248_vm1, %v21494_v43 }
 0x2d2   : > { %15609 = vmatmul.mubr.msk.bf16.gmra.mxu1 %vm2364_vm2, %v2896_v20  ;;  %v3581_v20 = vld [vmem:[#allocation3 + $0x35] sm:$0xff] }
 0x2d3   : > { %15656 = vmatprep.mubr.msk.bf16.mxu1 %vm17248_vm1, %v21494_v43 }
 0x2d6   : > { %15573 = vmatmul.mubr.msk.bf16.gmra.mxu0 %vm2364_vm2, %v2721_v46  ;;  %v3592_v46 = vpack.c.bf16 %v3582_v44, %v3581_v20  ;;  %v3752_v44 = vld [vmem:[#allocation3 + $0x16] sm:$0xff] }
 0x2d7   : > { %15620 = vmatprep.mubr.msk.bf16.mxu0 %vm17248_vm1, %v21494_v43 }
 0x2da   : > { %15657 = vmatmul.mubr.msk.bf16.vlgmr.msra.gmra.mxu1 %vm2364_vm2, %v3240_v22 }
 0x2db   : > { %15660 = vmatprep.mubr.msk.bf16.mxu1 %vm17248_vm1, %v21494_v43  ;;  %15721 = vmatpush3.bf16.msra.mxu1 %v15967_v30  ;;  %v3583_v30 = vld [vmem:[#allocation3 + $0x45] sm:$0xff] }
 0x2dc   : > { %15722 = vmatprep.subr.bf16.mxu1 %v21494_v43  ;;  %v3593_v22 = vpack.c.bf16 %v3584_v55, %v3583_v30 }
 0x2de   : > { %15621 = vmatmul.mubr.msk.bf16.vlgmr.msra.gmra.mxu0 %vm2364_vm2, %v3065_v40  ;;  %v3586_v40 = vld [vmem:[#allocation3 + $0x5d] sm:$0xff] }
 0x2df   : > { %15685 = vmatpush3.bf16.msra.mxu0 %v15964_v33  ;;  %15624 = vmatprep.mubr.msk.bf16.mxu0 %vm17248_vm1, %v21494_v43  ;;  %v3418_v33 = vpack.c.bf16 %v18302_v2, %v18287_v18  ;;  %v3420_v2 = vpack.c.bf16 %v3413_v14, %v18313_v58  ;;  %v3414_v58 = vld [vmem:[#allocation3 + $0x74] sm:$0xf] }
 0x2e0   : > { %15686 = vmatprep.subr.bf16.mxu0 %v21494_v43  ;;  %15723 = vmatpush3.bf16.msra.mxu1 %v15968_v21  ;;  %v3421_v56 = vpack.c.bf16 %v3414_v58, %v3414_v58 }
 0x2e1   : > { %15724 = vmatprep.subr.bf16.mxu1 %v21494_v43 }
 0x2e2   : > { %15661 = vmatmul.mubr.msk.bf16.gmra.mxu1 %vm2364_vm2, %v3241_v51 }
 0x2e3   : > { %15664 = vmatprep.mubr.msk.bf16.mxu1 %vm17248_vm1, %v21494_v43  ;;  %15687 = vmatpush3.bf16.msra.mxu0 %v15965_v52  ;;  %v3585_v52 = vld [vmem:[#allocation3 + $0x55] sm:$0xff] }
 0x2e4   : > { %15688 = vmatprep.subr.bf16.mxu0 %v21494_v43  ;;  %15725 = vmatpush3.bf16.msra.mxu1 %v15970_v29  ;;  %v3594_v10 = vpack.c.bf16 %v3586_v40, %v3585_v52 }
 0x2e5   : > { %15726 = vmatprep.subr.bf16.mxu1 %v21494_v43 }
 0x2e6   : > { %15625 = vmatmul.mubr.msk.bf16.gmra.mxu0 %vm2364_vm2, %v3066_v26 }
 0x2e7   : > { %15628 = vmatprep.mubr.msk.bf16.mxu0 %vm17248_vm1, %v21494_v43  ;;  %15689 = vmatpush3.bf16.msra.mxu0 %v15966_v9 }
 0x2e8   : > { %15690 = vmatprep.subr.bf16.mxu0 %v21494_v43  ;;  %15727 = vmatpush3.bf16.msra.mxu1 %v15971_v54  ;;  %v3587_v54 = vld [vmem:[#allocation3 + $0x65] sm:$0xff] }
 0x2ea   : > { %15665 = vmatmul.mubr.msk.bf16.gmra.mxu1 %vm2364_vm2, %v3242_v0  ;;  %v3419_v0 = vpack.c.bf16 %v18311_v1, %v18299_v25 }
 0x2eb   : > { %15668 = vmatprep.mubr.msk.bf16.mxu1 %vm17248_vm1, %v21494_v43  ;;  %15691 = vmatpush3.bf16.msra.mxu0 %v15969_v62 }
 0x2ec   : > { %15756 = vmatprep.subr.bf16.mxu0 %v21494_v43 }
 0x2ee   : > { %15629 = vmatmul.mubr.msk.bf16.gmra.mxu0 %vm2364_vm2, %v3067_v13  ;;  %v3595_v13 = vpack.c.bf16 %v3588_v28, %v3587_v54  ;;  %v3757_v54 = vld [vmem:[#allocation3 + $0x3e] sm:$0xff] }
 0x2ef   : > { %15632 = vmatprep.mubr.msk.bf16.mxu0 %vm17248_vm1, %v21494_v43 }
 0x2f2   : > { %15669 = vmatmul.mubr.msk.bf16.gmra.mxu1 %vm2364_vm2, %v3243_v34 }
 0x2f3   : > { %15672 = vmatprep.mubr.msk.bf16.mxu1 %vm17248_vm1, %v21494_v43 }
 0x2f6   : > { %15633 = vmatmul.mubr.msk.bf16.gmra.mxu0 %vm2364_vm2, %v3068_v23 }
 0x2f7   : > { %15636 = vmatprep.mubr.msk.bf16.mxu0 %vm17248_vm1, %v21494_v43 }
 0x2fa   : > { %15673 = vmatmul.mubr.msk.bf16.gmra.mxu1 %vm2364_vm2, %v3244_v32  ;;  %v3589_v32 = vld [vmem:[#allocation3 + $0x75] sm:$0xf] }
 0x2fb   : > { %15676 = vmatprep.mubr.msk.bf16.mxu1 %vm17248_vm1, %v21494_v43 }
 0x2fe   : > { %15637 = vmatmul.mubr.msk.bf16.gmra.mxu0 %vm2364_vm2, %v3069_v63 }
 0x2ff   : > { %15640 = vmatprep.mubr.msk.bf16.mxu0 %vm17248_vm1, %v21494_v43 }
 0x302   : > { %15677 = vmatmul.mubr.msk.bf16.gmra.mxu1 %vm2364_vm2, %v3245_v37  ;;  %v3596_v37 = vpack.c.bf16 %v3589_v32, %v3589_v32  ;;  %v3758_v32 = vld [vmem:[#allocation3 + $0x46] sm:$0xff] }
 0x303   : > { %15680 = vmatprep.mubr.msk.bf16.mxu1 %vm17248_vm1, %v21494_v43 }
 0x306   : > { %15641 = vmatmul.mubr.msk.bf16.gmra.mxu0 %vm2364_vm2, %v3070_v31 }
 0x307   : > { %15644 = vmatprep.mubr.msk.bf16.mxu0 %vm17248_vm1, %v21494_v43 }
 0x30a   : > { %15681 = vmatmul.mubr.msk.bf16.gmra.mxu1 %vm2364_vm2, %v3246_v59 }
 0x30b   : > { %15728 = vmatprep.mubr.msk.bf16.mxu1 %vm17248_vm1, %v21494_v43 }
 0x30e   : > { %15645 = vmatmul.mubr.msk.bf16.gmra.mxu0 %vm2364_vm2, %v3071_v60 }
 0x30f   : > { %15692 = vmatprep.mubr.msk.bf16.mxu0 %vm17248_vm1, %v21494_v43 }
 0x312   : > { %15729 = vmatmul.mubr.msk.bf16.vlgmr.msra.gmra.mxu1 %vm2364_vm2, %v3590_v57 }
 0x313   : > { %15732 = vmatprep.mubr.msk.bf16.mxu1 %vm17248_vm1, %v21494_v43 }
 0x316   : > { %15693 = vmatmul.mubr.msk.bf16.vlgmr.msra.gmra.mxu0 %vm2364_vm2, %v3415_v16 }
 0x317   : > { %15757 = vmatpush3.bf16.msra.mxu0 %v15972_v36  ;;  %15696 = vmatprep.mubr.msk.bf16.mxu0 %vm17248_vm1, %v21494_v43 }
 0x318   : > { %15758 = vmatprep.subr.bf16.mxu0 %v21494_v43 }
 0x31a   : > { %15733 = vmatmul.mubr.msk.bf16.gmra.mxu1 %vm2364_vm2, %v3591_v47 }
 0x31b   : > { %15736 = vmatprep.mubr.msk.bf16.mxu1 %vm17248_vm1, %v21494_v43  ;;  %15759 = vmatpush3.bf16.msra.mxu0 %v15973_v5  ;;  %v3753_v5 = vld [vmem:[#allocation3 + $0x1e] sm:$0xff] }
 0x31c   : > { %15760 = vmatprep.subr.bf16.mxu0 %v21494_v43 }
 0x31e   : > { %15697 = vmatmul.mubr.msk.bf16.gmra.mxu0 %vm2364_vm2, %v3416_v50 }
 0x31f   : > { %15700 = vmatprep.mubr.msk.bf16.mxu0 %vm17248_vm1, %v21494_v43  ;;  %15761 = vmatpush3.bf16.msra.mxu0 %v15974_v12 }
 0x320   : > { %15762 = vmatprep.subr.bf16.mxu0 %v21494_v43 }
 0x322   : > { %15737 = vmatmul.mubr.msk.bf16.gmra.mxu1 %vm2364_vm2, %v3592_v46  ;;  %v3765_v46 = vpack.c.bf16 %v3753_v5, %v3752_v44 }
 0x323   : > { %15740 = vmatprep.mubr.msk.bf16.mxu1 %vm17248_vm1, %v21494_v43  ;;  %15763 = vmatpush3.bf16.msra.mxu0 %v15975_v17 }
 0x326   : > { %15701 = vmatmul.mubr.msk.bf16.gmra.mxu0 %vm2364_vm2, %v3417_v48 }
 0x327   : > { %15704 = vmatprep.mubr.msk.bf16.mxu0 %vm17248_vm1, %v21494_v43 }
 0x32a   : > { %v2648_v24 = vpop.f32.mrf.mxu1  ;;  %15741 = vmatmul.mubr.msk.bf16.gmra.mxu1 %vm2364_vm2, %v3593_v22 }
 0x32b   : > { %15744 = vmatprep.mubr.msk.bf16.mxu1 %vm17248_vm1, %v21494_v43 }
 0x32c   : > { %v15514_v19 = vpop.f32.mrf.mxu1 }
 0x32d   : > { %v3755_v19 = vld [vmem:[#allocation3 + $0x2e] sm:$0xff] }
 0x32e   : > { %v2515_v21 = vpop.f32.mrf.mxu0  ;;  %v2651_v38 = vpop.f32.mrf.mxu1  ;;  %15705 = vmatmul.mubr.msk.bf16.gmra.mxu0 %vm2364_vm2, %v3418_v33 }
 0x32f   : > { %v18377_v7 = vadd.f32 %v2648_v24, %v2515_v21  ;;  %15708 = vmatprep.mubr.msk.bf16.mxu0 %vm17248_vm1, %v21494_v43  ;;  %v3754_v21 = vld [vmem:[#allocation3 + $0x26] sm:$0xff] }
 0x330   : > { %v15478_v51 = vpop.f32.mrf.mxu0  ;;  %v15515_v29 = vpop.f32.mrf.mxu1 }
 0x331   : > { %v3766_v51 = vpack.c.bf16 %v3755_v19, %v3754_v21 }
 0x332   : > { %v2518_v39 = vpop.f32.mrf.mxu0  ;;  %v2656_v9 = vpop.f32.mrf.mxu1  ;;  %15745 = vmatmul.mubr.msk.bf16.gmra.mxu1 %vm2364_vm2, %v3594_v10 }
 0x333   : > { %v18382_v26 = vadd.f32 %v2651_v38, %v2518_v39  ;;  %15748 = vmatprep.mubr.msk.bf16.mxu1 %vm17248_vm1, %v21494_v43 }
 0x334   : > { %v15479_v61 = vpop.f32.mrf.mxu0  ;;  %v15518_v62 = vpop.f32.mrf.mxu1 }
 0x335   : > { %v3756_v62 = vld [vmem:[#allocation3 + $0x36] sm:$0xff] }
 0x336   : > { %v2523_v53 = vpop.f32.mrf.mxu0  ;;  %v2659_v35 = vpop.f32.mrf.mxu1  ;;  %15709 = vmatmul.mubr.msk.bf16.gmra.mxu0 %vm2364_vm2, %v3419_v0 }
 0x337   : > { %v18389_v18 = vadd.f32 %v2656_v9, %v2523_v53  ;;  %15712 = vmatprep.mubr.msk.bf16.mxu0 %vm17248_vm1, %v21494_v43 }
 0x338   : > { %v15482_v34 = vpop.f32.mrf.mxu0  ;;  %v15519_v49 = vpop.f32.mrf.mxu1 }
 0x33a   : > { %v2526_v42 = vpop.f32.mrf.mxu0  ;;  %v2664_v23 = vpop.f32.mrf.mxu1  ;;  %15749 = vmatmul.mubr.msk.bf16.gmra.mxu1 %vm2364_vm2, %v3595_v13 }
 0x33b   : > { %v18395_v25 = vadd.f32 %v2659_v35, %v2526_v42  ;;  %15752 = vmatprep.mubr.msk.bf16.mxu1 %vm17248_vm1, %v21494_v43  ;;  %v3767_v35 = vpack.c.bf16 %v3757_v54, %v3756_v62  ;;  %v3759_v42 = vld [vmem:[#allocation3 + $0x4e] sm:$0xff] }
 0x33c   : > { %v15483_v27 = vpop.f32.mrf.mxu0  ;;  %v15522_v4 = vpop.f32.mrf.mxu1 }
 0x33e   : > { %v2531_v63 = vpop.f32.mrf.mxu0  ;;  %v2667_v1 = vpop.f32.mrf.mxu1  ;;  %15713 = vmatmul.mubr.msk.bf16.gmra.mxu0 %vm2364_vm2, %v3420_v2 }
 0x33f   : > { %v18400_v45 = vadd.f32 %v2664_v23, %v2531_v63  ;;  %15716 = vmatprep.mubr.msk.bf16.mxu0 %vm17248_vm1, %v21494_v43  ;;  %v3768_v63 = vpack.c.bf16 %v3759_v42, %v3758_v32 }
 0x340   : > { %v15486_v41 = vpop.f32.mrf.mxu0  ;;  %v15523_v3 = vpop.f32.mrf.mxu1 }
 0x341   : > { %v15976_v41 = vld [vmem:[%s21476_s7 + $0xe0] ss:$16 sps:$4 sm:$0xff]   ;;  %v15978_v3 = vld [vmem:[%s21476_s7 + $0xe4] ss:$16 sps:$4 sm:$0xff]  }
 0x342   : > { %v2534_v31 = vpop.f32.mrf.mxu0  ;;  %v2672_v59 = vpop.f32.mrf.mxu1  ;;  %15753 = vmatmul.mubr.msk.bf16.gmra.mxu1 %vm2364_vm2, %v3596_v37  ;;  %4100 = vmatprep.subr.bf16.mxu1 %v15978_v3 }
 0x343   : > { %v18405_v60 = vadd.f32 %v2667_v1, %v2534_v31  ;;  %4101 = vmatpush1.bf16.msra.mxu1 %v15976_v41 }
 0x344   : > { %v15487_v6 = vpop.f32.mrf.mxu0  ;;  %v15526_v8 = vpop.f32.mrf.mxu1 }
 0x346   : > { %v2539_v57 = vpop.f32.mrf.mxu0  ;;  %v2675_v36 = vpop.f32.mrf.mxu1  ;;  %15717 = vmatmul.mubr.msk.bf16.gmra.mxu0 %vm2364_vm2, %v3421_v56  ;;  %v3761_v56 = vld [vmem:[#allocation3 + $0x5e] sm:$0xff] }
 0x347   : > { %v18408_v16 = vadd.f32 %v2672_v59, %v2539_v57  ;;  %15764 = vmatprep.mubr.msk.bf16.mxu0 %vm17248_vm1, %v21494_v43 }
 0x348   : > { %v15490_v11 = vpop.f32.mrf.mxu0  ;;  %v15527_v15 = vpop.f32.mrf.mxu1 }
 0x34a   : > { %v2542_v47 = vpop.f32.mrf.mxu0  ;;  %v2680_v12 = vpop.f32.mrf.mxu1 }
 0x34b   : > { %v18412_v50 = vadd.f32 %v2675_v36, %v2542_v47  ;;  %v3760_v36 = vld [vmem:[#allocation3 + $0x56] sm:$0xff] }
 0x34c   : > { %v15491_v20 = vpop.f32.mrf.mxu0  ;;  %v15530_v17 = vpop.f32.mrf.mxu1  ;;  %v3769_v5 = vpack.c.bf16 %v3761_v56, %v3760_v36  ;;  %v15987_v36 = vld [vmem:[%s21476_s7 + $0x164] ss:$16 sps:$4 sm:$0xff]  }
 0x34d   : > { %v3762_v17 = vld [vmem:[#allocation3 + $0x66] sm:$0xff]  ;;  %4448 = vmatprep.subr.bf16.mxu0 %v15987_v36 }
 0x34e   : > { %v2547_v48 = vpop.f32.mrf.mxu0  ;;  %v2683_v55 = vpop.f32.mrf.mxu1  ;;  %15765 = vmatmul.mubr.msk.bf16.vlgmr.msra.gmra.mxu0 %vm2364_vm2, %v3765_v46  ;;  %v3763_v46 = vld [vmem:[#allocation3 + $0x6e] sm:$0xff] }
 0x34f   : > { %v18415_v30 = vadd.f32 %v2680_v12, %v2547_v48  ;;  %15768 = vmatprep.mubr.msk.bf16.mxu0 %vm17248_vm1, %v21494_v43  ;;  %v3770_v19 = vpack.c.bf16 %v3763_v46, %v3762_v17  ;;  %v15991_v46 = vld [vmem:[%s21476_s7 + $0x140] ss:$16 sps:$4 sm:$0xff]  }
 0x350   : > { %v15494_v22 = vpop.f32.mrf.mxu0  ;;  %v15531_v24 = vpop.f32.mrf.mxu1 }
 0x352   : > { %v2550_v33 = vpop.f32.mrf.mxu0  ;;  %v2688_v40 = vpop.f32.mrf.mxu1 }
 0x354   : > { %v15495_v38 = vpop.f32.mrf.mxu0  ;;  %v15534_v52 = vpop.f32.mrf.mxu1 }
 0x355   : > { %v15981_v38 = vld [vmem:[%s21476_s7 + $0xc4] ss:$16 sps:$4 sm:$0xff]  }
 0x356   : > { %v2555_v29 = vpop.f32.mrf.mxu0  ;;  %v2691_v10 = vpop.f32.mrf.mxu1  ;;  %15769 = vmatmul.mubr.msk.bf16.gmra.mxu0 %vm2364_vm2, %v3766_v51  ;;  %4102 = vmatprep.subr.bf16.mxu1 %v15981_v38 }
 0x357   : > { %15772 = vmatprep.mubr.msk.bf16.mxu0 %vm17248_vm1, %v21494_v43 }
 0x358   : > { %v15498_v39 = vpop.f32.mrf.mxu0  ;;  %v15535_v9 = vpop.f32.mrf.mxu1 }
 0x35a   : > { %v2558_v28 = vpop.f32.mrf.mxu0  ;;  %v2696_v61 = vpop.f32.mrf.mxu1 }
 0x35c   : > { %v15499_v0 = vpop.f32.mrf.mxu0  ;;  %v15538_v53 = vpop.f32.mrf.mxu1 }
 0x35e   : > { %v2563_v13 = vpop.f32.mrf.mxu0  ;;  %v2699_v14 = vpop.f32.mrf.mxu1  ;;  %15773 = vmatmul.mubr.msk.bf16.gmra.mxu0 %vm2364_vm2, %v3767_v35 }
 0x35f   : > { %15776 = vmatprep.mubr.msk.bf16.mxu0 %vm17248_vm1, %v21494_v43 }
 0x360   : > { %v15502_v34 = vpop.f32.mrf.mxu0  ;;  %v15539_v49 = vpop.f32.mrf.mxu1 }
 0x362   : > { %v2566_v23 = vpop.f32.mrf.mxu0  ;;  %v2985_v2 = vpop.f32.mrf.mxu1 }
 0x364   : > { %v15503_v27 = vpop.f32.mrf.mxu0  ;;  %v15586_v4 = vpop.f32.mrf.mxu1 }
 0x365   : > { %v15984_v27 = vld [vmem:[%s21476_s7 + $0xa4] ss:$16 sps:$4 sm:$0xff]  }
 0x366   : > { %v2810_v1 = vpop.f32.mrf.mxu0  ;;  %v2988_v37 = vpop.f32.mrf.mxu1  ;;  %15777 = vmatmul.mubr.msk.bf16.gmra.mxu0 %vm2364_vm2, %v3768_v63 }
 0x367   : > { %v2864_v58 = vadd.f32 %v2810_v1, %v18377_v7  ;;  %15780 = vmatprep.mubr.msk.bf16.mxu0 %vm17248_vm1, %v21494_v43 }
 0x368   : > { %v15550_v31 = vpop.f32.mrf.mxu0  ;;  %v15587_v59 = vpop.f32.mrf.mxu1 }
 0x369   : > { %v18435_v6 = vadd.f32 %v2985_v2, %v2864_v58 }
 0x36a   : > { %v2813_v8 = vpop.f32.mrf.mxu0  ;;  %v2993_v57 = vpop.f32.mrf.mxu1 }
 0x36b   : > { %v2865_v7 = vadd.f32 %v2813_v8, %v18382_v26 }
 0x36c   : > { %v15551_v11 = vpop.f32.mrf.mxu0  ;;  %v15590_v15 = vpop.f32.mrf.mxu1 }
 0x36d   : > { %v18438_v47 = vadd.f32 %v2988_v37, %v2865_v7 }
 0x36e   : > { %v2818_v12 = vpop.f32.mrf.mxu0  ;;  %v2996_v44 = vpop.f32.mrf.mxu1  ;;  %15781 = vmatmul.mubr.msk.bf16.gmra.mxu0 %vm2364_vm2, %v3769_v5 }
 0x36f   : > { %v2866_v20 = vadd.f32 %v2818_v12, %v18389_v18  ;;  %15784 = vmatprep.mubr.msk.bf16.mxu0 %vm17248_vm1, %v21494_v43  ;;  %v15979_v18 = vld [vmem:[%s21476_s7 + $0xc0] ss:$16 sps:$4 sm:$0xff]  }
 0x370   : > { %v15554_v48 = vpop.f32.mrf.mxu0  ;;  %v15591_v55 = vpop.f32.mrf.mxu1  ;;  %4103 = vmatpush1.bf16.msra.mxu1 %v15979_v18 }
 0x371   : > { %v18444_v26 = vadd.f32 %v2993_v57, %v2866_v20  ;;  %4104 = vmatprep.subr.bf16.mxu1 %v15984_v27  ;;  %v15988_v48 = vld [vmem:[%s21476_s7 + $0x80] ss:$16 sps:$4 sm:$0xff]   ;;  %v15990_v55 = vld [vmem:[%s21476_s7 + $0x84] ss:$16 sps:$4 sm:$0xff]  }
 0x372   : > { %v2821_v22 = vpop.f32.mrf.mxu0  ;;  %v3001_v24 = vpop.f32.mrf.mxu1 }
 0x373   : > { %v2867_v33 = vadd.f32 %v2821_v22, %v18395_v25  ;;  %v3764_v25 = vld [vmem:[#allocation3 + $0x76] sm:$0xf] }
 0x374   : > { %v15555_v40 = vpop.f32.mrf.mxu0  ;;  %v15594_v21 = vpop.f32.mrf.mxu1  ;;  %v3771_v62 = vpack.c.bf16 %v3764_v25, %v3764_v25  ;;  %v15997_v25 = vld [vmem:[%s21476_s7 + $0x100] ss:$16 sps:$4 sm:$0xff]  }
 0x375   : > { %v18453_v52 = vadd.f32 %v2996_v44, %v2867_v33  ;;  %v15993_v44 = vld [vmem:[%s21476_s7 + $0x144] ss:$16 sps:$4 sm:$0xff]   ;;  %v15994_v21 = vld [vmem:[%s21476_s7 + $0x120] ss:$16 sps:$4 sm:$0xff]  }
 0x376   : > { %v2826_v51 = vpop.f32.mrf.mxu0  ;;  %v3004_v29 = vpop.f32.mrf.mxu1  ;;  %15785 = vmatmul.mubr.msk.bf16.gmra.mxu0 %vm2364_vm2, %v3770_v19  ;;  %v15996_v19 = vld [vmem:[%s21476_s7 + $0x124] ss:$16 sps:$4 sm:$0xff]  }
 0x377   : > { %v2868_v10 = vadd.f32 %v2826_v51, %v18400_v45  ;;  %15788 = vmatprep.mubr.msk.bf16.mxu0 %vm17248_vm1, %v21494_v43  ;;  %v15999_v51 = vld [vmem:[%s21476_s7 + $0x104] ss:$16 sps:$4 sm:$0xff]  }
 0x378   : > { %v15558_v39 = vpop.f32.mrf.mxu0  ;;  %v15595_v9 = vpop.f32.mrf.mxu1 }
 0x379   : > { %v18459_v54 = vadd.f32 %v3001_v24, %v2868_v10 }
 0x37a   : > { %v2829_v28 = vpop.f32.mrf.mxu0  ;;  %v3009_v61 = vpop.f32.mrf.mxu1 }
 0x37b   : > { %v2869_v0 = vadd.f32 %v2829_v28, %v18405_v60  ;;  %v15982_v60 = vld [vmem:[%s21476_s7 + $0xa0] ss:$16 sps:$4 sm:$0xff]  }
 0x37c   : > { %v15559_v53 = vpop.f32.mrf.mxu0  ;;  %v15598_v35 = vpop.f32.mrf.mxu1  ;;  %4105 = vmatpush1.bf16.msra.mxu1 %v15982_v60 }
 0x37d   : > { %v18462_v13 = vadd.f32 %v3004_v29, %v2869_v0  ;;  %4106 = vmatprep.subr.bf16.mxu1 %v15990_v55 }
 0x37e   : > { %v2834_v14 = vpop.f32.mrf.mxu0  ;;  %v3012_v45 = vpop.f32.mrf.mxu1  ;;  %15789 = vmatmul.mubr.msk.bf16.gmra.mxu0 %vm2364_vm2, %v3771_v62  ;;  %v16005_v62 = vld [vmem:[%s21476_s7 + $0x1e4] ss:$16 sps:$4 sm:$0xff]  }
 0x37f   : > { %v2870_v43 = vadd.f32 %v2834_v14, %v18408_v16  ;;  %v17249_v14 = vmov 0  }
 0x380   : > { %v15562_v34 = vpop.f32.mrf.mxu0  ;;  %v15599_v49 = vpop.f32.mrf.mxu1  ;;  %4107 = vmatpush1.bf16.msra.mxu1 %v15988_v48  ;;  %4124 = vmatprep.mubr.bf16.mxu1 %v17249_v14 }
 0x381   : > { %v18466_v42 = vadd.f32 %v3009_v61, %v2870_v43  ;;  %v16002_v61 = vld [vmem:[%s21476_s7 + $0xec] ss:$16 sps:$4 sm:$0xff]   ;;  %4472 = vmatprep.mubr.bf16.mxu0 %v17249_v14 }
 0x382   : > { %v2837_v23 = vpop.f32.mrf.mxu0  ;;  %v3017_v2 = vpop.f32.mrf.mxu1  ;;  %4141 = vmatprep.subr.bf16.mxu1 %v16002_v61 }
 0x383   : > { %v2871_v32 = vadd.f32 %v2837_v23, %v18412_v50 }
 0x384   : > { %v15563_v4 = vpop.f32.mrf.mxu0  ;;  %v15602_v63 = vpop.f32.mrf.mxu1 }
 0x385   : > { %v18475_v1 = vadd.f32 %v3012_v45, %v2871_v32 }
 0x386   : > { %v2842_v16 = vpop.f32.mrf.mxu0  ;;  %v3020_v37 = vpop.f32.mrf.mxu1 }
 0x387   : > { %v2872_v58 = vadd.f32 %v2842_v16, %v18415_v30  ;;  %v15985_v30 = vld [vmem:[%s21476_s7 + $0x160] ss:$16 sps:$4 sm:$0xff]  }
 0x388   : > { %v15566_v41 = vpop.f32.mrf.mxu0  ;;  %v15603_v50 = vpop.f32.mrf.mxu1  ;;  %4449 = vmatpush1.bf16.msra.mxu0 %v15985_v30 }
 0x389   : > { %v18478_v3 = vadd.f32 %v3017_v2, %v2872_v58  ;;  %4450 = vmatprep.subr.bf16.mxu0 %v15993_v44 }
 0x38a   : > { %v2845_v31 = vpop.f32.mrf.mxu0  ;;  %v3025_v59 = vpop.f32.mrf.mxu1 }
 0x38c   : > { %v15567_v56 = vpop.f32.mrf.mxu0  ;;  %v15606_v8 = vpop.f32.mrf.mxu1  ;;  %4451 = vmatpush1.bf16.msra.mxu0 %v15991_v46 }
 0x38d   : > { %4452 = vmatprep.subr.bf16.mxu0 %v15996_v19 }
 0x38e   : > { %v2850_v57 = vpop.f32.mrf.mxu0  ;;  %v3028_v7 = vpop.f32.mrf.mxu1 }
 0x390   : > { %v15570_v11 = vpop.f32.mrf.mxu0  ;;  %v15607_v15 = vpop.f32.mrf.mxu1  ;;  %4453 = vmatpush1.bf16.msra.mxu0 %v15994_v21 }
 0x391   : > { %4454 = vmatprep.subr.bf16.mxu0 %v15999_v51 }
 0x392   : > { %v2853_v5 = vpop.f32.mrf.mxu0  ;;  %v3033_v12 = vpop.f32.mrf.mxu1 }
 0x394   : > { %v15571_v20 = vpop.f32.mrf.mxu0  ;;  %v15610_v17 = vpop.f32.mrf.mxu1  ;;  %4455 = vmatpush1.bf16.msra.mxu0 %v15997_v25 }
 0x395   : > { %4635 = vmatprep.subr.bf16.mxu0 %v16005_v62 }
 0x396   : > { %v2858_v22 = vpop.f32.mrf.mxu0  ;;  %v3036_v24 = vpop.f32.mrf.mxu1 }
 0x398   : > { %v15574_v33 = vpop.f32.mrf.mxu0  ;;  %v15611_v40 = vpop.f32.mrf.mxu1 }
 0x39a   : > { %v2861_v18 = vpop.f32.mrf.mxu0  ;;  %v3335_v38 = vpop.f32.mrf.mxu1 }
 0x39c   : > { %v15575_v29 = vpop.f32.mrf.mxu0  ;;  %v15658_v10 = vpop.f32.mrf.mxu1 }
 0x39e   : > { %v3160_v39 = vpop.f32.mrf.mxu0  ;;  %v3338_v9 = vpop.f32.mrf.mxu1 }
 0x39f   : > { %v3214_v28 = vadd.f32 %v3160_v39, %v18435_v6 }
 0x3a0   : > { %v15622_v0 = vpop.f32.mrf.mxu0  ;;  %v15659_v53 = vpop.f32.mrf.mxu1 }
 0x3a1   : > { %v18517_v35 = vadd.f32 %v3335_v38, %v3214_v28 }
 0x3a2   : > { %v3163_v45 = vpop.f32.mrf.mxu0  ;;  %v3343_v43 = vpop.f32.mrf.mxu1 }
 0x3a3   : > { %v3215_v6 = vadd.f32 %v3163_v45, %v18438_v47 }
 0x3a4   : > { %v15623_v34 = vpop.f32.mrf.mxu0  ;;  %v15662_v49 = vpop.f32.mrf.mxu1 }
 0x3a5   : > { %v18522_v23 = vadd.f32 %v3338_v9, %v3215_v6 }
 0x3a6   : > { %v3168_v2 = vpop.f32.mrf.mxu0  ;;  %v3346_v32 = vpop.f32.mrf.mxu1 }
 0x3a7   : > { %v3216_v60 = vadd.f32 %v3168_v2, %v18444_v26 }
 0x3a8   : > { %v15626_v27 = vpop.f32.mrf.mxu0  ;;  %v15663_v4 = vpop.f32.mrf.mxu1 }
 0x3a9   : > { %v18525_v63 = vadd.f32 %v3343_v43, %v3216_v60 }
 0x3aa   : > { %v3171_v16 = vpop.f32.mrf.mxu0  ;;  %v3351_v37 = vpop.f32.mrf.mxu1 }
 0x3ab   : > { %v3217_v58 = vadd.f32 %v3171_v16, %v18453_v52 }
 0x3ac   : > { %v15627_v41 = vpop.f32.mrf.mxu0  ;;  %v15666_v50 = vpop.f32.mrf.mxu1 }
 0x3ad   : > { %v18528_v31 = vadd.f32 %v3346_v32, %v3217_v58 }
 0x3ae   : > { %v3176_v47 = vpop.f32.mrf.mxu0  ;;  %v3354_v59 = vpop.f32.mrf.mxu1 }
 0x3af   : > { %v3218_v56 = vadd.f32 %v3176_v47, %v18459_v54 }
 0x3b0   : > { %v15630_v8 = vpop.f32.mrf.mxu0  ;;  %v15667_v57 = vpop.f32.mrf.mxu1 }
 0x3b1   : > { %v18531_v7 = vadd.f32 %v3351_v37, %v3218_v56 }
 0x3b2   : > { %v3179_v26 = vpop.f32.mrf.mxu0  ;;  %v3359_v36 = vpop.f32.mrf.mxu1 }
 0x3b3   : > { %v3219_v11 = vadd.f32 %v3179_v26, %v18462_v13 }
 0x3b4   : > { %v15631_v15 = vpop.f32.mrf.mxu0  ;;  %v15670_v30 = vpop.f32.mrf.mxu1 }
 0x3b5   : > { %v18534_v5 = vadd.f32 %v3354_v59, %v3219_v11 }
 0x3b6   : > { %v3184_v52 = vpop.f32.mrf.mxu0  ;;  %v3362_v12 = vpop.f32.mrf.mxu1 }
 0x3b7   : > { %v3220_v44 = vadd.f32 %v3184_v52, %v18466_v42 }
 0x3b8   : > { %v15634_v20 = vpop.f32.mrf.mxu0  ;;  %v15671_v17 = vpop.f32.mrf.mxu1 }
 0x3b9   : > { %v18537_v46 = vadd.f32 %v3359_v36, %v3220_v44 }
 0x3ba   : > { %v3187_v54 = vpop.f32.mrf.mxu0  ;;  %v3367_v48 = vpop.f32.mrf.mxu1 }
 0x3bb   : > { %v3221_v55 = vadd.f32 %v3187_v54, %v18475_v1 }
 0x3bc   : > { %v15635_v22 = vpop.f32.mrf.mxu0  ;;  %v15674_v24 = vpop.f32.mrf.mxu1 }
 0x3bd   : > { %v18540_v19 = vadd.f32 %v3362_v12, %v3221_v55 }
 0x3be   : > { %v3192_v13 = vpop.f32.mrf.mxu0  ;;  %v3370_v33 = vpop.f32.mrf.mxu1 }
 0x3bf   : > { %v3222_v40 = vadd.f32 %v3192_v13, %v18478_v3 }
 0x3c0   : > { %v15638_v21 = vpop.f32.mrf.mxu0  ;;  %v15675_v18 = vpop.f32.mrf.mxu1 }
 0x3c1   : > { %v18543_v38 = vadd.f32 %v3367_v48, %v3222_v40 }
 0x3c2   : > { %v3195_v42 = vpop.f32.mrf.mxu0  ;;  %v3375_v51 = vpop.f32.mrf.mxu1 }
 0x3c4   : > { %v15639_v29 = vpop.f32.mrf.mxu0  ;;  %v15678_v10 = vpop.f32.mrf.mxu1 }
 0x3c6   : > { %v3200_v25 = vpop.f32.mrf.mxu0  ;;  %v3378_v39 = vpop.f32.mrf.mxu1 }
 0x3c8   : > { %v15642_v9 = vpop.f32.mrf.mxu0  ;;  %v15679_v1 = vpop.f32.mrf.mxu1 }
 0x3ca   : > { %v3203_v28 = vpop.f32.mrf.mxu0  ;;  %v3383_v61 = vpop.f32.mrf.mxu1 }
 0x3cc   : > { %v15643_v62 = vpop.f32.mrf.mxu0  ;;  %v15682_v0 = vpop.f32.mrf.mxu1 }
 0x3ce   : > { %v3208_v53 = vpop.f32.mrf.mxu0  ;;  %v3386_v45 = vpop.f32.mrf.mxu1 }
 0x3d0   : > { %v15646_v43 = vpop.f32.mrf.mxu0  ;;  %v15683_v3 = vpop.f32.mrf.mxu1 }
 0x3d2   : > { %v3211_v6 = vpop.f32.mrf.mxu0  ;;  %v3685_v34 = vpop.f32.mrf.mxu1 }
 0x3d4   : > { %v15647_v49 = vpop.f32.mrf.mxu0  ;;  %v15730_v2 = vpop.f32.mrf.mxu1 }
 0x3d6   : > { %v3510_v32 = vpop.f32.mrf.mxu0  ;;  %v3688_v60 = vpop.f32.mrf.mxu1 }
 0x3d7   : > { %v3564_v2 = vadd.f32 %v3510_v32, %v18517_v35 }
 0x3d8   : > { %v15694_v27 = vpop.f32.mrf.mxu0  ;;  %v15731_v4 = vpop.f32.mrf.mxu1 }
 0x3da   : > { %v3513_v16 = vpop.f32.mrf.mxu0  ;;  %v18545_v37 = vpop.f32.mrf.mxu1 }
 0x3dc   : > { %v15695_v58 = vpop.f32.mrf.mxu0  ;;  %v15734_v41 = vpop.f32.mrf.mxu1 }
 0x3dd   : > { %v3565_v58 = vadd.f32 %v3513_v16, %v18522_v23  ;;  %v3739_v41 = vadd.f32 %v3685_v34, %v3564_v2  ;;  %v16012_v2 = vld [vmem:[%s21476_s7 + $0xa8] ss:$16 sps:$4 sm:$0xff]  }
 0x3de   : > { %v3518_v50 = vpop.f32.mrf.mxu0  ;;  %v18547_v47 = vpop.f32.mrf.mxu1 }
 0x3e0   : > { %v15698_v59 = vpop.f32.mrf.mxu0  ;;  %v15735_v56 = vpop.f32.mrf.mxu1 }
 0x3e1   : > { %v18572_v56 = vld [vmem:[%s21475_s6] ss:$0 sm:$0xff] }
 0x3e2   : > { %v3521_v8 = vpop.f32.mrf.mxu0  ;;  %v18549_v57 = vpop.f32.mrf.mxu1 }
 0x3e3   : > { %v3567_v23 = vadd.f32 %v3521_v8, %v18528_v31 }
 0x3e4   : > { %v15699_v26 = vpop.f32.mrf.mxu0  ;;  %v15738_v36 = vpop.f32.mrf.mxu1 }
 0x3e6   : > { %v3526_v11 = vpop.f32.mrf.mxu0  ;;  %v18551_v15 = vpop.f32.mrf.mxu1 }
 0x3e8   : > { %v15702_v30 = vpop.f32.mrf.mxu0  ;;  %v15739_v52 = vpop.f32.mrf.mxu1 }
 0x3e9   : > { %v3566_v30 = vadd.f32 %v3518_v50, %v18525_v63  ;;  %v3568_v63 = vadd.f32 %v3526_v11, %v18531_v7  ;;  %v16003_v7 = vld [vmem:[%s21476_s7 + $0x1e0] ss:$16 sps:$4 sm:$0xff]  }
 0x3ea   : > { %v18553_v12 = vpop.f32.mrf.mxu0  ;;  %v18555_v44 = vpop.f32.mrf.mxu1 }
 0x3eb   : > { %v3741_v16 = vadd.f32 %v18545_v37, %v3566_v30 }
 0x3ec   : > { %v15703_v20 = vpop.f32.mrf.mxu0  ;;  %v15742_v17 = vpop.f32.mrf.mxu1 }
 0x3ed   : > { %v3740_v20 = vadd.f32 %v3688_v60, %v3565_v58 }
 0x3ee   : > { %v18557_v54 = vpop.f32.mrf.mxu0  ;;  %v18559_v48 = vpop.f32.mrf.mxu1 }
 0x3f0   : > { %v15706_v55 = vpop.f32.mrf.mxu0  ;;  %v15743_v22 = vpop.f32.mrf.mxu1 }
 0x3f2   : > { %v18561_v24 = vpop.f32.mrf.mxu0  ;;  %v18563_v13 = vpop.f32.mrf.mxu1 }
 0x3f4   : > { %v15707_v33 = vpop.f32.mrf.mxu0  ;;  %v15746_v40 = vpop.f32.mrf.mxu1 }
 0x3f6   : > { %v18565_v21 = vpop.f32.mrf.mxu0  ;;  %v3720_v18 = vpop.f32.mrf.mxu1 }
 0x3f7   : > { %v3742_v18 = vadd.f32 %v18547_v47, %v3567_v23 }
 0x3f8   : > { %v15710_v42 = vpop.f32.mrf.mxu0  ;;  %v15747_v51 = vpop.f32.mrf.mxu1 }
 0x3f9   : > { %v16000_v51 = vld [vmem:[%s21476_s7 + $0xe8] ss:$16 sps:$4 sm:$0xff]  }
 0x3fa   : > { %v3545_v29 = vpop.f32.mrf.mxu0  ;;  %v3725_v10 = vpop.f32.mrf.mxu1 }
 0x3fb   : > { %v3743_v29 = vadd.f32 %v18549_v57, %v3568_v63  ;;  %v16008_v57 = vld [vmem:[%s21476_s7 + $0xcc] ss:$16 sps:$4 sm:$0xff]  }
 0x3fc   : > { %v15711_v25 = vpop.f32.mrf.mxu0  ;;  %v15750_v39 = vpop.f32.mrf.mxu1 }
 0x3fd   : > { %v3569_v25 = vadd.f32 %v18553_v12, %v18534_v5  ;;  %v16006_v12 = vld [vmem:[%s21476_s7 + $0xc8] ss:$16 sps:$4 sm:$0xff]  }
 0x3fe   : > { %v3550_v9 = vpop.f32.mrf.mxu0  ;;  %v3728_v1 = vpop.f32.mrf.mxu1 }
 0x3ff   : > { %v16011_v1 = vld [vmem:[%s21476_s7 + $0x1c4] ss:$16 sps:$4 sm:$0xff]  }
 0x400   : > { %v15714_v28 = vpop.f32.mrf.mxu0  ;;  %v15751_v61 = vpop.f32.mrf.mxu1 }
 0x402   : > { %v3553_v62 = vpop.f32.mrf.mxu0  ;;  %v3733_v0 = vpop.f32.mrf.mxu1 }
 0x403   : > { %v16009_v0 = vld [vmem:[%s21476_s7 + $0x1c0] ss:$16 sps:$4 sm:$0xff]  }
 0x404   : > { %v15715_v53 = vpop.f32.mrf.mxu0  ;;  %v15754_v45 = vpop.f32.mrf.mxu1 }
 0x405   : > { %v3570_v53 = vadd.f32 %v18557_v54, %v18537_v46 }
 0x406   : > { %v3558_v43 = vpop.f32.mrf.mxu0  ;;  %v3736_v3 = vpop.f32.mrf.mxu1 }
 0x407   : > { %v3744_v43 = vadd.f32 %v18551_v15, %v3569_v25  ;;  %v16014_v3 = vld [vmem:[%s21476_s7 + $0xac] ss:$16 sps:$4 sm:$0xff]  }
 0x408   : > { %v15718_v6 = vpop.f32.mrf.mxu0  ;;  %v15755_v49 = vpop.f32.mrf.mxu1 }
 0x409   : > { %v16017_v6 = vld [vmem:[%s21476_s7 + $0x1a4] ss:$16 sps:$4 sm:$0xff]  }
 0x40a   : > { %v3561_v27 = vpop.f32.mrf.mxu0 }
 0x40b   : > { %v16015_v27 = vld [vmem:[%s21476_s7 + $0x1a0] ss:$16 sps:$4 sm:$0xff]  }
 0x40c   : > { %v15719_v4 = vpop.f32.mrf.mxu0 }
 0x40d   : > { %v3571_v4 = vadd.f32 %v18561_v24, %v18540_v19  ;;  %v3572_v19 = vadd.f32 %v18565_v21, %v18543_v38  ;;  %v16026_v38 = vld [vmem:[%s21476_s7 + $0x64] ss:$16 sps:$4 sm:$0xff]  }
 0x40e   : > { %v3860_v59 = vpop.f32.mrf.mxu0  ;;  %v16029_v21 = vld [vmem:[%s21476_s7 + $0x264] ss:$16 sps:$4 sm:$0xff]  }
 0x40f   : > { %v3914_v26 = vadd.f32 %v3860_v59, %v3739_v41  ;;  %v3745_v41 = vadd.f32 %v18555_v44, %v3570_v53  ;;  %v16020_v59 = vld [vmem:[%s21476_s7 + $0x8c] ss:$16 sps:$4 sm:$0xff]   ;;  %v16018_v44 = vld [vmem:[%s21476_s7 + $0x88] ss:$16 sps:$4 sm:$0xff]  }
 0x410   : > { %v15766_v36 = vpop.f32.mrf.mxu0 }
 0x411   : > { %v3934_v52 = vadd.f32 %v18572_v56, %v3914_v26  ;;  %v16023_v26 = vld [vmem:[%s21476_s7 + $0x184] ss:$16 sps:$4 sm:$0xff]  }
 0x412   : > { %v3863_v17 = vpop.f32.mrf.mxu0 }
 0x413   : > { %v3947_v35 = vmax.f32 %v3934_v52, 0.0  ;;  %v3915_v32 = vadd.f32 %v3863_v17, %v3740_v20  ;;  %v16021_v20 = vld [vmem:[%s21476_s7 + $0x180] ss:$16 sps:$4 sm:$0xff]  }
 0x414   : > { %v15767_v55 = vpop.f32.mrf.mxu0 }
 0x415   : > { %3960 = vst.msk [vmem:[#allocation4] sm:$0xff] %vm2364_vm2, %v3947_v35  ;;  %v3935_v34 = vadd.f32 %v18572_v56, %v3915_v32  ;;  %v3746_v35 = vadd.f32 %v18559_v48, %v3571_v4  ;;  %v16024_v48 = vld [vmem:[%s21476_s7 + $0x60] ss:$16 sps:$4 sm:$0xff]  }
 0x416   : > { %v3868_v22 = vpop.f32.mrf.mxu0  ;;  %v16057_v4 = vld [vmem:[%s21476_s7 + $0x2c0] ss:$16 sps:$4 sm:$0xff]  }
 0x417   : > { %v3948_v33 = vmax.f32 %v3935_v34, 0.0  ;;  %v3916_v40 = vadd.f32 %v3868_v22, %v3741_v16  ;;  %v3747_v22 = vadd.f32 %v18563_v13, %v3572_v19  ;;  %v16032_v13 = vld [vmem:[%s21476_s7 + $0x44] ss:$16 sps:$4 sm:$0xff]   ;;  %v16068_v19 = vld [vmem:[%s21476_s7 + $0xc] ss:$16 sps:$4 sm:$0xff]  }
 0x418   : > { %v15770_v50 = vpop.f32.mrf.mxu0 }
 0x419   : > { %3961 = vst.msk [vmem:[#allocation4 + $0x8] sm:$0xff] %vm2364_vm2, %v3948_v33  ;;  %v3936_v60 = vadd.f32 %v18572_v56, %v3916_v40  ;;  %v16027_v33 = vld [vmem:[%s21476_s7 + $0x260] ss:$16 sps:$4 sm:$0xff]   ;;  %v16035_v50 = vld [vmem:[%s21476_s7 + $0x244] ss:$16 sps:$4 sm:$0xff]  }
 0x41a   : > { %v3871_v42 = vpop.f32.mrf.mxu0 }
 0x41b   : > { %v3949_v31 = vmax.f32 %v3936_v60, 0.0  ;;  %v3917_v8 = vadd.f32 %v3871_v42, %v3742_v18 }
 0x41c   : > { %v15771_v37 = vpop.f32.mrf.mxu0  ;;  %v3991_v11 = vld [vmem:[#allocation4 + $0x1] sm:$0x1]  ;;  %v4339_v10 = vld [vmem:[#allocation4 + $0x2] sm:$0x1]  ;;  %v4526_v55 = vld [vmem:[#allocation4 + $0x3] sm:$0x1] }
 0x41d   : > { %3962 = vst.msk [vmem:[#allocation4 + $0x10] sm:$0xff] %vm2364_vm2, %v3949_v31  ;;  %v3937_v47 = vadd.f32 %v18572_v56, %v3917_v8  ;;  %v18595_v39 = vpack.c.bf16 %v3991_v11, %v3991_v11  ;;  %v18597_v9 = vpack.c.bf16 %v4339_v10, %v4339_v10  ;;  %v18671_v63 = vpack.c.bf16 %v4526_v55, %v4526_v55  ;;  %v16030_v8 = vld [vmem:[%s21476_s7 + $0x40] ss:$16 sps:$4 sm:$0xff]  }
 0x41e   : > { %v3876_v28 = vpop.f32.mrf.mxu0  ;;  %v3973_v53 = vld [vmem:[#allocation4] sm:$0x1] }
 0x41f   : > { %v3950_v61 = vmax.f32 %v3937_v47, 0.0  ;;  %v3918_v62 = vadd.f32 %v3876_v28, %v3743_v29  ;;  %13956 = vmatmul.mubr.msk.bf16.vlgmr.msra.gmra.mxu1 %vm2364_vm2, %v18595_v39  ;;  %13992 = vmatmul.mubr.msk.bf16.vlgmr.msra.gmra.mxu0 %vm2364_vm2, %v18597_v9  ;;  %v16038_v29 = vld [vmem:[%s21476_s7 + $0x24] ss:$16 sps:$4 sm:$0xff]   ;;  %v16039_v47 = vld [vmem:[%s21476_s7 + $0x220] ss:$16 sps:$4 sm:$0xff]  }
 0x420   : > { %4142 = vmatpush1.bf16.msra.mxu1 %v16000_v51  ;;  %4636 = vmatpush1.bf16.msra.mxu0 %v16003_v7  ;;  %v15774_v5 = vpop.f32.mrf.mxu0  ;;  %v16033_v51 = vld [vmem:[%s21476_s7 + $0x240] ss:$16 sps:$4 sm:$0xff]   ;;  %v16041_v7 = vld [vmem:[%s21476_s7 + $0x224] ss:$16 sps:$4 sm:$0xff]  }
 0x421   : > { %3963 = vst.msk [vmem:[#allocation4 + $0x18] sm:$0xff] %vm2364_vm2, %v3950_v61  ;;  %v3938_v45 = vadd.f32 %v18572_v56, %v3918_v62  ;;  %4143 = vmatprep.subr.bf16.mxu1 %v16008_v57  ;;  %4637 = vmatprep.subr.bf16.mxu0 %v16011_v1  ;;  %v16047_v57 = vld [vmem:[%s21476_s7 + $0x204] ss:$16 sps:$4 sm:$0xff]   ;;  %v16042_v61 = vld [vmem:[%s21476_s7] ss:$16 sps:$4 sm:$0xff]  }
 0x422   : > { %v3879_v49 = vpop.f32.mrf.mxu0  ;;  %4165 = vmatprep.mubr.bf16.mxu1 %v17249_v14  ;;  %4659 = vmatprep.mubr.bf16.mxu0 %v17249_v14  ;;  %v16045_v62 = vld [vmem:[%s21476_s7 + $0x200] ss:$16 sps:$4 sm:$0xff]   ;;  %v16050_v5 = vld [vmem:[%s21476_s7 + $0x6c] ss:$16 sps:$4 sm:$0xff]  }
 0x423   : > { %v3951_v46 = vmax.f32 %v3938_v45, 0.0  ;;  %v3919_v54 = vadd.f32 %v3879_v49, %v3744_v43  ;;  %v4713_v45 = vld [vmem:[#allocation4 + $0x4] sm:$0x1]  ;;  %v3974_v49 = vpack.c.bf16 %v3973_v53, %v3973_v53  ;;  %v16120_v53 = vld [vmem:[%s21476_s7 + $0x268] ss:$16 sps:$4 sm:$0xff]  }
 0x424   : > { %4144 = vmatpush1.bf16.msra.mxu1 %v16006_v12  ;;  %4638 = vmatpush1.bf16.msra.mxu0 %v16009_v0  ;;  %v15775_v15 = vpop.f32.mrf.mxu0  ;;  %v16053_v12 = vld [vmem:[%s21476_s7 + $0x2e4] ss:$16 sps:$4 sm:$0xff]  }
 0x425   : > { %3964 = vst.msk [vmem:[#allocation4 + $0x20] sm:$0xff] %vm2364_vm2, %v3951_v46  ;;  %v3939_v58 = vadd.f32 %v18572_v56, %v3919_v54  ;;  %4145 = vmatprep.subr.bf16.mxu1 %v16014_v3  ;;  %4639 = vmatprep.subr.bf16.mxu0 %v16017_v6  ;;  %v16048_v3 = vld [vmem:[%s21476_s7 + $0x68] ss:$16 sps:$4 sm:$0xff]   ;;  %v16051_v6 = vld [vmem:[%s21476_s7 + $0x2e0] ss:$16 sps:$4 sm:$0xff]   ;;  %v18730_v46 = vpack.c.bf16 %v4713_v45, %v4713_v45 }
 0x426   : > { %v3884_v36 = vpop.f32.mrf.mxu0  ;;  %v16056_v54 = vld [vmem:[%s21476_s7 + $0x4c] ss:$16 sps:$4 sm:$0xff]   ;;  %v16059_v15 = vld [vmem:[%s21476_s7 + $0x2c4] ss:$16 sps:$4 sm:$0xff]   ;;  %v16123_v45 = vld [vmem:[%s21476_s7 + $0x460] ss:$16 sps:$4 sm:$0xff]  }
 0x427   : > { %v3952_v30 = vmax.f32 %v3939_v58, 0.0  ;;  %v3920_v52 = vadd.f32 %v3884_v36, %v3745_v41  ;;  %v16062_v41 = vld [vmem:[%s21476_s7 + $0x2c] ss:$16 sps:$4 sm:$0xff]   ;;  %v16060_v36 = vld [vmem:[%s21476_s7 + $0x28] ss:$16 sps:$4 sm:$0xff]  }
 0x428   : > { %4146 = vmatpush1.bf16.msra.mxu1 %v16012_v2  ;;  %4640 = vmatpush1.bf16.msra.mxu0 %v16015_v27  ;;  %v15778_v24 = vpop.f32.mrf.mxu0  ;;  %v16054_v27 = vld [vmem:[%s21476_s7 + $0x48] ss:$16 sps:$4 sm:$0xff]  }
 0x429   : > { %3965 = vst.msk [vmem:[#allocation4 + $0x28] sm:$0xff] %vm2364_vm2, %v3952_v30  ;;  %v3940_v17 = vadd.f32 %v18572_v56, %v3920_v52  ;;  %4147 = vmatprep.subr.bf16.mxu1 %v16020_v59  ;;  %4641 = vmatprep.subr.bf16.mxu0 %v16023_v26  ;;  %v16065_v59 = vld [vmem:[%s21476_s7 + $0x2a4] ss:$16 sps:$4 sm:$0xff]   ;;  %v16063_v30 = vld [vmem:[%s21476_s7 + $0x2a0] ss:$16 sps:$4 sm:$0xff]  }
 0x42a   : > { %v3887_v32 = vpop.f32.mrf.mxu0  ;;  %v16071_v24 = vld [vmem:[%s21476_s7 + $0x284] ss:$16 sps:$4 sm:$0xff]  }
 0x42b   : > { %v3953_v23 = vmax.f32 %v3940_v17, 0.0  ;;  %v3921_v34 = vadd.f32 %v3887_v32, %v3746_v35  ;;  %v16074_v17 = vld [vmem:[%s21476_s7 + $0x16c] ss:$16 sps:$4 sm:$0xff]   ;;  %v16077_v35 = vld [vmem:[%s21476_s7 + $0x364] ss:$16 sps:$4 sm:$0xff]  }
 0x42c   : > { %4148 = vmatpush1.bf16.msra.mxu1 %v16018_v44  ;;  %4642 = vmatpush1.bf16.msra.mxu0 %v16021_v20  ;;  %v15779_v16 = vpop.f32.mrf.mxu0  ;;  %v16066_v44 = vld [vmem:[%s21476_s7 + $0x8] ss:$16 sps:$4 sm:$0xff]   ;;  %v16069_v20 = vld [vmem:[%s21476_s7 + $0x280] ss:$16 sps:$4 sm:$0xff]  }
 0x42d   : > { %3966 = vst.msk [vmem:[#allocation4 + $0x30] sm:$0xff] %vm2364_vm2, %v3953_v23  ;;  %v3941_v40 = vadd.f32 %v18572_v56, %v3921_v34  ;;  %4265 = vmatprep.subr.bf16.mxu1 %v16026_v38  ;;  %4822 = vmatprep.subr.bf16.mxu0 %v16029_v21  ;;  %v4900_v38 = vld [vmem:[#allocation4 + $0x5] sm:$0x1]  ;;  %v16072_v21 = vld [vmem:[%s21476_s7 + $0x168] ss:$16 sps:$4 sm:$0xff]  }
 0x42e   : > { %v3892_v60 = vpop.f32.mrf.mxu0  ;;  %v16075_v32 = vld [vmem:[%s21476_s7 + $0x360] ss:$16 sps:$4 sm:$0xff]   ;;  %v18785_v55 = vpack.c.bf16 %v4900_v38, %v4900_v38  ;;  %v16080_v23 = vld [vmem:[%s21476_s7 + $0x14c] ss:$16 sps:$4 sm:$0xff]   ;;  %v16083_v34 = vld [vmem:[%s21476_s7 + $0x344] ss:$16 sps:$4 sm:$0xff]  }
 0x42f   : > { %v3954_v18 = vmax.f32 %v3941_v40, 0.0  ;;  %v3922_v42 = vadd.f32 %v3892_v60, %v3747_v22  ;;  %13957 = vmatmul.mubr.msk.bf16.vlgmr.msra.gmra.mxu1 %vm2364_vm2, %v18595_v39  ;;  %14010 = vmatmul.mubr.msk.bf16.vlgmr.msra.gmra.mxu0 %vm2364_vm2, %v18671_v63  ;;  %v16044_v39 = vld [vmem:[%s21476_s7 + $0x4] ss:$16 sps:$4 sm:$0xff]   ;;  %v16078_v16 = vld [vmem:[%s21476_s7 + $0x148] ss:$16 sps:$4 sm:$0xff]  }
 0x430   : > { %4266 = vmatpush1.bf16.msra.mxu1 %v16024_v48  ;;  %4823 = vmatpush1.bf16.msra.mxu0 %v16027_v33  ;;  %v15782_v31 = vpop.f32.mrf.mxu0  ;;  %v16081_v22 = vld [vmem:[%s21476_s7 + $0x340] ss:$16 sps:$4 sm:$0xff]   ;;  %v16086_v48 = vld [vmem:[%s21476_s7 + $0x12c] ss:$16 sps:$4 sm:$0xff]   ;;  %v16089_v33 = vld [vmem:[%s21476_s7 + $0x324] ss:$16 sps:$4 sm:$0xff]  }
 0x431   : > { %3967 = vst.msk [vmem:[#allocation4 + $0x38] sm:$0xff] %vm2364_vm2, %v3954_v18  ;;  %v3942_v37 = vadd.f32 %v18572_v56, %v3922_v42  ;;  %4267 = vmatprep.subr.bf16.mxu1 %v16032_v13  ;;  %4824 = vmatprep.subr.bf16.mxu0 %v16035_v50  ;;  %v16036_v56 = vld [vmem:[%s21476_s7 + $0x20] ss:$16 sps:$4 sm:$0xff]   ;;  %v16084_v40 = vld [vmem:[%s21476_s7 + $0x128] ss:$16 sps:$4 sm:$0xff]  }
 0x432   : > { %v3895_v11 = vpop.f32.mrf.mxu0  ;;  %4289 = vmatprep.mubr.bf16.mxu1 %v17249_v14  ;;  %4846 = vmatprep.mubr.bf16.mxu0 %v17249_v14  ;;  %v16087_v13 = vld [vmem:[%s21476_s7 + $0x320] ss:$16 sps:$4 sm:$0xff]   ;;  %v16092_v50 = vld [vmem:[%s21476_s7 + $0x10c] ss:$16 sps:$4 sm:$0xff]   ;;  %v16095_v60 = vld [vmem:[%s21476_s7 + $0x304] ss:$16 sps:$4 sm:$0xff]  }
 0x433   : > { %v3955_v10 = vmax.f32 %v3942_v37, 0.0  ;;  %v16090_v18 = vld [vmem:[%s21476_s7 + $0x108] ss:$16 sps:$4 sm:$0xff]   ;;  %v16093_v42 = vld [vmem:[%s21476_s7 + $0x300] ss:$16 sps:$4 sm:$0xff]  }
 0x434   : > { %4268 = vmatpush1.bf16.msra.mxu1 %v16030_v8  ;;  %4825 = vmatpush1.bf16.msra.mxu0 %v16033_v51  ;;  %v15783_v25 = vpop.f32.mrf.mxu0  ;;  %v16098_v31 = vld [vmem:[%s21476_s7 + $0x1ec] ss:$16 sps:$4 sm:$0xff]   ;;  %v16101_v8 = vld [vmem:[%s21476_s7 + $0x3e4] ss:$16 sps:$4 sm:$0xff]   ;;  %v16096_v37 = vld [vmem:[%s21476_s7 + $0x1e8] ss:$16 sps:$4 sm:$0xff]  }
 0x435   : > { %3968 = vst.msk [vmem:[#allocation4 + $0x40] sm:$0xff] %vm2364_vm2, %v3955_v10  ;;  %4269 = vmatprep.subr.bf16.mxu1 %v16038_v29  ;;  %4826 = vmatprep.subr.bf16.mxu0 %v16041_v7  ;;  %v5087_v51 = vld [vmem:[#allocation4 + $0x6] sm:$0x1]  ;;  %v16099_v29 = vld [vmem:[%s21476_s7 + $0x3e0] ss:$16 sps:$4 sm:$0xff]  }
 0x436   : > { %v3900_v1 = vpop.f32.mrf.mxu0  ;;  %v18840_v7 = vpack.c.bf16 %v5087_v51, %v5087_v51  ;;  %v16104_v11 = vld [vmem:[%s21476_s7 + $0x1cc] ss:$16 sps:$4 sm:$0xff]   ;;  %v16107_v10 = vld [vmem:[%s21476_s7 + $0x3c4] ss:$16 sps:$4 sm:$0xff]   ;;  %v16102_v25 = vld [vmem:[%s21476_s7 + $0x1c8] ss:$16 sps:$4 sm:$0xff]  }
 0x437   : > { %v16116_v1 = vld [vmem:[%s21476_s7 + $0x18c] ss:$16 sps:$4 sm:$0xff]  }
 0x438   : > { %4270 = vmatpush1.bf16.msra.mxu1 %v16036_v56  ;;  %4827 = vmatpush1.bf16.msra.mxu0 %v16039_v47  ;;  %v15786_v28 = vpop.f32.mrf.mxu0  ;;  %v16105_v56 = vld [vmem:[%s21476_s7 + $0x3c0] ss:$16 sps:$4 sm:$0xff]   ;;  %v16110_v47 = vld [vmem:[%s21476_s7 + $0x1ac] ss:$16 sps:$4 sm:$0xff]  }
 0x439   : > { %4271 = vmatprep.subr.bf16.mxu1 %v16044_v39  ;;  %4828 = vmatprep.subr.bf16.mxu0 %v16047_v57  ;;  %v16108_v39 = vld [vmem:[%s21476_s7 + $0x1a8] ss:$16 sps:$4 sm:$0xff]   ;;  %v16111_v57 = vld [vmem:[%s21476_s7 + $0x3a0] ss:$16 sps:$4 sm:$0xff]   ;;  %v16119_v28 = vld [vmem:[%s21476_s7 + $0x384] ss:$16 sps:$4 sm:$0xff]  }
 0x43a   : > { %v3903_v0 = vpop.f32.mrf.mxu0  ;;  %v16158_v38 = vld [vmem:[%s21476_s7 + $0x2ac] ss:$16 sps:$4 sm:$0xff]  }
 0x43b   : > { %v5274_v0 = vld [vmem:[#allocation4 + $0xa] sm:$0x1]  ;;  %v16182_v51 = vld [vmem:[%s21476_s7 + $0x32c] ss:$16 sps:$4 sm:$0xff]  }
 0x43c   : > { %4272 = vmatpush1.bf16.msra.mxu1 %v16042_v61  ;;  %4829 = vmatpush1.bf16.msra.mxu0 %v16045_v62  ;;  %v15787_v43 = vpop.f32.mrf.mxu0  ;;  %v16114_v61 = vld [vmem:[%s21476_s7 + $0x188] ss:$16 sps:$4 sm:$0xff]   ;;  %v16117_v62 = vld [vmem:[%s21476_s7 + $0x380] ss:$16 sps:$4 sm:$0xff]  }
 0x43d   : > { %4306 = vmatprep.subr.bf16.mxu1 %v16050_v5  ;;  %5009 = vmatprep.subr.bf16.mxu0 %v16053_v12  ;;  %v16122_v5 = vld [vmem:[%s21476_s7 + $0x26c] ss:$16 sps:$4 sm:$0xff]   ;;  %v16125_v12 = vld [vmem:[%s21476_s7 + $0x464] ss:$16 sps:$4 sm:$0xff]   ;;  %v18896_v43 = vpack.c.bf16 %v5274_v0, %v5274_v0 }
 0x43e   : > { %v3908_v2 = vpop.f32.mrf.mxu0  ;;  %v16206_v0 = vld [vmem:[%s21476_s7 + $0x3ac] ss:$16 sps:$4 sm:$0xff]  }
 0x43f   : > { %13974 = vmatmul.mubr.msk.bf16.vlgmr.msra.gmra.mxu1 %vm2364_vm2, %v3974_v49  ;;  %14028 = vmatmul.mubr.msk.bf16.vlgmr.msra.gmra.mxu0 %vm2364_vm2, %v18730_v46  ;;  %v16132_v2 = vld [vmem:[%s21476_s7 + $0x228] ss:$16 sps:$4 sm:$0xff]  }
 0x440   : > { %4307 = vmatpush1.bf16.msra.mxu1 %v16048_v3  ;;  %5010 = vmatpush1.bf16.msra.mxu0 %v16051_v6  ;;  %v15790_v58 = vpop.f32.mrf.mxu0  ;;  %v16128_v3 = vld [vmem:[%s21476_s7 + $0x24c] ss:$16 sps:$4 sm:$0xff]   ;;  %v16131_v6 = vld [vmem:[%s21476_s7 + $0x444] ss:$16 sps:$4 sm:$0xff]  }
 0x441   : > { %4308 = vmatprep.subr.bf16.mxu1 %v16056_v54  ;;  %5011 = vmatprep.subr.bf16.mxu0 %v16059_v15  ;;  %v16129_v54 = vld [vmem:[%s21476_s7 + $0x440] ss:$16 sps:$4 sm:$0xff]   ;;  %v16134_v15 = vld [vmem:[%s21476_s7 + $0x22c] ss:$16 sps:$4 sm:$0xff]   ;;  %v16143_v58 = vld [vmem:[%s21476_s7 + $0x404] ss:$16 sps:$4 sm:$0xff]  }
 0x442   : > { %4330 = vmatprep.mubr.bf16.mxu1 %v17249_v14  ;;  %5033 = vmatprep.mubr.bf16.mxu0 %v17249_v14  ;;  %v3911_v26 = vpop.f32.mrf.mxu0 }
 0x443   : > { %v16146_v26 = vld [vmem:[%s21476_s7 + $0x2ec] ss:$16 sps:$4 sm:$0xff]  }
 0x444   : > { %4309 = vmatpush1.bf16.msra.mxu1 %v16054_v27  ;;  %5012 = vmatpush1.bf16.msra.mxu0 %v16057_v4  ;;  %v15791_v52 = vpop.f32.mrf.mxu0  ;;  %v16135_v27 = vld [vmem:[%s21476_s7 + $0x420] ss:$16 sps:$4 sm:$0xff]   ;;  %v16140_v4 = vld [vmem:[%s21476_s7 + $0x20c] ss:$16 sps:$4 sm:$0xff]  }
 0x445   : > { %4310 = vmatprep.subr.bf16.mxu1 %v16062_v41  ;;  %5013 = vmatprep.subr.bf16.mxu0 %v16065_v59  ;;  %v16138_v41 = vld [vmem:[%s21476_s7 + $0x208] ss:$16 sps:$4 sm:$0xff]   ;;  %v16141_v59 = vld [vmem:[%s21476_s7 + $0x400] ss:$16 sps:$4 sm:$0xff]  }
 0x446   : > { %v16144_v52 = vld [vmem:[%s21476_s7 + $0x2e8] ss:$16 sps:$4 sm:$0xff]  }
 0x448   : > { %4311 = vmatpush1.bf16.msra.mxu1 %v16060_v36  ;;  %5014 = vmatpush1.bf16.msra.mxu0 %v16063_v30  ;;  %v16149_v36 = vld [vmem:[%s21476_s7 + $0x4e4] ss:$16 sps:$4 sm:$0xff]   ;;  %v5461_v30 = vld [vmem:[#allocation4 + $0xb] sm:$0x1] }
 0x449   : > { %4312 = vmatprep.subr.bf16.mxu1 %v16068_v19  ;;  %5015 = vmatprep.subr.bf16.mxu0 %v16071_v24  ;;  %v16147_v19 = vld [vmem:[%s21476_s7 + $0x4e0] ss:$16 sps:$4 sm:$0xff]   ;;  %v18952_v24 = vpack.c.bf16 %v5461_v30, %v5461_v30  ;;  %v16230_v30 = vld [vmem:[%s21476_s7 + $0x42c] ss:$16 sps:$4 sm:$0xff]  }
 0x44c   : > { %4313 = vmatpush1.bf16.msra.mxu1 %v16066_v44  ;;  %5016 = vmatpush1.bf16.msra.mxu0 %v16069_v20  ;;  %v16152_v44 = vld [vmem:[%s21476_s7 + $0x2cc] ss:$16 sps:$4 sm:$0xff]   ;;  %v16155_v20 = vld [vmem:[%s21476_s7 + $0x4c4] ss:$16 sps:$4 sm:$0xff]  }
 0x44d   : > { %4489 = vmatprep.subr.bf16.mxu1 %v16074_v17  ;;  %5196 = vmatprep.subr.bf16.mxu0 %v16077_v35  ;;  %v16150_v17 = vld [vmem:[%s21476_s7 + $0x2c8] ss:$16 sps:$4 sm:$0xff]   ;;  %v16153_v35 = vld [vmem:[%s21476_s7 + $0x4c0] ss:$16 sps:$4 sm:$0xff]  }
 0x44f   : > { %13975 = vmatmul.mubr.msk.bf16.vlgmr.msra.gmra.mxu1 %vm2364_vm2, %v3974_v49  ;;  %14046 = vmatmul.mubr.msk.bf16.vlgmr.msra.gmra.mxu0 %vm2364_vm2, %v18785_v55  ;;  %v16126_v49 = vld [vmem:[%s21476_s7 + $0x248] ss:$16 sps:$4 sm:$0xff]  }
 0x450   : > { %4490 = vmatpush1.bf16.msra.mxu1 %v16072_v21  ;;  %5197 = vmatpush1.bf16.msra.mxu0 %v16075_v32  ;;  %v16156_v21 = vld [vmem:[%s21476_s7 + $0x2a8] ss:$16 sps:$4 sm:$0xff]   ;;  %v16159_v32 = vld [vmem:[%s21476_s7 + $0x4a0] ss:$16 sps:$4 sm:$0xff]  }
 0x451   : > { %4491 = vmatprep.subr.bf16.mxu1 %v16080_v23  ;;  %5198 = vmatprep.subr.bf16.mxu0 %v16083_v34  ;;  %v16164_v23 = vld [vmem:[%s21476_s7 + $0x28c] ss:$16 sps:$4 sm:$0xff]   ;;  %v16167_v34 = vld [vmem:[%s21476_s7 + $0x484] ss:$16 sps:$4 sm:$0xff]  }
 0x452   : > { %4513 = vmatprep.mubr.bf16.mxu1 %v17249_v14  ;;  %5220 = vmatprep.mubr.bf16.mxu0 %v17249_v14 }
 0x454   : > { %4492 = vmatpush1.bf16.msra.mxu1 %v16078_v16  ;;  %5199 = vmatpush1.bf16.msra.mxu0 %v16081_v22  ;;  %v16162_v16 = vld [vmem:[%s21476_s7 + $0x288] ss:$16 sps:$4 sm:$0xff]   ;;  %v16165_v22 = vld [vmem:[%s21476_s7 + $0x480] ss:$16 sps:$4 sm:$0xff]  }
 0x455   : > { %4493 = vmatprep.subr.bf16.mxu1 %v16086_v48  ;;  %5200 = vmatprep.subr.bf16.mxu0 %v16089_v33  ;;  %v16170_v48 = vld [vmem:[%s21476_s7 + $0x36c] ss:$16 sps:$4 sm:$0xff]   ;;  %v16173_v33 = vld [vmem:[%s21476_s7 + $0x564] ss:$16 sps:$4 sm:$0xff]  }
 0x458   : > { %4494 = vmatpush1.bf16.msra.mxu1 %v16084_v40  ;;  %5201 = vmatpush1.bf16.msra.mxu0 %v16087_v13  ;;  %v5648_v40 = vld [vmem:[#allocation4 + $0xc] sm:$0x1]  ;;  %v16168_v13 = vld [vmem:[%s21476_s7 + $0x368] ss:$16 sps:$4 sm:$0xff]  }
 0x459   : > { %4495 = vmatprep.subr.bf16.mxu1 %v16092_v50  ;;  %5202 = vmatprep.subr.bf16.mxu0 %v16095_v60  ;;  %v16171_v50 = vld [vmem:[%s21476_s7 + $0x560] ss:$16 sps:$4 sm:$0xff]   ;;  %v19008_v60 = vpack.c.bf16 %v5648_v40, %v5648_v40  ;;  %v16254_v40 = vld [vmem:[%s21476_s7 + $0x4ac] ss:$16 sps:$4 sm:$0xff]  }
 0x45c   : > { %4496 = vmatpush1.bf16.msra.mxu1 %v16090_v18  ;;  %5203 = vmatpush1.bf16.msra.mxu0 %v16093_v42  ;;  %v16176_v18 = vld [vmem:[%s21476_s7 + $0x34c] ss:$16 sps:$4 sm:$0xff]   ;;  %v16179_v42 = vld [vmem:[%s21476_s7 + $0x544] ss:$16 sps:$4 sm:$0xff]  }
 0x45d   : > { %4676 = vmatprep.subr.bf16.mxu1 %v16098_v31  ;;  %5383 = vmatprep.subr.bf16.mxu0 %v16101_v8  ;;  %v16174_v31 = vld [vmem:[%s21476_s7 + $0x348] ss:$16 sps:$4 sm:$0xff]   ;;  %v16177_v8 = vld [vmem:[%s21476_s7 + $0x540] ss:$16 sps:$4 sm:$0xff]  }
 0x45f   : > { %13993 = vmatmul.mubr.msk.bf16.vlgmr.msra.gmra.mxu1 %vm2364_vm2, %v18597_v9  ;;  %14064 = vmatmul.mubr.msk.bf16.vlgmr.msra.gmra.mxu0 %vm2364_vm2, %v18840_v7  ;;  %v16113_v9 = vld [vmem:[%s21476_s7 + $0x3a4] ss:$16 sps:$4 sm:$0xff]  }
 0x460   : > { %4677 = vmatpush1.bf16.msra.mxu1 %v16096_v37  ;;  %5384 = vmatpush1.bf16.msra.mxu0 %v16099_v29  ;;  %v16180_v37 = vld [vmem:[%s21476_s7 + $0x328] ss:$16 sps:$4 sm:$0xff]   ;;  %v16183_v29 = vld [vmem:[%s21476_s7 + $0x520] ss:$16 sps:$4 sm:$0xff]  }
 0x461   : > { %4678 = vmatprep.subr.bf16.mxu1 %v16104_v11  ;;  %5385 = vmatprep.subr.bf16.mxu0 %v16107_v10  ;;  %v16188_v11 = vld [vmem:[%s21476_s7 + $0x30c] ss:$16 sps:$4 sm:$0xff]   ;;  %v16191_v10 = vld [vmem:[%s21476_s7 + $0x504] ss:$16 sps:$4 sm:$0xff]  }
 0x462   : > { %4700 = vmatprep.mubr.bf16.mxu1 %v17249_v14  ;;  %5407 = vmatprep.mubr.bf16.mxu0 %v17249_v14 }
 0x464   : > { %4679 = vmatpush1.bf16.msra.mxu1 %v16102_v25  ;;  %5386 = vmatpush1.bf16.msra.mxu0 %v16105_v56  ;;  %v16186_v25 = vld [vmem:[%s21476_s7 + $0x308] ss:$16 sps:$4 sm:$0xff]   ;;  %v16189_v56 = vld [vmem:[%s21476_s7 + $0x500] ss:$16 sps:$4 sm:$0xff]  }
 0x465   : > { %4680 = vmatprep.subr.bf16.mxu1 %v16110_v47  ;;  %5387 = vmatprep.subr.bf16.mxu0 %v16113_v9  ;;  %v16194_v47 = vld [vmem:[%s21476_s7 + $0x3ec] ss:$16 sps:$4 sm:$0xff]   ;;  %v16197_v9 = vld [vmem:[%s21476_s7 + $0x5e4] ss:$16 sps:$4 sm:$0xff]  }
 0x468   : > { %4681 = vmatpush1.bf16.msra.mxu1 %v16108_v39  ;;  %5388 = vmatpush1.bf16.msra.mxu0 %v16111_v57  ;;  %v5835_v39 = vld [vmem:[#allocation4 + $0xd] sm:$0x1]  ;;  %v16192_v57 = vld [vmem:[%s21476_s7 + $0x3e8] ss:$16 sps:$4 sm:$0xff]  }
 0x469   : > { %4682 = vmatprep.subr.bf16.mxu1 %v16116_v1  ;;  %5389 = vmatprep.subr.bf16.mxu0 %v16119_v28  ;;  %v16195_v1 = vld [vmem:[%s21476_s7 + $0x5e0] ss:$16 sps:$4 sm:$0xff]   ;;  %v19064_v28 = vpack.c.bf16 %v5835_v39, %v5835_v39  ;;  %v16278_v39 = vld [vmem:[%s21476_s7 + $0x52c] ss:$16 sps:$4 sm:$0xff]  }
 0x46c   : > { %4683 = vmatpush1.bf16.msra.mxu1 %v16114_v61  ;;  %5390 = vmatpush1.bf16.msra.mxu0 %v16117_v62  ;;  %v16200_v61 = vld [vmem:[%s21476_s7 + $0x3cc] ss:$16 sps:$4 sm:$0xff]   ;;  %v16203_v62 = vld [vmem:[%s21476_s7 + $0x5c4] ss:$16 sps:$4 sm:$0xff]  }
 0x46d   : > { %4863 = vmatprep.subr.bf16.mxu1 %v16122_v5  ;;  %5570 = vmatprep.subr.bf16.mxu0 %v16125_v12  ;;  %v16198_v5 = vld [vmem:[%s21476_s7 + $0x3c8] ss:$16 sps:$4 sm:$0xff]   ;;  %v16201_v12 = vld [vmem:[%s21476_s7 + $0x5c0] ss:$16 sps:$4 sm:$0xff]  }
 0x46f   : > { %14011 = vmatmul.mubr.msk.bf16.vlgmr.msra.gmra.mxu1 %vm2364_vm2, %v18671_v63  ;;  %14082 = vmatmul.mubr.msk.bf16.vlgmr.msra.gmra.mxu0 %vm2364_vm2, %v18896_v43  ;;  %v16137_v63 = vld [vmem:[%s21476_s7 + $0x424] ss:$16 sps:$4 sm:$0xff]  }
 0x470   : > { %4864 = vmatpush1.bf16.msra.mxu1 %v16120_v53  ;;  %5571 = vmatpush1.bf16.msra.mxu0 %v16123_v45  ;;  %v16204_v53 = vld [vmem:[%s21476_s7 + $0x3a8] ss:$16 sps:$4 sm:$0xff]   ;;  %v16207_v45 = vld [vmem:[%s21476_s7 + $0x5a0] ss:$16 sps:$4 sm:$0xff]  }
 0x471   : > { %4865 = vmatprep.subr.bf16.mxu1 %v16128_v3  ;;  %5572 = vmatprep.subr.bf16.mxu0 %v16131_v6  ;;  %v16212_v3 = vld [vmem:[%s21476_s7 + $0x38c] ss:$16 sps:$4 sm:$0xff]   ;;  %v16215_v6 = vld [vmem:[%s21476_s7 + $0x584] ss:$16 sps:$4 sm:$0xff]  }
 0x472   : > { %4887 = vmatprep.mubr.bf16.mxu1 %v17249_v14  ;;  %5594 = vmatprep.mubr.bf16.mxu0 %v17249_v14 }
 0x474   : > { %4866 = vmatpush1.bf16.msra.mxu1 %v16126_v49  ;;  %5573 = vmatpush1.bf16.msra.mxu0 %v16129_v54  ;;  %v16210_v49 = vld [vmem:[%s21476_s7 + $0x388] ss:$16 sps:$4 sm:$0xff]   ;;  %v16213_v54 = vld [vmem:[%s21476_s7 + $0x580] ss:$16 sps:$4 sm:$0xff]  }
 0x475   : > { %4867 = vmatprep.subr.bf16.mxu1 %v16134_v15  ;;  %5574 = vmatprep.subr.bf16.mxu0 %v16137_v63  ;;  %v16218_v15 = vld [vmem:[%s21476_s7 + $0x46c] ss:$16 sps:$4 sm:$0xff]   ;;  %v16221_v63 = vld [vmem:[%s21476_s7 + $0x664] ss:$16 sps:$4 sm:$0xff]  }
 0x478   : > { %4868 = vmatpush1.bf16.msra.mxu1 %v16132_v2  ;;  %5575 = vmatpush1.bf16.msra.mxu0 %v16135_v27  ;;  %v6022_v2 = vld [vmem:[#allocation4 + $0xe] sm:$0x1]  ;;  %v16216_v27 = vld [vmem:[%s21476_s7 + $0x468] ss:$16 sps:$4 sm:$0xff]  }
 0x479   : > { %4869 = vmatprep.subr.bf16.mxu1 %v16140_v4  ;;  %5576 = vmatprep.subr.bf16.mxu0 %v16143_v58  ;;  %v16219_v4 = vld [vmem:[%s21476_s7 + $0x660] ss:$16 sps:$4 sm:$0xff]   ;;  %v19120_v58 = vpack.c.bf16 %v6022_v2, %v6022_v2  ;;  %v16294_v2 = vld [vmem:[%s21476_s7 + $0x5c8] ss:$16 sps:$4 sm:$0xff]  }
 0x47c   : > { %4870 = vmatpush1.bf16.msra.mxu1 %v16138_v41  ;;  %5577 = vmatpush1.bf16.msra.mxu0 %v16141_v59  ;;  %v16224_v41 = vld [vmem:[%s21476_s7 + $0x44c] ss:$16 sps:$4 sm:$0xff]   ;;  %v16227_v59 = vld [vmem:[%s21476_s7 + $0x644] ss:$16 sps:$4 sm:$0xff]  }
 0x47d   : > { %5050 = vmatprep.subr.bf16.mxu1 %v16146_v26  ;;  %5757 = vmatprep.subr.bf16.mxu0 %v16149_v36  ;;  %v16222_v26 = vld [vmem:[%s21476_s7 + $0x448] ss:$16 sps:$4 sm:$0xff]   ;;  %v16225_v36 = vld [vmem:[%s21476_s7 + $0x640] ss:$16 sps:$4 sm:$0xff]  }
 0x47f   : > { %14029 = vmatmul.mubr.msk.bf16.vlgmr.msra.gmra.mxu1 %vm2364_vm2, %v18730_v46  ;;  %14100 = vmatmul.mubr.msk.bf16.vlgmr.msra.gmra.mxu0 %vm2364_vm2, %v18952_v24  ;;  %v16161_v46 = vld [vmem:[%s21476_s7 + $0x4a4] ss:$16 sps:$4 sm:$0xff]  }
 0x480   : > { %5051 = vmatpush1.bf16.msra.mxu1 %v16144_v52  ;;  %5758 = vmatpush1.bf16.msra.mxu0 %v16147_v19  ;;  %v16228_v52 = vld [vmem:[%s21476_s7 + $0x428] ss:$16 sps:$4 sm:$0xff]   ;;  %v16231_v19 = vld [vmem:[%s21476_s7 + $0x620] ss:$16 sps:$4 sm:$0xff]  }
 0x481   : > { %5052 = vmatprep.subr.bf16.mxu1 %v16152_v44  ;;  %5759 = vmatprep.subr.bf16.mxu0 %v16155_v20  ;;  %v16236_v44 = vld [vmem:[%s21476_s7 + $0x40c] ss:$16 sps:$4 sm:$0xff]   ;;  %v16239_v20 = vld [vmem:[%s21476_s7 + $0x604] ss:$16 sps:$4 sm:$0xff]  }
 0x482   : > { %5074 = vmatprep.mubr.bf16.mxu1 %v17249_v14  ;;  %5781 = vmatprep.mubr.bf16.mxu0 %v17249_v14 }
 0x484   : > { %5053 = vmatpush1.bf16.msra.mxu1 %v16150_v17  ;;  %5760 = vmatpush1.bf16.msra.mxu0 %v16153_v35  ;;  %v16234_v17 = vld [vmem:[%s21476_s7 + $0x408] ss:$16 sps:$4 sm:$0xff]   ;;  %v16237_v35 = vld [vmem:[%s21476_s7 + $0x600] ss:$16 sps:$4 sm:$0xff]  }
 0x485   : > { %5054 = vmatprep.subr.bf16.mxu1 %v16158_v38  ;;  %5761 = vmatprep.subr.bf16.mxu0 %v16161_v46  ;;  %v16242_v38 = vld [vmem:[%s21476_s7 + $0x4ec] ss:$16 sps:$4 sm:$0xff]   ;;  %v16245_v46 = vld [vmem:[%s21476_s7 + $0x6e4] ss:$16 sps:$4 sm:$0xff]  }
 0x488   : > { %5055 = vmatpush1.bf16.msra.mxu1 %v16156_v21  ;;  %5762 = vmatpush1.bf16.msra.mxu0 %v16159_v32  ;;  %v6209_v21 = vld [vmem:[#allocation4 + $0xf] sm:$0x1]  ;;  %v16240_v32 = vld [vmem:[%s21476_s7 + $0x4e8] ss:$16 sps:$4 sm:$0xff]  }
 0x489   : > { %5056 = vmatprep.subr.bf16.mxu1 %v16164_v23  ;;  %5763 = vmatprep.subr.bf16.mxu0 %v16167_v34  ;;  %v16243_v23 = vld [vmem:[%s21476_s7 + $0x6e0] ss:$16 sps:$4 sm:$0xff]   ;;  %v19176_v34 = vpack.c.bf16 %v6209_v21, %v6209_v21  ;;  %v6770_v21 = vld [vmem:[#allocation4 + $0x15] sm:$0x1] }
 0x48c   : > { %5057 = vmatpush1.bf16.msra.mxu1 %v16162_v16  ;;  %5764 = vmatpush1.bf16.msra.mxu0 %v16165_v22  ;;  %v16248_v16 = vld [vmem:[%s21476_s7 + $0x4cc] ss:$16 sps:$4 sm:$0xff]   ;;  %v16251_v22 = vld [vmem:[%s21476_s7 + $0x6c4] ss:$16 sps:$4 sm:$0xff]  }
 0x48d   : > { %5237 = vmatprep.subr.bf16.mxu1 %v16170_v48  ;;  %5944 = vmatprep.subr.bf16.mxu0 %v16173_v33  ;;  %v16246_v48 = vld [vmem:[%s21476_s7 + $0x4c8] ss:$16 sps:$4 sm:$0xff]   ;;  %v16249_v33 = vld [vmem:[%s21476_s7 + $0x6c0] ss:$16 sps:$4 sm:$0xff]  }
 0x48f   : > { %14047 = vmatmul.mubr.msk.bf16.vlgmr.msra.gmra.mxu1 %vm2364_vm2, %v18785_v55  ;;  %14118 = vmatmul.mubr.msk.bf16.vlgmr.msra.gmra.mxu0 %vm2364_vm2, %v19008_v60  ;;  %v16185_v55 = vld [vmem:[%s21476_s7 + $0x524] ss:$16 sps:$4 sm:$0xff]  }
 0x490   : > { %5238 = vmatpush1.bf16.msra.mxu1 %v16168_v13  ;;  %5945 = vmatpush1.bf16.msra.mxu0 %v16171_v50  ;;  %v16252_v13 = vld [vmem:[%s21476_s7 + $0x4a8] ss:$16 sps:$4 sm:$0xff]   ;;  %v16255_v50 = vld [vmem:[%s21476_s7 + $0x6a0] ss:$16 sps:$4 sm:$0xff]  }
 0x491   : > { %5239 = vmatprep.subr.bf16.mxu1 %v16176_v18  ;;  %5946 = vmatprep.subr.bf16.mxu0 %v16179_v42  ;;  %v16260_v18 = vld [vmem:[%s21476_s7 + $0x48c] ss:$16 sps:$4 sm:$0xff]   ;;  %v16263_v42 = vld [vmem:[%s21476_s7 + $0x684] ss:$16 sps:$4 sm:$0xff]  }
 0x492   : > { %5261 = vmatprep.mubr.bf16.mxu1 %v17249_v14  ;;  %5968 = vmatprep.mubr.bf16.mxu0 %v17249_v14 }
 0x494   : > { %5240 = vmatpush1.bf16.msra.mxu1 %v16174_v31  ;;  %5947 = vmatpush1.bf16.msra.mxu0 %v16177_v8  ;;  %v16258_v31 = vld [vmem:[%s21476_s7 + $0x488] ss:$16 sps:$4 sm:$0xff]   ;;  %v16261_v8 = vld [vmem:[%s21476_s7 + $0x680] ss:$16 sps:$4 sm:$0xff]  }
 0x495   : > { %5241 = vmatprep.subr.bf16.mxu1 %v16182_v51  ;;  %5948 = vmatprep.subr.bf16.mxu0 %v16185_v55  ;;  %v16266_v51 = vld [vmem:[%s21476_s7 + $0x56c] ss:$16 sps:$4 sm:$0xff]   ;;  %v16269_v55 = vld [vmem:[%s21476_s7 + $0x764] ss:$16 sps:$4 sm:$0xff]  }
 0x498   : > { %5242 = vmatpush1.bf16.msra.mxu1 %v16180_v37  ;;  %5949 = vmatpush1.bf16.msra.mxu0 %v16183_v29  ;;  %v6396_v37 = vld [vmem:[#allocation4 + $0x10] sm:$0x1]  ;;  %v16264_v29 = vld [vmem:[%s21476_s7 + $0x568] ss:$16 sps:$4 sm:$0xff]  }
 0x499   : > { %5243 = vmatprep.subr.bf16.mxu1 %v16188_v11  ;;  %5950 = vmatprep.subr.bf16.mxu0 %v16191_v10  ;;  %v16267_v11 = vld [vmem:[%s21476_s7 + $0x760] ss:$16 sps:$4 sm:$0xff]   ;;  %v19232_v10 = vpack.c.bf16 %v6396_v37, %v6396_v37 }
 0x49c   : > { %5244 = vmatpush1.bf16.msra.mxu1 %v16186_v25  ;;  %5951 = vmatpush1.bf16.msra.mxu0 %v16189_v56  ;;  %v16272_v25 = vld [vmem:[%s21476_s7 + $0x54c] ss:$16 sps:$4 sm:$0xff]   ;;  %v16275_v56 = vld [vmem:[%s21476_s7 + $0x744] ss:$16 sps:$4 sm:$0xff]  }
 0x49d   : > { %5424 = vmatprep.subr.bf16.mxu1 %v16194_v47  ;;  %6131 = vmatprep.subr.bf16.mxu0 %v16197_v9  ;;  %v16270_v47 = vld [vmem:[%s21476_s7 + $0x548] ss:$16 sps:$4 sm:$0xff]   ;;  %v16273_v9 = vld [vmem:[%s21476_s7 + $0x740] ss:$16 sps:$4 sm:$0xff]  }
 0x49f   : > { %14065 = vmatmul.mubr.msk.bf16.vlgmr.msra.gmra.mxu1 %vm2364_vm2, %v18840_v7  ;;  %14136 = vmatmul.mubr.msk.bf16.vlgmr.msra.gmra.mxu0 %vm2364_vm2, %v19064_v28  ;;  %v16209_v7 = vld [vmem:[%s21476_s7 + $0x5a4] ss:$16 sps:$4 sm:$0xff]  }
 0x4a0   : > { %5425 = vmatpush1.bf16.msra.mxu1 %v16192_v57  ;;  %6132 = vmatpush1.bf16.msra.mxu0 %v16195_v1  ;;  %v16276_v57 = vld [vmem:[%s21476_s7 + $0x528] ss:$16 sps:$4 sm:$0xff]   ;;  %v16279_v1 = vld [vmem:[%s21476_s7 + $0x720] ss:$16 sps:$4 sm:$0xff]  }
 0x4a1   : > { %5426 = vmatprep.subr.bf16.mxu1 %v16200_v61  ;;  %6133 = vmatprep.subr.bf16.mxu0 %v16203_v62  ;;  %v16284_v61 = vld [vmem:[%s21476_s7 + $0x50c] ss:$16 sps:$4 sm:$0xff]   ;;  %v16287_v62 = vld [vmem:[%s21476_s7 + $0x704] ss:$16 sps:$4 sm:$0xff]  }
 0x4a2   : > { %5448 = vmatprep.mubr.bf16.mxu1 %v17249_v14  ;;  %6155 = vmatprep.mubr.bf16.mxu0 %v17249_v14 }
 0x4a4   : > { %5427 = vmatpush1.bf16.msra.mxu1 %v16198_v5  ;;  %6134 = vmatpush1.bf16.msra.mxu0 %v16201_v12  ;;  %v16282_v5 = vld [vmem:[%s21476_s7 + $0x508] ss:$16 sps:$4 sm:$0xff]   ;;  %v16285_v12 = vld [vmem:[%s21476_s7 + $0x700] ss:$16 sps:$4 sm:$0xff]  }
 0x4a5   : > { %5428 = vmatprep.subr.bf16.mxu1 %v16206_v0  ;;  %6135 = vmatprep.subr.bf16.mxu0 %v16209_v7  ;;  %v16290_v0 = vld [vmem:[%s21476_s7 + $0x5ec] ss:$16 sps:$4 sm:$0xff]   ;;  %v16293_v7 = vld [vmem:[%s21476_s7 + $0x7e4] ss:$16 sps:$4 sm:$0xff]  }
 0x4a8   : > { %5429 = vmatpush1.bf16.msra.mxu1 %v16204_v53  ;;  %6136 = vmatpush1.bf16.msra.mxu0 %v16207_v45  ;;  %v6583_v53 = vld [vmem:[#allocation4 + $0x14] sm:$0x1]  ;;  %v16288_v45 = vld [vmem:[%s21476_s7 + $0x5e8] ss:$16 sps:$4 sm:$0xff]  }
 0x4a9   : > { %5430 = vmatprep.subr.bf16.mxu1 %v16212_v3  ;;  %6137 = vmatprep.subr.bf16.mxu0 %v16215_v6  ;;  %v16291_v3 = vld [vmem:[%s21476_s7 + $0x7e0] ss:$16 sps:$4 sm:$0xff]   ;;  %v19288_v6 = vpack.c.bf16 %v6583_v53, %v6583_v53  ;;  %v16342_v53 = vld [vmem:[%s21476_s7 + $0x6c8] ss:$16 sps:$4 sm:$0xff]  }
 0x4ac   : > { %5431 = vmatpush1.bf16.msra.mxu1 %v16210_v49  ;;  %6138 = vmatpush1.bf16.msra.mxu0 %v16213_v54  ;;  %v16296_v49 = vld [vmem:[%s21476_s7 + $0x5cc] ss:$16 sps:$4 sm:$0xff]   ;;  %v16299_v54 = vld [vmem:[%s21476_s7 + $0x7c4] ss:$16 sps:$4 sm:$0xff]  }
 0x4ad   : > { %5611 = vmatprep.subr.bf16.mxu1 %v16218_v15  ;;  %6318 = vmatprep.subr.bf16.mxu0 %v16221_v63 }
 0x4af   : > { %14083 = vmatmul.mubr.msk.bf16.vlgmr.msra.gmra.mxu1 %vm2364_vm2, %v18896_v43  ;;  %14154 = vmatmul.mubr.msk.bf16.vlgmr.msra.gmra.mxu0 %vm2364_vm2, %v19120_v58  ;;  %v16233_v43 = vld [vmem:[%s21476_s7 + $0x624] ss:$16 sps:$4 sm:$0xff]  }
 0x4b0   : > { %5612 = vmatpush1.bf16.msra.mxu1 %v16216_v27  ;;  %6319 = vmatpush1.bf16.msra.mxu0 %v16219_v4  ;;  %v16297_v27 = vld [vmem:[%s21476_s7 + $0x7c0] ss:$16 sps:$4 sm:$0xff]  }
 0x4b1   : > { %5613 = vmatprep.subr.bf16.mxu1 %v16224_v41  ;;  %6320 = vmatprep.subr.bf16.mxu0 %v16227_v59  ;;  %v16302_v41 = vld [vmem:[%s21476_s7 + $0x5ac] ss:$16 sps:$4 sm:$0xff]   ;;  %v16305_v59 = vld [vmem:[%s21476_s7 + $0x7a4] ss:$16 sps:$4 sm:$0xff]  }
 0x4b2   : > { %5635 = vmatprep.mubr.bf16.mxu1 %v17249_v14  ;;  %6342 = vmatprep.mubr.bf16.mxu0 %v17249_v14 }
 0x4b4   : > { %5614 = vmatpush1.bf16.msra.mxu1 %v16222_v26  ;;  %6321 = vmatpush1.bf16.msra.mxu0 %v16225_v36 }
 0x4b5   : > { %5615 = vmatprep.subr.bf16.mxu1 %v16230_v30  ;;  %6322 = vmatprep.subr.bf16.mxu0 %v16233_v43  ;;  %v16300_v30 = vld [vmem:[%s21476_s7 + $0x5a8] ss:$16 sps:$4 sm:$0xff]   ;;  %v16303_v43 = vld [vmem:[%s21476_s7 + $0x7a0] ss:$16 sps:$4 sm:$0xff]  }
 0x4b8   : > { %5616 = vmatpush1.bf16.msra.mxu1 %v16228_v52  ;;  %6323 = vmatpush1.bf16.msra.mxu0 %v16231_v19 }
 0x4b9   : > { %5617 = vmatprep.subr.bf16.mxu1 %v16236_v44  ;;  %6324 = vmatprep.subr.bf16.mxu0 %v16239_v20  ;;  %v16308_v44 = vld [vmem:[%s21476_s7 + $0x58c] ss:$16 sps:$4 sm:$0xff]   ;;  %v16311_v20 = vld [vmem:[%s21476_s7 + $0x784] ss:$16 sps:$4 sm:$0xff]  }
 0x4bc   : > { %5618 = vmatpush1.bf16.msra.mxu1 %v16234_v17  ;;  %6325 = vmatpush1.bf16.msra.mxu0 %v16237_v35  ;;  %v16306_v17 = vld [vmem:[%s21476_s7 + $0x588] ss:$16 sps:$4 sm:$0xff]   ;;  %v16309_v35 = vld [vmem:[%s21476_s7 + $0x780] ss:$16 sps:$4 sm:$0xff]  }
 0x4bd   : > { %5798 = vmatprep.subr.bf16.mxu1 %v16242_v38  ;;  %6505 = vmatprep.subr.bf16.mxu0 %v16245_v46  ;;  %v16314_v38 = vld [vmem:[%s21476_s7 + $0x66c] ss:$16 sps:$4 sm:$0xff]   ;;  %v16317_v46 = vld [vmem:[%s21476_s7 + $0x864] ss:$16 sps:$4 sm:$0xff]  }
 0x4bf   : > { %14101 = vmatmul.mubr.msk.bf16.vlgmr.msra.gmra.mxu1 %vm2364_vm2, %v18952_v24  ;;  %14172 = vmatmul.mubr.msk.bf16.vlgmr.msra.gmra.mxu0 %vm2364_vm2, %v19176_v34  ;;  %v16257_v24 = vld [vmem:[%s21476_s7 + $0x6a4] ss:$16 sps:$4 sm:$0xff]  }
 0x4c0   : > { %5799 = vmatpush1.bf16.msra.mxu1 %v16240_v32  ;;  %6506 = vmatpush1.bf16.msra.mxu0 %v16243_v23  ;;  %v16312_v32 = vld [vmem:[%s21476_s7 + $0x668] ss:$16 sps:$4 sm:$0xff]   ;;  %v16315_v23 = vld [vmem:[%s21476_s7 + $0x860] ss:$16 sps:$4 sm:$0xff]  }
 0x4c1   : > { %5800 = vmatprep.subr.bf16.mxu1 %v16248_v16  ;;  %6507 = vmatprep.subr.bf16.mxu0 %v16251_v22  ;;  %v19352_v16 = vpack.c.bf16 %v6770_v21, %v6770_v21  ;;  %v16320_v22 = vld [vmem:[%s21476_s7 + $0x64c] ss:$16 sps:$4 sm:$0xff]   ;;  %v16360_v21 = vld [vmem:[%s21476_s7 + $0x768] ss:$16 sps:$4 sm:$0xff]  }
 0x4c2   : > { %5822 = vmatprep.mubr.bf16.mxu1 %v17249_v14  ;;  %6529 = vmatprep.mubr.bf16.mxu0 %v17249_v14 }
 0x4c4   : > { %5801 = vmatpush1.bf16.msra.mxu1 %v16246_v48  ;;  %6508 = vmatpush1.bf16.msra.mxu0 %v16249_v33  ;;  %v16323_v48 = vld [vmem:[%s21476_s7 + $0x844] ss:$16 sps:$4 sm:$0xff]  }
 0x4c5   : > { %5802 = vmatprep.subr.bf16.mxu1 %v16254_v40  ;;  %6509 = vmatprep.subr.bf16.mxu0 %v16257_v24  ;;  %v16318_v24 = vld [vmem:[%s21476_s7 + $0x648] ss:$16 sps:$4 sm:$0xff]  }
 0x4c8   : > { %5803 = vmatpush1.bf16.msra.mxu1 %v16252_v13  ;;  %6510 = vmatpush1.bf16.msra.mxu0 %v16255_v50  ;;  %v16321_v13 = vld [vmem:[%s21476_s7 + $0x840] ss:$16 sps:$4 sm:$0xff]  }
 0x4c9   : > { %5804 = vmatprep.subr.bf16.mxu1 %v16260_v18  ;;  %6511 = vmatprep.subr.bf16.mxu0 %v16263_v42  ;;  %v16329_v42 = vld [vmem:[%s21476_s7 + $0x824] ss:$16 sps:$4 sm:$0xff]  }
 0x4cc   : > { %5805 = vmatpush1.bf16.msra.mxu1 %v16258_v31  ;;  %6512 = vmatpush1.bf16.msra.mxu0 %v16261_v8 }
 0x4cd   : > { %5985 = vmatprep.subr.bf16.mxu1 %v16266_v51  ;;  %6692 = vmatprep.subr.bf16.mxu0 %v16269_v55  ;;  %v16324_v51 = vld [vmem:[%s21476_s7 + $0x628] ss:$16 sps:$4 sm:$0xff]   ;;  %v16327_v55 = vld [vmem:[%s21476_s7 + $0x820] ss:$16 sps:$4 sm:$0xff]  }
 0x4cf   : > { %14119 = vmatmul.mubr.msk.bf16.vlgmr.msra.gmra.mxu1 %vm2364_vm2, %v19008_v60  ;;  %14190 = vmatmul.mubr.msk.bf16.vlgmr.msra.gmra.mxu0 %vm2364_vm2, %v19232_v10  ;;  %v16281_v60 = vld [vmem:[%s21476_s7 + $0x724] ss:$16 sps:$4 sm:$0xff]  }
 0x4d0   : > { %5986 = vmatpush1.bf16.msra.mxu1 %v16264_v29  ;;  %6693 = vmatpush1.bf16.msra.mxu0 %v16267_v11  ;;  %v16332_v11 = vld [vmem:[%s21476_s7 + $0x60c] ss:$16 sps:$4 sm:$0xff]  }
 0x4d1   : > { %5987 = vmatprep.subr.bf16.mxu1 %v16272_v25  ;;  %6694 = vmatprep.subr.bf16.mxu0 %v16275_v56  ;;  %v16335_v25 = vld [vmem:[%s21476_s7 + $0x804] ss:$16 sps:$4 sm:$0xff]   ;;  %v16330_v56 = vld [vmem:[%s21476_s7 + $0x608] ss:$16 sps:$4 sm:$0xff]  }
 0x4d2   : > { %6009 = vmatprep.mubr.bf16.mxu1 %v17249_v14  ;;  %6716 = vmatprep.mubr.bf16.mxu0 %v17249_v14 }
 0x4d4   : > { %5988 = vmatpush1.bf16.msra.mxu1 %v16270_v47  ;;  %6695 = vmatpush1.bf16.msra.mxu0 %v16273_v9  ;;  %v16333_v47 = vld [vmem:[%s21476_s7 + $0x800] ss:$16 sps:$4 sm:$0xff]   ;;  %v16338_v9 = vld [vmem:[%s21476_s7 + $0x6ec] ss:$16 sps:$4 sm:$0xff]  }
 0x4d5   : > { %5989 = vmatprep.subr.bf16.mxu1 %v16278_v39  ;;  %6696 = vmatprep.subr.bf16.mxu0 %v16281_v60  ;;  %v16341_v39 = vld [vmem:[%s21476_s7 + $0x8e4] ss:$16 sps:$4 sm:$0xff]  }
 0x4d6   : > { %v6957_v60 = vld [vmem:[#allocation4 + $0x16] sm:$0x1] }
 0x4d8   : > { %5990 = vmatpush1.bf16.msra.mxu1 %v16276_v57  ;;  %6697 = vmatpush1.bf16.msra.mxu0 %v16279_v1  ;;  %v16336_v57 = vld [vmem:[%s21476_s7 + $0x6e8] ss:$16 sps:$4 sm:$0xff]   ;;  %v16339_v1 = vld [vmem:[%s21476_s7 + $0x8e0] ss:$16 sps:$4 sm:$0xff]  }
 0x4d9   : > { %5991 = vmatprep.subr.bf16.mxu1 %v16284_v61  ;;  %6698 = vmatprep.subr.bf16.mxu0 %v16287_v62  ;;  %v19416_v61 = vpack.c.bf16 %v6957_v60, %v6957_v60  ;;  %v16344_v62 = vld [vmem:[%s21476_s7 + $0x6cc] ss:$16 sps:$4 sm:$0xff]   ;;  %v16381_v60 = vld [vmem:[%s21476_s7 + $0x900] ss:$16 sps:$4 sm:$0xff]  }
 0x4dc   : > { %5992 = vmatpush1.bf16.msra.mxu1 %v16282_v5  ;;  %6699 = vmatpush1.bf16.msra.mxu0 %v16285_v12  ;;  %v16347_v5 = vld [vmem:[%s21476_s7 + $0x8c4] ss:$16 sps:$4 sm:$0xff]  }
 0x4dd   : > { %6172 = vmatprep.subr.bf16.mxu1 %v16290_v0  ;;  %6879 = vmatprep.subr.bf16.mxu0 %v16293_v7 }
 0x4df   : > { %14137 = vmatmul.mubr.msk.bf16.vlgmr.msra.gmra.mxu1 %vm2364_vm2, %v19064_v28  ;;  %14208 = vmatmul.mubr.msk.bf16.vlgmr.msra.gmra.mxu0 %vm2364_vm2, %v19288_v6  ;;  %v19300_v15 = vpop.f32.mrf.mxu1  ;;  %v19302_v63 = vpop.f32.mrf.mxu0 }
 0x4e0   : > { %6173 = vmatpush1.bf16.msra.mxu1 %v16288_v45  ;;  %6880 = vmatpush1.bf16.msra.mxu0 %v16291_v3  ;;  %v16345_v45 = vld [vmem:[%s21476_s7 + $0x8c0] ss:$16 sps:$4 sm:$0xff]  }
 0x4e1   : > { %v19310_v4 = vpop.f32.mrf.mxu1  ;;  %v19312_v28 = vpop.f32.mrf.mxu0  ;;  %6174 = vmatprep.subr.bf16.mxu1 %v16296_v49  ;;  %6881 = vmatprep.subr.bf16.mxu0 %v16299_v54  ;;  %v16353_v54 = vld [vmem:[%s21476_s7 + $0x8a4] ss:$16 sps:$4 sm:$0xff]  }
 0x4e2   : > { %6196 = vmatprep.mubr.bf16.mxu1 %v17249_v14  ;;  %6903 = vmatprep.mubr.bf16.mxu0 %v17249_v14 }
 0x4e3   : > { %v4130_v26 = vpop.f32.mrf.mxu1  ;;  %v4478_v36 = vpop.f32.mrf.mxu0 }
 0x4e4   : > { %6175 = vmatpush1.bf16.msra.mxu1 %v16294_v2  ;;  %6882 = vmatpush1.bf16.msra.mxu0 %v16297_v27  ;;  %v16348_v36 = vld [vmem:[%s21476_s7 + $0x6a8] ss:$16 sps:$4 sm:$0xff]  }
 0x4e5   : > { %v4131_v52 = vpop.f32.mrf.mxu1  ;;  %v4479_v19 = vpop.f32.mrf.mxu0  ;;  %6176 = vmatprep.subr.bf16.mxu1 %v16302_v41  ;;  %6883 = vmatprep.subr.bf16.mxu0 %v16305_v59 }
 0x4e8   : > { %6177 = vmatpush1.bf16.msra.mxu1 %v16300_v30  ;;  %6884 = vmatpush1.bf16.msra.mxu0 %v16303_v43  ;;  %v16356_v43 = vld [vmem:[%s21476_s7 + $0x68c] ss:$16 sps:$4 sm:$0xff]  }
 0x4e9   : > { %6178 = vmatprep.subr.bf16.mxu1 %v16308_v44  ;;  %6885 = vmatprep.subr.bf16.mxu0 %v16311_v20  ;;  %v16354_v20 = vld [vmem:[%s21476_s7 + $0x688] ss:$16 sps:$4 sm:$0xff]  }
 0x4ec   : > { %6179 = vmatpush1.bf16.msra.mxu1 %v16306_v17  ;;  %6886 = vmatpush1.bf16.msra.mxu0 %v16309_v35  ;;  %v16357_v17 = vld [vmem:[%s21476_s7 + $0x880] ss:$16 sps:$4 sm:$0xff]   ;;  %v16362_v35 = vld [vmem:[%s21476_s7 + $0x76c] ss:$16 sps:$4 sm:$0xff]  }
 0x4ed   : > { %6359 = vmatprep.subr.bf16.mxu1 %v16314_v38  ;;  %7066 = vmatprep.subr.bf16.mxu0 %v16317_v46  ;;  %v16365_v38 = vld [vmem:[%s21476_s7 + $0x964] ss:$16 sps:$4 sm:$0xff]  }
 0x4ee   : > { %v7144_v46 = vld [vmem:[#allocation4 + $0x17] sm:$0x1] }
 0x4ef   : > { %v19360_v33 = vpop.f32.mrf.mxu1  ;;  %v19362_v40 = vpop.f32.mrf.mxu0  ;;  %14155 = vmatmul.mubr.msk.bf16.vlgmr.msra.gmra.mxu1 %vm2364_vm2, %v19120_v58  ;;  %14226 = vmatmul.mubr.msk.bf16.vlgmr.msra.gmra.mxu0 %vm2364_vm2, %v19352_v16  ;;  %v16326_v58 = vld [vmem:[%s21476_s7 + $0x62c] ss:$16 sps:$4 sm:$0xff]  }
 0x4f0   : > { %6360 = vmatpush1.bf16.msra.mxu1 %v16312_v32  ;;  %7067 = vmatpush1.bf16.msra.mxu0 %v16315_v23  ;;  %v16363_v32 = vld [vmem:[%s21476_s7 + $0x960] ss:$16 sps:$4 sm:$0xff]   ;;  %v19478_v23 = vpack.c.bf16 %v7144_v46, %v7144_v46  ;;  %v16408_v46 = vld [vmem:[%s21476_s7 + $0x868] ss:$16 sps:$4 sm:$0xff]  }
 0x4f1   : > { %v19374_v50 = vpop.f32.mrf.mxu1  ;;  %v19376_v18 = vpop.f32.mrf.mxu0  ;;  %6361 = vmatprep.subr.bf16.mxu1 %v16320_v22  ;;  %7068 = vmatprep.subr.bf16.mxu0 %v16323_v48  ;;  %v16368_v22 = vld [vmem:[%s21476_s7 + $0x74c] ss:$16 sps:$4 sm:$0xff]   ;;  %v16371_v48 = vld [vmem:[%s21476_s7 + $0x944] ss:$16 sps:$4 sm:$0xff]  }
 0x4f2   : > { %6383 = vmatprep.mubr.bf16.mxu1 %v17249_v14  ;;  %7090 = vmatprep.mubr.bf16.mxu0 %v17249_v14 }
 0x4f3   : > { %v4171_v31 = vpop.f32.mrf.mxu1  ;;  %v4665_v8 = vpop.f32.mrf.mxu0 }
 0x4f4   : > { %6362 = vmatpush1.bf16.msra.mxu1 %v16318_v24  ;;  %7069 = vmatpush1.bf16.msra.mxu0 %v16321_v13 }
 0x4f5   : > { %v4172_v37 = vpop.f32.mrf.mxu1  ;;  %v4666_v29 = vpop.f32.mrf.mxu0  ;;  %6363 = vmatprep.subr.bf16.mxu1 %v16326_v58  ;;  %7070 = vmatprep.subr.bf16.mxu0 %v16329_v42  ;;  %v16366_v58 = vld [vmem:[%s21476_s7 + $0x748] ss:$16 sps:$4 sm:$0xff]   ;;  %v16369_v42 = vld [vmem:[%s21476_s7 + $0x940] ss:$16 sps:$4 sm:$0xff]  }
 0x4f8   : > { %6364 = vmatpush1.bf16.msra.mxu1 %v16324_v51  ;;  %7071 = vmatpush1.bf16.msra.mxu0 %v16327_v55 }
 0x4f9   : > { %6365 = vmatprep.subr.bf16.mxu1 %v16332_v11  ;;  %7072 = vmatprep.subr.bf16.mxu0 %v16335_v25  ;;  %v16372_v11 = vld [vmem:[%s21476_s7 + $0x728] ss:$16 sps:$4 sm:$0xff]   ;;  %v16375_v25 = vld [vmem:[%s21476_s7 + $0x920] ss:$16 sps:$4 sm:$0xff]  }
 0x4fc   : > { %6366 = vmatpush1.bf16.msra.mxu1 %v16330_v56  ;;  %7073 = vmatpush1.bf16.msra.mxu0 %v16333_v47 }
 0x4fd   : > { %6546 = vmatprep.subr.bf16.mxu1 %v16338_v9  ;;  %7253 = vmatprep.subr.bf16.mxu0 %v16341_v39  ;;  %v16383_v9 = vld [vmem:[%s21476_s7 + $0x904] ss:$16 sps:$4 sm:$0xff]   ;;  %v16378_v39 = vld [vmem:[%s21476_s7 + $0x708] ss:$16 sps:$4 sm:$0xff]  }
 0x4ff   : > { %v4291_v12 = vpop.f32.mrf.mxu1  ;;  %v4848_v0 = vpop.f32.mrf.mxu0  ;;  %14173 = vmatmul.mubr.msk.bf16.vlgmr.msra.gmra.mxu1 %vm2364_vm2, %v19176_v34  ;;  %14244 = vmatmul.mubr.msk.bf16.vlgmr.msra.gmra.mxu0 %vm2364_vm2, %v19416_v61  ;;  %v16350_v34 = vld [vmem:[%s21476_s7 + $0x6ac] ss:$16 sps:$4 sm:$0xff]  }
 0x500   : > { %v4292_v7 = vadd.f32 %v4291_v12, %v19300_v15  ;;  %6547 = vmatpush1.bf16.msra.mxu1 %v16336_v57  ;;  %7254 = vmatpush1.bf16.msra.mxu0 %v16339_v1  ;;  %v16386_v57 = vld [vmem:[%s21476_s7 + $0x7ec] ss:$16 sps:$4 sm:$0xff]   ;;  %v16389_v1 = vld [vmem:[%s21476_s7 + $0x9e4] ss:$16 sps:$4 sm:$0xff]   ;;  %v16387_v12 = vld [vmem:[%s21476_s7 + $0x9e0] ss:$16 sps:$4 sm:$0xff]  }
 0x501   : > { %v4293_v3 = vpop.f32.mrf.mxu1  ;;  %v4850_v49 = vpop.f32.mrf.mxu0  ;;  %6548 = vmatprep.subr.bf16.mxu1 %v16344_v62  ;;  %7255 = vmatprep.subr.bf16.mxu0 %v16347_v5  ;;  %v7331_v62 = vld [vmem:[#allocation4 + $0x18] sm:$0x1] }
 0x502   : > { %v4522_v15 = vadd.f32 %v19302_v63, %v4292_v7  ;;  %v4294_v2 = vadd.f32 %v4293_v3, %v19310_v4  ;;  %6570 = vmatprep.mubr.bf16.mxu1 %v17249_v14  ;;  %7277 = vmatprep.mubr.bf16.mxu0 %v17249_v14  ;;  %v16351_v63 = vld [vmem:[%s21476_s7 + $0x8a0] ss:$16 sps:$4 sm:$0xff]   ;;  %v16384_v5 = vld [vmem:[%s21476_s7 + $0x7e8] ss:$16 sps:$4 sm:$0xff]   ;;  %v16392_v7 = vld [vmem:[%s21476_s7 + $0x7cc] ss:$16 sps:$4 sm:$0xff]  }
 0x503   : > { %v4295_v27 = vpop.f32.mrf.mxu1  ;;  %v4852_v41 = vpop.f32.mrf.mxu0 }
 0x504   : > { %v4709_v59 = vadd.f32 %v19362_v40, %v4522_v15  ;;  %v4523_v26 = vadd.f32 %v19312_v28, %v4294_v2  ;;  %6549 = vmatpush1.bf16.msra.mxu1 %v16342_v53  ;;  %7256 = vmatpush1.bf16.msra.mxu0 %v16345_v45  ;;  %v16359_v28 = vld [vmem:[%s21476_s7 + $0x884] ss:$16 sps:$4 sm:$0xff]   ;;  %v16393_v15 = vld [vmem:[%s21476_s7 + $0x9c0] ss:$16 sps:$4 sm:$0xff]  }
 0x505   : > { %v4296_v4 = vpop.f32.mrf.mxu1  ;;  %v4853_v30 = vpop.f32.mrf.mxu0  ;;  %6550 = vmatprep.subr.bf16.mxu1 %v16350_v34  ;;  %7257 = vmatprep.subr.bf16.mxu0 %v16353_v54  ;;  %v16395_v53 = vld [vmem:[%s21476_s7 + $0x9c4] ss:$16 sps:$4 sm:$0xff]   ;;  %v16390_v54 = vld [vmem:[%s21476_s7 + $0x7c8] ss:$16 sps:$4 sm:$0xff]  }
 0x506   : > { %v4896_v52 = vadd.f32 %v4848_v0, %v4709_v59  ;;  %v4710_v19 = vadd.f32 %v19376_v18, %v4523_v26  ;;  %v19536_v0 = vpack.c.bf16 %v7331_v62, %v7331_v62  ;;  %v16401_v41 = vld [vmem:[%s21476_s7 + $0x9a4] ss:$16 sps:$4 sm:$0xff]   ;;  %v16396_v4 = vld [vmem:[%s21476_s7 + $0x7a8] ss:$16 sps:$4 sm:$0xff]   ;;  %v16399_v30 = vld [vmem:[%s21476_s7 + $0x9a0] ss:$16 sps:$4 sm:$0xff]  }
 0x507   : > { %v16432_v62 = vld [vmem:[%s21476_s7 + $0x8e8] ss:$16 sps:$4 sm:$0xff]  }
 0x508   : > { %v4897_v44 = vadd.f32 %v4850_v49, %v4710_v19  ;;  %6551 = vmatpush1.bf16.msra.mxu1 %v16348_v36  ;;  %7258 = vmatpush1.bf16.msra.mxu0 %v16351_v63  ;;  %v16407_v19 = vld [vmem:[%s21476_s7 + $0x984] ss:$16 sps:$4 sm:$0xff]  }
 0x509   : > { %6552 = vmatprep.subr.bf16.mxu1 %v16356_v43  ;;  %7259 = vmatprep.subr.bf16.mxu0 %v16359_v28 }
 0x50c   : > { %6553 = vmatpush1.bf16.msra.mxu1 %v16354_v20  ;;  %7260 = vmatpush1.bf16.msra.mxu0 %v16357_v17  ;;  %v16405_v20 = vld [vmem:[%s21476_s7 + $0x980] ss:$16 sps:$4 sm:$0xff]   ;;  %v16410_v17 = vld [vmem:[%s21476_s7 + $0x86c] ss:$16 sps:$4 sm:$0xff]  }
 0x50d   : > { %6733 = vmatprep.subr.bf16.mxu1 %v16362_v35  ;;  %7440 = vmatprep.subr.bf16.mxu0 %v16365_v38  ;;  %v16413_v35 = vld [vmem:[%s21476_s7 + $0xa64] ss:$16 sps:$4 sm:$0xff]   ;;  %v7518_v38 = vld [vmem:[#allocation4 + $0x19] sm:$0x1] }
 0x50f   : > { %v4332_v40 = vpop.f32.mrf.mxu1  ;;  %v5035_v24 = vpop.f32.mrf.mxu0  ;;  %14191 = vmatmul.mubr.msk.bf16.vlgmr.msra.gmra.mxu1 %vm2364_vm2, %v19232_v10  ;;  %14262 = vmatmul.mubr.msk.bf16.vlgmr.msra.gmra.mxu0 %vm2364_vm2, %v19478_v23  ;;  %v16374_v10 = vld [vmem:[%s21476_s7 + $0x72c] ss:$16 sps:$4 sm:$0xff]  }
 0x510   : > { %v4333_v13 = vadd.f32 %v4332_v40, %v19360_v33  ;;  %v5083_v18 = vadd.f32 %v5035_v24, %v4896_v52  ;;  %6734 = vmatpush1.bf16.msra.mxu1 %v16360_v21  ;;  %7441 = vmatpush1.bf16.msra.mxu0 %v16363_v32  ;;  %v16377_v33 = vld [vmem:[%s21476_s7 + $0x924] ss:$16 sps:$4 sm:$0xff]   ;;  %v16404_v52 = vld [vmem:[%s21476_s7 + $0x78c] ss:$16 sps:$4 sm:$0xff]   ;;  %v16411_v21 = vld [vmem:[%s21476_s7 + $0xa60] ss:$16 sps:$4 sm:$0xff]   ;;  %v19592_v32 = vpack.c.bf16 %v7518_v38, %v7518_v38 }
 0x511   : > { %v4334_v31 = vpop.f32.mrf.mxu1  ;;  %v5037_v8 = vpop.f32.mrf.mxu0  ;;  %6735 = vmatprep.subr.bf16.mxu1 %v16368_v22  ;;  %7442 = vmatprep.subr.bf16.mxu0 %v16371_v48  ;;  %v16416_v22 = vld [vmem:[%s21476_s7 + $0x84c] ss:$16 sps:$4 sm:$0xff]   ;;  %v16419_v48 = vld [vmem:[%s21476_s7 + $0xa44] ss:$16 sps:$4 sm:$0xff]   ;;  %v16456_v38 = vld [vmem:[%s21476_s7 + $0x968] ss:$16 sps:$4 sm:$0xff]  }
 0x512   : > { %v4335_v51 = vadd.f32 %v4334_v31, %v19374_v50  ;;  %v5084_v55 = vadd.f32 %v5037_v8, %v4897_v44  ;;  %6757 = vmatprep.mubr.bf16.mxu1 %v17249_v14  ;;  %7464 = vmatprep.mubr.bf16.mxu0 %v17249_v14  ;;  %v16380_v50 = vld [vmem:[%s21476_s7 + $0x70c] ss:$16 sps:$4 sm:$0xff]   ;;  %v16402_v44 = vld [vmem:[%s21476_s7 + $0x788] ss:$16 sps:$4 sm:$0xff]  }
 0x513   : > { %v4336_v37 = vpop.f32.mrf.mxu1  ;;  %v5039_v29 = vpop.f32.mrf.mxu0 }
 0x514   : > { %6736 = vmatpush1.bf16.msra.mxu1 %v16366_v58  ;;  %7443 = vmatpush1.bf16.msra.mxu0 %v16369_v42  ;;  %v16414_v58 = vld [vmem:[%s21476_s7 + $0x848] ss:$16 sps:$4 sm:$0xff]   ;;  %v16417_v42 = vld [vmem:[%s21476_s7 + $0xa40] ss:$16 sps:$4 sm:$0xff]  }
 0x515   : > { %v4337_v56 = vpop.f32.mrf.mxu1  ;;  %v5040_v47 = vpop.f32.mrf.mxu0  ;;  %6737 = vmatprep.subr.bf16.mxu1 %v16374_v10  ;;  %7444 = vmatprep.subr.bf16.mxu0 %v16377_v33  ;;  %v16425_v10 = vld [vmem:[%s21476_s7 + $0xa24] ss:$16 sps:$4 sm:$0xff]   ;;  %v16420_v29 = vld [vmem:[%s21476_s7 + $0x828] ss:$16 sps:$4 sm:$0xff]  }
 0x516   : > { %v16428_v47 = vld [vmem:[%s21476_s7 + $0x80c] ss:$16 sps:$4 sm:$0xff]  }
 0x518   : > { %6738 = vmatpush1.bf16.msra.mxu1 %v16372_v11  ;;  %7445 = vmatpush1.bf16.msra.mxu0 %v16375_v25  ;;  %v16423_v11 = vld [vmem:[%s21476_s7 + $0xa20] ss:$16 sps:$4 sm:$0xff]  }
 0x519   : > { %6739 = vmatprep.subr.bf16.mxu1 %v16380_v50  ;;  %7446 = vmatprep.subr.bf16.mxu0 %v16383_v9  ;;  %v16431_v50 = vld [vmem:[%s21476_s7 + $0xa04] ss:$16 sps:$4 sm:$0xff]   ;;  %v16426_v9 = vld [vmem:[%s21476_s7 + $0x808] ss:$16 sps:$4 sm:$0xff]  }
 0x51c   : > { %6740 = vmatpush1.bf16.msra.mxu1 %v16378_v39  ;;  %7447 = vmatpush1.bf16.msra.mxu0 %v16381_v60  ;;  %v16429_v39 = vld [vmem:[%s21476_s7 + $0xa00] ss:$16 sps:$4 sm:$0xff]   ;;  %v16434_v60 = vld [vmem:[%s21476_s7 + $0x8ec] ss:$16 sps:$4 sm:$0xff]  }
 0x51d   : > { %6920 = vmatprep.subr.bf16.mxu1 %v16386_v57  ;;  %7627 = vmatprep.subr.bf16.mxu0 %v16389_v1  ;;  %v16437_v57 = vld [vmem:[%s21476_s7 + $0xae4] ss:$16 sps:$4 sm:$0xff]   ;;  %v7705_v1 = vld [vmem:[#allocation4 + $0x1a] sm:$0x1] }
 0x51f   : > { %v4515_v45 = vpop.f32.mrf.mxu1  ;;  %v5222_v3 = vpop.f32.mrf.mxu0  ;;  %14209 = vmatmul.mubr.msk.bf16.vlgmr.msra.gmra.mxu1 %vm2364_vm2, %v19288_v6  ;;  %14280 = vmatmul.mubr.msk.bf16.vlgmr.msra.gmra.mxu0 %vm2364_vm2, %v19536_v0  ;;  %v16398_v6 = vld [vmem:[%s21476_s7 + $0x7ac] ss:$16 sps:$4 sm:$0xff]  }
 0x520   : > { %v4524_v49 = vadd.f32 %v4515_v45, %v4333_v13  ;;  %v5270_v34 = vadd.f32 %v5222_v3, %v5083_v18  ;;  %6921 = vmatpush1.bf16.msra.mxu1 %v16384_v5  ;;  %7628 = vmatpush1.bf16.msra.mxu0 %v16387_v12  ;;  %v16435_v5 = vld [vmem:[%s21476_s7 + $0xae0] ss:$16 sps:$4 sm:$0xff]   ;;  %v19648_v12 = vpack.c.bf16 %v7705_v1, %v7705_v1  ;;  %v16480_v1 = vld [vmem:[%s21476_s7 + $0x9e8] ss:$16 sps:$4 sm:$0xff]  }
 0x521   : > { %v4517_v2 = vpop.f32.mrf.mxu1  ;;  %v5224_v27 = vpop.f32.mrf.mxu0  ;;  %6922 = vmatprep.subr.bf16.mxu1 %v16392_v7  ;;  %7629 = vmatprep.subr.bf16.mxu0 %v16395_v53  ;;  %v16440_v7 = vld [vmem:[%s21476_s7 + $0x8cc] ss:$16 sps:$4 sm:$0xff]   ;;  %v16443_v53 = vld [vmem:[%s21476_s7 + $0xac4] ss:$16 sps:$4 sm:$0xff]  }
 0x522   : > { %v4525_v59 = vadd.f32 %v4517_v2, %v4335_v51  ;;  %v5271_v26 = vadd.f32 %v5224_v27, %v5084_v55  ;;  %6944 = vmatprep.mubr.bf16.mxu1 %v17249_v14  ;;  %7651 = vmatprep.mubr.bf16.mxu0 %v17249_v14 }
 0x523   : > { %v4519_v36 = vpop.f32.mrf.mxu1  ;;  %v5226_v63 = vpop.f32.mrf.mxu0 }
 0x524   : > { %6923 = vmatpush1.bf16.msra.mxu1 %v16390_v54  ;;  %7630 = vmatpush1.bf16.msra.mxu0 %v16393_v15  ;;  %v16438_v54 = vld [vmem:[%s21476_s7 + $0x8c8] ss:$16 sps:$4 sm:$0xff]   ;;  %v16441_v15 = vld [vmem:[%s21476_s7 + $0xac0] ss:$16 sps:$4 sm:$0xff]  }
 0x525   : > { %v4520_v43 = vpop.f32.mrf.mxu1  ;;  %v5227_v28 = vpop.f32.mrf.mxu0  ;;  %6924 = vmatprep.subr.bf16.mxu1 %v16398_v6  ;;  %7631 = vmatprep.subr.bf16.mxu0 %v16401_v41  ;;  %v16449_v6 = vld [vmem:[%s21476_s7 + $0xaa4] ss:$16 sps:$4 sm:$0xff]   ;;  %v16444_v63 = vld [vmem:[%s21476_s7 + $0x8a8] ss:$16 sps:$4 sm:$0xff]  }
 0x526   : > { %v16452_v28 = vld [vmem:[%s21476_s7 + $0x88c] ss:$16 sps:$4 sm:$0xff]  }
 0x528   : > { %6925 = vmatpush1.bf16.msra.mxu1 %v16396_v4  ;;  %7632 = vmatpush1.bf16.msra.mxu0 %v16399_v30  ;;  %v16447_v4 = vld [vmem:[%s21476_s7 + $0xaa0] ss:$16 sps:$4 sm:$0xff]  }
 0x529   : > { %6926 = vmatprep.subr.bf16.mxu1 %v16404_v52  ;;  %7633 = vmatprep.subr.bf16.mxu0 %v16407_v19  ;;  %v16455_v52 = vld [vmem:[%s21476_s7 + $0xa84] ss:$16 sps:$4 sm:$0xff]   ;;  %v16450_v19 = vld [vmem:[%s21476_s7 + $0x888] ss:$16 sps:$4 sm:$0xff]  }
 0x52c   : > { %6927 = vmatpush1.bf16.msra.mxu1 %v16402_v44  ;;  %7634 = vmatpush1.bf16.msra.mxu0 %v16405_v20  ;;  %v16453_v44 = vld [vmem:[%s21476_s7 + $0xa80] ss:$16 sps:$4 sm:$0xff]   ;;  %v16458_v20 = vld [vmem:[%s21476_s7 + $0x96c] ss:$16 sps:$4 sm:$0xff]  }
 0x52d   : > { %7107 = vmatprep.subr.bf16.mxu1 %v16410_v17  ;;  %7814 = vmatprep.subr.bf16.mxu0 %v16413_v35  ;;  %v16461_v17 = vld [vmem:[%s21476_s7 + $0xb64] ss:$16 sps:$4 sm:$0xff]   ;;  %v7892_v35 = vld [vmem:[#allocation4 + $0x1e] sm:$0x1] }
 0x52f   : > { %v4702_v40 = vpop.f32.mrf.mxu1  ;;  %v5409_v24 = vpop.f32.mrf.mxu0  ;;  %14227 = vmatmul.mubr.msk.bf16.vlgmr.msra.gmra.mxu1 %vm2364_vm2, %v19352_v16  ;;  %14298 = vmatmul.mubr.msk.bf16.vlgmr.msra.gmra.mxu0 %vm2364_vm2, %v19592_v32  ;;  %v16422_v16 = vld [vmem:[%s21476_s7 + $0x82c] ss:$16 sps:$4 sm:$0xff]  }
 0x530   : > { %v4711_v13 = vadd.f32 %v4702_v40, %v4524_v49  ;;  %v5457_v18 = vadd.f32 %v5409_v24, %v5270_v34  ;;  %7108 = vmatpush1.bf16.msra.mxu1 %v16408_v46  ;;  %7815 = vmatpush1.bf16.msra.mxu0 %v16411_v21  ;;  %v16459_v46 = vld [vmem:[%s21476_s7 + $0xb60] ss:$16 sps:$4 sm:$0xff]   ;;  %v19704_v21 = vpack.c.bf16 %v7892_v35, %v7892_v35  ;;  %v16504_v35 = vld [vmem:[%s21476_s7 + $0xa68] ss:$16 sps:$4 sm:$0xff]  }
 0x531   : > { %v4704_v31 = vpop.f32.mrf.mxu1  ;;  %v5411_v8 = vpop.f32.mrf.mxu0  ;;  %7109 = vmatprep.subr.bf16.mxu1 %v16416_v22  ;;  %7816 = vmatprep.subr.bf16.mxu0 %v16419_v48  ;;  %v16464_v22 = vld [vmem:[%s21476_s7 + $0x94c] ss:$16 sps:$4 sm:$0xff]   ;;  %v16467_v48 = vld [vmem:[%s21476_s7 + $0xb44] ss:$16 sps:$4 sm:$0xff]  }
 0x532   : > { %v4712_v33 = vadd.f32 %v4704_v31, %v4525_v59  ;;  %v5458_v51 = vadd.f32 %v5411_v8, %v5271_v26  ;;  %7131 = vmatprep.mubr.bf16.mxu1 %v17249_v14  ;;  %7838 = vmatprep.mubr.bf16.mxu0 %v17249_v14 }
 0x533   : > { %v4706_v55 = vpop.f32.mrf.mxu1  ;;  %v5413_v37 = vpop.f32.mrf.mxu0 }
 0x534   : > { %7110 = vmatpush1.bf16.msra.mxu1 %v16414_v58  ;;  %7817 = vmatpush1.bf16.msra.mxu0 %v16417_v42  ;;  %v16462_v58 = vld [vmem:[%s21476_s7 + $0x948] ss:$16 sps:$4 sm:$0xff]   ;;  %v16465_v42 = vld [vmem:[%s21476_s7 + $0xb40] ss:$16 sps:$4 sm:$0xff]  }
 0x535   : > { %v4707_v25 = vpop.f32.mrf.mxu1  ;;  %v5414_v56 = vpop.f32.mrf.mxu0  ;;  %7111 = vmatprep.subr.bf16.mxu1 %v16422_v16  ;;  %7818 = vmatprep.subr.bf16.mxu0 %v16425_v10  ;;  %v16473_v16 = vld [vmem:[%s21476_s7 + $0xb24] ss:$16 sps:$4 sm:$0xff]   ;;  %v16468_v37 = vld [vmem:[%s21476_s7 + $0x928] ss:$16 sps:$4 sm:$0xff]  }
 0x536   : > { %v16476_v56 = vld [vmem:[%s21476_s7 + $0x90c] ss:$16 sps:$4 sm:$0xff]  }
 0x538   : > { %7112 = vmatpush1.bf16.msra.mxu1 %v16420_v29  ;;  %7819 = vmatpush1.bf16.msra.mxu0 %v16423_v11  ;;  %v16471_v29 = vld [vmem:[%s21476_s7 + $0xb20] ss:$16 sps:$4 sm:$0xff]  }
 0x539   : > { %7113 = vmatprep.subr.bf16.mxu1 %v16428_v47  ;;  %7820 = vmatprep.subr.bf16.mxu0 %v16431_v50  ;;  %v16479_v47 = vld [vmem:[%s21476_s7 + $0xb04] ss:$16 sps:$4 sm:$0xff]   ;;  %v16474_v50 = vld [vmem:[%s21476_s7 + $0x908] ss:$16 sps:$4 sm:$0xff]  }
 0x53c   : > { %7114 = vmatpush1.bf16.msra.mxu1 %v16426_v9  ;;  %7821 = vmatpush1.bf16.msra.mxu0 %v16429_v39  ;;  %v16477_v9 = vld [vmem:[%s21476_s7 + $0xb00] ss:$16 sps:$4 sm:$0xff]   ;;  %v16482_v39 = vld [vmem:[%s21476_s7 + $0x9ec] ss:$16 sps:$4 sm:$0xff]  }
 0x53d   : > { %7294 = vmatprep.subr.bf16.mxu1 %v16434_v60  ;;  %8001 = vmatprep.subr.bf16.mxu0 %v16437_v57  ;;  %v16485_v60 = vld [vmem:[%s21476_s7 + $0xbe4] ss:$16 sps:$4 sm:$0xff]   ;;  %v8079_v57 = vld [vmem:[#allocation4 + $0x1f] sm:$0x1] }
 0x53f   : > { %v4889_v45 = vpop.f32.mrf.mxu1  ;;  %v5596_v3 = vpop.f32.mrf.mxu0  ;;  %14245 = vmatmul.mubr.msk.bf16.vlgmr.msra.gmra.mxu1 %vm2364_vm2, %v19416_v61  ;;  %14316 = vmatmul.mubr.msk.bf16.vlgmr.msra.gmra.mxu0 %vm2364_vm2, %v19648_v12  ;;  %v16446_v61 = vld [vmem:[%s21476_s7 + $0x8ac] ss:$16 sps:$4 sm:$0xff]  }
 0x540   : > { %v4898_v49 = vadd.f32 %v4889_v45, %v4711_v13  ;;  %v5644_v34 = vadd.f32 %v5596_v3, %v5457_v18  ;;  %7295 = vmatpush1.bf16.msra.mxu1 %v16432_v62  ;;  %8002 = vmatpush1.bf16.msra.mxu0 %v16435_v5  ;;  %v16483_v62 = vld [vmem:[%s21476_s7 + $0xbe0] ss:$16 sps:$4 sm:$0xff]   ;;  %v19760_v5 = vpack.c.bf16 %v8079_v57, %v8079_v57  ;;  %v16528_v57 = vld [vmem:[%s21476_s7 + $0xae8] ss:$16 sps:$4 sm:$0xff]  }
 0x541   : > { %v4891_v2 = vpop.f32.mrf.mxu1  ;;  %v5598_v27 = vpop.f32.mrf.mxu0  ;;  %7296 = vmatprep.subr.bf16.mxu1 %v16440_v7  ;;  %8003 = vmatprep.subr.bf16.mxu0 %v16443_v53  ;;  %v16488_v7 = vld [vmem:[%s21476_s7 + $0x9cc] ss:$16 sps:$4 sm:$0xff]   ;;  %v16491_v53 = vld [vmem:[%s21476_s7 + $0xbc4] ss:$16 sps:$4 sm:$0xff]  }
 0x542   : > { %v4899_v41 = vadd.f32 %v4891_v2, %v4712_v33  ;;  %v5645_v59 = vadd.f32 %v5598_v27, %v5458_v51  ;;  %7318 = vmatprep.mubr.bf16.mxu1 %v17249_v14  ;;  %8025 = vmatprep.mubr.bf16.mxu0 %v17249_v14 }
 0x543   : > { %v4893_v26 = vpop.f32.mrf.mxu1  ;;  %v5600_v36 = vpop.f32.mrf.mxu0 }
 0x544   : > { %7297 = vmatpush1.bf16.msra.mxu1 %v16438_v54  ;;  %8004 = vmatpush1.bf16.msra.mxu0 %v16441_v15  ;;  %v16486_v54 = vld [vmem:[%s21476_s7 + $0x9c8] ss:$16 sps:$4 sm:$0xff]   ;;  %v16489_v15 = vld [vmem:[%s21476_s7 + $0xbc0] ss:$16 sps:$4 sm:$0xff]  }
 0x545   : > { %v4894_v30 = vpop.f32.mrf.mxu1  ;;  %v5601_v43 = vpop.f32.mrf.mxu0  ;;  %7298 = vmatprep.subr.bf16.mxu1 %v16446_v61  ;;  %8005 = vmatprep.subr.bf16.mxu0 %v16449_v6  ;;  %v16497_v61 = vld [vmem:[%s21476_s7 + $0xba4] ss:$16 sps:$4 sm:$0xff]   ;;  %v16492_v36 = vld [vmem:[%s21476_s7 + $0x9a8] ss:$16 sps:$4 sm:$0xff]  }
 0x546   : > { %v16500_v43 = vld [vmem:[%s21476_s7 + $0x98c] ss:$16 sps:$4 sm:$0xff]  }
 0x548   : > { %7299 = vmatpush1.bf16.msra.mxu1 %v16444_v63  ;;  %8006 = vmatpush1.bf16.msra.mxu0 %v16447_v4  ;;  %v16495_v63 = vld [vmem:[%s21476_s7 + $0xba0] ss:$16 sps:$4 sm:$0xff]  }
 0x549   : > { %7300 = vmatprep.subr.bf16.mxu1 %v16452_v28  ;;  %8007 = vmatprep.subr.bf16.mxu0 %v16455_v52  ;;  %v16503_v28 = vld [vmem:[%s21476_s7 + $0xb84] ss:$16 sps:$4 sm:$0xff]   ;;  %v16498_v52 = vld [vmem:[%s21476_s7 + $0x988] ss:$16 sps:$4 sm:$0xff]  }
 0x54c   : > { %7301 = vmatpush1.bf16.msra.mxu1 %v16450_v19  ;;  %8008 = vmatpush1.bf16.msra.mxu0 %v16453_v44  ;;  %v16501_v19 = vld [vmem:[%s21476_s7 + $0xb80] ss:$16 sps:$4 sm:$0xff]   ;;  %v16506_v44 = vld [vmem:[%s21476_s7 + $0xa6c] ss:$16 sps:$4 sm:$0xff]  }
 0x54d   : > { %7481 = vmatprep.subr.bf16.mxu1 %v16458_v20  ;;  %8188 = vmatprep.subr.bf16.mxu0 %v16461_v17  ;;  %v16509_v20 = vld [vmem:[%s21476_s7 + $0xc64] ss:$16 sps:$4 sm:$0xff]   ;;  %v8266_v17 = vld [vmem:[#allocation4 + $0x20] sm:$0x1] }
 0x54f   : > { %v5076_v40 = vpop.f32.mrf.mxu1  ;;  %v5783_v24 = vpop.f32.mrf.mxu0  ;;  %14263 = vmatmul.mubr.msk.bf16.vlgmr.msra.gmra.mxu1 %vm2364_vm2, %v19478_v23  ;;  %14334 = vmatmul.mubr.msk.bf16.vlgmr.msra.gmra.mxu0 %vm2364_vm2, %v19704_v21  ;;  %v16470_v23 = vld [vmem:[%s21476_s7 + $0x92c] ss:$16 sps:$4 sm:$0xff]  }
 0x550   : > { %v5085_v13 = vadd.f32 %v5076_v40, %v4898_v49  ;;  %v5831_v18 = vadd.f32 %v5783_v24, %v5644_v34  ;;  %7482 = vmatpush1.bf16.msra.mxu1 %v16456_v38  ;;  %8189 = vmatpush1.bf16.msra.mxu0 %v16459_v46  ;;  %v16507_v38 = vld [vmem:[%s21476_s7 + $0xc60] ss:$16 sps:$4 sm:$0xff]   ;;  %v19816_v46 = vpack.c.bf16 %v8266_v17, %v8266_v17  ;;  %v16552_v17 = vld [vmem:[%s21476_s7 + $0xb68] ss:$16 sps:$4 sm:$0xff]  }
 0x551   : > { %v5078_v31 = vpop.f32.mrf.mxu1  ;;  %v5785_v8 = vpop.f32.mrf.mxu0  ;;  %7483 = vmatprep.subr.bf16.mxu1 %v16464_v22  ;;  %8190 = vmatprep.subr.bf16.mxu0 %v16467_v48  ;;  %v16512_v22 = vld [vmem:[%s21476_s7 + $0xa4c] ss:$16 sps:$4 sm:$0xff]   ;;  %v16515_v48 = vld [vmem:[%s21476_s7 + $0xc44] ss:$16 sps:$4 sm:$0xff]  }
 0x552   : > { %v5086_v10 = vadd.f32 %v5078_v31, %v4899_v41  ;;  %v5832_v33 = vadd.f32 %v5785_v8, %v5645_v59  ;;  %7505 = vmatprep.mubr.bf16.mxu1 %v17249_v14  ;;  %8212 = vmatprep.mubr.bf16.mxu0 %v17249_v14 }
 0x553   : > { %v5080_v51 = vpop.f32.mrf.mxu1  ;;  %v5787_v55 = vpop.f32.mrf.mxu0 }
 0x554   : > { %7484 = vmatpush1.bf16.msra.mxu1 %v16462_v58  ;;  %8191 = vmatpush1.bf16.msra.mxu0 %v16465_v42  ;;  %v16510_v58 = vld [vmem:[%s21476_s7 + $0xa48] ss:$16 sps:$4 sm:$0xff]   ;;  %v16513_v42 = vld [vmem:[%s21476_s7 + $0xc40] ss:$16 sps:$4 sm:$0xff]  }
 0x555   : > { %v5081_v11 = vpop.f32.mrf.mxu1  ;;  %v5788_v25 = vpop.f32.mrf.mxu0  ;;  %7485 = vmatprep.subr.bf16.mxu1 %v16470_v23  ;;  %8192 = vmatprep.subr.bf16.mxu0 %v16473_v16  ;;  %v16521_v23 = vld [vmem:[%s21476_s7 + $0xc24] ss:$16 sps:$4 sm:$0xff]   ;;  %v16516_v55 = vld [vmem:[%s21476_s7 + $0xa28] ss:$16 sps:$4 sm:$0xff]  }
 0x556   : > { %v16524_v25 = vld [vmem:[%s21476_s7 + $0xa0c] ss:$16 sps:$4 sm:$0xff]  }
 0x558   : > { %7486 = vmatpush1.bf16.msra.mxu1 %v16468_v37  ;;  %8193 = vmatpush1.bf16.msra.mxu0 %v16471_v29  ;;  %v16519_v37 = vld [vmem:[%s21476_s7 + $0xc20] ss:$16 sps:$4 sm:$0xff]  }
 0x559   : > { %7487 = vmatprep.subr.bf16.mxu1 %v16476_v56  ;;  %8194 = vmatprep.subr.bf16.mxu0 %v16479_v47  ;;  %v16527_v56 = vld [vmem:[%s21476_s7 + $0xc04] ss:$16 sps:$4 sm:$0xff]   ;;  %v16522_v47 = vld [vmem:[%s21476_s7 + $0xa08] ss:$16 sps:$4 sm:$0xff]  }
 0x55c   : > { %7488 = vmatpush1.bf16.msra.mxu1 %v16474_v50  ;;  %8195 = vmatpush1.bf16.msra.mxu0 %v16477_v9  ;;  %v16525_v50 = vld [vmem:[%s21476_s7 + $0xc00] ss:$16 sps:$4 sm:$0xff]   ;;  %v16530_v9 = vld [vmem:[%s21476_s7 + $0xaec] ss:$16 sps:$4 sm:$0xff]  }
 0x55d   : > { %7668 = vmatprep.subr.bf16.mxu1 %v16482_v39  ;;  %8375 = vmatprep.subr.bf16.mxu0 %v16485_v60  ;;  %v16533_v39 = vld [vmem:[%s21476_s7 + $0xce4] ss:$16 sps:$4 sm:$0xff]   ;;  %v8453_v60 = vld [vmem:[#allocation4 + $0x21] sm:$0x1] }
 0x55f   : > { %v5263_v45 = vpop.f32.mrf.mxu1  ;;  %v5970_v3 = vpop.f32.mrf.mxu0  ;;  %14281 = vmatmul.mubr.msk.bf16.vlgmr.msra.gmra.mxu1 %vm2364_vm2, %v19536_v0  ;;  %14352 = vmatmul.mubr.msk.bf16.vlgmr.msra.gmra.mxu0 %vm2364_vm2, %v19760_v5  ;;  %v16494_v0 = vld [vmem:[%s21476_s7 + $0x9ac] ss:$16 sps:$4 sm:$0xff]  }
 0x560   : > { %v5272_v49 = vadd.f32 %v5263_v45, %v5085_v13  ;;  %v6018_v34 = vadd.f32 %v5970_v3, %v5831_v18  ;;  %7669 = vmatpush1.bf16.msra.mxu1 %v16480_v1  ;;  %8376 = vmatpush1.bf16.msra.mxu0 %v16483_v62  ;;  %v16531_v1 = vld [vmem:[%s21476_s7 + $0xce0] ss:$16 sps:$4 sm:$0xff]   ;;  %v19872_v62 = vpack.c.bf16 %v8453_v60, %v8453_v60  ;;  %v16576_v60 = vld [vmem:[%s21476_s7 + $0xbe8] ss:$16 sps:$4 sm:$0xff]  }
 0x561   : > { %v5265_v2 = vpop.f32.mrf.mxu1  ;;  %v5972_v27 = vpop.f32.mrf.mxu0  ;;  %7670 = vmatprep.subr.bf16.mxu1 %v16488_v7  ;;  %8377 = vmatprep.subr.bf16.mxu0 %v16491_v53  ;;  %v16536_v7 = vld [vmem:[%s21476_s7 + $0xacc] ss:$16 sps:$4 sm:$0xff]   ;;  %v16539_v53 = vld [vmem:[%s21476_s7 + $0xcc4] ss:$16 sps:$4 sm:$0xff]  }
 0x562   : > { %v5273_v6 = vadd.f32 %v5265_v2, %v5086_v10  ;;  %v6019_v41 = vadd.f32 %v5972_v27, %v5832_v33  ;;  %7692 = vmatprep.mubr.bf16.mxu1 %v17249_v14  ;;  %8399 = vmatprep.mubr.bf16.mxu0 %v17249_v14 }
 0x563   : > { %v5267_v59 = vpop.f32.mrf.mxu1  ;;  %v5974_v26 = vpop.f32.mrf.mxu0 }
 0x564   : > { %7671 = vmatpush1.bf16.msra.mxu1 %v16486_v54  ;;  %8378 = vmatpush1.bf16.msra.mxu0 %v16489_v15  ;;  %v16534_v54 = vld [vmem:[%s21476_s7 + $0xac8] ss:$16 sps:$4 sm:$0xff]   ;;  %v16537_v15 = vld [vmem:[%s21476_s7 + $0xcc0] ss:$16 sps:$4 sm:$0xff]  }
 0x565   : > { %v5268_v4 = vpop.f32.mrf.mxu1  ;;  %v5975_v30 = vpop.f32.mrf.mxu0  ;;  %7672 = vmatprep.subr.bf16.mxu1 %v16494_v0  ;;  %8379 = vmatprep.subr.bf16.mxu0 %v16497_v61  ;;  %v16545_v0 = vld [vmem:[%s21476_s7 + $0xca4] ss:$16 sps:$4 sm:$0xff]   ;;  %v16540_v26 = vld [vmem:[%s21476_s7 + $0xaa8] ss:$16 sps:$4 sm:$0xff]  }
 0x566   : > { %v16548_v30 = vld [vmem:[%s21476_s7 + $0xa8c] ss:$16 sps:$4 sm:$0xff]  }
 0x568   : > { %7673 = vmatpush1.bf16.msra.mxu1 %v16492_v36  ;;  %8380 = vmatpush1.bf16.msra.mxu0 %v16495_v63  ;;  %v16543_v36 = vld [vmem:[%s21476_s7 + $0xca0] ss:$16 sps:$4 sm:$0xff]  }
 0x569   : > { %7674 = vmatprep.subr.bf16.mxu1 %v16500_v43  ;;  %8381 = vmatprep.subr.bf16.mxu0 %v16503_v28  ;;  %v16551_v43 = vld [vmem:[%s21476_s7 + $0xc84] ss:$16 sps:$4 sm:$0xff]   ;;  %v16546_v28 = vld [vmem:[%s21476_s7 + $0xa88] ss:$16 sps:$4 sm:$0xff]  }
 0x56c   : > { %7675 = vmatpush1.bf16.msra.mxu1 %v16498_v52  ;;  %8382 = vmatpush1.bf16.msra.mxu0 %v16501_v19  ;;  %v16549_v52 = vld [vmem:[%s21476_s7 + $0xc80] ss:$16 sps:$4 sm:$0xff]   ;;  %v16554_v19 = vld [vmem:[%s21476_s7 + $0xb6c] ss:$16 sps:$4 sm:$0xff]  }
 0x56d   : > { %7855 = vmatprep.subr.bf16.mxu1 %v16506_v44  ;;  %8562 = vmatprep.subr.bf16.mxu0 %v16509_v20  ;;  %v16557_v44 = vld [vmem:[%s21476_s7 + $0xd64] ss:$16 sps:$4 sm:$0xff]   ;;  %v8640_v20 = vld [vmem:[#allocation4 + $0x22] sm:$0x1] }
 0x56f   : > { %v5450_v40 = vpop.f32.mrf.mxu1  ;;  %v6157_v24 = vpop.f32.mrf.mxu0  ;;  %14299 = vmatmul.mubr.msk.bf16.vlgmr.msra.gmra.mxu1 %vm2364_vm2, %v19592_v32  ;;  %14370 = vmatmul.mubr.msk.bf16.vlgmr.msra.gmra.mxu0 %vm2364_vm2, %v19816_v46  ;;  %v16518_v32 = vld [vmem:[%s21476_s7 + $0xa2c] ss:$16 sps:$4 sm:$0xff]  }
 0x570   : > { %v5459_v13 = vadd.f32 %v5450_v40, %v5272_v49  ;;  %v6205_v18 = vadd.f32 %v6157_v24, %v6018_v34  ;;  %7856 = vmatpush1.bf16.msra.mxu1 %v16504_v35  ;;  %8563 = vmatpush1.bf16.msra.mxu0 %v16507_v38  ;;  %v16555_v35 = vld [vmem:[%s21476_s7 + $0xd60] ss:$16 sps:$4 sm:$0xff]   ;;  %v19928_v38 = vpack.c.bf16 %v8640_v20, %v8640_v20  ;;  %v16600_v20 = vld [vmem:[%s21476_s7 + $0xc68] ss:$16 sps:$4 sm:$0xff]  }
 0x571   : > { %v5452_v31 = vpop.f32.mrf.mxu1  ;;  %v6159_v8 = vpop.f32.mrf.mxu0  ;;  %7857 = vmatprep.subr.bf16.mxu1 %v16512_v22  ;;  %8564 = vmatprep.subr.bf16.mxu0 %v16515_v48  ;;  %v16560_v22 = vld [vmem:[%s21476_s7 + $0xb4c] ss:$16 sps:$4 sm:$0xff]   ;;  %v16563_v48 = vld [vmem:[%s21476_s7 + $0xd44] ss:$16 sps:$4 sm:$0xff]  }
 0x572   : > { %v5460_v16 = vadd.f32 %v5452_v31, %v5273_v6  ;;  %v6206_v10 = vadd.f32 %v6159_v8, %v6019_v41  ;;  %7879 = vmatprep.mubr.bf16.mxu1 %v17249_v14  ;;  %8586 = vmatprep.mubr.bf16.mxu0 %v17249_v14 }
 0x573   : > { %v5454_v33 = vpop.f32.mrf.mxu1  ;;  %v6161_v51 = vpop.f32.mrf.mxu0 }
 0x574   : > { %7858 = vmatpush1.bf16.msra.mxu1 %v16510_v58  ;;  %8565 = vmatpush1.bf16.msra.mxu0 %v16513_v42  ;;  %v16558_v58 = vld [vmem:[%s21476_s7 + $0xb48] ss:$16 sps:$4 sm:$0xff]   ;;  %v16561_v42 = vld [vmem:[%s21476_s7 + $0xd40] ss:$16 sps:$4 sm:$0xff]  }
 0x575   : > { %v5455_v29 = vpop.f32.mrf.mxu1  ;;  %v6162_v11 = vpop.f32.mrf.mxu0  ;;  %7859 = vmatprep.subr.bf16.mxu1 %v16518_v32  ;;  %8566 = vmatprep.subr.bf16.mxu0 %v16521_v23  ;;  %v16569_v32 = vld [vmem:[%s21476_s7 + $0xd24] ss:$16 sps:$4 sm:$0xff]   ;;  %v16564_v51 = vld [vmem:[%s21476_s7 + $0xb28] ss:$16 sps:$4 sm:$0xff]  }
 0x576   : > { %v16572_v11 = vld [vmem:[%s21476_s7 + $0xb0c] ss:$16 sps:$4 sm:$0xff]  }
 0x578   : > { %7860 = vmatpush1.bf16.msra.mxu1 %v16516_v55  ;;  %8567 = vmatpush1.bf16.msra.mxu0 %v16519_v37  ;;  %v16567_v55 = vld [vmem:[%s21476_s7 + $0xd20] ss:$16 sps:$4 sm:$0xff]  }
 0x579   : > { %7861 = vmatprep.subr.bf16.mxu1 %v16524_v25  ;;  %8568 = vmatprep.subr.bf16.mxu0 %v16527_v56  ;;  %v16575_v25 = vld [vmem:[%s21476_s7 + $0xd04] ss:$16 sps:$4 sm:$0xff]   ;;  %v16570_v56 = vld [vmem:[%s21476_s7 + $0xb08] ss:$16 sps:$4 sm:$0xff]  }
 0x57c   : > { %7862 = vmatpush1.bf16.msra.mxu1 %v16522_v47  ;;  %8569 = vmatpush1.bf16.msra.mxu0 %v16525_v50  ;;  %v16573_v47 = vld [vmem:[%s21476_s7 + $0xd00] ss:$16 sps:$4 sm:$0xff]   ;;  %v16578_v50 = vld [vmem:[%s21476_s7 + $0xbec] ss:$16 sps:$4 sm:$0xff]  }
 0x57d   : > { %8042 = vmatprep.subr.bf16.mxu1 %v16530_v9  ;;  %8749 = vmatprep.subr.bf16.mxu0 %v16533_v39  ;;  %v16581_v9 = vld [vmem:[%s21476_s7 + $0xde4] ss:$16 sps:$4 sm:$0xff]   ;;  %v8827_v39 = vld [vmem:[#allocation4 + $0x23] sm:$0x1] }
 0x57f   : > { %v5637_v45 = vpop.f32.mrf.mxu1  ;;  %v6344_v3 = vpop.f32.mrf.mxu0  ;;  %14317 = vmatmul.mubr.msk.bf16.vlgmr.msra.gmra.mxu1 %vm2364_vm2, %v19648_v12  ;;  %14388 = vmatmul.mubr.msk.bf16.vlgmr.msra.gmra.mxu0 %vm2364_vm2, %v19872_v62  ;;  %v16542_v12 = vld [vmem:[%s21476_s7 + $0xaac] ss:$16 sps:$4 sm:$0xff]  }
 0x580   : > { %v5646_v49 = vadd.f32 %v5637_v45, %v5459_v13  ;;  %v6392_v34 = vadd.f32 %v6344_v3, %v6205_v18  ;;  %8043 = vmatpush1.bf16.msra.mxu1 %v16528_v57  ;;  %8750 = vmatpush1.bf16.msra.mxu0 %v16531_v1  ;;  %v16579_v57 = vld [vmem:[%s21476_s7 + $0xde0] ss:$16 sps:$4 sm:$0xff]   ;;  %v19984_v1 = vpack.c.bf16 %v8827_v39, %v8827_v39  ;;  %v16624_v39 = vld [vmem:[%s21476_s7 + $0xce8] ss:$16 sps:$4 sm:$0xff]  }
 0x581   : > { %v5639_v2 = vpop.f32.mrf.mxu1  ;;  %v6346_v27 = vpop.f32.mrf.mxu0  ;;  %8044 = vmatprep.subr.bf16.mxu1 %v16536_v7  ;;  %8751 = vmatprep.subr.bf16.mxu0 %v16539_v53  ;;  %v16584_v7 = vld [vmem:[%s21476_s7 + $0xbcc] ss:$16 sps:$4 sm:$0xff]   ;;  %v16587_v53 = vld [vmem:[%s21476_s7 + $0xdc4] ss:$16 sps:$4 sm:$0xff]  }
 0x582   : > { %v5647_v61 = vadd.f32 %v5639_v2, %v5460_v16  ;;  %v6393_v6 = vadd.f32 %v6346_v27, %v6206_v10  ;;  %8066 = vmatprep.mubr.bf16.mxu1 %v17249_v14  ;;  %8773 = vmatprep.mubr.bf16.mxu0 %v17249_v14 }
 0x583   : > { %v5641_v41 = vpop.f32.mrf.mxu1  ;;  %v6348_v59 = vpop.f32.mrf.mxu0 }
 0x584   : > { %8045 = vmatpush1.bf16.msra.mxu1 %v16534_v54  ;;  %8752 = vmatpush1.bf16.msra.mxu0 %v16537_v15  ;;  %v16582_v54 = vld [vmem:[%s21476_s7 + $0xbc8] ss:$16 sps:$4 sm:$0xff]   ;;  %v16585_v15 = vld [vmem:[%s21476_s7 + $0xdc0] ss:$16 sps:$4 sm:$0xff]  }
 0x585   : > { %v5642_v63 = vpop.f32.mrf.mxu1  ;;  %v6349_v4 = vpop.f32.mrf.mxu0  ;;  %8046 = vmatprep.subr.bf16.mxu1 %v16542_v12  ;;  %8753 = vmatprep.subr.bf16.mxu0 %v16545_v0  ;;  %v16593_v12 = vld [vmem:[%s21476_s7 + $0xda4] ss:$16 sps:$4 sm:$0xff]   ;;  %v16588_v59 = vld [vmem:[%s21476_s7 + $0xba8] ss:$16 sps:$4 sm:$0xff]  }
 0x586   : > { %v16596_v4 = vld [vmem:[%s21476_s7 + $0xb8c] ss:$16 sps:$4 sm:$0xff]  }
 0x588   : > { %8047 = vmatpush1.bf16.msra.mxu1 %v16540_v26  ;;  %8754 = vmatpush1.bf16.msra.mxu0 %v16543_v36  ;;  %v16591_v26 = vld [vmem:[%s21476_s7 + $0xda0] ss:$16 sps:$4 sm:$0xff]  }
 0x589   : > { %8048 = vmatprep.subr.bf16.mxu1 %v16548_v30  ;;  %8755 = vmatprep.subr.bf16.mxu0 %v16551_v43  ;;  %v16599_v30 = vld [vmem:[%s21476_s7 + $0xd84] ss:$16 sps:$4 sm:$0xff]   ;;  %v16594_v43 = vld [vmem:[%s21476_s7 + $0xb88] ss:$16 sps:$4 sm:$0xff]  }
 0x58c   : > { %8049 = vmatpush1.bf16.msra.mxu1 %v16546_v28  ;;  %8756 = vmatpush1.bf16.msra.mxu0 %v16549_v52  ;;  %v16597_v28 = vld [vmem:[%s21476_s7 + $0xd80] ss:$16 sps:$4 sm:$0xff]   ;;  %v16602_v52 = vld [vmem:[%s21476_s7 + $0xc6c] ss:$16 sps:$4 sm:$0xff]  }
 0x58d   : > { %8229 = vmatprep.subr.bf16.mxu1 %v16554_v19  ;;  %8936 = vmatprep.subr.bf16.mxu0 %v16557_v44  ;;  %v16605_v19 = vld [vmem:[%s21476_s7 + $0xe64] ss:$16 sps:$4 sm:$0xff]  }
 0x58e   : > { %v9014_v44 = vld [vmem:[#allocation4 + $0x24] sm:$0x1] }
 0x58f   : > { %v5824_v40 = vpop.f32.mrf.mxu1  ;;  %v6531_v24 = vpop.f32.mrf.mxu0  ;;  %14335 = vmatmul.mubr.msk.bf16.vlgmr.msra.gmra.mxu1 %vm2364_vm2, %v19704_v21  ;;  %14406 = vmatmul.mubr.msk.bf16.vlgmr.msra.gmra.mxu0 %vm2364_vm2, %v19928_v38  ;;  %v16566_v21 = vld [vmem:[%s21476_s7 + $0xb2c] ss:$16 sps:$4 sm:$0xff]  }
 0x590   : > { %v5833_v13 = vadd.f32 %v5824_v40, %v5646_v49  ;;  %v6579_v18 = vadd.f32 %v6531_v24, %v6392_v34  ;;  %8230 = vmatpush1.bf16.msra.mxu1 %v16552_v17  ;;  %8937 = vmatpush1.bf16.msra.mxu0 %v16555_v35  ;;  %v16603_v17 = vld [vmem:[%s21476_s7 + $0xe60] ss:$16 sps:$4 sm:$0xff]   ;;  %v20040_v35 = vpack.c.bf16 %v9014_v44, %v9014_v44  ;;  %v16648_v44 = vld [vmem:[%s21476_s7 + $0xd68] ss:$16 sps:$4 sm:$0xff]  }
 0x591   : > { %v5826_v31 = vpop.f32.mrf.mxu1  ;;  %v6533_v8 = vpop.f32.mrf.mxu0  ;;  %8231 = vmatprep.subr.bf16.mxu1 %v16560_v22  ;;  %8938 = vmatprep.subr.bf16.mxu0 %v16563_v48  ;;  %v16608_v22 = vld [vmem:[%s21476_s7 + $0xc4c] ss:$16 sps:$4 sm:$0xff]   ;;  %v16611_v48 = vld [vmem:[%s21476_s7 + $0xe44] ss:$16 sps:$4 sm:$0xff]  }
 0x592   : > { %v5834_v23 = vadd.f32 %v5826_v31, %v5647_v61  ;;  %v6580_v16 = vadd.f32 %v6533_v8, %v6393_v6  ;;  %8253 = vmatprep.mubr.bf16.mxu1 %v17249_v14  ;;  %8960 = vmatprep.mubr.bf16.mxu0 %v17249_v14 }
 0x593   : > { %v5828_v10 = vpop.f32.mrf.mxu1  ;;  %v6535_v33 = vpop.f32.mrf.mxu0 }
 0x594   : > { %8232 = vmatpush1.bf16.msra.mxu1 %v16558_v58  ;;  %8939 = vmatpush1.bf16.msra.mxu0 %v16561_v42  ;;  %v16606_v58 = vld [vmem:[%s21476_s7 + $0xc48] ss:$16 sps:$4 sm:$0xff]   ;;  %v16609_v42 = vld [vmem:[%s21476_s7 + $0xe40] ss:$16 sps:$4 sm:$0xff]  }
 0x595   : > { %v5829_v37 = vpop.f32.mrf.mxu1  ;;  %v6536_v29 = vpop.f32.mrf.mxu0  ;;  %8233 = vmatprep.subr.bf16.mxu1 %v16566_v21  ;;  %8940 = vmatprep.subr.bf16.mxu0 %v16569_v32  ;;  %v16617_v21 = vld [vmem:[%s21476_s7 + $0xe24] ss:$16 sps:$4 sm:$0xff]   ;;  %v16612_v33 = vld [vmem:[%s21476_s7 + $0xc28] ss:$16 sps:$4 sm:$0xff]  }
 0x596   : > { %v16620_v29 = vld [vmem:[%s21476_s7 + $0xc0c] ss:$16 sps:$4 sm:$0xff]  }
 0x598   : > { %8234 = vmatpush1.bf16.msra.mxu1 %v16564_v51  ;;  %8941 = vmatpush1.bf16.msra.mxu0 %v16567_v55  ;;  %v16615_v51 = vld [vmem:[%s21476_s7 + $0xe20] ss:$16 sps:$4 sm:$0xff]  }
 0x599   : > { %8235 = vmatprep.subr.bf16.mxu1 %v16572_v11  ;;  %8942 = vmatprep.subr.bf16.mxu0 %v16575_v25  ;;  %v16623_v11 = vld [vmem:[%s21476_s7 + $0xe04] ss:$16 sps:$4 sm:$0xff]   ;;  %v16618_v25 = vld [vmem:[%s21476_s7 + $0xc08] ss:$16 sps:$4 sm:$0xff]  }
 0x59c   : > { %8236 = vmatpush1.bf16.msra.mxu1 %v16570_v56  ;;  %8943 = vmatpush1.bf16.msra.mxu0 %v16573_v47  ;;  %v16621_v56 = vld [vmem:[%s21476_s7 + $0xe00] ss:$16 sps:$4 sm:$0xff]   ;;  %v16626_v47 = vld [vmem:[%s21476_s7 + $0xcec] ss:$16 sps:$4 sm:$0xff]  }
 0x59d   : > { %8416 = vmatprep.subr.bf16.mxu1 %v16578_v50  ;;  %9123 = vmatprep.subr.bf16.mxu0 %v16581_v9  ;;  %v16629_v50 = vld [vmem:[%s21476_s7 + $0xee4] ss:$16 sps:$4 sm:$0xff]   ;;  %v9201_v9 = vld [vmem:[#allocation4 + $0x28] sm:$0x1] }
 0x59f   : > { %v6011_v45 = vpop.f32.mrf.mxu1  ;;  %v6718_v3 = vpop.f32.mrf.mxu0  ;;  %14353 = vmatmul.mubr.msk.bf16.vlgmr.msra.gmra.mxu1 %vm2364_vm2, %v19760_v5  ;;  %14424 = vmatmul.mubr.msk.bf16.vlgmr.msra.gmra.mxu0 %vm2364_vm2, %v19984_v1  ;;  %v16590_v5 = vld [vmem:[%s21476_s7 + $0xbac] ss:$16 sps:$4 sm:$0xff]  }
 0x5a0   : > { %v6020_v49 = vadd.f32 %v6011_v45, %v5833_v13  ;;  %v6766_v34 = vadd.f32 %v6718_v3, %v6579_v18  ;;  %8417 = vmatpush1.bf16.msra.mxu1 %v16576_v60  ;;  %9124 = vmatpush1.bf16.msra.mxu0 %v16579_v57  ;;  %v16627_v60 = vld [vmem:[%s21476_s7 + $0xee0] ss:$16 sps:$4 sm:$0xff]   ;;  %v20096_v57 = vpack.c.bf16 %v9201_v9, %v9201_v9  ;;  %v16672_v9 = vld [vmem:[%s21476_s7 + $0xde8] ss:$16 sps:$4 sm:$0xff]  }
 0x5a1   : > { %v6013_v2 = vpop.f32.mrf.mxu1  ;;  %v6720_v27 = vpop.f32.mrf.mxu0  ;;  %8418 = vmatprep.subr.bf16.mxu1 %v16584_v7  ;;  %9125 = vmatprep.subr.bf16.mxu0 %v16587_v53  ;;  %v16632_v7 = vld [vmem:[%s21476_s7 + $0xccc] ss:$16 sps:$4 sm:$0xff]   ;;  %v16635_v53 = vld [vmem:[%s21476_s7 + $0xec4] ss:$16 sps:$4 sm:$0xff]  }
 0x5a2   : > { %v6021_v0 = vadd.f32 %v6013_v2, %v5834_v23  ;;  %v6767_v61 = vadd.f32 %v6720_v27, %v6580_v16  ;;  %8440 = vmatprep.mubr.bf16.mxu1 %v17249_v14  ;;  %9147 = vmatprep.mubr.bf16.mxu0 %v17249_v14 }
 0x5a3   : > { %v6015_v6 = vpop.f32.mrf.mxu1  ;;  %v6722_v41 = vpop.f32.mrf.mxu0 }
 0x5a4   : > { %8419 = vmatpush1.bf16.msra.mxu1 %v16582_v54  ;;  %9126 = vmatpush1.bf16.msra.mxu0 %v16585_v15  ;;  %v16630_v54 = vld [vmem:[%s21476_s7 + $0xcc8] ss:$16 sps:$4 sm:$0xff]   ;;  %v16633_v15 = vld [vmem:[%s21476_s7 + $0xec0] ss:$16 sps:$4 sm:$0xff]  }
 0x5a5   : > { %v6016_v36 = vpop.f32.mrf.mxu1  ;;  %v6723_v63 = vpop.f32.mrf.mxu0  ;;  %8420 = vmatprep.subr.bf16.mxu1 %v16590_v5  ;;  %9127 = vmatprep.subr.bf16.mxu0 %v16593_v12  ;;  %v16641_v5 = vld [vmem:[%s21476_s7 + $0xea4] ss:$16 sps:$4 sm:$0xff]   ;;  %v16636_v41 = vld [vmem:[%s21476_s7 + $0xca8] ss:$16 sps:$4 sm:$0xff]  }
 0x5a6   : > { %v16644_v63 = vld [vmem:[%s21476_s7 + $0xc8c] ss:$16 sps:$4 sm:$0xff]  }
 0x5a8   : > { %8421 = vmatpush1.bf16.msra.mxu1 %v16588_v59  ;;  %9128 = vmatpush1.bf16.msra.mxu0 %v16591_v26  ;;  %v16639_v59 = vld [vmem:[%s21476_s7 + $0xea0] ss:$16 sps:$4 sm:$0xff]  }
 0x5a9   : > { %8422 = vmatprep.subr.bf16.mxu1 %v16596_v4  ;;  %9129 = vmatprep.subr.bf16.mxu0 %v16599_v30  ;;  %v16647_v4 = vld [vmem:[%s21476_s7 + $0xe84] ss:$16 sps:$4 sm:$0xff]   ;;  %v16642_v30 = vld [vmem:[%s21476_s7 + $0xc88] ss:$16 sps:$4 sm:$0xff]  }
 0x5ac   : > { %8423 = vmatpush1.bf16.msra.mxu1 %v16594_v43  ;;  %9130 = vmatpush1.bf16.msra.mxu0 %v16597_v28  ;;  %v16645_v43 = vld [vmem:[%s21476_s7 + $0xe80] ss:$16 sps:$4 sm:$0xff]   ;;  %v16650_v28 = vld [vmem:[%s21476_s7 + $0xd6c] ss:$16 sps:$4 sm:$0xff]  }
 0x5ad   : > { %8603 = vmatprep.subr.bf16.mxu1 %v16602_v52  ;;  %9310 = vmatprep.subr.bf16.mxu0 %v16605_v19  ;;  %v16653_v52 = vld [vmem:[%s21476_s7 + $0xf64] ss:$16 sps:$4 sm:$0xff]   ;;  %v9388_v19 = vld [vmem:[#allocation4 + $0x29] sm:$0x1] }
 0x5af   : > { %v6198_v40 = vpop.f32.mrf.mxu1  ;;  %v6905_v24 = vpop.f32.mrf.mxu0  ;;  %14371 = vmatmul.mubr.msk.bf16.vlgmr.msra.gmra.mxu1 %vm2364_vm2, %v19816_v46  ;;  %14442 = vmatmul.mubr.msk.bf16.vlgmr.msra.gmra.mxu0 %vm2364_vm2, %v20040_v35  ;;  %v16614_v46 = vld [vmem:[%s21476_s7 + $0xc2c] ss:$16 sps:$4 sm:$0xff]  }
 0x5b0   : > { %v6207_v13 = vadd.f32 %v6198_v40, %v6020_v49  ;;  %v6953_v18 = vadd.f32 %v6905_v24, %v6766_v34  ;;  %8604 = vmatpush1.bf16.msra.mxu1 %v16600_v20  ;;  %9311 = vmatpush1.bf16.msra.mxu0 %v16603_v17  ;;  %v16651_v20 = vld [vmem:[%s21476_s7 + $0xf60] ss:$16 sps:$4 sm:$0xff]   ;;  %v20152_v17 = vpack.c.bf16 %v9388_v19, %v9388_v19  ;;  %v16696_v19 = vld [vmem:[%s21476_s7 + $0xe68] ss:$16 sps:$4 sm:$0xff]  }
 0x5b1   : > { %v6200_v31 = vpop.f32.mrf.mxu1  ;;  %v6907_v8 = vpop.f32.mrf.mxu0  ;;  %8605 = vmatprep.subr.bf16.mxu1 %v16608_v22  ;;  %9312 = vmatprep.subr.bf16.mxu0 %v16611_v48  ;;  %v16656_v22 = vld [vmem:[%s21476_s7 + $0xd4c] ss:$16 sps:$4 sm:$0xff]   ;;  %v16659_v48 = vld [vmem:[%s21476_s7 + $0xf44] ss:$16 sps:$4 sm:$0xff]  }
 0x5b2   : > { %v6208_v32 = vadd.f32 %v6200_v31, %v6021_v0  ;;  %v6954_v23 = vadd.f32 %v6907_v8, %v6767_v61  ;;  %8627 = vmatprep.mubr.bf16.mxu1 %v17249_v14  ;;  %9334 = vmatprep.mubr.bf16.mxu0 %v17249_v14 }
 0x5b3   : > { %v6202_v16 = vpop.f32.mrf.mxu1  ;;  %v6909_v10 = vpop.f32.mrf.mxu0 }
 0x5b4   : > { %8606 = vmatpush1.bf16.msra.mxu1 %v16606_v58  ;;  %9313 = vmatpush1.bf16.msra.mxu0 %v16609_v42  ;;  %v16654_v58 = vld [vmem:[%s21476_s7 + $0xd48] ss:$16 sps:$4 sm:$0xff]   ;;  %v16657_v42 = vld [vmem:[%s21476_s7 + $0xf40] ss:$16 sps:$4 sm:$0xff]  }
 0x5b5   : > { %v6203_v55 = vpop.f32.mrf.mxu1  ;;  %v6910_v37 = vpop.f32.mrf.mxu0  ;;  %8607 = vmatprep.subr.bf16.mxu1 %v16614_v46  ;;  %9314 = vmatprep.subr.bf16.mxu0 %v16617_v21  ;;  %v16665_v46 = vld [vmem:[%s21476_s7 + $0xf24] ss:$16 sps:$4 sm:$0xff]   ;;  %v16660_v10 = vld [vmem:[%s21476_s7 + $0xd28] ss:$16 sps:$4 sm:$0xff]  }
 0x5b6   : > { %v16668_v37 = vld [vmem:[%s21476_s7 + $0xd0c] ss:$16 sps:$4 sm:$0xff]  }
 0x5b8   : > { %8608 = vmatpush1.bf16.msra.mxu1 %v16612_v33  ;;  %9315 = vmatpush1.bf16.msra.mxu0 %v16615_v51  ;;  %v16663_v33 = vld [vmem:[%s21476_s7 + $0xf20] ss:$16 sps:$4 sm:$0xff]  }
 0x5b9   : > { %8609 = vmatprep.subr.bf16.mxu1 %v16620_v29  ;;  %9316 = vmatprep.subr.bf16.mxu0 %v16623_v11  ;;  %v16671_v29 = vld [vmem:[%s21476_s7 + $0xf04] ss:$16 sps:$4 sm:$0xff]   ;;  %v16666_v11 = vld [vmem:[%s21476_s7 + $0xd08] ss:$16 sps:$4 sm:$0xff]  }
 0x5bc   : > { %8610 = vmatpush1.bf16.msra.mxu1 %v16618_v25  ;;  %9317 = vmatpush1.bf16.msra.mxu0 %v16621_v56  ;;  %v16669_v25 = vld [vmem:[%s21476_s7 + $0xf00] ss:$16 sps:$4 sm:$0xff]   ;;  %v16674_v56 = vld [vmem:[%s21476_s7 + $0xdec] ss:$16 sps:$4 sm:$0xff]  }
 0x5bd   : > { %8790 = vmatprep.subr.bf16.mxu1 %v16626_v47  ;;  %9497 = vmatprep.subr.bf16.mxu0 %v16629_v50  ;;  %v16677_v47 = vld [vmem:[%s21476_s7 + $0xfe4] ss:$16 sps:$4 sm:$0xff]   ;;  %v9575_v50 = vld [vmem:[#allocation4 + $0x2a] sm:$0x1] }
 0x5bf   : > { %v6385_v45 = vpop.f32.mrf.mxu1  ;;  %v7092_v3 = vpop.f32.mrf.mxu0  ;;  %14389 = vmatmul.mubr.msk.bf16.vlgmr.msra.gmra.mxu1 %vm2364_vm2, %v19872_v62  ;;  %14460 = vmatmul.mubr.msk.bf16.vlgmr.msra.gmra.mxu0 %vm2364_vm2, %v20096_v57  ;;  %v16638_v62 = vld [vmem:[%s21476_s7 + $0xcac] ss:$16 sps:$4 sm:$0xff]  }
 0x5c0   : > { %v6394_v49 = vadd.f32 %v6385_v45, %v6207_v13  ;;  %v7140_v34 = vadd.f32 %v7092_v3, %v6953_v18  ;;  %8791 = vmatpush1.bf16.msra.mxu1 %v16624_v39  ;;  %9498 = vmatpush1.bf16.msra.mxu0 %v16627_v60  ;;  %v16675_v39 = vld [vmem:[%s21476_s7 + $0xfe0] ss:$16 sps:$4 sm:$0xff]   ;;  %v20208_v60 = vpack.c.bf16 %v9575_v50, %v9575_v50  ;;  %v16720_v50 = vld [vmem:[%s21476_s7 + $0xee8] ss:$16 sps:$4 sm:$0xff]  }
 0x5c1   : > { %v6387_v2 = vpop.f32.mrf.mxu1  ;;  %v7094_v27 = vpop.f32.mrf.mxu0  ;;  %8792 = vmatprep.subr.bf16.mxu1 %v16632_v7  ;;  %9499 = vmatprep.subr.bf16.mxu0 %v16635_v53  ;;  %v16680_v7 = vld [vmem:[%s21476_s7 + $0xdcc] ss:$16 sps:$4 sm:$0xff]   ;;  %v16683_v53 = vld [vmem:[%s21476_s7 + $0xfc4] ss:$16 sps:$4 sm:$0xff]  }
 0x5c2   : > { %v6395_v12 = vadd.f32 %v6387_v2, %v6208_v32  ;;  %v7141_v0 = vadd.f32 %v7094_v27, %v6954_v23  ;;  %8814 = vmatprep.mubr.bf16.mxu1 %v17249_v14  ;;  %9521 = vmatprep.mubr.bf16.mxu0 %v17249_v14 }
 0x5c3   : > { %v6389_v61 = vpop.f32.mrf.mxu1  ;;  %v7096_v6 = vpop.f32.mrf.mxu0 }
 0x5c4   : > { %8793 = vmatpush1.bf16.msra.mxu1 %v16630_v54  ;;  %9500 = vmatpush1.bf16.msra.mxu0 %v16633_v15  ;;  %v16678_v54 = vld [vmem:[%s21476_s7 + $0xdc8] ss:$16 sps:$4 sm:$0xff]   ;;  %v16681_v15 = vld [vmem:[%s21476_s7 + $0xfc0] ss:$16 sps:$4 sm:$0xff]  }
 0x5c5   : > { %v6390_v26 = vpop.f32.mrf.mxu1  ;;  %v7097_v36 = vpop.f32.mrf.mxu0  ;;  %8794 = vmatprep.subr.bf16.mxu1 %v16638_v62  ;;  %9501 = vmatprep.subr.bf16.mxu0 %v16641_v5  ;;  %v16689_v62 = vld [vmem:[%s21476_s7 + $0xfa4] ss:$16 sps:$4 sm:$0xff]   ;;  %v16684_v6 = vld [vmem:[%s21476_s7 + $0xda8] ss:$16 sps:$4 sm:$0xff]  }
 0x5c6   : > { %v16692_v36 = vld [vmem:[%s21476_s7 + $0xd8c] ss:$16 sps:$4 sm:$0xff]  }
 0x5c8   : > { %8795 = vmatpush1.bf16.msra.mxu1 %v16636_v41  ;;  %9502 = vmatpush1.bf16.msra.mxu0 %v16639_v59  ;;  %v16687_v41 = vld [vmem:[%s21476_s7 + $0xfa0] ss:$16 sps:$4 sm:$0xff]  }
 0x5c9   : > { %8796 = vmatprep.subr.bf16.mxu1 %v16644_v63  ;;  %9503 = vmatprep.subr.bf16.mxu0 %v16647_v4  ;;  %v16695_v63 = vld [vmem:[%s21476_s7 + $0xf84] ss:$16 sps:$4 sm:$0xff]   ;;  %v16690_v4 = vld [vmem:[%s21476_s7 + $0xd88] ss:$16 sps:$4 sm:$0xff]  }
 0x5cc   : > { %8797 = vmatpush1.bf16.msra.mxu1 %v16642_v30  ;;  %9504 = vmatpush1.bf16.msra.mxu0 %v16645_v43  ;;  %v16693_v30 = vld [vmem:[%s21476_s7 + $0xf80] ss:$16 sps:$4 sm:$0xff]   ;;  %v16698_v43 = vld [vmem:[%s21476_s7 + $0xe6c] ss:$16 sps:$4 sm:$0xff]  }
 0x5cd   : > { %8977 = vmatprep.subr.bf16.mxu1 %v16650_v28  ;;  %9684 = vmatprep.subr.bf16.mxu0 %v16653_v52  ;;  %v16701_v28 = vld [vmem:[%s21476_s7 + $0x1064] ss:$16 sps:$4 sm:$0xff]   ;;  %v9762_v52 = vld [vmem:[#allocation4 + $0x2b] sm:$0x1] }
 0x5cf   : > { %v6572_v40 = vpop.f32.mrf.mxu1  ;;  %v7279_v24 = vpop.f32.mrf.mxu0  ;;  %14407 = vmatmul.mubr.msk.bf16.vlgmr.msra.gmra.mxu1 %vm2364_vm2, %v19928_v38  ;;  %14478 = vmatmul.mubr.msk.bf16.vlgmr.msra.gmra.mxu0 %vm2364_vm2, %v20152_v17  ;;  %v16662_v38 = vld [vmem:[%s21476_s7 + $0xd2c] ss:$16 sps:$4 sm:$0xff]  }
 0x5d0   : > { %v6581_v13 = vadd.f32 %v6572_v40, %v6394_v49  ;;  %v7327_v18 = vadd.f32 %v7279_v24, %v7140_v34  ;;  %8978 = vmatpush1.bf16.msra.mxu1 %v16648_v44  ;;  %9685 = vmatpush1.bf16.msra.mxu0 %v16651_v20  ;;  %v16699_v44 = vld [vmem:[%s21476_s7 + $0x1060] ss:$16 sps:$4 sm:$0xff]   ;;  %v20264_v20 = vpack.c.bf16 %v9762_v52, %v9762_v52  ;;  %v16744_v52 = vld [vmem:[%s21476_s7 + $0xf68] ss:$16 sps:$4 sm:$0xff]  }
 0x5d1   : > { %v6574_v31 = vpop.f32.mrf.mxu1  ;;  %v7281_v8 = vpop.f32.mrf.mxu0  ;;  %8979 = vmatprep.subr.bf16.mxu1 %v16656_v22  ;;  %9686 = vmatprep.subr.bf16.mxu0 %v16659_v48  ;;  %v16704_v22 = vld [vmem:[%s21476_s7 + $0xe4c] ss:$16 sps:$4 sm:$0xff]   ;;  %v16707_v48 = vld [vmem:[%s21476_s7 + $0x1044] ss:$16 sps:$4 sm:$0xff]  }
 0x5d2   : > { %v6582_v21 = vadd.f32 %v6574_v31, %v6395_v12  ;;  %v7328_v32 = vadd.f32 %v7281_v8, %v7141_v0  ;;  %9001 = vmatprep.mubr.bf16.mxu1 %v17249_v14  ;;  %9708 = vmatprep.mubr.bf16.mxu0 %v17249_v14 }
 0x5d3   : > { %v6576_v23 = vpop.f32.mrf.mxu1  ;;  %v7283_v16 = vpop.f32.mrf.mxu0 }
 0x5d4   : > { %8980 = vmatpush1.bf16.msra.mxu1 %v16654_v58  ;;  %9687 = vmatpush1.bf16.msra.mxu0 %v16657_v42  ;;  %v16702_v58 = vld [vmem:[%s21476_s7 + $0xe48] ss:$16 sps:$4 sm:$0xff]   ;;  %v16705_v42 = vld [vmem:[%s21476_s7 + $0x1040] ss:$16 sps:$4 sm:$0xff]  }
 0x5d5   : > { %v6577_v51 = vpop.f32.mrf.mxu1  ;;  %v7284_v55 = vpop.f32.mrf.mxu0  ;;  %8981 = vmatprep.subr.bf16.mxu1 %v16662_v38  ;;  %9688 = vmatprep.subr.bf16.mxu0 %v16665_v46  ;;  %v16713_v38 = vld [vmem:[%s21476_s7 + $0x1024] ss:$16 sps:$4 sm:$0xff]   ;;  %v16708_v16 = vld [vmem:[%s21476_s7 + $0xe28] ss:$16 sps:$4 sm:$0xff]  }
 0x5d6   : > { %v16716_v55 = vld [vmem:[%s21476_s7 + $0xe0c] ss:$16 sps:$4 sm:$0xff]  }
 0x5d8   : > { %8982 = vmatpush1.bf16.msra.mxu1 %v16660_v10  ;;  %9689 = vmatpush1.bf16.msra.mxu0 %v16663_v33  ;;  %v16711_v10 = vld [vmem:[%s21476_s7 + $0x1020] ss:$16 sps:$4 sm:$0xff]  }
 0x5d9   : > { %8983 = vmatprep.subr.bf16.mxu1 %v16668_v37  ;;  %9690 = vmatprep.subr.bf16.mxu0 %v16671_v29  ;;  %v16719_v37 = vld [vmem:[%s21476_s7 + $0x1004] ss:$16 sps:$4 sm:$0xff]   ;;  %v16714_v29 = vld [vmem:[%s21476_s7 + $0xe08] ss:$16 sps:$4 sm:$0xff]  }
 0x5dc   : > { %8984 = vmatpush1.bf16.msra.mxu1 %v16666_v11  ;;  %9691 = vmatpush1.bf16.msra.mxu0 %v16669_v25  ;;  %v16717_v11 = vld [vmem:[%s21476_s7 + $0x1000] ss:$16 sps:$4 sm:$0xff]   ;;  %v16722_v25 = vld [vmem:[%s21476_s7 + $0xeec] ss:$16 sps:$4 sm:$0xff]  }
 0x5dd   : > { %9164 = vmatprep.subr.bf16.mxu1 %v16674_v56  ;;  %9871 = vmatprep.subr.bf16.mxu0 %v16677_v47  ;;  %v16725_v56 = vld [vmem:[%s21476_s7 + $0x10e4] ss:$16 sps:$4 sm:$0xff]   ;;  %v9949_v47 = vld [vmem:[#allocation4 + $0x2c] sm:$0x1] }
 0x5df   : > { %v6759_v45 = vpop.f32.mrf.mxu1  ;;  %v7466_v3 = vpop.f32.mrf.mxu0  ;;  %14425 = vmatmul.mubr.msk.bf16.vlgmr.msra.gmra.mxu1 %vm2364_vm2, %v19984_v1  ;;  %14496 = vmatmul.mubr.msk.bf16.vlgmr.msra.gmra.mxu0 %vm2364_vm2, %v20208_v60  ;;  %v16686_v1 = vld [vmem:[%s21476_s7 + $0xdac] ss:$16 sps:$4 sm:$0xff]  }
 0x5e0   : > { %v6768_v49 = vadd.f32 %v6759_v45, %v6581_v13  ;;  %v7514_v34 = vadd.f32 %v7466_v3, %v7327_v18  ;;  %9165 = vmatpush1.bf16.msra.mxu1 %v16672_v9  ;;  %9872 = vmatpush1.bf16.msra.mxu0 %v16675_v39  ;;  %v16723_v9 = vld [vmem:[%s21476_s7 + $0x10e0] ss:$16 sps:$4 sm:$0xff]   ;;  %v20320_v39 = vpack.c.bf16 %v9949_v47, %v9949_v47  ;;  %v16768_v47 = vld [vmem:[%s21476_s7 + $0xfe8] ss:$16 sps:$4 sm:$0xff]  }
 0x5e1   : > { %v6761_v2 = vpop.f32.mrf.mxu1  ;;  %v7468_v27 = vpop.f32.mrf.mxu0  ;;  %9166 = vmatprep.subr.bf16.mxu1 %v16680_v7  ;;  %9873 = vmatprep.subr.bf16.mxu0 %v16683_v53  ;;  %v16728_v7 = vld [vmem:[%s21476_s7 + $0xecc] ss:$16 sps:$4 sm:$0xff]   ;;  %v16731_v53 = vld [vmem:[%s21476_s7 + $0x10c4] ss:$16 sps:$4 sm:$0xff]  }
 0x5e2   : > { %v6769_v5 = vadd.f32 %v6761_v2, %v6582_v21  ;;  %v7515_v12 = vadd.f32 %v7468_v27, %v7328_v32  ;;  %9188 = vmatprep.mubr.bf16.mxu1 %v17249_v14  ;;  %9895 = vmatprep.mubr.bf16.mxu0 %v17249_v14 }
 0x5e3   : > { %v6763_v0 = vpop.f32.mrf.mxu1  ;;  %v7470_v61 = vpop.f32.mrf.mxu0 }
 0x5e4   : > { %9167 = vmatpush1.bf16.msra.mxu1 %v16678_v54  ;;  %9874 = vmatpush1.bf16.msra.mxu0 %v16681_v15  ;;  %v16726_v54 = vld [vmem:[%s21476_s7 + $0xec8] ss:$16 sps:$4 sm:$0xff]   ;;  %v16729_v15 = vld [vmem:[%s21476_s7 + $0x10c0] ss:$16 sps:$4 sm:$0xff]  }
 0x5e5   : > { %v6764_v59 = vpop.f32.mrf.mxu1  ;;  %v7471_v26 = vpop.f32.mrf.mxu0  ;;  %9168 = vmatprep.subr.bf16.mxu1 %v16686_v1  ;;  %9875 = vmatprep.subr.bf16.mxu0 %v16689_v62  ;;  %v16737_v1 = vld [vmem:[%s21476_s7 + $0x10a4] ss:$16 sps:$4 sm:$0xff]   ;;  %v16732_v61 = vld [vmem:[%s21476_s7 + $0xea8] ss:$16 sps:$4 sm:$0xff]  }
 0x5e6   : > { %v16740_v26 = vld [vmem:[%s21476_s7 + $0xe8c] ss:$16 sps:$4 sm:$0xff]  }
 0x5e8   : > { %9169 = vmatpush1.bf16.msra.mxu1 %v16684_v6  ;;  %9876 = vmatpush1.bf16.msra.mxu0 %v16687_v41  ;;  %v16735_v6 = vld [vmem:[%s21476_s7 + $0x10a0] ss:$16 sps:$4 sm:$0xff]  }
 0x5e9   : > { %9170 = vmatprep.subr.bf16.mxu1 %v16692_v36  ;;  %9877 = vmatprep.subr.bf16.mxu0 %v16695_v63  ;;  %v16743_v36 = vld [vmem:[%s21476_s7 + $0x1084] ss:$16 sps:$4 sm:$0xff]   ;;  %v16738_v63 = vld [vmem:[%s21476_s7 + $0xe88] ss:$16 sps:$4 sm:$0xff]  }
 0x5ec   : > { %9171 = vmatpush1.bf16.msra.mxu1 %v16690_v4  ;;  %9878 = vmatpush1.bf16.msra.mxu0 %v16693_v30  ;;  %v16741_v4 = vld [vmem:[%s21476_s7 + $0x1080] ss:$16 sps:$4 sm:$0xff]   ;;  %v16746_v30 = vld [vmem:[%s21476_s7 + $0xf6c] ss:$16 sps:$4 sm:$0xff]  }
 0x5ed   : > { %9351 = vmatprep.subr.bf16.mxu1 %v16698_v43  ;;  %10058 = vmatprep.subr.bf16.mxu0 %v16701_v28  ;;  %v16749_v43 = vld [vmem:[%s21476_s7 + $0x1164] ss:$16 sps:$4 sm:$0xff]   ;;  %v10136_v28 = vld [vmem:[#allocation4 + $0x2d] sm:$0x1] }
 0x5ef   : > { %v6946_v40 = vpop.f32.mrf.mxu1  ;;  %v7653_v24 = vpop.f32.mrf.mxu0  ;;  %14443 = vmatmul.mubr.msk.bf16.vlgmr.msra.gmra.mxu1 %vm2364_vm2, %v20040_v35  ;;  %14514 = vmatmul.mubr.msk.bf16.vlgmr.msra.gmra.mxu0 %vm2364_vm2, %v20264_v20  ;;  %v16710_v35 = vld [vmem:[%s21476_s7 + $0xe2c] ss:$16 sps:$4 sm:$0xff]  }
 0x5f0   : > { %v6955_v13 = vadd.f32 %v6946_v40, %v6768_v49  ;;  %v7701_v18 = vadd.f32 %v7653_v24, %v7514_v34  ;;  %9352 = vmatpush1.bf16.msra.mxu1 %v16696_v19  ;;  %10059 = vmatpush1.bf16.msra.mxu0 %v16699_v44  ;;  %v16747_v19 = vld [vmem:[%s21476_s7 + $0x1160] ss:$16 sps:$4 sm:$0xff]   ;;  %v20376_v44 = vpack.c.bf16 %v10136_v28, %v10136_v28  ;;  %v16792_v28 = vld [vmem:[%s21476_s7 + $0x1068] ss:$16 sps:$4 sm:$0xff]  }
 0x5f1   : > { %v6948_v31 = vpop.f32.mrf.mxu1  ;;  %v7655_v8 = vpop.f32.mrf.mxu0  ;;  %9353 = vmatprep.subr.bf16.mxu1 %v16704_v22  ;;  %10060 = vmatprep.subr.bf16.mxu0 %v16707_v48  ;;  %v16752_v22 = vld [vmem:[%s21476_s7 + $0xf4c] ss:$16 sps:$4 sm:$0xff]   ;;  %v16755_v48 = vld [vmem:[%s21476_s7 + $0x1144] ss:$16 sps:$4 sm:$0xff]  }
 0x5f2   : > { %v6956_v46 = vadd.f32 %v6948_v31, %v6769_v5  ;;  %v7702_v21 = vadd.f32 %v7655_v8, %v7515_v12  ;;  %9375 = vmatprep.mubr.bf16.mxu1 %v17249_v14  ;;  %10082 = vmatprep.mubr.bf16.mxu0 %v17249_v14 }
 0x5f3   : > { %v6950_v32 = vpop.f32.mrf.mxu1  ;;  %v7657_v23 = vpop.f32.mrf.mxu0 }
 0x5f4   : > { %9354 = vmatpush1.bf16.msra.mxu1 %v16702_v58  ;;  %10061 = vmatpush1.bf16.msra.mxu0 %v16705_v42  ;;  %v16750_v58 = vld [vmem:[%s21476_s7 + $0xf48] ss:$16 sps:$4 sm:$0xff]   ;;  %v16753_v42 = vld [vmem:[%s21476_s7 + $0x1140] ss:$16 sps:$4 sm:$0xff]  }
 0x5f5   : > { %v6951_v33 = vpop.f32.mrf.mxu1  ;;  %v7658_v51 = vpop.f32.mrf.mxu0  ;;  %9355 = vmatprep.subr.bf16.mxu1 %v16710_v35  ;;  %10062 = vmatprep.subr.bf16.mxu0 %v16713_v38  ;;  %v16761_v35 = vld [vmem:[%s21476_s7 + $0x1124] ss:$16 sps:$4 sm:$0xff]   ;;  %v16756_v23 = vld [vmem:[%s21476_s7 + $0xf28] ss:$16 sps:$4 sm:$0xff]  }
 0x5f6   : > { %v16764_v51 = vld [vmem:[%s21476_s7 + $0xf0c] ss:$16 sps:$4 sm:$0xff]  }
 0x5f8   : > { %9356 = vmatpush1.bf16.msra.mxu1 %v16708_v16  ;;  %10063 = vmatpush1.bf16.msra.mxu0 %v16711_v10  ;;  %v16759_v16 = vld [vmem:[%s21476_s7 + $0x1120] ss:$16 sps:$4 sm:$0xff]  }
 0x5f9   : > { %9357 = vmatprep.subr.bf16.mxu1 %v16716_v55  ;;  %10064 = vmatprep.subr.bf16.mxu0 %v16719_v37  ;;  %v16767_v55 = vld [vmem:[%s21476_s7 + $0x1104] ss:$16 sps:$4 sm:$0xff]   ;;  %v16762_v37 = vld [vmem:[%s21476_s7 + $0xf08] ss:$16 sps:$4 sm:$0xff]  }
 0x5fc   : > { %9358 = vmatpush1.bf16.msra.mxu1 %v16714_v29  ;;  %10065 = vmatpush1.bf16.msra.mxu0 %v16717_v11  ;;  %v16765_v29 = vld [vmem:[%s21476_s7 + $0x1100] ss:$16 sps:$4 sm:$0xff]   ;;  %v16770_v11 = vld [vmem:[%s21476_s7 + $0xfec] ss:$16 sps:$4 sm:$0xff]  }
 0x5fd   : > { %9538 = vmatprep.subr.bf16.mxu1 %v16722_v25  ;;  %10245 = vmatprep.subr.bf16.mxu0 %v16725_v56  ;;  %v16773_v25 = vld [vmem:[%s21476_s7 + $0x11e4] ss:$16 sps:$4 sm:$0xff]   ;;  %v10323_v56 = vld [vmem:[#allocation4 + $0x2e] sm:$0x1] }
 0x5ff   : > { %v7133_v45 = vpop.f32.mrf.mxu1  ;;  %v7840_v3 = vpop.f32.mrf.mxu0  ;;  %14461 = vmatmul.mubr.msk.bf16.vlgmr.msra.gmra.mxu1 %vm2364_vm2, %v20096_v57  ;;  %14532 = vmatmul.mubr.msk.bf16.vlgmr.msra.gmra.mxu0 %vm2364_vm2, %v20320_v39  ;;  %v16734_v57 = vld [vmem:[%s21476_s7 + $0xeac] ss:$16 sps:$4 sm:$0xff]  }
 0x600   : > { %v7142_v49 = vadd.f32 %v7133_v45, %v6955_v13  ;;  %v7888_v34 = vadd.f32 %v7840_v3, %v7701_v18  ;;  %9539 = vmatpush1.bf16.msra.mxu1 %v16720_v50  ;;  %10246 = vmatpush1.bf16.msra.mxu0 %v16723_v9  ;;  %v16771_v50 = vld [vmem:[%s21476_s7 + $0x11e0] ss:$16 sps:$4 sm:$0xff]   ;;  %v20432_v9 = vpack.c.bf16 %v10323_v56, %v10323_v56  ;;  %v16816_v56 = vld [vmem:[%s21476_s7 + $0x10e8] ss:$16 sps:$4 sm:$0xff]  }
 0x601   : > { %v7135_v2 = vpop.f32.mrf.mxu1  ;;  %v7842_v27 = vpop.f32.mrf.mxu0  ;;  %9540 = vmatprep.subr.bf16.mxu1 %v16728_v7  ;;  %10247 = vmatprep.subr.bf16.mxu0 %v16731_v53  ;;  %v16776_v7 = vld [vmem:[%s21476_s7 + $0xfcc] ss:$16 sps:$4 sm:$0xff]   ;;  %v16779_v53 = vld [vmem:[%s21476_s7 + $0x11c4] ss:$16 sps:$4 sm:$0xff]  }
 0x602   : > { %v7143_v62 = vadd.f32 %v7135_v2, %v6956_v46  ;;  %v7889_v5 = vadd.f32 %v7842_v27, %v7702_v21  ;;  %9562 = vmatprep.mubr.bf16.mxu1 %v17249_v14  ;;  %10269 = vmatprep.mubr.bf16.mxu0 %v17249_v14 }
 0x603   : > { %v7137_v12 = vpop.f32.mrf.mxu1  ;;  %v7844_v0 = vpop.f32.mrf.mxu0 }
 0x604   : > { %9541 = vmatpush1.bf16.msra.mxu1 %v16726_v54  ;;  %10248 = vmatpush1.bf16.msra.mxu0 %v16729_v15  ;;  %v16774_v54 = vld [vmem:[%s21476_s7 + $0xfc8] ss:$16 sps:$4 sm:$0xff]   ;;  %v16777_v15 = vld [vmem:[%s21476_s7 + $0x11c0] ss:$16 sps:$4 sm:$0xff]  }
 0x605   : > { %v7138_v41 = vpop.f32.mrf.mxu1  ;;  %v7845_v59 = vpop.f32.mrf.mxu0  ;;  %9542 = vmatprep.subr.bf16.mxu1 %v16734_v57  ;;  %10249 = vmatprep.subr.bf16.mxu0 %v16737_v1  ;;  %v16785_v57 = vld [vmem:[%s21476_s7 + $0x11a4] ss:$16 sps:$4 sm:$0xff]   ;;  %v16780_v0 = vld [vmem:[%s21476_s7 + $0xfa8] ss:$16 sps:$4 sm:$0xff]  }
 0x606   : > { %v16788_v59 = vld [vmem:[%s21476_s7 + $0xf8c] ss:$16 sps:$4 sm:$0xff]  }
 0x608   : > { %9543 = vmatpush1.bf16.msra.mxu1 %v16732_v61  ;;  %10250 = vmatpush1.bf16.msra.mxu0 %v16735_v6  ;;  %v16783_v61 = vld [vmem:[%s21476_s7 + $0x11a0] ss:$16 sps:$4 sm:$0xff]  }
 0x609   : > { %9544 = vmatprep.subr.bf16.mxu1 %v16740_v26  ;;  %10251 = vmatprep.subr.bf16.mxu0 %v16743_v36  ;;  %v16791_v26 = vld [vmem:[%s21476_s7 + $0x1184] ss:$16 sps:$4 sm:$0xff]   ;;  %v16786_v36 = vld [vmem:[%s21476_s7 + $0xf88] ss:$16 sps:$4 sm:$0xff]  }
 0x60c   : > { %9545 = vmatpush1.bf16.msra.mxu1 %v16738_v63  ;;  %10252 = vmatpush1.bf16.msra.mxu0 %v16741_v4  ;;  %v16789_v63 = vld [vmem:[%s21476_s7 + $0x1180] ss:$16 sps:$4 sm:$0xff]   ;;  %v16794_v4 = vld [vmem:[%s21476_s7 + $0x106c] ss:$16 sps:$4 sm:$0xff]  }
 0x60d   : > { %9725 = vmatprep.subr.bf16.mxu1 %v16746_v30  ;;  %10432 = vmatprep.subr.bf16.mxu0 %v16749_v43  ;;  %v16797_v30 = vld [vmem:[%s21476_s7 + $0x1264] ss:$16 sps:$4 sm:$0xff]   ;;  %v10510_v43 = vld [vmem:[#allocation4 + $0x32] sm:$0x1] }
 0x60f   : > { %v7320_v40 = vpop.f32.mrf.mxu1  ;;  %v8027_v24 = vpop.f32.mrf.mxu0  ;;  %14479 = vmatmul.mubr.msk.bf16.vlgmr.msra.gmra.mxu1 %vm2364_vm2, %v20152_v17  ;;  %14550 = vmatmul.mubr.msk.bf16.vlgmr.msra.gmra.mxu0 %vm2364_vm2, %v20376_v44  ;;  %v16758_v17 = vld [vmem:[%s21476_s7 + $0xf2c] ss:$16 sps:$4 sm:$0xff]  }
 0x610   : > { %v7329_v13 = vadd.f32 %v7320_v40, %v7142_v49  ;;  %v8075_v18 = vadd.f32 %v8027_v24, %v7888_v34  ;;  %9726 = vmatpush1.bf16.msra.mxu1 %v16744_v52  ;;  %10433 = vmatpush1.bf16.msra.mxu0 %v16747_v19  ;;  %v16795_v52 = vld [vmem:[%s21476_s7 + $0x1260] ss:$16 sps:$4 sm:$0xff]   ;;  %v20488_v19 = vpack.c.bf16 %v10510_v43, %v10510_v43  ;;  %v16840_v43 = vld [vmem:[%s21476_s7 + $0x1168] ss:$16 sps:$4 sm:$0xff]  }
 0x611   : > { %v7322_v31 = vpop.f32.mrf.mxu1  ;;  %v8029_v8 = vpop.f32.mrf.mxu0  ;;  %9727 = vmatprep.subr.bf16.mxu1 %v16752_v22  ;;  %10434 = vmatprep.subr.bf16.mxu0 %v16755_v48  ;;  %v16800_v22 = vld [vmem:[%s21476_s7 + $0x104c] ss:$16 sps:$4 sm:$0xff]   ;;  %v16803_v48 = vld [vmem:[%s21476_s7 + $0x1244] ss:$16 sps:$4 sm:$0xff]  }
 0x612   : > { %v7330_v38 = vadd.f32 %v7322_v31, %v7143_v62  ;;  %v8076_v46 = vadd.f32 %v8029_v8, %v7889_v5  ;;  %9749 = vmatprep.mubr.bf16.mxu1 %v17249_v14  ;;  %10456 = vmatprep.mubr.bf16.mxu0 %v17249_v14 }
 0x613   : > { %v7324_v21 = vpop.f32.mrf.mxu1  ;;  %v8031_v32 = vpop.f32.mrf.mxu0 }
 0x614   : > { %9728 = vmatpush1.bf16.msra.mxu1 %v16750_v58  ;;  %10435 = vmatpush1.bf16.msra.mxu0 %v16753_v42  ;;  %v16798_v58 = vld [vmem:[%s21476_s7 + $0x1048] ss:$16 sps:$4 sm:$0xff]   ;;  %v16801_v42 = vld [vmem:[%s21476_s7 + $0x1240] ss:$16 sps:$4 sm:$0xff]  }
 0x615   : > { %v7325_v10 = vpop.f32.mrf.mxu1  ;;  %v8032_v33 = vpop.f32.mrf.mxu0  ;;  %9729 = vmatprep.subr.bf16.mxu1 %v16758_v17  ;;  %10436 = vmatprep.subr.bf16.mxu0 %v16761_v35  ;;  %v16809_v17 = vld [vmem:[%s21476_s7 + $0x1224] ss:$16 sps:$4 sm:$0xff]   ;;  %v16804_v32 = vld [vmem:[%s21476_s7 + $0x1028] ss:$16 sps:$4 sm:$0xff]  }
 0x616   : > { %v16812_v33 = vld [vmem:[%s21476_s7 + $0x100c] ss:$16 sps:$4 sm:$0xff]  }
 0x618   : > { %9730 = vmatpush1.bf16.msra.mxu1 %v16756_v23  ;;  %10437 = vmatpush1.bf16.msra.mxu0 %v16759_v16  ;;  %v16807_v23 = vld [vmem:[%s21476_s7 + $0x1220] ss:$16 sps:$4 sm:$0xff]  }
 0x619   : > { %9731 = vmatprep.subr.bf16.mxu1 %v16764_v51  ;;  %10438 = vmatprep.subr.bf16.mxu0 %v16767_v55  ;;  %v16815_v51 = vld [vmem:[%s21476_s7 + $0x1204] ss:$16 sps:$4 sm:$0xff]   ;;  %v16810_v55 = vld [vmem:[%s21476_s7 + $0x1008] ss:$16 sps:$4 sm:$0xff]  }
 0x61c   : > { %9732 = vmatpush1.bf16.msra.mxu1 %v16762_v37  ;;  %10439 = vmatpush1.bf16.msra.mxu0 %v16765_v29  ;;  %v16813_v37 = vld [vmem:[%s21476_s7 + $0x1200] ss:$16 sps:$4 sm:$0xff]   ;;  %v16818_v29 = vld [vmem:[%s21476_s7 + $0x10ec] ss:$16 sps:$4 sm:$0xff]  }
 0x61d   : > { %9912 = vmatprep.subr.bf16.mxu1 %v16770_v11  ;;  %10619 = vmatprep.subr.bf16.mxu0 %v16773_v25  ;;  %v16821_v11 = vld [vmem:[%s21476_s7 + $0x12e4] ss:$16 sps:$4 sm:$0xff]   ;;  %v10697_v25 = vld [vmem:[#allocation4 + $0x33] sm:$0x1] }
 0x61f   : > { %v7507_v45 = vpop.f32.mrf.mxu1  ;;  %v8214_v3 = vpop.f32.mrf.mxu0  ;;  %14497 = vmatmul.mubr.msk.bf16.vlgmr.msra.gmra.mxu1 %vm2364_vm2, %v20208_v60  ;;  %14568 = vmatmul.mubr.msk.bf16.vlgmr.msra.gmra.mxu0 %vm2364_vm2, %v20432_v9  ;;  %v16782_v60 = vld [vmem:[%s21476_s7 + $0xfac] ss:$16 sps:$4 sm:$0xff]  }
 0x620   : > { %v7516_v49 = vadd.f32 %v7507_v45, %v7329_v13  ;;  %v8262_v34 = vadd.f32 %v8214_v3, %v8075_v18  ;;  %9913 = vmatpush1.bf16.msra.mxu1 %v16768_v47  ;;  %10620 = vmatpush1.bf16.msra.mxu0 %v16771_v50  ;;  %v16819_v47 = vld [vmem:[%s21476_s7 + $0x12e0] ss:$16 sps:$4 sm:$0xff]   ;;  %v20544_v50 = vpack.c.bf16 %v10697_v25, %v10697_v25  ;;  %v16864_v25 = vld [vmem:[%s21476_s7 + $0x11e8] ss:$16 sps:$4 sm:$0xff]  }
 0x621   : > { %v7509_v2 = vpop.f32.mrf.mxu1  ;;  %v8216_v27 = vpop.f32.mrf.mxu0  ;;  %9914 = vmatprep.subr.bf16.mxu1 %v16776_v7  ;;  %10621 = vmatprep.subr.bf16.mxu0 %v16779_v53  ;;  %v16824_v7 = vld [vmem:[%s21476_s7 + $0x10cc] ss:$16 sps:$4 sm:$0xff]   ;;  %v16827_v53 = vld [vmem:[%s21476_s7 + $0x12c4] ss:$16 sps:$4 sm:$0xff]  }
 0x622   : > { %v7517_v1 = vadd.f32 %v7509_v2, %v7330_v38  ;;  %v8263_v62 = vadd.f32 %v8216_v27, %v8076_v46  ;;  %9936 = vmatprep.mubr.bf16.mxu1 %v17249_v14  ;;  %10643 = vmatprep.mubr.bf16.mxu0 %v17249_v14 }
 0x623   : > { %v7511_v5 = vpop.f32.mrf.mxu1  ;;  %v8218_v12 = vpop.f32.mrf.mxu0 }
 0x624   : > { %9915 = vmatpush1.bf16.msra.mxu1 %v16774_v54  ;;  %10622 = vmatpush1.bf16.msra.mxu0 %v16777_v15  ;;  %v16822_v54 = vld [vmem:[%s21476_s7 + $0x10c8] ss:$16 sps:$4 sm:$0xff]   ;;  %v16825_v15 = vld [vmem:[%s21476_s7 + $0x12c0] ss:$16 sps:$4 sm:$0xff]  }
 0x625   : > { %v7512_v6 = vpop.f32.mrf.mxu1  ;;  %v8219_v41 = vpop.f32.mrf.mxu0  ;;  %9916 = vmatprep.subr.bf16.mxu1 %v16782_v60  ;;  %10623 = vmatprep.subr.bf16.mxu0 %v16785_v57  ;;  %v16833_v60 = vld [vmem:[%s21476_s7 + $0x12a4] ss:$16 sps:$4 sm:$0xff]   ;;  %v16828_v12 = vld [vmem:[%s21476_s7 + $0x10a8] ss:$16 sps:$4 sm:$0xff]  }
 0x626   : > { %v16836_v41 = vld [vmem:[%s21476_s7 + $0x108c] ss:$16 sps:$4 sm:$0xff]  }
 0x628   : > { %9917 = vmatpush1.bf16.msra.mxu1 %v16780_v0  ;;  %10624 = vmatpush1.bf16.msra.mxu0 %v16783_v61  ;;  %v16831_v0 = vld [vmem:[%s21476_s7 + $0x12a0] ss:$16 sps:$4 sm:$0xff]  }
 0x629   : > { %9918 = vmatprep.subr.bf16.mxu1 %v16788_v59  ;;  %10625 = vmatprep.subr.bf16.mxu0 %v16791_v26  ;;  %v16839_v59 = vld [vmem:[%s21476_s7 + $0x1284] ss:$16 sps:$4 sm:$0xff]   ;;  %v16834_v26 = vld [vmem:[%s21476_s7 + $0x1088] ss:$16 sps:$4 sm:$0xff]  }
 0x62c   : > { %9919 = vmatpush1.bf16.msra.mxu1 %v16786_v36  ;;  %10626 = vmatpush1.bf16.msra.mxu0 %v16789_v63  ;;  %v16837_v36 = vld [vmem:[%s21476_s7 + $0x1280] ss:$16 sps:$4 sm:$0xff]   ;;  %v16842_v63 = vld [vmem:[%s21476_s7 + $0x116c] ss:$16 sps:$4 sm:$0xff]  }
 0x62d   : > { %10099 = vmatprep.subr.bf16.mxu1 %v16794_v4  ;;  %10806 = vmatprep.subr.bf16.mxu0 %v16797_v30  ;;  %v16845_v4 = vld [vmem:[%s21476_s7 + $0x1364] ss:$16 sps:$4 sm:$0xff]  }
 0x62e   : > { %v10884_v30 = vld [vmem:[#allocation4 + $0x34] sm:$0x1] }
 0x62f   : > { %v7694_v40 = vpop.f32.mrf.mxu1  ;;  %v8401_v24 = vpop.f32.mrf.mxu0  ;;  %14515 = vmatmul.mubr.msk.bf16.vlgmr.msra.gmra.mxu1 %vm2364_vm2, %v20264_v20  ;;  %14586 = vmatmul.mubr.msk.bf16.vlgmr.msra.gmra.mxu0 %vm2364_vm2, %v20488_v19  ;;  %v16806_v20 = vld [vmem:[%s21476_s7 + $0x102c] ss:$16 sps:$4 sm:$0xff]  }
 0x630   : > { %v7703_v13 = vadd.f32 %v7694_v40, %v7516_v49  ;;  %v8449_v18 = vadd.f32 %v8401_v24, %v8262_v34  ;;  %10100 = vmatpush1.bf16.msra.mxu1 %v16792_v28  ;;  %10807 = vmatpush1.bf16.msra.mxu0 %v16795_v52  ;;  %v16843_v28 = vld [vmem:[%s21476_s7 + $0x1360] ss:$16 sps:$4 sm:$0xff]   ;;  %v20600_v52 = vpack.c.bf16 %v10884_v30, %v10884_v30  ;;  %v16888_v30 = vld [vmem:[%s21476_s7 + $0x1268] ss:$16 sps:$4 sm:$0xff]  }
 0x631   : > { %v7696_v31 = vpop.f32.mrf.mxu1  ;;  %v8403_v8 = vpop.f32.mrf.mxu0  ;;  %10101 = vmatprep.subr.bf16.mxu1 %v16800_v22  ;;  %10808 = vmatprep.subr.bf16.mxu0 %v16803_v48  ;;  %v16848_v22 = vld [vmem:[%s21476_s7 + $0x114c] ss:$16 sps:$4 sm:$0xff]   ;;  %v16851_v48 = vld [vmem:[%s21476_s7 + $0x1344] ss:$16 sps:$4 sm:$0xff]  }
 0x632   : > { %v7704_v35 = vadd.f32 %v7696_v31, %v7517_v1  ;;  %v8450_v38 = vadd.f32 %v8403_v8, %v8263_v62  ;;  %10123 = vmatprep.mubr.bf16.mxu1 %v17249_v14  ;;  %10830 = vmatprep.mubr.bf16.mxu0 %v17249_v14 }
 0x633   : > { %v7698_v46 = vpop.f32.mrf.mxu1  ;;  %v8405_v21 = vpop.f32.mrf.mxu0 }
 0x634   : > { %10102 = vmatpush1.bf16.msra.mxu1 %v16798_v58  ;;  %10809 = vmatpush1.bf16.msra.mxu0 %v16801_v42  ;;  %v16846_v58 = vld [vmem:[%s21476_s7 + $0x1148] ss:$16 sps:$4 sm:$0xff]   ;;  %v16849_v42 = vld [vmem:[%s21476_s7 + $0x1340] ss:$16 sps:$4 sm:$0xff]  }
 0x635   : > { %v7699_v16 = vpop.f32.mrf.mxu1  ;;  %v8406_v10 = vpop.f32.mrf.mxu0  ;;  %10103 = vmatprep.subr.bf16.mxu1 %v16806_v20  ;;  %10810 = vmatprep.subr.bf16.mxu0 %v16809_v17  ;;  %v16857_v20 = vld [vmem:[%s21476_s7 + $0x1324] ss:$16 sps:$4 sm:$0xff]   ;;  %v16852_v21 = vld [vmem:[%s21476_s7 + $0x1128] ss:$16 sps:$4 sm:$0xff]  }
 0x636   : > { %v16860_v10 = vld [vmem:[%s21476_s7 + $0x110c] ss:$16 sps:$4 sm:$0xff]  }
 0x638   : > { %10104 = vmatpush1.bf16.msra.mxu1 %v16804_v32  ;;  %10811 = vmatpush1.bf16.msra.mxu0 %v16807_v23  ;;  %v16855_v32 = vld [vmem:[%s21476_s7 + $0x1320] ss:$16 sps:$4 sm:$0xff]  }
 0x639   : > { %10105 = vmatprep.subr.bf16.mxu1 %v16812_v33  ;;  %10812 = vmatprep.subr.bf16.mxu0 %v16815_v51  ;;  %v16863_v33 = vld [vmem:[%s21476_s7 + $0x1304] ss:$16 sps:$4 sm:$0xff]   ;;  %v16858_v51 = vld [vmem:[%s21476_s7 + $0x1108] ss:$16 sps:$4 sm:$0xff]  }
 0x63c   : > { %10106 = vmatpush1.bf16.msra.mxu1 %v16810_v55  ;;  %10813 = vmatpush1.bf16.msra.mxu0 %v16813_v37  ;;  %v16861_v55 = vld [vmem:[%s21476_s7 + $0x1300] ss:$16 sps:$4 sm:$0xff]   ;;  %v16866_v37 = vld [vmem:[%s21476_s7 + $0x11ec] ss:$16 sps:$4 sm:$0xff]  }
 0x63d   : > { %10286 = vmatprep.subr.bf16.mxu1 %v16818_v29  ;;  %10993 = vmatprep.subr.bf16.mxu0 %v16821_v11  ;;  %v16869_v29 = vld [vmem:[%s21476_s7 + $0x13e4] ss:$16 sps:$4 sm:$0xff]  }
 0x63e   : > { %v11071_v11 = vld [vmem:[#allocation4 + $0x35] sm:$0x1] }
 0x63f   : > { %v7881_v45 = vpop.f32.mrf.mxu1  ;;  %v8588_v3 = vpop.f32.mrf.mxu0  ;;  %14533 = vmatmul.mubr.msk.bf16.vlgmr.msra.gmra.mxu1 %vm2364_vm2, %v20320_v39  ;;  %14604 = vmatmul.mubr.msk.bf16.vlgmr.msra.gmra.mxu0 %vm2364_vm2, %v20544_v50  ;;  %v16830_v39 = vld [vmem:[%s21476_s7 + $0x10ac] ss:$16 sps:$4 sm:$0xff]  }
 0x640   : > { %v7890_v49 = vadd.f32 %v7881_v45, %v7703_v13  ;;  %v8636_v34 = vadd.f32 %v8588_v3, %v8449_v18  ;;  %10287 = vmatpush1.bf16.msra.mxu1 %v16816_v56  ;;  %10994 = vmatpush1.bf16.msra.mxu0 %v16819_v47  ;;  %v16867_v56 = vld [vmem:[%s21476_s7 + $0x13e0] ss:$16 sps:$4 sm:$0xff]   ;;  %v20656_v47 = vpack.c.bf16 %v11071_v11, %v11071_v11  ;;  %v16912_v11 = vld [vmem:[%s21476_s7 + $0x12e8] ss:$16 sps:$4 sm:$0xff]  }
 0x641   : > { %v7883_v2 = vpop.f32.mrf.mxu1  ;;  %v8590_v27 = vpop.f32.mrf.mxu0  ;;  %10288 = vmatprep.subr.bf16.mxu1 %v16824_v7  ;;  %10995 = vmatprep.subr.bf16.mxu0 %v16827_v53  ;;  %v16872_v7 = vld [vmem:[%s21476_s7 + $0x11cc] ss:$16 sps:$4 sm:$0xff]   ;;  %v16875_v53 = vld [vmem:[%s21476_s7 + $0x13c4] ss:$16 sps:$4 sm:$0xff]  }
 0x642   : > { %v7891_v57 = vadd.f32 %v7883_v2, %v7704_v35  ;;  %v8637_v1 = vadd.f32 %v8590_v27, %v8450_v38  ;;  %10310 = vmatprep.mubr.bf16.mxu1 %v17249_v14  ;;  %11017 = vmatprep.mubr.bf16.mxu0 %v17249_v14 }
 0x643   : > { %v7885_v62 = vpop.f32.mrf.mxu1  ;;  %v8592_v5 = vpop.f32.mrf.mxu0 }
 0x644   : > { %10289 = vmatpush1.bf16.msra.mxu1 %v16822_v54  ;;  %10996 = vmatpush1.bf16.msra.mxu0 %v16825_v15  ;;  %v16870_v54 = vld [vmem:[%s21476_s7 + $0x11c8] ss:$16 sps:$4 sm:$0xff]   ;;  %v16873_v15 = vld [vmem:[%s21476_s7 + $0x13c0] ss:$16 sps:$4 sm:$0xff]  }
 0x645   : > { %v7886_v61 = vpop.f32.mrf.mxu1  ;;  %v8593_v6 = vpop.f32.mrf.mxu0  ;;  %10290 = vmatprep.subr.bf16.mxu1 %v16830_v39  ;;  %10997 = vmatprep.subr.bf16.mxu0 %v16833_v60  ;;  %v16881_v39 = vld [vmem:[%s21476_s7 + $0x13a4] ss:$16 sps:$4 sm:$0xff]   ;;  %v16876_v5 = vld [vmem:[%s21476_s7 + $0x11a8] ss:$16 sps:$4 sm:$0xff]  }
 0x646   : > { %v16884_v6 = vld [vmem:[%s21476_s7 + $0x118c] ss:$16 sps:$4 sm:$0xff]  }
 0x648   : > { %10291 = vmatpush1.bf16.msra.mxu1 %v16828_v12  ;;  %10998 = vmatpush1.bf16.msra.mxu0 %v16831_v0  ;;  %v16879_v12 = vld [vmem:[%s21476_s7 + $0x13a0] ss:$16 sps:$4 sm:$0xff]  }
 0x649   : > { %10292 = vmatprep.subr.bf16.mxu1 %v16836_v41  ;;  %10999 = vmatprep.subr.bf16.mxu0 %v16839_v59  ;;  %v16887_v41 = vld [vmem:[%s21476_s7 + $0x1384] ss:$16 sps:$4 sm:$0xff]   ;;  %v16882_v59 = vld [vmem:[%s21476_s7 + $0x1188] ss:$16 sps:$4 sm:$0xff]  }
 0x64c   : > { %10293 = vmatpush1.bf16.msra.mxu1 %v16834_v26  ;;  %11000 = vmatpush1.bf16.msra.mxu0 %v16837_v36  ;;  %v16885_v26 = vld [vmem:[%s21476_s7 + $0x1380] ss:$16 sps:$4 sm:$0xff]   ;;  %v16890_v36 = vld [vmem:[%s21476_s7 + $0x126c] ss:$16 sps:$4 sm:$0xff]  }
 0x64d   : > { %10473 = vmatprep.subr.bf16.mxu1 %v16842_v63  ;;  %11180 = vmatprep.subr.bf16.mxu0 %v16845_v4  ;;  %v16893_v63 = vld [vmem:[%s21476_s7 + $0x1464] ss:$16 sps:$4 sm:$0xff]  }
 0x64e   : > { %v11258_v4 = vld [vmem:[#allocation4 + $0x36] sm:$0x1] }
 0x64f   : > { %v8068_v40 = vpop.f32.mrf.mxu1  ;;  %v8775_v24 = vpop.f32.mrf.mxu0  ;;  %14551 = vmatmul.mubr.msk.bf16.vlgmr.msra.gmra.mxu1 %vm2364_vm2, %v20376_v44  ;;  %14622 = vmatmul.mubr.msk.bf16.vlgmr.msra.gmra.mxu0 %vm2364_vm2, %v20600_v52  ;;  %v16854_v44 = vld [vmem:[%s21476_s7 + $0x112c] ss:$16 sps:$4 sm:$0xff]  }
 0x650   : > { %v8077_v13 = vadd.f32 %v8068_v40, %v7890_v49  ;;  %v8823_v18 = vadd.f32 %v8775_v24, %v8636_v34  ;;  %10474 = vmatpush1.bf16.msra.mxu1 %v16840_v43  ;;  %11181 = vmatpush1.bf16.msra.mxu0 %v16843_v28  ;;  %v16891_v43 = vld [vmem:[%s21476_s7 + $0x1460] ss:$16 sps:$4 sm:$0xff]   ;;  %v20712_v28 = vpack.c.bf16 %v11258_v4, %v11258_v4  ;;  %v16936_v4 = vld [vmem:[%s21476_s7 + $0x1368] ss:$16 sps:$4 sm:$0xff]  }
 0x651   : > { %v8070_v31 = vpop.f32.mrf.mxu1  ;;  %v8777_v8 = vpop.f32.mrf.mxu0  ;;  %10475 = vmatprep.subr.bf16.mxu1 %v16848_v22  ;;  %11182 = vmatprep.subr.bf16.mxu0 %v16851_v48  ;;  %v16896_v22 = vld [vmem:[%s21476_s7 + $0x124c] ss:$16 sps:$4 sm:$0xff]   ;;  %v16899_v48 = vld [vmem:[%s21476_s7 + $0x1444] ss:$16 sps:$4 sm:$0xff]  }
 0x652   : > { %v8078_v17 = vadd.f32 %v8070_v31, %v7891_v57  ;;  %v8824_v35 = vadd.f32 %v8777_v8, %v8637_v1  ;;  %10497 = vmatprep.mubr.bf16.mxu1 %v17249_v14  ;;  %11204 = vmatprep.mubr.bf16.mxu0 %v17249_v14 }
 0x653   : > { %v8072_v38 = vpop.f32.mrf.mxu1  ;;  %v8779_v46 = vpop.f32.mrf.mxu0 }
 0x654   : > { %10476 = vmatpush1.bf16.msra.mxu1 %v16846_v58  ;;  %11183 = vmatpush1.bf16.msra.mxu0 %v16849_v42  ;;  %v16894_v58 = vld [vmem:[%s21476_s7 + $0x1248] ss:$16 sps:$4 sm:$0xff]   ;;  %v16897_v42 = vld [vmem:[%s21476_s7 + $0x1440] ss:$16 sps:$4 sm:$0xff]  }
 0x655   : > { %v8073_v23 = vpop.f32.mrf.mxu1  ;;  %v8780_v16 = vpop.f32.mrf.mxu0  ;;  %10477 = vmatprep.subr.bf16.mxu1 %v16854_v44  ;;  %11184 = vmatprep.subr.bf16.mxu0 %v16857_v20  ;;  %v16905_v44 = vld [vmem:[%s21476_s7 + $0x1424] ss:$16 sps:$4 sm:$0xff]   ;;  %v16900_v46 = vld [vmem:[%s21476_s7 + $0x1228] ss:$16 sps:$4 sm:$0xff]  }
 0x656   : > { %v16908_v16 = vld [vmem:[%s21476_s7 + $0x120c] ss:$16 sps:$4 sm:$0xff]  }
 0x658   : > { %10478 = vmatpush1.bf16.msra.mxu1 %v16852_v21  ;;  %11185 = vmatpush1.bf16.msra.mxu0 %v16855_v32  ;;  %v16903_v21 = vld [vmem:[%s21476_s7 + $0x1420] ss:$16 sps:$4 sm:$0xff]  }
 0x659   : > { %10479 = vmatprep.subr.bf16.mxu1 %v16860_v10  ;;  %11186 = vmatprep.subr.bf16.mxu0 %v16863_v33  ;;  %v16911_v10 = vld [vmem:[%s21476_s7 + $0x1404] ss:$16 sps:$4 sm:$0xff]   ;;  %v16906_v33 = vld [vmem:[%s21476_s7 + $0x1208] ss:$16 sps:$4 sm:$0xff]  }
 0x65c   : > { %10480 = vmatpush1.bf16.msra.mxu1 %v16858_v51  ;;  %11187 = vmatpush1.bf16.msra.mxu0 %v16861_v55  ;;  %v16909_v51 = vld [vmem:[%s21476_s7 + $0x1400] ss:$16 sps:$4 sm:$0xff]   ;;  %v16914_v55 = vld [vmem:[%s21476_s7 + $0x12ec] ss:$16 sps:$4 sm:$0xff]  }
 0x65d   : > { %10660 = vmatprep.subr.bf16.mxu1 %v16866_v37  ;;  %11367 = vmatprep.subr.bf16.mxu0 %v16869_v29  ;;  %v16917_v37 = vld [vmem:[%s21476_s7 + $0x14e4] ss:$16 sps:$4 sm:$0xff]  }
 0x65e   : > { %v11445_v29 = vld [vmem:[#allocation4 + $0x37] sm:$0x1] }
 0x65f   : > { %v8255_v45 = vpop.f32.mrf.mxu1  ;;  %v8962_v3 = vpop.f32.mrf.mxu0  ;;  %14569 = vmatmul.mubr.msk.bf16.vlgmr.msra.gmra.mxu1 %vm2364_vm2, %v20432_v9  ;;  %14640 = vmatmul.mubr.msk.bf16.vlgmr.msra.gmra.mxu0 %vm2364_vm2, %v20656_v47  ;;  %v16878_v9 = vld [vmem:[%s21476_s7 + $0x11ac] ss:$16 sps:$4 sm:$0xff]  }
 0x660   : > { %v8264_v49 = vadd.f32 %v8255_v45, %v8077_v13  ;;  %v9010_v34 = vadd.f32 %v8962_v3, %v8823_v18  ;;  %10661 = vmatpush1.bf16.msra.mxu1 %v16864_v25  ;;  %11368 = vmatpush1.bf16.msra.mxu0 %v16867_v56  ;;  %v16915_v25 = vld [vmem:[%s21476_s7 + $0x14e0] ss:$16 sps:$4 sm:$0xff]   ;;  %v20768_v56 = vpack.c.bf16 %v11445_v29, %v11445_v29  ;;  %v16960_v29 = vld [vmem:[%s21476_s7 + $0x13e8] ss:$16 sps:$4 sm:$0xff]  }
 0x661   : > { %v8257_v2 = vpop.f32.mrf.mxu1  ;;  %v8964_v27 = vpop.f32.mrf.mxu0  ;;  %10662 = vmatprep.subr.bf16.mxu1 %v16872_v7  ;;  %11369 = vmatprep.subr.bf16.mxu0 %v16875_v53  ;;  %v16920_v7 = vld [vmem:[%s21476_s7 + $0x12cc] ss:$16 sps:$4 sm:$0xff]   ;;  %v16923_v53 = vld [vmem:[%s21476_s7 + $0x14c4] ss:$16 sps:$4 sm:$0xff]  }
 0x662   : > { %v8265_v60 = vadd.f32 %v8257_v2, %v8078_v17  ;;  %v9011_v57 = vadd.f32 %v8964_v27, %v8824_v35  ;;  %10684 = vmatprep.mubr.bf16.mxu1 %v17249_v14  ;;  %11391 = vmatprep.mubr.bf16.mxu0 %v17249_v14 }
 0x663   : > { %v8259_v1 = vpop.f32.mrf.mxu1  ;;  %v8966_v62 = vpop.f32.mrf.mxu0 }
 0x664   : > { %10663 = vmatpush1.bf16.msra.mxu1 %v16870_v54  ;;  %11370 = vmatpush1.bf16.msra.mxu0 %v16873_v15  ;;  %v16918_v54 = vld [vmem:[%s21476_s7 + $0x12c8] ss:$16 sps:$4 sm:$0xff]   ;;  %v16921_v15 = vld [vmem:[%s21476_s7 + $0x14c0] ss:$16 sps:$4 sm:$0xff]  }
 0x665   : > { %v8260_v0 = vpop.f32.mrf.mxu1  ;;  %v8967_v61 = vpop.f32.mrf.mxu0  ;;  %10664 = vmatprep.subr.bf16.mxu1 %v16878_v9  ;;  %11371 = vmatprep.subr.bf16.mxu0 %v16881_v39  ;;  %v16929_v9 = vld [vmem:[%s21476_s7 + $0x14a4] ss:$16 sps:$4 sm:$0xff]   ;;  %v16924_v62 = vld [vmem:[%s21476_s7 + $0x12a8] ss:$16 sps:$4 sm:$0xff]  }
 0x666   : > { %v16932_v61 = vld [vmem:[%s21476_s7 + $0x128c] ss:$16 sps:$4 sm:$0xff]  }
 0x668   : > { %10665 = vmatpush1.bf16.msra.mxu1 %v16876_v5  ;;  %11372 = vmatpush1.bf16.msra.mxu0 %v16879_v12  ;;  %v16927_v5 = vld [vmem:[%s21476_s7 + $0x14a0] ss:$16 sps:$4 sm:$0xff]  }
 0x669   : > { %10666 = vmatprep.subr.bf16.mxu1 %v16884_v6  ;;  %11373 = vmatprep.subr.bf16.mxu0 %v16887_v41  ;;  %v16935_v6 = vld [vmem:[%s21476_s7 + $0x1484] ss:$16 sps:$4 sm:$0xff]   ;;  %v16930_v41 = vld [vmem:[%s21476_s7 + $0x1288] ss:$16 sps:$4 sm:$0xff]  }
 0x66c   : > { %10667 = vmatpush1.bf16.msra.mxu1 %v16882_v59  ;;  %11374 = vmatpush1.bf16.msra.mxu0 %v16885_v26  ;;  %v16933_v59 = vld [vmem:[%s21476_s7 + $0x1480] ss:$16 sps:$4 sm:$0xff]   ;;  %v16938_v26 = vld [vmem:[%s21476_s7 + $0x136c] ss:$16 sps:$4 sm:$0xff]  }
 0x66d   : > { %10847 = vmatprep.subr.bf16.mxu1 %v16890_v36  ;;  %11554 = vmatprep.subr.bf16.mxu0 %v16893_v63  ;;  %v16941_v36 = vld [vmem:[%s21476_s7 + $0x1564] ss:$16 sps:$4 sm:$0xff]   ;;  %v11632_v63 = vld [vmem:[#allocation4 + $0x38] sm:$0x1] }
 0x66f   : > { %v8442_v40 = vpop.f32.mrf.mxu1  ;;  %v9149_v24 = vpop.f32.mrf.mxu0  ;;  %14587 = vmatmul.mubr.msk.bf16.vlgmr.msra.gmra.mxu1 %vm2364_vm2, %v20488_v19  ;;  %14658 = vmatmul.mubr.msk.bf16.vlgmr.msra.gmra.mxu0 %vm2364_vm2, %v20712_v28  ;;  %v16902_v19 = vld [vmem:[%s21476_s7 + $0x122c] ss:$16 sps:$4 sm:$0xff]  }
 0x670   : > { %v8451_v13 = vadd.f32 %v8442_v40, %v8264_v49  ;;  %v9197_v18 = vadd.f32 %v9149_v24, %v9010_v34  ;;  %10848 = vmatpush1.bf16.msra.mxu1 %v16888_v30  ;;  %11555 = vmatpush1.bf16.msra.mxu0 %v16891_v43  ;;  %v16939_v30 = vld [vmem:[%s21476_s7 + $0x1560] ss:$16 sps:$4 sm:$0xff]   ;;  %v20824_v43 = vpack.c.bf16 %v11632_v63, %v11632_v63  ;;  %v16984_v63 = vld [vmem:[%s21476_s7 + $0x1468] ss:$16 sps:$4 sm:$0xff]  }
 0x671   : > { %v8444_v31 = vpop.f32.mrf.mxu1  ;;  %v9151_v8 = vpop.f32.mrf.mxu0  ;;  %10849 = vmatprep.subr.bf16.mxu1 %v16896_v22  ;;  %11556 = vmatprep.subr.bf16.mxu0 %v16899_v48  ;;  %v16944_v22 = vld [vmem:[%s21476_s7 + $0x134c] ss:$16 sps:$4 sm:$0xff]   ;;  %v16947_v48 = vld [vmem:[%s21476_s7 + $0x1544] ss:$16 sps:$4 sm:$0xff]  }
 0x672   : > { %v8452_v20 = vadd.f32 %v8444_v31, %v8265_v60  ;;  %v9198_v17 = vadd.f32 %v9151_v8, %v9011_v57  ;;  %10871 = vmatprep.mubr.bf16.mxu1 %v17249_v14  ;;  %11578 = vmatprep.mubr.bf16.mxu0 %v17249_v14 }
 0x673   : > { %v8446_v35 = vpop.f32.mrf.mxu1  ;;  %v9153_v38 = vpop.f32.mrf.mxu0 }
 0x674   : > { %10850 = vmatpush1.bf16.msra.mxu1 %v16894_v58  ;;  %11557 = vmatpush1.bf16.msra.mxu0 %v16897_v42  ;;  %v16942_v58 = vld [vmem:[%s21476_s7 + $0x1348] ss:$16 sps:$4 sm:$0xff]   ;;  %v16945_v42 = vld [vmem:[%s21476_s7 + $0x1540] ss:$16 sps:$4 sm:$0xff]  }
 0x675   : > { %v8447_v32 = vpop.f32.mrf.mxu1  ;;  %v9154_v23 = vpop.f32.mrf.mxu0  ;;  %10851 = vmatprep.subr.bf16.mxu1 %v16902_v19  ;;  %11558 = vmatprep.subr.bf16.mxu0 %v16905_v44  ;;  %v16953_v19 = vld [vmem:[%s21476_s7 + $0x1524] ss:$16 sps:$4 sm:$0xff]   ;;  %v16948_v38 = vld [vmem:[%s21476_s7 + $0x1328] ss:$16 sps:$4 sm:$0xff]  }
 0x676   : > { %v16956_v23 = vld [vmem:[%s21476_s7 + $0x130c] ss:$16 sps:$4 sm:$0xff]  }
 0x678   : > { %10852 = vmatpush1.bf16.msra.mxu1 %v16900_v46  ;;  %11559 = vmatpush1.bf16.msra.mxu0 %v16903_v21  ;;  %v16951_v46 = vld [vmem:[%s21476_s7 + $0x1520] ss:$16 sps:$4 sm:$0xff]  }
 0x679   : > { %10853 = vmatprep.subr.bf16.mxu1 %v16908_v16  ;;  %11560 = vmatprep.subr.bf16.mxu0 %v16911_v10  ;;  %v16959_v16 = vld [vmem:[%s21476_s7 + $0x1504] ss:$16 sps:$4 sm:$0xff]   ;;  %v16954_v10 = vld [vmem:[%s21476_s7 + $0x1308] ss:$16 sps:$4 sm:$0xff]  }
 0x67c   : > { %10854 = vmatpush1.bf16.msra.mxu1 %v16906_v33  ;;  %11561 = vmatpush1.bf16.msra.mxu0 %v16909_v51  ;;  %v16957_v33 = vld [vmem:[%s21476_s7 + $0x1500] ss:$16 sps:$4 sm:$0xff]   ;;  %v16962_v51 = vld [vmem:[%s21476_s7 + $0x13ec] ss:$16 sps:$4 sm:$0xff]  }
 0x67d   : > { %11034 = vmatprep.subr.bf16.mxu1 %v16914_v55  ;;  %11741 = vmatprep.subr.bf16.mxu0 %v16917_v37  ;;  %v16965_v55 = vld [vmem:[%s21476_s7 + $0x15e4] ss:$16 sps:$4 sm:$0xff]   ;;  %v11819_v37 = vld [vmem:[#allocation4 + $0x3c] sm:$0x1] }
 0x67f   : > { %v8629_v45 = vpop.f32.mrf.mxu1  ;;  %v9336_v3 = vpop.f32.mrf.mxu0  ;;  %14605 = vmatmul.mubr.msk.bf16.vlgmr.msra.gmra.mxu1 %vm2364_vm2, %v20544_v50  ;;  %14676 = vmatmul.mubr.msk.bf16.vlgmr.msra.gmra.mxu0 %vm2364_vm2, %v20768_v56  ;;  %v16926_v50 = vld [vmem:[%s21476_s7 + $0x12ac] ss:$16 sps:$4 sm:$0xff]  }
 0x680   : > { %v8638_v49 = vadd.f32 %v8629_v45, %v8451_v13  ;;  %v9384_v34 = vadd.f32 %v9336_v3, %v9197_v18  ;;  %11035 = vmatpush1.bf16.msra.mxu1 %v16912_v11  ;;  %11742 = vmatpush1.bf16.msra.mxu0 %v16915_v25  ;;  %v16963_v11 = vld [vmem:[%s21476_s7 + $0x15e0] ss:$16 sps:$4 sm:$0xff]   ;;  %v20880_v25 = vpack.c.bf16 %v11819_v37, %v11819_v37  ;;  %v17008_v37 = vld [vmem:[%s21476_s7 + $0x14e8] ss:$16 sps:$4 sm:$0xff]  }
 0x681   : > { %v8631_v2 = vpop.f32.mrf.mxu1  ;;  %v9338_v27 = vpop.f32.mrf.mxu0  ;;  %11036 = vmatprep.subr.bf16.mxu1 %v16920_v7  ;;  %11743 = vmatprep.subr.bf16.mxu0 %v16923_v53  ;;  %v16968_v7 = vld [vmem:[%s21476_s7 + $0x13cc] ss:$16 sps:$4 sm:$0xff]   ;;  %v16971_v53 = vld [vmem:[%s21476_s7 + $0x15c4] ss:$16 sps:$4 sm:$0xff]  }
 0x682   : > { %v8639_v39 = vadd.f32 %v8631_v2, %v8452_v20  ;;  %v9385_v60 = vadd.f32 %v9338_v27, %v9198_v17  ;;  %11058 = vmatprep.mubr.bf16.mxu1 %v17249_v14  ;;  %11765 = vmatprep.mubr.bf16.mxu0 %v17249_v14 }
 0x683   : > { %v8633_v57 = vpop.f32.mrf.mxu1  ;;  %v9340_v1 = vpop.f32.mrf.mxu0 }
 0x684   : > { %11037 = vmatpush1.bf16.msra.mxu1 %v16918_v54  ;;  %11744 = vmatpush1.bf16.msra.mxu0 %v16921_v15  ;;  %v16966_v54 = vld [vmem:[%s21476_s7 + $0x13c8] ss:$16 sps:$4 sm:$0xff]   ;;  %v16969_v15 = vld [vmem:[%s21476_s7 + $0x15c0] ss:$16 sps:$4 sm:$0xff]  }
 0x685   : > { %v8634_v12 = vpop.f32.mrf.mxu1  ;;  %v9341_v0 = vpop.f32.mrf.mxu0  ;;  %11038 = vmatprep.subr.bf16.mxu1 %v16926_v50  ;;  %11745 = vmatprep.subr.bf16.mxu0 %v16929_v9  ;;  %v16977_v50 = vld [vmem:[%s21476_s7 + $0x15a4] ss:$16 sps:$4 sm:$0xff]   ;;  %v16972_v1 = vld [vmem:[%s21476_s7 + $0x13a8] ss:$16 sps:$4 sm:$0xff]  }
 0x686   : > { %v16980_v0 = vld [vmem:[%s21476_s7 + $0x138c] ss:$16 sps:$4 sm:$0xff]  }
 0x688   : > { %11039 = vmatpush1.bf16.msra.mxu1 %v16924_v62  ;;  %11746 = vmatpush1.bf16.msra.mxu0 %v16927_v5  ;;  %v16975_v62 = vld [vmem:[%s21476_s7 + $0x15a0] ss:$16 sps:$4 sm:$0xff]  }
 0x689   : > { %11040 = vmatprep.subr.bf16.mxu1 %v16932_v61  ;;  %11747 = vmatprep.subr.bf16.mxu0 %v16935_v6  ;;  %v16983_v61 = vld [vmem:[%s21476_s7 + $0x1584] ss:$16 sps:$4 sm:$0xff]   ;;  %v16978_v6 = vld [vmem:[%s21476_s7 + $0x1388] ss:$16 sps:$4 sm:$0xff]  }
 0x68c   : > { %11041 = vmatpush1.bf16.msra.mxu1 %v16930_v41  ;;  %11748 = vmatpush1.bf16.msra.mxu0 %v16933_v59  ;;  %v16981_v41 = vld [vmem:[%s21476_s7 + $0x1580] ss:$16 sps:$4 sm:$0xff]   ;;  %v16986_v59 = vld [vmem:[%s21476_s7 + $0x146c] ss:$16 sps:$4 sm:$0xff]  }
 0x68d   : > { %11221 = vmatprep.subr.bf16.mxu1 %v16938_v26  ;;  %11928 = vmatprep.subr.bf16.mxu0 %v16941_v36  ;;  %v16989_v26 = vld [vmem:[%s21476_s7 + $0x1664] ss:$16 sps:$4 sm:$0xff]   ;;  %v12006_v36 = vld [vmem:[#allocation4 + $0x3d] sm:$0x1] }
 0x68f   : > { %v8816_v40 = vpop.f32.mrf.mxu1  ;;  %v9523_v24 = vpop.f32.mrf.mxu0  ;;  %14623 = vmatmul.mubr.msk.bf16.vlgmr.msra.gmra.mxu1 %vm2364_vm2, %v20600_v52  ;;  %14694 = vmatmul.mubr.msk.bf16.vlgmr.msra.gmra.mxu0 %vm2364_vm2, %v20824_v43  ;;  %v16950_v52 = vld [vmem:[%s21476_s7 + $0x132c] ss:$16 sps:$4 sm:$0xff]  }
 0x690   : > { %v8825_v13 = vadd.f32 %v8816_v40, %v8638_v49  ;;  %v9571_v18 = vadd.f32 %v9523_v24, %v9384_v34  ;;  %11222 = vmatpush1.bf16.msra.mxu1 %v16936_v4  ;;  %11929 = vmatpush1.bf16.msra.mxu0 %v16939_v30  ;;  %v16987_v4 = vld [vmem:[%s21476_s7 + $0x1660] ss:$16 sps:$4 sm:$0xff]   ;;  %v20936_v30 = vpack.c.bf16 %v12006_v36, %v12006_v36  ;;  %v17032_v36 = vld [vmem:[%s21476_s7 + $0x1568] ss:$16 sps:$4 sm:$0xff]  }
 0x691   : > { %v8818_v31 = vpop.f32.mrf.mxu1  ;;  %v9525_v8 = vpop.f32.mrf.mxu0  ;;  %11223 = vmatprep.subr.bf16.mxu1 %v16944_v22  ;;  %11930 = vmatprep.subr.bf16.mxu0 %v16947_v48  ;;  %v16992_v22 = vld [vmem:[%s21476_s7 + $0x144c] ss:$16 sps:$4 sm:$0xff]   ;;  %v16995_v48 = vld [vmem:[%s21476_s7 + $0x1644] ss:$16 sps:$4 sm:$0xff]  }
 0x692   : > { %v8826_v44 = vadd.f32 %v8818_v31, %v8639_v39  ;;  %v9572_v20 = vadd.f32 %v9525_v8, %v9385_v60  ;;  %11245 = vmatprep.mubr.bf16.mxu1 %v17249_v14  ;;  %11952 = vmatprep.mubr.bf16.mxu0 %v17249_v14 }
 0x693   : > { %v8820_v17 = vpop.f32.mrf.mxu1  ;;  %v9527_v35 = vpop.f32.mrf.mxu0 }
 0x694   : > { %11224 = vmatpush1.bf16.msra.mxu1 %v16942_v58  ;;  %11931 = vmatpush1.bf16.msra.mxu0 %v16945_v42  ;;  %v16990_v58 = vld [vmem:[%s21476_s7 + $0x1448] ss:$16 sps:$4 sm:$0xff]   ;;  %v16993_v42 = vld [vmem:[%s21476_s7 + $0x1640] ss:$16 sps:$4 sm:$0xff]  }
 0x695   : > { %v8821_v21 = vpop.f32.mrf.mxu1  ;;  %v9528_v32 = vpop.f32.mrf.mxu0  ;;  %11225 = vmatprep.subr.bf16.mxu1 %v16950_v52  ;;  %11932 = vmatprep.subr.bf16.mxu0 %v16953_v19  ;;  %v17001_v52 = vld [vmem:[%s21476_s7 + $0x1624] ss:$16 sps:$4 sm:$0xff]   ;;  %v16996_v35 = vld [vmem:[%s21476_s7 + $0x1428] ss:$16 sps:$4 sm:$0xff]  }
 0x696   : > { %v17004_v32 = vld [vmem:[%s21476_s7 + $0x140c] ss:$16 sps:$4 sm:$0xff]  }
 0x698   : > { %11226 = vmatpush1.bf16.msra.mxu1 %v16948_v38  ;;  %11933 = vmatpush1.bf16.msra.mxu0 %v16951_v46  ;;  %v16999_v38 = vld [vmem:[%s21476_s7 + $0x1620] ss:$16 sps:$4 sm:$0xff]  }
 0x699   : > { %11227 = vmatprep.subr.bf16.mxu1 %v16956_v23  ;;  %11934 = vmatprep.subr.bf16.mxu0 %v16959_v16  ;;  %v17007_v23 = vld [vmem:[%s21476_s7 + $0x1604] ss:$16 sps:$4 sm:$0xff]   ;;  %v17002_v16 = vld [vmem:[%s21476_s7 + $0x1408] ss:$16 sps:$4 sm:$0xff]  }
 0x69c   : > { %11228 = vmatpush1.bf16.msra.mxu1 %v16954_v10  ;;  %11935 = vmatpush1.bf16.msra.mxu0 %v16957_v33  ;;  %v17005_v10 = vld [vmem:[%s21476_s7 + $0x1600] ss:$16 sps:$4 sm:$0xff]   ;;  %v17010_v33 = vld [vmem:[%s21476_s7 + $0x14ec] ss:$16 sps:$4 sm:$0xff]  }
 0x69d   : > { %11408 = vmatprep.subr.bf16.mxu1 %v16962_v51  ;;  %12115 = vmatprep.subr.bf16.mxu0 %v16965_v55  ;;  %v17013_v51 = vld [vmem:[%s21476_s7 + $0x16e4] ss:$16 sps:$4 sm:$0xff]   ;;  %v12193_v55 = vld [vmem:[#allocation4 + $0x3e] sm:$0x1] }
 0x69f   : > { %v9003_v45 = vpop.f32.mrf.mxu1  ;;  %v9710_v3 = vpop.f32.mrf.mxu0  ;;  %14641 = vmatmul.mubr.msk.bf16.vlgmr.msra.gmra.mxu1 %vm2364_vm2, %v20656_v47  ;;  %14712 = vmatmul.mubr.msk.bf16.vlgmr.msra.gmra.mxu0 %vm2364_vm2, %v20880_v25  ;;  %v16974_v47 = vld [vmem:[%s21476_s7 + $0x13ac] ss:$16 sps:$4 sm:$0xff]  }
 0x6a0   : > { %v9012_v49 = vadd.f32 %v9003_v45, %v8825_v13  ;;  %v9758_v34 = vadd.f32 %v9710_v3, %v9571_v18  ;;  %11409 = vmatpush1.bf16.msra.mxu1 %v16960_v29  ;;  %12116 = vmatpush1.bf16.msra.mxu0 %v16963_v11  ;;  %v17011_v29 = vld [vmem:[%s21476_s7 + $0x16e0] ss:$16 sps:$4 sm:$0xff]   ;;  %v20992_v11 = vpack.c.bf16 %v12193_v55, %v12193_v55  ;;  %v17056_v55 = vld [vmem:[%s21476_s7 + $0x15e8] ss:$16 sps:$4 sm:$0xff]  }
 0x6a1   : > { %v9005_v2 = vpop.f32.mrf.mxu1  ;;  %v9712_v27 = vpop.f32.mrf.mxu0  ;;  %11410 = vmatprep.subr.bf16.mxu1 %v16968_v7  ;;  %12117 = vmatprep.subr.bf16.mxu0 %v16971_v53  ;;  %v17016_v7 = vld [vmem:[%s21476_s7 + $0x14cc] ss:$16 sps:$4 sm:$0xff]   ;;  %v17019_v53 = vld [vmem:[%s21476_s7 + $0x16c4] ss:$16 sps:$4 sm:$0xff]  }
 0x6a2   : > { %v9013_v9 = vadd.f32 %v9005_v2, %v8826_v44  ;;  %v9759_v39 = vadd.f32 %v9712_v27, %v9572_v20  ;;  %11432 = vmatprep.mubr.bf16.mxu1 %v17249_v14  ;;  %12139 = vmatprep.mubr.bf16.mxu0 %v17249_v14 }
 0x6a3   : > { %v9007_v60 = vpop.f32.mrf.mxu1  ;;  %v9714_v57 = vpop.f32.mrf.mxu0 }
 0x6a4   : > { %11411 = vmatpush1.bf16.msra.mxu1 %v16966_v54  ;;  %12118 = vmatpush1.bf16.msra.mxu0 %v16969_v15  ;;  %v17014_v54 = vld [vmem:[%s21476_s7 + $0x14c8] ss:$16 sps:$4 sm:$0xff]   ;;  %v17017_v15 = vld [vmem:[%s21476_s7 + $0x16c0] ss:$16 sps:$4 sm:$0xff]  }
 0x6a5   : > { %v9008_v5 = vpop.f32.mrf.mxu1  ;;  %v9715_v12 = vpop.f32.mrf.mxu0  ;;  %11412 = vmatprep.subr.bf16.mxu1 %v16974_v47  ;;  %12119 = vmatprep.subr.bf16.mxu0 %v16977_v50  ;;  %v17025_v47 = vld [vmem:[%s21476_s7 + $0x16a4] ss:$16 sps:$4 sm:$0xff]   ;;  %v17020_v57 = vld [vmem:[%s21476_s7 + $0x14a8] ss:$16 sps:$4 sm:$0xff]  }
 0x6a6   : > { %v17028_v12 = vld [vmem:[%s21476_s7 + $0x148c] ss:$16 sps:$4 sm:$0xff]  }
 0x6a8   : > { %11413 = vmatpush1.bf16.msra.mxu1 %v16972_v1  ;;  %12120 = vmatpush1.bf16.msra.mxu0 %v16975_v62  ;;  %v17023_v1 = vld [vmem:[%s21476_s7 + $0x16a0] ss:$16 sps:$4 sm:$0xff]  }
 0x6a9   : > { %11414 = vmatprep.subr.bf16.mxu1 %v16980_v0  ;;  %12121 = vmatprep.subr.bf16.mxu0 %v16983_v61  ;;  %v17031_v0 = vld [vmem:[%s21476_s7 + $0x1684] ss:$16 sps:$4 sm:$0xff]   ;;  %v17026_v61 = vld [vmem:[%s21476_s7 + $0x1488] ss:$16 sps:$4 sm:$0xff]  }
 0x6ac   : > { %11415 = vmatpush1.bf16.msra.mxu1 %v16978_v6  ;;  %12122 = vmatpush1.bf16.msra.mxu0 %v16981_v41  ;;  %v17029_v6 = vld [vmem:[%s21476_s7 + $0x1680] ss:$16 sps:$4 sm:$0xff]   ;;  %v17034_v41 = vld [vmem:[%s21476_s7 + $0x156c] ss:$16 sps:$4 sm:$0xff]  }
 0x6ad   : > { %11595 = vmatprep.subr.bf16.mxu1 %v16986_v59  ;;  %12302 = vmatprep.subr.bf16.mxu0 %v16989_v26  ;;  %v17037_v59 = vld [vmem:[%s21476_s7 + $0x1764] ss:$16 sps:$4 sm:$0xff]   ;;  %v12380_v26 = vld [vmem:[#allocation4 + $0x3f] sm:$0x1] }
 0x6af   : > { %v9190_v40 = vpop.f32.mrf.mxu1  ;;  %v9897_v24 = vpop.f32.mrf.mxu0  ;;  %14659 = vmatmul.mubr.msk.bf16.vlgmr.msra.gmra.mxu1 %vm2364_vm2, %v20712_v28  ;;  %14730 = vmatmul.mubr.msk.bf16.vlgmr.msra.gmra.mxu0 %vm2364_vm2, %v20936_v30  ;;  %v16998_v28 = vld [vmem:[%s21476_s7 + $0x142c] ss:$16 sps:$4 sm:$0xff]  }
 0x6b0   : > { %v9199_v13 = vadd.f32 %v9190_v40, %v9012_v49  ;;  %v9945_v18 = vadd.f32 %v9897_v24, %v9758_v34  ;;  %11596 = vmatpush1.bf16.msra.mxu1 %v16984_v63  ;;  %12303 = vmatpush1.bf16.msra.mxu0 %v16987_v4  ;;  %v17035_v63 = vld [vmem:[%s21476_s7 + $0x1760] ss:$16 sps:$4 sm:$0xff]   ;;  %v21048_v4 = vpack.c.bf16 %v12380_v26, %v12380_v26  ;;  %v17080_v26 = vld [vmem:[%s21476_s7 + $0x1668] ss:$16 sps:$4 sm:$0xff]  }
 0x6b1   : > { %v9192_v31 = vpop.f32.mrf.mxu1  ;;  %v9899_v8 = vpop.f32.mrf.mxu0  ;;  %11597 = vmatprep.subr.bf16.mxu1 %v16992_v22  ;;  %12304 = vmatprep.subr.bf16.mxu0 %v16995_v48  ;;  %v17040_v22 = vld [vmem:[%s21476_s7 + $0x154c] ss:$16 sps:$4 sm:$0xff]   ;;  %v17043_v48 = vld [vmem:[%s21476_s7 + $0x1744] ss:$16 sps:$4 sm:$0xff]  }
 0x6b2   : > { %v9200_v19 = vadd.f32 %v9192_v31, %v9013_v9  ;;  %v9946_v44 = vadd.f32 %v9899_v8, %v9759_v39  ;;  %11619 = vmatprep.mubr.bf16.mxu1 %v17249_v14  ;;  %12326 = vmatprep.mubr.bf16.mxu0 %v17249_v14 }
 0x6b3   : > { %v9194_v20 = vpop.f32.mrf.mxu1  ;;  %v9901_v17 = vpop.f32.mrf.mxu0 }
 0x6b4   : > { %11598 = vmatpush1.bf16.msra.mxu1 %v16990_v58  ;;  %12305 = vmatpush1.bf16.msra.mxu0 %v16993_v42  ;;  %v17038_v58 = vld [vmem:[%s21476_s7 + $0x1548] ss:$16 sps:$4 sm:$0xff]   ;;  %v17041_v42 = vld [vmem:[%s21476_s7 + $0x1740] ss:$16 sps:$4 sm:$0xff]  }
 0x6b5   : > { %v9195_v46 = vpop.f32.mrf.mxu1  ;;  %v9902_v21 = vpop.f32.mrf.mxu0  ;;  %11599 = vmatprep.subr.bf16.mxu1 %v16998_v28  ;;  %12306 = vmatprep.subr.bf16.mxu0 %v17001_v52  ;;  %v17049_v28 = vld [vmem:[%s21476_s7 + $0x1724] ss:$16 sps:$4 sm:$0xff]   ;;  %v17044_v17 = vld [vmem:[%s21476_s7 + $0x1528] ss:$16 sps:$4 sm:$0xff]  }
 0x6b6   : > { %v17052_v21 = vld [vmem:[%s21476_s7 + $0x150c] ss:$16 sps:$4 sm:$0xff]  }
 0x6b8   : > { %11600 = vmatpush1.bf16.msra.mxu1 %v16996_v35  ;;  %12307 = vmatpush1.bf16.msra.mxu0 %v16999_v38  ;;  %v17047_v35 = vld [vmem:[%s21476_s7 + $0x1720] ss:$16 sps:$4 sm:$0xff]  }
 0x6b9   : > { %11601 = vmatprep.subr.bf16.mxu1 %v17004_v32  ;;  %12308 = vmatprep.subr.bf16.mxu0 %v17007_v23  ;;  %v17055_v32 = vld [vmem:[%s21476_s7 + $0x1704] ss:$16 sps:$4 sm:$0xff]   ;;  %v17050_v23 = vld [vmem:[%s21476_s7 + $0x1508] ss:$16 sps:$4 sm:$0xff]  }
 0x6bc   : > { %11602 = vmatpush1.bf16.msra.mxu1 %v17002_v16  ;;  %12309 = vmatpush1.bf16.msra.mxu0 %v17005_v10  ;;  %v17053_v16 = vld [vmem:[%s21476_s7 + $0x1700] ss:$16 sps:$4 sm:$0xff]   ;;  %v17058_v10 = vld [vmem:[%s21476_s7 + $0x15ec] ss:$16 sps:$4 sm:$0xff]  }
 0x6bd   : > { %11782 = vmatprep.subr.bf16.mxu1 %v17010_v33  ;;  %12489 = vmatprep.subr.bf16.mxu0 %v17013_v51  ;;  %v17061_v33 = vld [vmem:[%s21476_s7 + $0x17e4] ss:$16 sps:$4 sm:$0xff]   ;;  %v12567_v51 = vld [vmem:[#allocation4 + $0x40] sm:$0x1] }
 0x6bf   : > { %v9377_v45 = vpop.f32.mrf.mxu1  ;;  %v10084_v3 = vpop.f32.mrf.mxu0  ;;  %14677 = vmatmul.mubr.msk.bf16.vlgmr.msra.gmra.mxu1 %vm2364_vm2, %v20768_v56  ;;  %14748 = vmatmul.mubr.msk.bf16.vlgmr.msra.gmra.mxu0 %vm2364_vm2, %v20992_v11  ;;  %v17022_v56 = vld [vmem:[%s21476_s7 + $0x14ac] ss:$16 sps:$4 sm:$0xff]  }
 0x6c0   : > { %v9386_v49 = vadd.f32 %v9377_v45, %v9199_v13  ;;  %v10132_v34 = vadd.f32 %v10084_v3, %v9945_v18  ;;  %11783 = vmatpush1.bf16.msra.mxu1 %v17008_v37  ;;  %12490 = vmatpush1.bf16.msra.mxu0 %v17011_v29  ;;  %v17059_v37 = vld [vmem:[%s21476_s7 + $0x17e0] ss:$16 sps:$4 sm:$0xff]   ;;  %v21104_v29 = vpack.c.bf16 %v12567_v51, %v12567_v51 }
 0x6c1   : > { %v9379_v2 = vpop.f32.mrf.mxu1  ;;  %v10086_v27 = vpop.f32.mrf.mxu0  ;;  %11784 = vmatprep.subr.bf16.mxu1 %v17016_v7  ;;  %12491 = vmatprep.subr.bf16.mxu0 %v17019_v53  ;;  %v17064_v7 = vld [vmem:[%s21476_s7 + $0x15cc] ss:$16 sps:$4 sm:$0xff]   ;;  %v17067_v53 = vld [vmem:[%s21476_s7 + $0x17c4] ss:$16 sps:$4 sm:$0xff]  }
 0x6c2   : > { %v9387_v50 = vadd.f32 %v9379_v2, %v9200_v19  ;;  %v10133_v9 = vadd.f32 %v10086_v27, %v9946_v44  ;;  %11806 = vmatprep.mubr.bf16.mxu1 %v17249_v14  ;;  %12513 = vmatprep.mubr.bf16.mxu0 %v17249_v14 }
 0x6c3   : > { %v9381_v39 = vpop.f32.mrf.mxu1  ;;  %v10088_v60 = vpop.f32.mrf.mxu0 }
 0x6c4   : > { %11785 = vmatpush1.bf16.msra.mxu1 %v17014_v54  ;;  %12492 = vmatpush1.bf16.msra.mxu0 %v17017_v15  ;;  %v17062_v54 = vld [vmem:[%s21476_s7 + $0x15c8] ss:$16 sps:$4 sm:$0xff]   ;;  %v17065_v15 = vld [vmem:[%s21476_s7 + $0x17c0] ss:$16 sps:$4 sm:$0xff]  }
 0x6c5   : > { %v9382_v62 = vpop.f32.mrf.mxu1  ;;  %v10089_v5 = vpop.f32.mrf.mxu0  ;;  %11786 = vmatprep.subr.bf16.mxu1 %v17022_v56  ;;  %12493 = vmatprep.subr.bf16.mxu0 %v17025_v47  ;;  %v17073_v56 = vld [vmem:[%s21476_s7 + $0x17a4] ss:$16 sps:$4 sm:$0xff]   ;;  %v17068_v60 = vld [vmem:[%s21476_s7 + $0x15a8] ss:$16 sps:$4 sm:$0xff]  }
 0x6c6   : > { %v17076_v5 = vld [vmem:[%s21476_s7 + $0x158c] ss:$16 sps:$4 sm:$0xff]  }
 0x6c8   : > { %11787 = vmatpush1.bf16.msra.mxu1 %v17020_v57  ;;  %12494 = vmatpush1.bf16.msra.mxu0 %v17023_v1  ;;  %v17071_v57 = vld [vmem:[%s21476_s7 + $0x17a0] ss:$16 sps:$4 sm:$0xff]  }
 0x6c9   : > { %11788 = vmatprep.subr.bf16.mxu1 %v17028_v12  ;;  %12495 = vmatprep.subr.bf16.mxu0 %v17031_v0  ;;  %v17079_v12 = vld [vmem:[%s21476_s7 + $0x1784] ss:$16 sps:$4 sm:$0xff]   ;;  %v17074_v0 = vld [vmem:[%s21476_s7 + $0x1588] ss:$16 sps:$4 sm:$0xff]  }
 0x6cc   : > { %11789 = vmatpush1.bf16.msra.mxu1 %v17026_v61  ;;  %12496 = vmatpush1.bf16.msra.mxu0 %v17029_v6  ;;  %v17077_v61 = vld [vmem:[%s21476_s7 + $0x1780] ss:$16 sps:$4 sm:$0xff]   ;;  %v17082_v6 = vld [vmem:[%s21476_s7 + $0x166c] ss:$16 sps:$4 sm:$0xff]  }
 0x6cd   : > { %11969 = vmatprep.subr.bf16.mxu1 %v17034_v41  ;;  %12676 = vmatprep.subr.bf16.mxu0 %v17037_v59  ;;  %v17085_v41 = vld [vmem:[%s21476_s7 + $0x1864] ss:$16 sps:$4 sm:$0xff]   ;;  %v12754_v59 = vld [vmem:[#allocation4 + $0x41] sm:$0x1] }
 0x6cf   : > { %v9564_v40 = vpop.f32.mrf.mxu1  ;;  %v10271_v24 = vpop.f32.mrf.mxu0  ;;  %14695 = vmatmul.mubr.msk.bf16.vlgmr.msra.gmra.mxu1 %vm2364_vm2, %v20824_v43  ;;  %14766 = vmatmul.mubr.msk.bf16.vlgmr.msra.gmra.mxu0 %vm2364_vm2, %v21048_v4  ;;  %v17046_v43 = vld [vmem:[%s21476_s7 + $0x152c] ss:$16 sps:$4 sm:$0xff]  }
 0x6d0   : > { %v9573_v13 = vadd.f32 %v9564_v40, %v9386_v49  ;;  %v10319_v18 = vadd.f32 %v10271_v24, %v10132_v34  ;;  %11970 = vmatpush1.bf16.msra.mxu1 %v17032_v36  ;;  %12677 = vmatpush1.bf16.msra.mxu0 %v17035_v63  ;;  %v17083_v36 = vld [vmem:[%s21476_s7 + $0x1860] ss:$16 sps:$4 sm:$0xff]   ;;  %v21160_v63 = vpack.c.bf16 %v12754_v59, %v12754_v59 }
 0x6d1   : > { %v9566_v31 = vpop.f32.mrf.mxu1  ;;  %v10273_v8 = vpop.f32.mrf.mxu0  ;;  %11971 = vmatprep.subr.bf16.mxu1 %v17040_v22  ;;  %12678 = vmatprep.subr.bf16.mxu0 %v17043_v48  ;;  %v17088_v22 = vld [vmem:[%s21476_s7 + $0x164c] ss:$16 sps:$4 sm:$0xff]   ;;  %v17091_v48 = vld [vmem:[%s21476_s7 + $0x1844] ss:$16 sps:$4 sm:$0xff]  }
 0x6d2   : > { %v9574_v52 = vadd.f32 %v9566_v31, %v9387_v50  ;;  %v10320_v19 = vadd.f32 %v10273_v8, %v10133_v9  ;;  %11993 = vmatprep.mubr.bf16.mxu1 %v17249_v14  ;;  %12700 = vmatprep.mubr.bf16.mxu0 %v17249_v14 }
 0x6d3   : > { %v9568_v44 = vpop.f32.mrf.mxu1  ;;  %v10275_v20 = vpop.f32.mrf.mxu0 }
 0x6d4   : > { %11972 = vmatpush1.bf16.msra.mxu1 %v17038_v58  ;;  %12679 = vmatpush1.bf16.msra.mxu0 %v17041_v42  ;;  %v17086_v58 = vld [vmem:[%s21476_s7 + $0x1648] ss:$16 sps:$4 sm:$0xff]   ;;  %v17089_v42 = vld [vmem:[%s21476_s7 + $0x1840] ss:$16 sps:$4 sm:$0xff]  }
 0x6d5   : > { %v9569_v38 = vpop.f32.mrf.mxu1  ;;  %v10276_v46 = vpop.f32.mrf.mxu0  ;;  %11973 = vmatprep.subr.bf16.mxu1 %v17046_v43  ;;  %12680 = vmatprep.subr.bf16.mxu0 %v17049_v28  ;;  %v17097_v43 = vld [vmem:[%s21476_s7 + $0x1824] ss:$16 sps:$4 sm:$0xff]   ;;  %v17092_v20 = vld [vmem:[%s21476_s7 + $0x1628] ss:$16 sps:$4 sm:$0xff]  }
 0x6d6   : > { %v17100_v46 = vld [vmem:[%s21476_s7 + $0x160c] ss:$16 sps:$4 sm:$0xff]  }
 0x6d8   : > { %11974 = vmatpush1.bf16.msra.mxu1 %v17044_v17  ;;  %12681 = vmatpush1.bf16.msra.mxu0 %v17047_v35  ;;  %v17095_v17 = vld [vmem:[%s21476_s7 + $0x1820] ss:$16 sps:$4 sm:$0xff]  }
 0x6d9   : > { %11975 = vmatprep.subr.bf16.mxu1 %v17052_v21  ;;  %12682 = vmatprep.subr.bf16.mxu0 %v17055_v32  ;;  %v17103_v21 = vld [vmem:[%s21476_s7 + $0x1804] ss:$16 sps:$4 sm:$0xff]   ;;  %v17098_v32 = vld [vmem:[%s21476_s7 + $0x1608] ss:$16 sps:$4 sm:$0xff]  }
 0x6dc   : > { %11976 = vmatpush1.bf16.msra.mxu1 %v17050_v23  ;;  %12683 = vmatpush1.bf16.msra.mxu0 %v17053_v16  ;;  %v17101_v23 = vld [vmem:[%s21476_s7 + $0x1800] ss:$16 sps:$4 sm:$0xff]   ;;  %v17106_v16 = vld [vmem:[%s21476_s7 + $0x16ec] ss:$16 sps:$4 sm:$0xff]  }
 0x6dd   : > { %12156 = vmatprep.subr.bf16.mxu1 %v17058_v10  ;;  %12863 = vmatprep.subr.bf16.mxu0 %v17061_v33  ;;  %v12941_v10 = vld [vmem:[#allocation4 + $0x42] sm:$0x1]  ;;  %v17104_v33 = vld [vmem:[%s21476_s7 + $0x16e8] ss:$16 sps:$4 sm:$0xff]  }
 0x6de   : > { %v21210_v51 = vpack.c.bf16 %v12941_v10, %v12941_v10  ;;  %v17137_v10 = vld [vmem:[%s21476_s7 + $0x1788] ss:$16 sps:$4 sm:$0xff]  }
 0x6df   : > { %v9751_v45 = vpop.f32.mrf.mxu1  ;;  %v10458_v3 = vpop.f32.mrf.mxu0  ;;  %14713 = vmatmul.mubr.msk.bf16.vlgmr.msra.gmra.mxu1 %vm2364_vm2, %v20880_v25  ;;  %14784 = vmatmul.mubr.msk.bf16.vlgmr.msra.gmra.mxu0 %vm2364_vm2, %v21104_v29  ;;  %v17070_v25 = vld [vmem:[%s21476_s7 + $0x15ac] ss:$16 sps:$4 sm:$0xff]  }
 0x6e0   : > { %v9760_v49 = vadd.f32 %v9751_v45, %v9573_v13  ;;  %v10506_v34 = vadd.f32 %v10458_v3, %v10319_v18  ;;  %12157 = vmatpush1.bf16.msra.mxu1 %v17056_v55  ;;  %12864 = vmatpush1.bf16.msra.mxu0 %v17059_v37  ;;  %v17109_v55 = vld [vmem:[%s21476_s7 + $0x16cc] ss:$16 sps:$4 sm:$0xff]   ;;  %v17107_v3 = vld [vmem:[%s21476_s7 + $0x16c8] ss:$16 sps:$4 sm:$0xff]  }
 0x6e1   : > { %v9753_v2 = vpop.f32.mrf.mxu1  ;;  %v10460_v27 = vpop.f32.mrf.mxu0  ;;  %12158 = vmatprep.subr.bf16.mxu1 %v17064_v7  ;;  %12865 = vmatprep.subr.bf16.mxu0 %v17067_v53 }
 0x6e2   : > { %v9761_v47 = vadd.f32 %v9753_v2, %v9574_v52  ;;  %v10507_v50 = vadd.f32 %v10460_v27, %v10320_v19  ;;  %12180 = vmatprep.mubr.bf16.mxu1 %v17249_v14  ;;  %12887 = vmatprep.mubr.bf16.mxu0 %v17249_v14 }
 0x6e3   : > { %v9755_v9 = vpop.f32.mrf.mxu1  ;;  %v10462_v39 = vpop.f32.mrf.mxu0 }
 0x6e4   : > { %12159 = vmatpush1.bf16.msra.mxu1 %v17062_v54  ;;  %12866 = vmatpush1.bf16.msra.mxu0 %v17065_v15  ;;  %v17112_v54 = vld [vmem:[%s21476_s7 + $0x16ac] ss:$16 sps:$4 sm:$0xff]   ;;  %v17113_v9 = vld [vmem:[%s21476_s7 + $0x1688] ss:$16 sps:$4 sm:$0xff]  }
 0x6e5   : > { %v9756_v1 = vpop.f32.mrf.mxu1  ;;  %v10463_v62 = vpop.f32.mrf.mxu0  ;;  %12160 = vmatprep.subr.bf16.mxu1 %v17070_v25  ;;  %12867 = vmatprep.subr.bf16.mxu0 %v17073_v56  ;;  %v17110_v25 = vld [vmem:[%s21476_s7 + $0x16a8] ss:$16 sps:$4 sm:$0xff]   ;;  %v17118_v39 = vld [vmem:[%s21476_s7 + $0x176c] ss:$16 sps:$4 sm:$0xff]  }
 0x6e8   : > { %12161 = vmatpush1.bf16.msra.mxu1 %v17068_v60  ;;  %12868 = vmatpush1.bf16.msra.mxu0 %v17071_v57  ;;  %v17116_v60 = vld [vmem:[%s21476_s7 + $0x1768] ss:$16 sps:$4 sm:$0xff]   ;;  %v17121_v57 = vld [vmem:[%s21476_s7 + $0x174c] ss:$16 sps:$4 sm:$0xff]  }
 0x6e9   : > { %12162 = vmatprep.subr.bf16.mxu1 %v17076_v5  ;;  %12869 = vmatprep.subr.bf16.mxu0 %v17079_v12 }
 0x6ec   : > { %12163 = vmatpush1.bf16.msra.mxu1 %v17074_v0  ;;  %12870 = vmatpush1.bf16.msra.mxu0 %v17077_v61  ;;  %v17119_v0 = vld [vmem:[%s21476_s7 + $0x1748] ss:$16 sps:$4 sm:$0xff]  }
 0x6ed   : > { %12343 = vmatprep.subr.bf16.mxu1 %v17082_v6  ;;  %13050 = vmatprep.subr.bf16.mxu0 %v17085_v41  ;;  %v17124_v41 = vld [vmem:[%s21476_s7 + $0x172c] ss:$16 sps:$4 sm:$0xff]  }
 0x6ef   : > { %v9938_v40 = vpop.f32.mrf.mxu1  ;;  %v10645_v24 = vpop.f32.mrf.mxu0  ;;  %14731 = vmatmul.mubr.msk.bf16.vlgmr.msra.gmra.mxu1 %vm2364_vm2, %v20936_v30  ;;  %14802 = vmatmul.mubr.msk.bf16.vlgmr.msra.gmra.mxu0 %vm2364_vm2, %v21160_v63  ;;  %v17094_v30 = vld [vmem:[%s21476_s7 + $0x162c] ss:$16 sps:$4 sm:$0xff]  }
 0x6f0   : > { %v9947_v13 = vadd.f32 %v9938_v40, %v9760_v49  ;;  %v10693_v18 = vadd.f32 %v10645_v24, %v10506_v34  ;;  %12344 = vmatpush1.bf16.msra.mxu1 %v17080_v26  ;;  %13051 = vmatpush1.bf16.msra.mxu0 %v17083_v36  ;;  %v17127_v24 = vld [vmem:[%s21476_s7 + $0x170c] ss:$16 sps:$4 sm:$0xff]  }
 0x6f1   : > { %v9940_v31 = vpop.f32.mrf.mxu1  ;;  %v10647_v8 = vpop.f32.mrf.mxu0  ;;  %12345 = vmatprep.subr.bf16.mxu1 %v17088_v22  ;;  %13052 = vmatprep.subr.bf16.mxu0 %v17091_v48  ;;  %v17122_v22 = vld [vmem:[%s21476_s7 + $0x1728] ss:$16 sps:$4 sm:$0xff]  }
 0x6f2   : > { %v9948_v28 = vadd.f32 %v9940_v31, %v9761_v47  ;;  %v10694_v52 = vadd.f32 %v10647_v8, %v10507_v50  ;;  %12367 = vmatprep.mubr.bf16.mxu1 %v17249_v14  ;;  %13074 = vmatprep.mubr.bf16.mxu0 %v17249_v14  ;;  %v17115_v50 = vld [vmem:[%s21476_s7 + $0x168c] ss:$16 sps:$4 sm:$0xff]  }
 0x6f3   : > { %v9942_v19 = vpop.f32.mrf.mxu1  ;;  %v10649_v44 = vpop.f32.mrf.mxu0 }
 0x6f4   : > { %12346 = vmatpush1.bf16.msra.mxu1 %v17086_v58  ;;  %13053 = vmatpush1.bf16.msra.mxu0 %v17089_v42  ;;  %v17128_v58 = vld [vmem:[%s21476_s7 + $0x17e8] ss:$16 sps:$4 sm:$0xff]   ;;  %v17133_v42 = vld [vmem:[%s21476_s7 + $0x17cc] ss:$16 sps:$4 sm:$0xff]  }
 0x6f5   : > { %v9943_v35 = vpop.f32.mrf.mxu1  ;;  %v10650_v38 = vpop.f32.mrf.mxu0  ;;  %12347 = vmatprep.subr.bf16.mxu1 %v17094_v30  ;;  %13054 = vmatprep.subr.bf16.mxu0 %v17097_v43  ;;  %v17136_v44 = vld [vmem:[%s21476_s7 + $0x17ac] ss:$16 sps:$4 sm:$0xff]  }
 0x6f6   : > { %v17134_v38 = vld [vmem:[%s21476_s7 + $0x17a8] ss:$16 sps:$4 sm:$0xff]  }
 0x6f8   : > { %12348 = vmatpush1.bf16.msra.mxu1 %v17092_v20  ;;  %13055 = vmatpush1.bf16.msra.mxu0 %v17095_v17 }
 0x6f9   : > { %12349 = vmatprep.subr.bf16.mxu1 %v17100_v46  ;;  %13056 = vmatprep.subr.bf16.mxu0 %v17103_v21 }
 0x6fc   : > { %12350 = vmatpush1.bf16.msra.mxu1 %v17098_v32  ;;  %13057 = vmatpush1.bf16.msra.mxu0 %v17101_v23  ;;  %v17139_v32 = vld [vmem:[%s21476_s7 + $0x178c] ss:$16 sps:$4 sm:$0xff]  }
 0x6fd   : > { %12530 = vmatprep.subr.bf16.mxu1 %v17106_v16  ;;  %v17152_v23 = vld [vmem:[%s21478_s9 + $0x78] sm:$0xff]  }
 0x6fe   : > { %v17153_v16 = vld [vmem:[%s21478_s9 + $0x38] sm:$0xff]   ;;  %15248 = vmatprep.subr.bf16.mxu0 %v17152_v23 }
 0x6ff   : > { %v10125_v37 = vpop.f32.mrf.mxu1  ;;  %v10832_v7 = vpop.f32.mrf.mxu0  ;;  %14749 = vmatmul.mubr.msk.bf16.vlgmr.msra.gmra.mxu1 %vm2364_vm2, %v20992_v11  ;;  %14820 = vmatmul.mubr.msk.bf16.vlgmr.msra.gmra.mxu0 %vm2364_vm2, %v21210_v51 }
 0x700   : > { %v10134_v53 = vadd.f32 %v10125_v37, %v9947_v13  ;;  %v10880_v45 = vadd.f32 %v10832_v7, %v10693_v18  ;;  %12531 = vmatpush1.bf16.msra.mxu1 %v17104_v33  ;;  %12554 = vmatprep.mubr.bf16.mxu1 %v17249_v14  ;;  %v17125_v13 = vld [vmem:[%s21476_s7 + $0x1708] ss:$16 sps:$4 sm:$0xff]   ;;  %v17130_v18 = vld [vmem:[%s21476_s7 + $0x17ec] ss:$16 sps:$4 sm:$0xff]  }
 0x701   : > { %v10127_v49 = vpop.f32.mrf.mxu1  ;;  %v10834_v34 = vpop.f32.mrf.mxu0  ;;  %12532 = vmatprep.subr.bf16.mxu1 %v17109_v55  ;;  %15249 = vmatpush3.bf16.msra.mxu0 %v17153_v16  ;;  %v17142_v33 = vld [vmem:[%s21476_s7 + $0x186c] ss:$16 sps:$4 sm:$0xff]   ;;  %v17140_v55 = vld [vmem:[%s21476_s7 + $0x1868] ss:$16 sps:$4 sm:$0xff]  }
 0x702   : > { %v10135_v11 = vadd.f32 %v10127_v49, %v9948_v28  ;;  %v10881_v15 = vadd.f32 %v10834_v34, %v10694_v52  ;;  %v17131_v28 = vld [vmem:[%s21476_s7 + $0x17c8] ss:$16 sps:$4 sm:$0xff]   ;;  %v17145_v37 = vld [vmem:[%s21476_s7 + $0x184c] ss:$16 sps:$4 sm:$0xff]   ;;  %v17154_v34 = vld [vmem:[%s21478_s9 + $0x70] sm:$0xff]  }
 0x703   : > { %v10129_v2 = vpop.f32.mrf.mxu1  ;;  %v10836_v27 = vpop.f32.mrf.mxu0  ;;  %v17143_v49 = vld [vmem:[%s21476_s7 + $0x1848] ss:$16 sps:$4 sm:$0xff]   ;;  %15250 = vmatprep.subr.bf16.mxu0 %v17154_v34 }
 0x704   : > { %12533 = vmatpush1.bf16.msra.mxu1 %v17107_v3 }
 0x705   : > { %v10130_v56 = vpop.f32.mrf.mxu1  ;;  %v10837_v47 = vpop.f32.mrf.mxu0  ;;  %12534 = vmatprep.subr.bf16.mxu1 %v17112_v54  ;;  %v17155_v54 = vld [vmem:[%s21478_s9 + $0x30] sm:$0xff]  }
 0x706   : > { %15251 = vmatpush3.bf16.msra.mxu0 %v17155_v54  ;;  %v17156_v56 = vld [vmem:[%s21478_s9 + $0x68] sm:$0xff]  }
 0x707   : > { %v17157_v47 = vld [vmem:[%s21478_s9 + $0x28] sm:$0xff]   ;;  %15252 = vmatprep.subr.bf16.mxu0 %v17156_v56 }
 0x708   : > { %12535 = vmatpush1.bf16.msra.mxu1 %v17110_v25 }
 0x709   : > { %12536 = vmatprep.subr.bf16.mxu1 %v17115_v50  ;;  %v17146_v50 = vld [vmem:[%s21476_s7 + $0x1828] ss:$16 sps:$4 sm:$0xff]  }
 0x70a   : > { %15253 = vmatpush3.bf16.msra.mxu0 %v17157_v47 }
 0x70c   : > { %12537 = vmatpush1.bf16.msra.mxu1 %v17113_v9 }
 0x70d   : > { %12717 = vmatprep.subr.bf16.mxu1 %v17118_v39 }
 0x70f   : > { %v10312_v1 = vpop.f32.mrf.mxu1  ;;  %v11019_v62 = vpop.f32.mrf.mxu0  ;;  %14767 = vmatmul.mubr.msk.bf16.vlgmr.msra.gmra.mxu1 %vm2364_vm2, %v21048_v4 }
 0x710   : > { %v10321_v5 = vadd.f32 %v10312_v1, %v10134_v53  ;;  %v11067_v12 = vadd.f32 %v11019_v62, %v10880_v45  ;;  %12718 = vmatpush1.bf16.msra.mxu1 %v17116_v60  ;;  %12741 = vmatprep.mubr.bf16.mxu1 %v17249_v14  ;;  %v17151_v60 = vld [vmem:[%s21476_s7 + $0x180c] ss:$16 sps:$4 sm:$0xff]   ;;  %v17159_v1 = vld [vmem:[%s21478_s9 + $0x20] sm:$0xff]   ;;  %v17149_v62 = vld [vmem:[%s21476_s7 + $0x1808] ss:$16 sps:$4 sm:$0xff]  }
 0x711   : > { %v10314_v61 = vpop.f32.mrf.mxu1  ;;  %v11021_v6 = vpop.f32.mrf.mxu0  ;;  %12719 = vmatprep.subr.bf16.mxu1 %v17121_v57  ;;  %v17158_v57 = vld [vmem:[%s21478_s9 + $0x60] sm:$0xff]  }
 0x712   : > { %v10322_v59 = vadd.f32 %v10314_v61, %v10135_v11  ;;  %v11068_v26 = vadd.f32 %v11021_v6, %v10881_v15  ;;  %15254 = vmatprep.subr.bf16.mxu0 %v17158_v57 }
 0x713   : > { %v10316_v36 = vpop.f32.mrf.mxu1  ;;  %v11023_v4 = vpop.f32.mrf.mxu0  ;;  %15255 = vmatpush3.bf16.msra.mxu0 %v17159_v1  ;;  %v17174_v1 = vld [vmem:[%s21478_s9 + $0xe0] sm:$0xff]  }
 0x714   : > { %12720 = vmatpush1.bf16.msra.mxu1 %v17119_v0  ;;  %v17162_v36 = vld [vmem:[%s21478_s9 + $0x50] sm:$0xff]  }
 0x715   : > { %v10317_v48 = vpop.f32.mrf.mxu1  ;;  %v11024_v40 = vpop.f32.mrf.mxu0  ;;  %12721 = vmatprep.subr.bf16.mxu1 %v17124_v41 }
 0x716   : > { %v17163_v48 = vld [vmem:[%s21478_s9 + $0x10] sm:$0xff]  }
 0x718   : > { %12722 = vmatpush1.bf16.msra.mxu1 %v17122_v22 }
 0x719   : > { %12723 = vmatprep.subr.bf16.mxu1 %v17127_v24 }
 0x71c   : > { %12724 = vmatpush1.bf16.msra.mxu1 %v17125_v13 }
 0x71d   : > { %12904 = vmatprep.subr.bf16.mxu1 %v17130_v18  ;;  %v17164_v18 = vld [vmem:[%s21478_s9 + $0x48] sm:$0xff]  }
 0x71f   : > { %v10499_v31 = vpop.f32.mrf.mxu1  ;;  %v11206_v8 = vpop.f32.mrf.mxu0  ;;  %14785 = vmatmul.mubr.msk.bf16.vlgmr.msra.gmra.mxu1 %vm2364_vm2, %v21104_v29 }
 0x720   : > { %v10508_v30 = vadd.f32 %v10499_v31, %v10321_v5  ;;  %v11254_v43 = vadd.f32 %v11206_v8, %v11067_v12  ;;  %12905 = vmatpush1.bf16.msra.mxu1 %v17128_v58  ;;  %12928 = vmatprep.mubr.bf16.mxu1 %v17249_v14  ;;  %v17160_v5 = vld [vmem:[%s21478_s9 + $0x58] sm:$0xff]   ;;  %v17165_v58 = vld [vmem:[%s21478_s9 + $0x8] sm:$0xff]   ;;  %v17167_v31 = vld [vmem:[%s21478_s9] sm:$0xff]  }
 0x721   : > { %v10501_v52 = vpop.f32.mrf.mxu1  ;;  %v11208_v19 = vpop.f32.mrf.mxu0  ;;  %12906 = vmatprep.subr.bf16.mxu1 %v17133_v42  ;;  %v17161_v12 = vld [vmem:[%s21478_s9 + $0x18] sm:$0xff]   ;;  %15256 = vmatprep.subr.bf16.mxu0 %v17160_v5  ;;  %v17166_v42 = vld [vmem:[%s21478_s9 + $0x40] sm:$0xff]  }
 0x722   : > { %v10509_v20 = vadd.f32 %v10501_v52, %v10322_v59  ;;  %v11255_v17 = vadd.f32 %v11208_v19, %v11068_v26  ;;  %15257 = vmatpush3.bf16.msra.mxu0 %v17161_v12  ;;  %v17176_v5 = vld [vmem:[%s21478_s9 + $0xd8] sm:$0xff]  }
 0x723   : > { %v10503_v35 = vpop.f32.mrf.mxu1  ;;  %v11210_v29 = vpop.f32.mrf.mxu0  ;;  %15258 = vmatprep.subr.bf16.mxu0 %v17162_v36  ;;  %v17177_v12 = vld [vmem:[%s21478_s9 + $0x98] sm:$0xff]  }
 0x724   : > { %12907 = vmatpush1.bf16.msra.mxu1 %v17131_v28 }
 0x725   : > { %v10504_v46 = vpop.f32.mrf.mxu1  ;;  %v11211_v21 = vpop.f32.mrf.mxu0  ;;  %12908 = vmatprep.subr.bf16.mxu1 %v17136_v44 }
 0x726   : > { %15259 = vmatpush3.bf16.msra.mxu0 %v17163_v48 }
 0x727   : > { %15260 = vmatprep.subr.bf16.mxu0 %v17164_v18  ;;  %v17182_v18 = vld [vmem:[%s21478_s9 + $0xc0] sm:$0xff]  }
 0x728   : > { %12909 = vmatpush1.bf16.msra.mxu1 %v17134_v38 }
 0x729   : > { %12910 = vmatprep.subr.bf16.mxu1 %v17139_v32 }
 0x72a   : > { %15261 = vmatpush3.bf16.msra.mxu0 %v17165_v58  ;;  %v17183_v58 = vld [vmem:[%s21478_s9 + $0x80] sm:$0xff]  }
 0x72b   : > { %15262 = vmatprep.subr.bf16.mxu0 %v17166_v42 }
 0x72c   : > { %12911 = vmatpush1.bf16.msra.mxu1 %v17137_v10 }
 0x72d   : > { %13091 = vmatprep.subr.bf16.mxu1 %v17142_v33 }
 0x72e   : > { %15263 = vmatpush3.bf16.msra.mxu0 %v17167_v31 }
 0x72f   : > { %v10686_v7 = vpop.f32.mrf.mxu1  ;;  %v11393_v53 = vpop.f32.mrf.mxu0  ;;  %14803 = vmatmul.mubr.msk.bf16.vlgmr.msra.gmra.mxu1 %vm2364_vm2, %v21160_v63  ;;  %v17148_v63 = vld [vmem:[%s21476_s7 + $0x182c] ss:$16 sps:$4 sm:$0xff]  }
 0x730   : > { %v10695_v45 = vadd.f32 %v10686_v7, %v10508_v30  ;;  %v11441_v3 = vadd.f32 %v11393_v53, %v11254_v43  ;;  %13092 = vmatpush1.bf16.msra.mxu1 %v17140_v55  ;;  %13115 = vmatprep.mubr.bf16.mxu1 %v17249_v14 }
 0x731   : > { %v10688_v11 = vpop.f32.mrf.mxu1  ;;  %v11395_v15 = vpop.f32.mrf.mxu0  ;;  %13093 = vmatprep.subr.bf16.mxu1 %v17145_v37 }
 0x732   : > { %v10696_v2 = vadd.f32 %v10688_v11, %v10509_v20  ;;  %v11442_v27 = vadd.f32 %v11395_v15, %v11255_v17 }
 0x733   : > { %v10690_v25 = vpop.f32.mrf.mxu1  ;;  %v11397_v14 = vpop.f32.mrf.mxu0 }
 0x734   : > { %13094 = vmatpush1.bf16.msra.mxu1 %v17143_v49  ;;  %v17169_v49 = vld [vmem:[%s21478_s9 + $0xb8] sm:$0xff]  }
 0x735   : > { %v10691_v9 = vpop.f32.mrf.mxu1  ;;  %v11398_v39 = vpop.f32.mrf.mxu0  ;;  %13095 = vmatprep.subr.bf16.mxu1 %v17148_v63  ;;  %v17170_v63 = vld [vmem:[%s21478_s9 + $0xf0] sm:$0xff]  }
 0x736   : > { %v17172_v9 = vld [vmem:[%s21478_s9 + $0xe8] sm:$0xff]  }
 0x737   : > { %v17173_v39 = vld [vmem:[%s21478_s9 + $0xa8] sm:$0xff]  }
 0x738   : > { %13096 = vmatpush1.bf16.msra.mxu1 %v17146_v50 }
 0x739   : > { %13097 = vmatprep.subr.bf16.mxu1 %v17151_v60 }
 0x73c   : > { %13098 = vmatpush1.bf16.msra.mxu1 %v17149_v62  ;;  %v17175_v62 = vld [vmem:[%s21478_s9 + $0xa0] sm:$0xff]  }
 0x73f   : > { %v10873_v0 = vpop.f32.mrf.mxu1  ;;  %v11580_v61 = vpop.f32.mrf.mxu0  ;;  %14821 = vmatmul.mubr.msk.bf16.vlgmr.msra.gmra.mxu1 %vm2364_vm2, %v21210_v51 }
 0x740   : > { %v10882_v6 = vadd.f32 %v10873_v0, %v10695_v45  ;;  %v11628_v41 = vadd.f32 %v11580_v61, %v11441_v3  ;;  %v17168_v3 = vld [vmem:[%s21478_s9 + $0xf8] sm:$0xff]  }
 0x741   : > { %v10875_v59 = vpop.f32.mrf.mxu1  ;;  %v11582_v26 = vpop.f32.mrf.mxu0  ;;  %15270 = vmatprep.subr.bf16.mxu1 %v17168_v3  ;;  %v13130_v3 = vlaneseq }
 0x742   : > { %v10883_v4 = vadd.f32 %v10875_v59, %v10696_v2  ;;  %v11629_v22 = vadd.f32 %v11582_v26, %v11442_v27  ;;  %15271 = vmatpush3.bf16.msra.mxu1 %v17169_v49  ;;  %v17171_v2 = vld [vmem:[%s21478_s9 + $0xb0] sm:$0xff]  }
 0x743   : > { %v10877_v40 = vpop.f32.mrf.mxu1  ;;  %v11584_v24 = vpop.f32.mrf.mxu0  ;;  %15272 = vmatprep.subr.bf16.mxu1 %v17170_v63  ;;  %v17178_v26 = vld [vmem:[%s21478_s9 + $0xd0] sm:$0xff]   ;;  %v13131_v63 = vshrl.u32 %v13130_v3, 7 }
 0x745   : > { %v10878_v51 = vpop.f32.mrf.mxu1  ;;  %v11585_v13 = vpop.f32.mrf.mxu0 }
 0x746   : > { %15273 = vmatpush3.bf16.msra.mxu1 %v17171_v2  ;;  %v17180_v51 = vld [vmem:[%s21478_s9 + $0xc8] sm:$0xff]  }
 0x747   : > { %15274 = vmatprep.subr.bf16.mxu1 %v17172_v9  ;;  %v17181_v13 = vld [vmem:[%s21478_s9 + $0x88] sm:$0xff]  }
 0x74a   : > { %15275 = vmatpush3.bf16.msra.mxu1 %v17173_v39  ;;  %v13136_v39 = vsub.s32 1, %v13131_v63 }
 0x74b   : > { %15276 = vmatprep.subr.bf16.mxu1 %v17174_v1 }
 0x74e   : > { %15277 = vmatpush3.bf16.msra.mxu1 %v17175_v62 }
 0x74f   : > { %v11060_v8 = vpop.f32.mrf.mxu1  ;;  %v11767_v30 = vpop.f32.mrf.mxu0  ;;  %15278 = vmatprep.subr.bf16.mxu1 %v17176_v5 }
 0x750   : > { %v11069_v43 = vadd.f32 %v11060_v8, %v10882_v6  ;;  %v11815_v28 = vadd.f32 %v11767_v30, %v11628_v41 }
 0x751   : > { %v11062_v52 = vpop.f32.mrf.mxu1  ;;  %v11769_v19 = vpop.f32.mrf.mxu0 }
 0x752   : > { %v11070_v44 = vadd.f32 %v11062_v52, %v10883_v4  ;;  %v11816_v20 = vadd.f32 %v11769_v19, %v11629_v22  ;;  %15279 = vmatpush3.bf16.msra.mxu1 %v17177_v12  ;;  %v17179_v4 = vld [vmem:[%s21478_s9 + $0x90] sm:$0xff]  }
 0x753   : > { %v11064_v17 = vpop.f32.mrf.mxu1  ;;  %v11771_v35 = vpop.f32.mrf.mxu0  ;;  %15280 = vmatprep.subr.bf16.mxu1 %v17178_v26 }
 0x755   : > { %v11065_v29 = vpop.f32.mrf.mxu1  ;;  %v11772_v38 = vpop.f32.mrf.mxu0 }
 0x756   : > { %15281 = vmatpush3.bf16.msra.mxu1 %v17179_v4 }
 0x757   : > { %15282 = vmatprep.subr.bf16.mxu1 %v17180_v51 }
 0x75a   : > { %15283 = vmatpush3.bf16.msra.mxu1 %v17181_v13 }
 0x75b   : > { %15284 = vmatprep.subr.bf16.mxu1 %v17182_v18 }
 0x75e   : > { %15285 = vmatpush3.bf16.msra.mxu1 %v17183_v58 }
 0x75f   : > { %v11247_v46 = vpop.f32.mrf.mxu1  ;;  %v11954_v21 = vpop.f32.mrf.mxu0 }
 0x760   : > { %v11256_v32 = vadd.f32 %v11247_v46, %v11069_v43  ;;  %v12002_v23 = vadd.f32 %v11954_v21, %v11815_v28 }
 0x761   : > { %v11249_v16 = vpop.f32.mrf.mxu1  ;;  %v11956_v10 = vpop.f32.mrf.mxu0 }
 0x762   : > { %v11257_v33 = vadd.f32 %v11249_v16, %v11070_v44  ;;  %v12003_v55 = vadd.f32 %v11956_v10, %v11816_v20 }
 0x763   : > { %v11251_v37 = vpop.f32.mrf.mxu1  ;;  %v11958_v7 = vpop.f32.mrf.mxu0 }
 0x765   : > { %v11252_v53 = vpop.f32.mrf.mxu1  ;;  %v11959_v45 = vpop.f32.mrf.mxu0 }
 0x76f   : > { %v11434_v34 = vpop.f32.mrf.mxu1  ;;  %v12141_v54 = vpop.f32.mrf.mxu0 }
 0x770   : > { %v11443_v11 = vadd.f32 %v11434_v34, %v11256_v32  ;;  %v21372_v15 = vadd.f32 %v12141_v54, %v12002_v23 }
 0x771   : > { %v11436_v27 = vpop.f32.mrf.mxu1  ;;  %v12143_v25 = vpop.f32.mrf.mxu0 }
 0x772   : > { %v11444_v14 = vadd.f32 %v11436_v27, %v11257_v33  ;;  %v21380_v56 = vadd.f32 %v12143_v25, %v12003_v55 }
 0x773   : > { %v11438_v47 = vpop.f32.mrf.mxu1  ;;  %v12145_v50 = vpop.f32.mrf.mxu0 }
 0x774   : > { %v13128_v47 = vld [vmem:[%s21477_s8] sm:$0xf] }
 0x775   : > { %v11439_v60 = vpop.f32.mrf.mxu1  ;;  %v12146_v57 = vpop.f32.mrf.mxu0 }
 0x77f   : > { %v11621_v0 = vpop.f32.mrf.mxu1  ;;  %v12328_v61 = vpop.f32.mrf.mxu0 }
 0x780   : > { %v11630_v6 = vadd.f32 %v11621_v0, %v11443_v11  ;;  %v12376_v2 = vadd.f32 %v12328_v61, %v21372_v15 }
 0x781   : > { %v11623_v41 = vpop.f32.mrf.mxu1  ;;  %v12330_v59 = vpop.f32.mrf.mxu0 }
 0x782   : > { %v11631_v36 = vadd.f32 %v11623_v41, %v11444_v14  ;;  %v12377_v27 = vadd.f32 %v12330_v59, %v21380_v56  ;;  %v13132_v14 = vsub.s32 0, %v13131_v63 }
 0x783   : > { %v11625_v22 = vpop.f32.mrf.mxu1  ;;  %v12332_v48 = vpop.f32.mrf.mxu0 }
 0x784   : > { %v13133_v1 = vrot.slane %v13128_v47, %v13132_v14 }
 0x785   : > { %v11626_v40 = vpop.f32.mrf.mxu1  ;;  %v12333_v24 = vpop.f32.mrf.mxu0 }
 0x78f   : > { %v11808_v42 = vpop.f32.mrf.mxu1  ;;  %v12515_v31 = vpop.f32.mrf.mxu0 }
 0x790   : > { %v11817_v8 = vadd.f32 %v11808_v42, %v11630_v6  ;;  %v12563_v25 = vadd.f32 %v12515_v31, %v12376_v2  ;;  %v13137_v6 = vrot.slane %v13128_v47, %v13136_v39 }
 0x791   : > { %v11810_v30 = vpop.f32.mrf.mxu1  ;;  %v12517_v43 = vpop.f32.mrf.mxu0 }
 0x792   : > { %v11818_v28 = vadd.f32 %v11810_v30, %v11631_v36  ;;  %v12564_v50 = vadd.f32 %v12517_v43, %v12377_v27 }
 0x793   : > { %v11812_v52 = vpop.f32.mrf.mxu1  ;;  %v12519_v19 = vpop.f32.mrf.mxu0 }
 0x795   : > { %v11813_v44 = vpop.f32.mrf.mxu1  ;;  %v12520_v20 = vpop.f32.mrf.mxu0 }
 0x79f   : > { %v11995_v17 = vpop.f32.mrf.mxu1  ;;  %v12702_v35 = vpop.f32.mrf.mxu0 }
 0x7a0   : > { %v12004_v29 = vadd.f32 %v11995_v17, %v11817_v8  ;;  %v12750_v9 = vadd.f32 %v12702_v35, %v12563_v25 }
 0x7a1   : > { %v11997_v38 = vpop.f32.mrf.mxu1  ;;  %v12704_v46 = vpop.f32.mrf.mxu0 }
 0x7a2   : > { %v12005_v21 = vadd.f32 %v11997_v38, %v11818_v28  ;;  %v12751_v60 = vadd.f32 %v12704_v46, %v12564_v50 }
 0x7a3   : > { %v11999_v32 = vpop.f32.mrf.mxu1  ;;  %v12706_v23 = vpop.f32.mrf.mxu0 }
 0x7a5   : > { %v12000_v16 = vpop.f32.mrf.mxu1  ;;  %v12707_v10 = vpop.f32.mrf.mxu0 }
 0x7af   : > { %v12182_v33 = vpop.f32.mrf.mxu1  ;;  %v12889_v55 = vpop.f32.mrf.mxu0 }
 0x7b0   : > { %v12191_v37 = vadd.f32 %v12182_v33, %v12004_v29  ;;  %v12937_v57 = vadd.f32 %v12889_v55, %v12750_v9  ;;  %v13140_v29 = vsub.s32 2, %v13131_v63  ;;  %v13226_v9 = vld [vmem:[%s21479_s10] sm:$0x1] }
 0x7b1   : > { %v12184_v7 = vpop.f32.mrf.mxu1  ;;  %v12891_v53 = vpop.f32.mrf.mxu0 }
 0x7b2   : > { %v12192_v45 = vadd.f32 %v12184_v7, %v12005_v21  ;;  %v12938_v12 = vadd.f32 %v12891_v53, %v12751_v60  ;;  %v13144_v21 = vsub.s32 3, %v13131_v63  ;;  %v13141_v16 = vrot.slane %v13128_v47, %v13140_v29 }
 0x7b3   : > { %v12186_v49 = vpop.f32.mrf.mxu1  ;;  %v12893_v34 = vpop.f32.mrf.mxu0 }
 0x7b4   : > { %v13145_v7 = vrot.slane %v13128_v47, %v13144_v21 }
 0x7b5   : > { %v12187_v54 = vpop.f32.mrf.mxu1  ;;  %v12894_v11 = vpop.f32.mrf.mxu0 }
 0x7bf   : > { %v12369_v62 = vpop.f32.mrf.mxu1  ;;  %v13076_v5 = vpop.f32.mrf.mxu0 }
 0x7c0   : > { %v13124_v0 = vadd.f32 %v13076_v5, %v12937_v57  ;;  %v12378_v20 = vadd.f32 %v12369_v62, %v12191_v37 }
 0x7c1   : > { %v12371_v15 = vpop.f32.mrf.mxu1  ;;  %v13078_v61 = vpop.f32.mrf.mxu0 }
 0x7c2   : > { %v13150_v56 = vadd.f32 %v13133_v1, %v13124_v0  ;;  %v13125_v41 = vadd.f32 %v13078_v61, %v12938_v12  ;;  %v12379_v17 = vadd.f32 %v12371_v15, %v12192_v45 }
 0x7c3   : > { %v12373_v59 = vpop.f32.mrf.mxu1  ;;  %v13080_v26 = vpop.f32.mrf.mxu0 }
 0x7c4   : > { %v13151_v36 = vadd.f32 %v13137_v6, %v13125_v41  ;;  %v13154_v4 = vmax.f32 %v13150_v56, 0.0 }
 0x7c5   : > { %v12374_v22 = vpop.f32.mrf.mxu1  ;;  %v13081_v48 = vpop.f32.mrf.mxu0 }
 0x7c6   : > { %v13155_v40 = vmax.f32 %v13151_v36, 0.0  ;;  %v13158_v51 = vpack.c.bf16 %v13154_v4, %v13154_v4 }
 0x7c8   : > { %v13159_v24 = vpack.c.bf16 %v13155_v40, %v13155_v40 }
 0x7ca   : > { %13451 = vmatprep.mubr.bf16.mxu0 %v13159_v24 }
 0x7cb   : > { %13452 = vmatmul.mubr.bf16.vlgmr.msra.gmra.mxu0 %v13158_v51 }
 0x7cf   : > { %v12556_v13 = vpop.f32.mrf.mxu1 }
 0x7d0   : > { %v12565_v35 = vadd.f32 %v12556_v13, %v12378_v20 }
 0x7d1   : > { %v12558_v18 = vpop.f32.mrf.mxu1 }
 0x7d2   : > { %v12566_v38 = vadd.f32 %v12558_v18, %v12379_v17 }
 0x7d3   : > { %v12560_v58 = vpop.f32.mrf.mxu1 }
 0x7d5   : > { %v12561_v42 = vpop.f32.mrf.mxu1 }
 0x7df   : > { %v12743_v31 = vpop.f32.mrf.mxu1 }
 0x7e0   : > { %v12752_v46 = vadd.f32 %v12743_v31, %v12565_v35 }
 0x7e1   : > { %v12745_v8 = vpop.f32.mrf.mxu1 }
 0x7e2   : > { %v12753_v32 = vadd.f32 %v12745_v8, %v12566_v38 }
 0x7e3   : > { %v12747_v30 = vpop.f32.mrf.mxu1 }
 0x7e5   : > { %v12748_v43 = vpop.f32.mrf.mxu1 }
 0x7ef   : > { %v12930_v28 = vpop.f32.mrf.mxu1 }
 0x7f0   : > { %v12939_v23 = vadd.f32 %v12930_v28, %v12752_v46 }
 0x7f1   : > { %v12932_v52 = vpop.f32.mrf.mxu1 }
 0x7f2   : > { %v12940_v33 = vadd.f32 %v12932_v52, %v12753_v32 }
 0x7f3   : > { %v12934_v19 = vpop.f32.mrf.mxu1 }
 0x7f5   : > { %v12935_v44 = vpop.f32.mrf.mxu1 }
 0x7ff   : > { %v13117_v10 = vpop.f32.mrf.mxu1 }
 0x800   : > { %v13126_v55 = vadd.f32 %v13117_v10, %v12939_v23 }
 0x801   : > { %v13119_v53 = vpop.f32.mrf.mxu1 }
 0x802   : > { %v13152_v3 = vadd.f32 %v13141_v16, %v13126_v55  ;;  %v13127_v49 = vadd.f32 %v13119_v53, %v12940_v33 }
 0x803   : > { %v13121_v34 = vpop.f32.mrf.mxu1 }
 0x804   : > { %v13153_v54 = vadd.f32 %v13145_v7, %v13127_v49  ;;  %v13156_v37 = vmax.f32 %v13152_v3, 0.0 }
 0x805   : > { %v13122_v45 = vpop.f32.mrf.mxu1 }
 0x806   : > { %v13157_v11 = vmax.f32 %v13153_v54, 0.0  ;;  %v13160_v27 = vpack.c.bf16 %v13156_v37, %v13156_v37 }
 0x808   : > { %v13161_v2 = vpack.c.bf16 %v13157_v11, %v13157_v11 }
 0x80a   : > { %13491 = vmatprep.mubr.bf16.mxu1 %v13161_v2 }
 0x80b   : > { %13492 = vmatmul.mubr.bf16.vlgmr.msra.gmra.mxu1 %v13160_v27 }
 0x88b   : > { %v15264_v63 = vpop.f32.mrf.mxu0 }
 0x88d   : > { %v15265_v25 = vpop.f32.mrf.mxu0 }
 0x88e   : > { %v15266_v50 = vadd.f32 %v15265_v25, %v15264_v63 }
 0x88f   : > { %v15267_v14 = vpop.f32.mrf.mxu0 }
 0x890   : > { %v13454_v57 = vadd.f32 %v15266_v50, %v13226_v9 }
 0x891   : > { %v15268_v47 = vpop.f32.mrf.mxu0 }
 0x8cb   : > { %v15286_v39 = vpop.f32.mrf.mxu1 }
 0x8cd   : > { %v15287_v60 = vpop.f32.mrf.mxu1 }
 0x8ce   : > { %v15288_v1 = vadd.f32 %v15287_v60, %v15286_v39 }
 0x8cf   : > { %v15289_v62 = vpop.f32.mrf.mxu1 }
 0x8d0   : > { %v13494_v5 = vadd.f32 %v15288_v1, %v13454_v57 }
 0x8d1   : > { %v15290_v12 = vpop.f32.mrf.mxu1 }
 0x8d2   : > { %13499 = vst [vmem:[%s17369_s16] sm:$0x1] %v13494_v5 }
 0x8d3   : > { %17197 = shalt.err (!%p17194_p4)
}
 0x8d4   : > { %s17198_s16 = scalar_lea.hbm %s21431_s0, 16  ;;  %s17202_s29 = scalar_lea.hbm %s21480_s11, 32 }
 0x8d5   : > { %p17199_p7 = scmp.ne.s32.totalorder %s21431_s0, %s17198_s16  ;;  %p17203_p10 = scmp.lt.s32.totalorder %s21431_s0, %s21480_s11 }
 0x8d6   : > { %p17204_p11 = scmp.lt.s32.totalorder %s17202_s29, %s17198_s16 }
 0x8d7   : > { %p17200_p8 = pnand %p17199_p7, %p17349_p5 }
 0x8d8   : > { %p17205_p12 = por %p17204_p11, %p17203_p10 }
 0x8d9   : > { %p17201_p9 = pneg %p17200_p8 }
 0x8db   : > { %p17206_p13 = pnand %p17205_p12, %p17201_p9 }
 0x8dd   : > { %17209 = shalt.err (!%p17206_p13)
}
 0x8de   : > { %15793 = dma.vmem_to_hbm [thread:$0]  (%p17349_p5), %s13514_s13, 16, %s21431_s0, %s13501_s22  }
 0x8df PF: > { %p15799_p0 = scmp.ge.s32.totalorder %s17244_s20, 2  ;;  %s13525_s15 = sand.u32 1, %s17232_s17  }
 0x8e0   : > { %s13526_s21 = scalar_lea.sflag [#allocation6], %s13525_s15 }
 0x8e1   : > { %p15796_p1 = pnand %p15799_p0, %p17353_p6 }
 0x8e3   : > { %p15797_p2 = pneg %p15796_p1 }
 0x8e5   : > { %17227 = dma.done.wait (%p15797_p2), %s13526_s21, 16  }
 0x8e6   : > { %17229 = vsyncadd (%p15797_p2), %s13526_s21, 4294967280  ;;  %s21501_s24 = sld [smem:[#allocation8_spill]]  ;;  %p21_p3 = scmp.ge.s32.totalorder %s17336_s23, 4  }
 0x8e7   : > { %s21502_s17 = smov %s17236_s18  ;;  %s21503_s18 = smov %s17240_s19 }
 0x8e8   : > { %s21505_s20 = smov %s17336_s23  ;;  %23 = sbr.rel (!%p21_p3) target bundleno = 5 (0x5), region = 114 }
 0x8ec   : > { %s21504_s19 = smov %s21501_s24 }
 0x8ed   :  { %13530 = vsyncpa [#allocation6], 1 }
 0x8ee   :  { %13532 = vsyncpa [#allocation6 + $0x1], 1 }

</bundles_post_ra>
